<compile_context>
chip_gen: v7x
topology: tpu7x:2x2x1
jax: 0.10.0
libtpu: 0.0.40
codegen_flags: <defaults>
</compile_context>

<pallas_src>
import functools

import jax
import jax.numpy as jnp
from jax.experimental import pallas as pl
from jax.experimental.pallas import tpu as pltpu


# ----------------------------------------------------------------------------
# Lane-dense conv matmul:  out = act(W @ X + b)
#   W: (Cout, Cin*9)  X: (Cin*9, N*H*W)  ->  (Cout, N*H*W), bf16 in / bf16 out,
#   f32 accumulate + epilogue.  Grid tiles either the lane axis (when an exact
#   128-multiple divisor exists) or the Cout rows (guarantees >= 2 grid steps).
# ----------------------------------------------------------------------------

def _mmt_kernel(w_ref, x_ref, b_ref, o_ref, *, act):
    y = jnp.dot(w_ref[...], x_ref[...], preferred_element_type=jnp.float32)
    y = y + b_ref[...]
    if act == "leaky_relu":
        y = jnp.where(y >= 0.0, y, 0.1 * y)
    o_ref[...] = y.astype(o_ref.dtype)


def _lane_tile(n, target=2304):
    """Largest multiple of 128 <= target that divides n exactly (or None)."""
    best = None
    t = 128
    while t <= min(n, target):
        if n % t == 0:
            best = t
        t += 128
    return best


def matmul_t(w, x, b, *, act="none", out_dtype=jnp.float32, target_lane_tile=2304):
    cout, cin = w.shape
    n = x.shape[1]
    tn = _lane_tile(n, target_lane_tile)
    if tn is not None and n // tn >= 2:
        tile_m, tile_n = cout, tn            # lane-tiled (no pad copy needed)
    elif cout % 16 == 0:
        tile_m, tile_n = cout // 2, n        # row-split: >=2 steps for v7x megacore
    else:
        tile_m, tile_n = cout, n
    grid = (cout // tile_m, n // tile_n)
    return pl.pallas_call(
        functools.partial(_mmt_kernel, act=act),
        out_shape=jax.ShapeDtypeStruct((cout, n), out_dtype),
        grid=grid,
        in_specs=[pl.BlockSpec((tile_m, cin), lambda mi, ni: (mi, 0)),
                  pl.BlockSpec((cin, tile_n), lambda mi, ni: (0, ni)),
                  pl.BlockSpec((tile_m, 1), lambda mi, ni: (mi, 0))],
        out_specs=pl.BlockSpec((tile_m, tile_n), lambda mi, ni: (mi, ni)),
        compiler_params=pltpu.CompilerParams(
            dimension_semantics=("parallel", "parallel")),
    )(w.astype(jnp.bfloat16), x.astype(jnp.bfloat16),
      b.reshape(cout, 1).astype(jnp.float32))


def conv3x3_cnhw(x, w, bias, *, act="leaky_relu", out_dtype=jnp.bfloat16):
    """SAME 3x3 conv on (Cin, N, H, W) via bf16 im2col + lane-dense matmul."""
    Cin, N, H, W = x.shape
    Cout = w.shape[0]
    xb = x.astype(jnp.bfloat16)                                     # bf16 patches
    xp = jnp.pad(xb, ((0, 0), (0, 0), (1, 1), (1, 1)))
    cols = [xp[:, :, di:di + H, dj:dj + W] for di in range(3) for dj in range(3)]
    patches = jnp.stack(cols, axis=1).reshape(Cin * 9, N * H * W)
    wf = w.reshape(Cout, Cin * 9)
    out = matmul_t(wf, patches, bias, act=act, out_dtype=out_dtype)
    return out.reshape(Cout, N, H, W)


def maxpool2(x):
    return jax.lax.reduce_window(x, jnp.array(-jnp.inf, x.dtype), jax.lax.max,
                                 (1, 1, 2, 2), (1, 1, 2, 2), 'VALID')


def base_forward(p, x_nchw):
    # TODO(synk): real resnet12 replaced by a 3-layer conv stand-in.
    x = jnp.transpose(x_nchw, (1, 0, 2, 3))                         # (C, N, H, W)
    x = conv3x3_cnhw(x, p['w_c1'], p['b_c1'])                       # lane-tiled grid (7 steps)
    x = maxpool2(x)
    x = conv3x3_cnhw(x, p['w_c2'], p['b_c2'])                       # Cout-split grid (2 steps)
    x = maxpool2(x)
    x = conv3x3_cnhw(x, p['w_c3'], p['b_c3'])                       # Cout-split grid (2 steps)
    return x                                                        # (nFeat, N, 6, 6) bf16


# ----------------------------------------------------------------------------
# Fused CAM kernel.  Grid step (bi, ii): support prototype of class ii vs. ALL
# n2 queries of batch element bi.  The (hw, hw) correlation is never formed:
# every use is contracted through the channel axis, leaving only small
# lane-dense dots.  Per step it stores:
#   proto (n2, c)        attention-weighted spatial mean of the prototype
#   cls   (1, n2*hw)     scale * <normalize(proto), f2_norm>  (training scores)
#   attn2 (1, n2*hw)     softmax(score2 / 0.025) + 1          (query attention)
# ----------------------------------------------------------------------------

def _cam_kernel(f1p_ref, f1c_ref, f2n_ref, f2nt_ref, f2mean_ref,
                w1_ref, b1_ref, w2_ref, b2_ref,
                w1b_ref, b1b_ref, w2b_ref, b2b_ref, mseg_ref,
                proto_ref, cls_ref, attn2_ref, *, scale, inv_hw):
    f32, bf16 = jnp.float32, jnp.bfloat16
    f1_p = f1p_ref[0, 0]                                   # (hw, c)     f32
    f1_c = f1c_ref[0, 0]                                   # (c, hw)     f32
    f2n = f2n_ref[0]                                       # (c, n2*hw)  bf16 (L2-normalised)
    f2nT = f2nt_ref[0]                                     # (n2*hw, c)  bf16
    f2mean = f2mean_ref[0]                                 # (n2, c)     f32
    mseg = mseg_ref[...]                                   # (n2, n2*hw) 0/1 segment mask
    inv_t = inv_hw / 0.025

    # L2-normalise the prototype over channels (f32 math, both layouts).
    f1n_p = f1_p * jax.lax.rsqrt(
        jnp.maximum(jnp.sum(f1_p * f1_p, axis=1, keepdims=True), 1e-24))
    f1n_c = f1_c * jax.lax.rsqrt(
        jnp.maximum(jnp.sum(f1_c * f1_c, axis=0, keepdims=True), 1e-24))
    f1mean = jnp.mean(f1n_p, axis=0, keepdims=True)        # (1, c)

    # ---- branch 1: attention over support-spatial positions ----------------
    # am1[(j,q)] = mean_p a_j[p,q]  (correlation contracted through channels)
    am1 = jnp.dot(f1mean.astype(bf16), f2n, preferred_element_type=f32)      # (1, n2*hw)
    # TODO(synk): BatchNorm in ConvBlock treated as identity.
    h1 = jnp.maximum(
        jnp.dot(am1, w1b_ref[...], preferred_element_type=f32) + b1b_ref[...], 0.0)
    watt1 = jnp.dot(h1, w2b_ref[...], preferred_element_type=f32) + b2b_ref[...]
    # wq[j] = sum_q watt1_j[q] * f2n_j[:, q]
    wq = jnp.dot((mseg * watt1).astype(bf16), f2nT, preferred_element_type=f32)  # (n2, c)
    s1 = jnp.dot(wq, f1n_c, preferred_element_type=f32) * inv_t                  # (n2, hw)
    s1 = s1 - jnp.max(s1, axis=1, keepdims=True)
    e1 = jnp.exp(s1)
    attn1 = e1 * pl.reciprocal(jnp.sum(e1, axis=1, keepdims=True), approx=True) + 1.0
    proto = jnp.dot(attn1, f1_p, preferred_element_type=f32) * inv_hw            # (n2, c)
    proto_ref[0, 0] = proto
    pn = proto * jax.lax.rsqrt(
        jnp.maximum(jnp.sum(proto * proto, axis=1, keepdims=True), 1e-24))
    clsf = jnp.dot(pn.astype(bf16), f2n, preferred_element_type=f32)             # (n2, n2*hw)
    cls_ref[0, 0] = scale * jnp.sum(clsf * mseg, axis=0, keepdims=True)          # (1, n2*hw)

    # ---- branch 2: attention over query-spatial positions -------------------
    am2 = jnp.dot(f2mean, f1n_c, preferred_element_type=f32)                     # (n2, hw)
    h2 = jnp.maximum(
        jnp.dot(am2, w1_ref[...], preferred_element_type=f32) + b1_ref[...], 0.0)
    watt2 = jnp.dot(h2, w2_ref[...], preferred_element_type=f32) + b2_ref[...]   # (n2, hw)
    wp = jnp.dot(watt2, f1n_p, preferred_element_type=f32)                       # (n2, c)
    s2 = jnp.dot(wp.astype(bf16), f2n, preferred_element_type=f32) * inv_t       # (n2, n2*hw)
    s2 = jnp.where(mseg > 0.0, s2, -1e30)                  # segmented softmax via masking
    s2 = s2 - jnp.max(s2, axis=1, keepdims=True)
    e2 = jnp.exp(s2)
    a2 = e2 * pl.reciprocal(jnp.sum(e2, axis=1, keepdims=True), approx=True)
    attn2_ref[0, 0] = jnp.sum(a2, axis=0, keepdims=True) + 1.0                   # (1, n2*hw)


def cam_fused(f1_p, f1_c, f2n_cm, f2n_qm, f2mean, p, scale_cls, *, hw, n2):
    b, K, _, c = f1_p.shape
    hw6 = p['cam_w1'].shape[1]
    nq = n2 * hw
    eye = jnp.eye(n2, dtype=jnp.float32)
    w1b = jnp.kron(eye, p['cam_w1'].astype(jnp.float32))   # (n2*hw, n2*hw6) block-diag
    w2b = jnp.kron(eye, p['cam_w2'].astype(jnp.float32))   # (n2*hw6, n2*hw)
    b1b = jnp.tile(p['cam_b1'].astype(jnp.float32), n2).reshape(1, n2 * hw6)
    b2b = jnp.tile(p['cam_b2'].astype(jnp.float32), n2).reshape(1, nq)
    mseg = jnp.kron(eye, jnp.ones((1, hw), jnp.float32))   # (n2, n2*hw) segment mask

    const = lambda bi, ii: (0, 0)
    kern = functools.partial(_cam_kernel, scale=float(scale_cls),
                             inv_hw=1.0 / float(hw))
    return pl.pallas_call(
        kern,
        out_shape=(
            # proto is eval-only and tiny; cls/attn2 (the training outputs) are
            # stored as lane-dense (1, n2*hw) rows.
            jax.ShapeDtypeStruct((b, K, n2, c), jnp.float32),
            jax.ShapeDtypeStruct((b, K, 1, nq), jnp.float32),
            jax.ShapeDtypeStruct((b, K, 1, nq), jnp.float32),
        ),
        grid=(b, K),
        in_specs=[
            pl.BlockSpec((1, 1, hw, c), lambda bi, ii: (bi, ii, 0, 0)),
            pl.BlockSpec((1, 1, c, hw), lambda bi, ii: (bi, ii, 0, 0)),
            pl.BlockSpec((1, c, nq), lambda bi, ii: (bi, 0, 0)),
            pl.BlockSpec((1, nq, c), lambda bi, ii: (bi, 0, 0)),
            pl.BlockSpec((1, n2, c), lambda bi, ii: (bi, 0, 0)),
            pl.BlockSpec((hw, hw6), const),
            pl.BlockSpec((1, hw6), const),
            pl.BlockSpec((hw6, hw), const),
            pl.BlockSpec((1, hw), const),
            pl.BlockSpec((nq, n2 * hw6), const),
            pl.BlockSpec((1, n2 * hw6), const),
            pl.BlockSpec((n2 * hw6, nq), const),
            pl.BlockSpec((1, nq), const),
            pl.BlockSpec((n2, nq), const),
        ],
        out_specs=(
            pl.BlockSpec((1, 1, n2, c), lambda bi, ii: (bi, ii, 0, 0)),
            pl.BlockSpec((1, 1, 1, nq), lambda bi, ii: (bi, ii, 0, 0)),
            pl.BlockSpec((1, 1, 1, nq), lambda bi, ii: (bi, ii, 0, 0)),
        ),
        compiler_params=pltpu.CompilerParams(
            dimension_semantics=("parallel", "parallel")),
    )(f1_p, f1_c, f2n_cm, f2n_qm, f2mean,
      p['cam_w1'].astype(jnp.float32), p['cam_b1'].reshape(1, hw6).astype(jnp.float32),
      p['cam_w2'].astype(jnp.float32), p['cam_b2'].reshape(1, hw).astype(jnp.float32),
      w1b, b1b, w2b, b2b, mseg)


# ----------------------------------------------------------------------------
# Model forward
# ----------------------------------------------------------------------------

@functools.partial(jax.jit, static_argnames=("scale_cls", "training"))
def model_forward(p, xtrain, xtest, ytrain, ytest, scale_cls=7.0, training=True):
    b, num_train = xtrain.shape[:2]
    num_test = xtest.shape[1]
    K = ytrain.shape[2]

    ytrain_t = jnp.transpose(ytrain, (0, 2, 1))                     # (b, K, num_train)
    xall = jnp.concatenate([xtrain.reshape((-1,) + xtrain.shape[2:]),
                            xtest.reshape((-1,) + xtest.shape[2:])], axis=0)

    f_cnhw = base_forward(p, xall)                                  # (c, N, 6, 6) bf16
    c, fh, fw = f_cnhw.shape[0], f_cnhw.shape[2], f_cnhw.shape[3]
    hw = fh * fw
    f_flat = f_cnhw.reshape(c, -1, hw)                              # (c, N, hw)

    # Prototypes (tiny -> plain XLA einsum; no pallas launch).
    ftr = f_flat[:, :b * num_train].reshape(c, b, num_train, hw).astype(jnp.float32)
    proto = jnp.einsum('bkt,cbtp->bkcp', ytrain_t, ftr)             # (b, K, c, hw)
    counts = jnp.sum(ytrain_t, axis=2)[:, :, None, None]
    # Guard: a class absent from the support set gives a zero prototype instead
    # of NaN (the PyTorch reference would divide by zero).
    proto = proto / jnp.maximum(counts, 1e-12)

    f1_c = proto                                                    # (b, K, c, hw)
    f1_p = jnp.transpose(proto, (0, 1, 3, 2))                       # (b, K, hw, c)

    # Query features, L2-normalised over channels (f32 math, bf16 kernel input).
    f2 = f_flat[:, b * num_train:].reshape(c, b, num_test, hw)
    f2 = jnp.transpose(f2, (1, 0, 2, 3)).astype(jnp.float32)        # (b, c, n2, hw)
    f2n = f2 * jax.lax.rsqrt(
        jnp.maximum(jnp.sum(f2 * f2, axis=1, keepdims=True), 1e-24))
    f2mean = jnp.transpose(jnp.mean(f2n, axis=3), (0, 2, 1))        # (b, n2, c) f32
    f2n_cm = f2n.reshape(b, c, num_test * hw).astype(jnp.bfloat16)  # (b, c, n2*hw)
    f2n_qm = jnp.transpose(f2n, (0, 2, 3, 1)).reshape(
        b, num_test * hw, c).astype(jnp.bfloat16)                   # (b, n2*hw, c)

    proto_m, cls, attn2 = cam_fused(f1_p, f1_c, f2n_cm, f2n_qm, f2mean, p,
                                    scale_cls, hw=hw, n2=num_test)
    cls = cls.reshape(b, K, num_test, hw)
    attn2 = attn2.reshape(b, K, num_test, hw)

    if not training:                                                # Model.test path
        ftest_m = jnp.einsum('bcjq,bijq->bjic', f2, attn2) / hw     # (b, n2, K, c)
        ftrain_m = jnp.transpose(proto_m, (0, 2, 1, 3))             # (b, n2, K, c)
        ftn = ftest_m * jax.lax.rsqrt(
            jnp.maximum(jnp.sum(ftest_m ** 2, -1, keepdims=True), 1e-24))
        fpn = ftrain_m * jax.lax.rsqrt(
            jnp.maximum(jnp.sum(ftrain_m ** 2, -1, keepdims=True), 1e-24))
        return scale_cls * jnp.sum(ftn * fpn, axis=-1)

    # --- training path ---
    cls_scores = jnp.transpose(cls, (0, 2, 1, 3)).reshape(b * num_test, K, fh, fw)

    # One-hot class selection of the query-side attention + 1x1 classifier
    # (tiny shapes -> plain XLA per feedback; logits stay f32).
    attn_sel = jnp.einsum('bjk,bkjq->bjq', ytest, attn2)            # (b, n2, hw)
    logits = jnp.einsum('oc,bcjq,bjq->bjoq', p['cls_w'], f2, attn_sel)
    logits = logits + p['cls_b'][None, None, :, None]
    ytest_out = logits.reshape(b * num_test, -1, fh, fw)
    return ytest_out, cls_scores


# ----------------------------------------------------------------------------
# Deterministic parameter init + driver
# ----------------------------------------------------------------------------

def init_params(key, nfeat=64, num_classes=64, hw=36):
    ks = jax.random.split(key, 8)

    def w(k, shape, fan_in):
        return jax.random.normal(k, shape, jnp.float32) / jnp.sqrt(fan_in)

    return {
        'w_c1': w(ks[0], (32, 3, 3, 3), 3 * 9),
        'b_c1': jnp.zeros((32,), jnp.float32),
        'w_c2': w(ks[1], (64, 32, 3, 3), 32 * 9),
        'b_c2': jnp.zeros((64,), jnp.float32),
        'w_c3': w(ks[2], (nfeat, 64, 3, 3), 64 * 9),
        'b_c3': jnp.zeros((nfeat,), jnp.float32),
        'cam_w1': w(ks[3], (hw, hw // 6), hw),
        'cam_b1': jnp.zeros((hw // 6,), jnp.float32),
        'cam_w2': w(ks[4], (hw // 6, hw), hw // 6),
        'cam_b2': jnp.zeros((hw,), jnp.float32),
        'cls_w': w(ks[5], (num_classes, nfeat), nfeat),
        'cls_b': jnp.zeros((num_classes,), jnp.float32),
    }


if __name__ == "__main__":
    key = jax.random.PRNGKey(0)
    kx1, kx2, ky, kp = jax.random.split(key, 4)

    b, num_train, num_test, K = 2, 10, 4, 5
    C, H, W = 3, 24, 24
    NFEAT, NUM_CLASSES = 64, 64

    xtrain = jax.random.normal(kx1, (b, num_train, C, H, W), jnp.float32)
    xtest = jax.random.normal(kx2, (b, num_test, C, H, W), jnp.float32)
    # every class appears num_train//K times in the support set
    ytrain_lbl = jnp.tile(jnp.arange(K), (b, num_train // K))       # (b, num_train)
    ytrain = jax.nn.one_hot(ytrain_lbl, K, dtype=jnp.float32)
    ytest_lbl = jax.random.randint(ky, (b, num_test), 0, K)
    ytest = jax.nn.one_hot(ytest_lbl, K, dtype=jnp.float32)

    params = init_params(kp, nfeat=NFEAT, num_classes=NUM_CLASSES, hw=36)

    ytest_logits, cls_scores = model_forward(
        params, xtrain, xtest, ytrain, ytest, scale_cls=7.0, training=True)
    jax.block_until_ready((ytest_logits, cls_scores))

    assert ytest_logits.shape == (b * num_test, NUM_CLASSES, 6, 6)
    assert cls_scores.shape == (b * num_test, K, 6, 6)
    assert bool(jnp.all(jnp.isfinite(ytest_logits)))
    assert bool(jnp.all(jnp.isfinite(cls_scores)))
    print("KERNEL_OK")
</pallas_src>

<mosaic_0001>
module attributes {stable_mosaic.version = 11 : i64} {
  func.func @_mmt_kernel(%arg0: i32, %arg1: i32, %arg2: memref<32x27xbf16, #tpu.memory_space<vmem>>, %arg3: memref<27x2304xbf16, #tpu.memory_space<vmem>>, %arg4: memref<32x1xf32, #tpu.memory_space<vmem>>, %arg5: memref<32x2304xbf16, #tpu.memory_space<vmem>>) attributes {dimension_semantics = [#tpu.dimension_semantics<parallel>, #tpu.dimension_semantics<parallel>], iteration_bounds = array<i64: 1, 7>, scalar_prefetch = 0 : i64, scratch_operands = 0 : i64, tpu.core_type = #tpu.core_type<tc>, window_params = [{transform_indices = @transform_0, window_bounds = array<i64: 32, 27>}, {transform_indices = @transform_1, window_bounds = array<i64: 27, 2304>}, {transform_indices = @transform_2, window_bounds = array<i64: 32, 1>}, {transform_indices = @transform_3, window_bounds = array<i64: 32, 2304>}]} {
    %c0 = arith.constant 0 : index
    %c0_0 = arith.constant 0 : index
    %0 = vector.load %arg2[%c0, %c0_0] : memref<32x27xbf16, #tpu.memory_space<vmem>>, vector<32x27xbf16>
    %c0_1 = arith.constant 0 : index
    %c0_2 = arith.constant 0 : index
    %1 = vector.load %arg3[%c0_1, %c0_2] : memref<27x2304xbf16, #tpu.memory_space<vmem>>, vector<27x2304xbf16>
    %cst = arith.constant dense<0.000000e+00> : vector<32x2304xf32>
    %2 = tpu.matmul %0, %1, %cst {dimension_numbers = #tpu.dot_dimension_numbers<[1], [0], [0], [1], [0, 0, 1, 1], [], []>} : vector<32x27xbf16>, vector<27x2304xbf16>, vector<32x2304xf32> -> vector<32x2304xf32>
    %c0_3 = arith.constant 0 : index
    %c0_4 = arith.constant 0 : index
    %3 = vector.load %arg4[%c0_3, %c0_4] : memref<32x1xf32, #tpu.memory_space<vmem>>, vector<32x1xf32>
    %4 = vector.broadcast %3 : vector<32x1xf32> to vector<32x2304xf32>
    %5 = arith.addf %2, %4 : vector<32x2304xf32>
    %cst_5 = arith.constant 0.000000e+00 : f32
    %6 = vector.broadcast %cst_5 : f32 to vector<32x2304xf32>
    %7 = arith.cmpf oge, %5, %6 : vector<32x2304xf32>
    %cst_6 = arith.constant 1.000000e-01 : f32
    %8 = vector.broadcast %cst_6 : f32 to vector<32x2304xf32>
    %9 = arith.mulf %8, %5 : vector<32x2304xf32>
    %10 = arith.select %7, %5, %9 : vector<32x2304xi1>, vector<32x2304xf32>
    %11 = arith.truncf %10 : vector<32x2304xf32> to vector<32x2304xbf16>
    %c0_7 = arith.constant 0 : index
    %c0_8 = arith.constant 0 : index
    %12 = vector.load %arg5[%c0_7, %c0_8] : memref<32x2304xbf16, #tpu.memory_space<vmem>>, vector<32x2304xbf16>
    tpu.vector_store %arg5[%c0_7, %c0_8], %11 {strides = array<i32>} : memref<32x2304xbf16, #tpu.memory_space<vmem>>, vector<32x2304xbf16>,
    return
  }
  func.func @transform_0(%arg0: i32, %arg1: i32) -> (i32, i32) {
    %c0_i32 = arith.constant 0 : i32
    %c0_i32_0 = arith.constant 0 : i32
    return %arg0, %c0_i32 : i32, i32
  }
  func.func @transform_1(%arg0: i32, %arg1: i32) -> (i32, i32) {
    %c0_i32 = arith.constant 0 : i32
    %c0_i32_0 = arith.constant 0 : i32
    return %c0_i32, %arg1 : i32, i32
  }
  func.func @transform_2(%arg0: i32, %arg1: i32) -> (i32, i32) {
    %c0_i32 = arith.constant 0 : i32
    %c0_i32_0 = arith.constant 0 : i32
    return %arg0, %c0_i32 : i32, i32
  }
  func.func @transform_3(%arg0: i32, %arg1: i32) -> (i32, i32) {
    %c0_i32 = arith.constant 0 : i32
    return %arg0, %arg1 : i32, i32
  }
}

module attributes {stable_mosaic.version = 11 : i64} {
  func.func @_mmt_kernel(%arg0: i32, %arg1: i32, %arg2: memref<32x288xbf16, #tpu.memory_space<vmem>>, %arg3: memref<288x4032xbf16, #tpu.memory_space<vmem>>, %arg4: memref<32x1xf32, #tpu.memory_space<vmem>>, %arg5: memref<32x4032xbf16, #tpu.memory_space<vmem>>) attributes {dimension_semantics = [#tpu.dimension_semantics<parallel>, #tpu.dimension_semantics<parallel>], iteration_bounds = array<i64: 2, 1>, scalar_prefetch = 0 : i64, scratch_operands = 0 : i64, tpu.core_type = #tpu.core_type<tc>, window_params = [{transform_indices = @transform_0, window_bounds = array<i64: 32, 288>}, {transform_indices = @transform_1, window_bounds = array<i64: 288, 4032>}, {transform_indices = @transform_2, window_bounds = array<i64: 32, 1>}, {transform_indices = @transform_3, window_bounds = array<i64: 32, 4032>}]} {
    %c0 = arith.constant 0 : index
    %c0_0 = arith.constant 0 : index
    %0 = vector.load %arg2[%c0, %c0_0] : memref<32x288xbf16, #tpu.memory_space<vmem>>, vector<32x288xbf16>
    %c0_1 = arith.constant 0 : index
    %c0_2 = arith.constant 0 : index
    %1 = vector.load %arg3[%c0_1, %c0_2] : memref<288x4032xbf16, #tpu.memory_space<vmem>>, vector<288x4032xbf16>
    %cst = arith.constant dense<0.000000e+00> : vector<32x4032xf32>
    %2 = tpu.matmul %0, %1, %cst {dimension_numbers = #tpu.dot_dimension_numbers<[1], [0], [0], [1], [0, 0, 1, 1], [], []>} : vector<32x288xbf16>, vector<288x4032xbf16>, vector<32x4032xf32> -> vector<32x4032xf32>
    %c0_3 = arith.constant 0 : index
    %c0_4 = arith.constant 0 : index
    %3 = vector.load %arg4[%c0_3, %c0_4] : memref<32x1xf32, #tpu.memory_space<vmem>>, vector<32x1xf32>
    %4 = vector.broadcast %3 : vector<32x1xf32> to vector<32x4032xf32>
    %5 = arith.addf %2, %4 : vector<32x4032xf32>
    %cst_5 = arith.constant 0.000000e+00 : f32
    %6 = vector.broadcast %cst_5 : f32 to vector<32x4032xf32>
    %7 = arith.cmpf oge, %5, %6 : vector<32x4032xf32>
    %cst_6 = arith.constant 1.000000e-01 : f32
    %8 = vector.broadcast %cst_6 : f32 to vector<32x4032xf32>
    %9 = arith.mulf %8, %5 : vector<32x4032xf32>
    %10 = arith.select %7, %5, %9 : vector<32x4032xi1>, vector<32x4032xf32>
    %11 = arith.truncf %10 : vector<32x4032xf32> to vector<32x4032xbf16>
    %c0_7 = arith.constant 0 : index
    %c0_8 = arith.constant 0 : index
    %12 = vector.load %arg5[%c0_7, %c0_8] : memref<32x4032xbf16, #tpu.memory_space<vmem>>, vector<32x4032xbf16>
    tpu.vector_store %arg5[%c0_7, %c0_8], %11 {strides = array<i32>} : memref<32x4032xbf16, #tpu.memory_space<vmem>>, vector<32x4032xbf16>,
    return
  }
  func.func @transform_0(%arg0: i32, %arg1: i32) -> (i32, i32) {
    %c0_i32 = arith.constant 0 : i32
    %c0_i32_0 = arith.constant 0 : i32
    return %arg0, %c0_i32 : i32, i32
  }
  func.func @transform_1(%arg0: i32, %arg1: i32) -> (i32, i32) {
    %c0_i32 = arith.constant 0 : i32
    %c0_i32_0 = arith.constant 0 : i32
    return %c0_i32, %arg1 : i32, i32
  }
  func.func @transform_2(%arg0: i32, %arg1: i32) -> (i32, i32) {
    %c0_i32 = arith.constant 0 : i32
    %c0_i32_0 = arith.constant 0 : i32
    return %arg0, %c0_i32 : i32, i32
  }
  func.func @transform_3(%arg0: i32, %arg1: i32) -> (i32, i32) {
    %c0_i32 = arith.constant 0 : i32
    return %arg0, %arg1 : i32, i32
  }
}

module attributes {stable_mosaic.version = 11 : i64} {
  func.func @_mmt_kernel(%arg0: i32, %arg1: i32, %arg2: memref<32x576xbf16, #tpu.memory_space<vmem>>, %arg3: memref<576x1008xbf16, #tpu.memory_space<vmem>>, %arg4: memref<32x1xf32, #tpu.memory_space<vmem>>, %arg5: memref<32x1008xbf16, #tpu.memory_space<vmem>>) attributes {dimension_semantics = [#tpu.dimension_semantics<parallel>, #tpu.dimension_semantics<parallel>], iteration_bounds = array<i64: 2, 1>, scalar_prefetch = 0 : i64, scratch_operands = 0 : i64, tpu.core_type = #tpu.core_type<tc>, window_params = [{transform_indices = @transform_0, window_bounds = array<i64: 32, 576>}, {transform_indices = @transform_1, window_bounds = array<i64: 576, 1008>}, {transform_indices = @transform_2, window_bounds = array<i64: 32, 1>}, {transform_indices = @transform_3, window_bounds = array<i64: 32, 1008>}]} {
    %c0 = arith.constant 0 : index
    %c0_0 = arith.constant 0 : index
    %0 = vector.load %arg2[%c0, %c0_0] : memref<32x576xbf16, #tpu.memory_space<vmem>>, vector<32x576xbf16>
    %c0_1 = arith.constant 0 : index
    %c0_2 = arith.constant 0 : index
    %1 = vector.load %arg3[%c0_1, %c0_2] : memref<576x1008xbf16, #tpu.memory_space<vmem>>, vector<576x1008xbf16>
    %cst = arith.constant dense<0.000000e+00> : vector<32x1008xf32>
    %2 = tpu.matmul %0, %1, %cst {dimension_numbers = #tpu.dot_dimension_numbers<[1], [0], [0], [1], [0, 0, 1, 1], [], []>} : vector<32x576xbf16>, vector<576x1008xbf16>, vector<32x1008xf32> -> vector<32x1008xf32>
    %c0_3 = arith.constant 0 : index
    %c0_4 = arith.constant 0 : index
    %3 = vector.load %arg4[%c0_3, %c0_4] : memref<32x1xf32, #tpu.memory_space<vmem>>, vector<32x1xf32>
    %4 = vector.broadcast %3 : vector<32x1xf32> to vector<32x1008xf32>
    %5 = arith.addf %2, %4 : vector<32x1008xf32>
    %cst_5 = arith.constant 0.000000e+00 : f32
    %6 = vector.broadcast %cst_5 : f32 to vector<32x1008xf32>
    %7 = arith.cmpf oge, %5, %6 : vector<32x1008xf32>
    %cst_6 = arith.constant 1.000000e-01 : f32
    %8 = vector.broadcast %cst_6 : f32 to vector<32x1008xf32>
    %9 = arith.mulf %8, %5 : vector<32x1008xf32>
    %10 = arith.select %7, %5, %9 : vector<32x1008xi1>, vector<32x1008xf32>
    %11 = arith.truncf %10 : vector<32x1008xf32> to vector<32x1008xbf16>
    %c0_7 = arith.constant 0 : index
    %c0_8 = arith.constant 0 : index
    %12 = vector.load %arg5[%c0_7, %c0_8] : memref<32x1008xbf16, #tpu.memory_space<vmem>>, vector<32x1008xbf16>
    tpu.vector_store %arg5[%c0_7, %c0_8], %11 {strides = array<i32>} : memref<32x1008xbf16, #tpu.memory_space<vmem>>, vector<32x1008xbf16>,
    return
  }
  func.func @transform_0(%arg0: i32, %arg1: i32) -> (i32, i32) {
    %c0_i32 = arith.constant 0 : i32
    %c0_i32_0 = arith.constant 0 : i32
    return %arg0, %c0_i32 : i32, i32
  }
  func.func @transform_1(%arg0: i32, %arg1: i32) -> (i32, i32) {
    %c0_i32 = arith.constant 0 : i32
    %c0_i32_0 = arith.constant 0 : i32
    return %c0_i32, %arg1 : i32, i32
  }
  func.func @transform_2(%arg0: i32, %arg1: i32) -> (i32, i32) {
    %c0_i32 = arith.constant 0 : i32
    %c0_i32_0 = arith.constant 0 : i32
    return %arg0, %c0_i32 : i32, i32
  }
  func.func @transform_3(%arg0: i32, %arg1: i32) -> (i32, i32) {
    %c0_i32 = arith.constant 0 : i32
    return %arg0, %arg1 : i32, i32
  }
}

module attributes {stable_mosaic.version = 11 : i64} {
  func.func @_cam_kernel(%arg0: i32, %arg1: i32, %arg2: memref<1x1x36x64xf32, #tpu.memory_space<vmem>>, %arg3: memref<1x1x64x36xf32, #tpu.memory_space<vmem>>, %arg4: memref<1x64x144xbf16, #tpu.memory_space<vmem>>, %arg5: memref<1x144x64xbf16, #tpu.memory_space<vmem>>, %arg6: memref<1x4x64xf32, #tpu.memory_space<vmem>>, %arg7: memref<36x6xf32, #tpu.memory_space<vmem>>, %arg8: memref<1x6xf32, #tpu.memory_space<vmem>>, %arg9: memref<6x36xf32, #tpu.memory_space<vmem>>, %arg10: memref<1x36xf32, #tpu.memory_space<vmem>>, %arg11: memref<144x24xf32, #tpu.memory_space<vmem>>, %arg12: memref<1x24xf32, #tpu.memory_space<vmem>>, %arg13: memref<24x144xf32, #tpu.memory_space<vmem>>, %arg14: memref<1x144xf32, #tpu.memory_space<vmem>>, %arg15: memref<4x144xf32, #tpu.memory_space<vmem>>, %arg16: memref<1x1x4x64xf32, #tpu.memory_space<vmem>>, %arg17: memref<1x1x1x144xf32, #tpu.memory_space<vmem>>, %arg18: memref<1x1x1x144xf32, #tpu.memory_space<vmem>>) attributes {dimension_semantics = [#tpu.dimension_semantics<parallel>, #tpu.dimension_semantics<parallel>], iteration_bounds = array<i64: 2, 5>, scalar_prefetch = 0 : i64, scratch_operands = 0 : i64, tpu.core_type = #tpu.core_type<tc>, window_params = [{transform_indices = @transform_0, window_bounds = array<i64: 1, 1, 36, 64>}, {transform_indices = @transform_1, window_bounds = array<i64: 1, 1, 64, 36>}, {transform_indices = @transform_2, window_bounds = array<i64: 1, 64, 144>}, {transform_indices = @transform_3, window_bounds = array<i64: 1, 144, 64>}, {transform_indices = @transform_4, window_bounds = array<i64: 1, 4, 64>}, {pipeline_mode = #tpu.pipeline_mode<synchronous>, transform_indices = @transform_5, window_bounds = array<i64: 36, 6>}, {pipeline_mode = #tpu.pipeline_mode<synchronous>, transform_indices = @transform_6, window_bounds = array<i64: 1, 6>}, {pipeline_mode = #tpu.pipeline_mode<synchronous>, transform_indices = @transform_7, window_bounds = array<i64: 6, 36>}, {pipeline_mode = #tpu.pipeline_mode<synchronous>, transform_indices = @transform_8, window_bounds = array<i64: 1, 36>}, {pipeline_mode = #tpu.pipeline_mode<synchronous>, transform_indices = @transform_9, window_bounds = array<i64: 144, 24>}, {pipeline_mode = #tpu.pipeline_mode<synchronous>, transform_indices = @transform_10, window_bounds = array<i64: 1, 24>}, {pipeline_mode = #tpu.pipeline_mode<synchronous>, transform_indices = @transform_11, window_bounds = array<i64: 24, 144>}, {pipeline_mode = #tpu.pipeline_mode<synchronous>, transform_indices = @transform_12, window_bounds = array<i64: 1, 144>}, {pipeline_mode = #tpu.pipeline_mode<synchronous>, transform_indices = @transform_13, window_bounds = array<i64: 4, 144>}, {transform_indices = @transform_14, window_bounds = array<i64: 1, 1, 4, 64>}, {transform_indices = @transform_15, window_bounds = array<i64: 1, 1, 1, 144>}, {transform_indices = @transform_16, window_bounds = array<i64: 1, 1, 1, 144>}]} {
    %c0 = arith.constant 0 : index
    %c0_0 = arith.constant 0 : index
    %c0_1 = arith.constant 0 : index
    %c0_2 = arith.constant 0 : index
    %0 = vector.load %arg2[%c0, %c0_0, %c0_1, %c0_2] : memref<1x1x36x64xf32, #tpu.memory_space<vmem>>, vector<1x1x36x64xf32>
    %1 = vector.shape_cast %0 : vector<1x1x36x64xf32> to vector<36x64xf32>
    %c0_3 = arith.constant 0 : index
    %c0_4 = arith.constant 0 : index
    %c0_5 = arith.constant 0 : index
    %c0_6 = arith.constant 0 : index
    %2 = vector.load %arg3[%c0_3, %c0_4, %c0_5, %c0_6] : memref<1x1x64x36xf32, #tpu.memory_space<vmem>>, vector<1x1x64x36xf32>
    %3 = vector.shape_cast %2 : vector<1x1x64x36xf32> to vector<64x36xf32>
    %c0_7 = arith.constant 0 : index
    %c0_8 = arith.constant 0 : index
    %c0_9 = arith.constant 0 : index
    %4 = vector.load %arg4[%c0_7, %c0_8, %c0_9] : memref<1x64x144xbf16, #tpu.memory_space<vmem>>, vector<1x64x144xbf16>
    %5 = vector.shape_cast %4 : vector<1x64x144xbf16> to vector<64x144xbf16>
    %c0_10 = arith.constant 0 : index
    %c0_11 = arith.constant 0 : index
    %c0_12 = arith.constant 0 : index
    %6 = vector.load %arg5[%c0_10, %c0_11, %c0_12] : memref<1x144x64xbf16, #tpu.memory_space<vmem>>, vector<1x144x64xbf16>
    %7 = vector.shape_cast %6 : vector<1x144x64xbf16> to vector<144x64xbf16>
    %c0_13 = arith.constant 0 : index
    %c0_14 = arith.constant 0 : index
    %c0_15 = arith.constant 0 : index
    %8 = vector.load %arg6[%c0_13, %c0_14, %c0_15] : memref<1x4x64xf32, #tpu.memory_space<vmem>>, vector<1x4x64xf32>
    %9 = vector.shape_cast %8 : vector<1x4x64xf32> to vector<4x64xf32>
    %c0_16 = arith.constant 0 : index
    %c0_17 = arith.constant 0 : index
    %10 = vector.load %arg15[%c0_16, %c0_17] : memref<4x144xf32, #tpu.memory_space<vmem>>, vector<4x144xf32>
    %11 = arith.mulf %1, %1 : vector<36x64xf32>
    %cst = arith.constant dense<0.000000e+00> : vector<36xf32>
    %12 = vector.multi_reduction <add>, %11, %cst [1] : vector<36x64xf32> to vector<36xf32>
    %13 = vector.shape_cast %12 : vector<36xf32> to vector<36x1xf32>
    %cst_18 = arith.constant 1.000000e-24 : f32
    %14 = vector.broadcast %cst_18 : f32 to vector<36x1xf32>
    %15 = arith.maximumf %13, %14 : vector<36x1xf32>
    %16 = math.rsqrt %15 : vector<36x1xf32>
    %17 = vector.broadcast %16 : vector<36x1xf32> to vector<36x64xf32>
    %18 = arith.mulf %1, %17 : vector<36x64xf32>
    %19 = arith.mulf %3, %3 : vector<64x36xf32>
    %cst_19 = arith.constant dense<0.000000e+00> : vector<36xf32>
    %20 = vector.multi_reduction <add>, %19, %cst_19 [0] : vector<64x36xf32> to vector<36xf32>
    %21 = vector.shape_cast %20 : vector<36xf32> to vector<1x36xf32>
    %cst_20 = arith.constant 1.000000e-24 : f32
    %22 = vector.broadcast %cst_20 : f32 to vector<1x36xf32>
    %23 = arith.maximumf %21, %22 : vector<1x36xf32>
    %24 = math.rsqrt %23 : vector<1x36xf32>
    %25 = vector.broadcast %24 : vector<1x36xf32> to vector<64x36xf32>
    %26 = arith.mulf %3, %25 : vector<64x36xf32>
    %cst_21 = arith.constant dense<0.000000e+00> : vector<64xf32>
    %27 = vector.multi_reduction <add>, %18, %cst_21 [0] : vector<36x64xf32> to vector<64xf32>
    %28 = vector.shape_cast %27 : vector<64xf32> to vector<1x64xf32>
    %cst_22 = arith.constant 3.600000e+01 : f32
    %29 = vector.broadcast %cst_22 : f32 to vector<1x64xf32>
    %30 = arith.divf %28, %29 : vector<1x64xf32>
    %31 = arith.truncf %30 : vector<1x64xf32> to vector<1x64xbf16>
    %cst_23 = arith.constant dense<0.000000e+00> : vector<1x144xf32>
    %32 = tpu.matmul %31, %5, %cst_23 {dimension_numbers = #tpu.dot_dimension_numbers<[1], [0], [0], [1], [0, 0, 1, 1], [], []>} : vector<1x64xbf16>, vector<64x144xbf16>, vector<1x144xf32> -> vector<1x144xf32>
    %c0_24 = arith.constant 0 : index
    %c0_25 = arith.constant 0 : index
    %33 = vector.load %arg11[%c0_24, %c0_25] : memref<144x24xf32, #tpu.memory_space<vmem>>, vector<144x24xf32>
    %cst_26 = arith.constant dense<0.000000e+00> : vector<1x24xf32>
    %34 = tpu.matmul %32, %33, %cst_26 {dimension_numbers = #tpu.dot_dimension_numbers<[1], [0], [0], [1], [0, 0, 1, 1], [], []>} : vector<1x144xf32>, vector<144x24xf32>, vector<1x24xf32> -> vector<1x24xf32>
    %c0_27 = arith.constant 0 : index
    %c0_28 = arith.constant 0 : index
    %35 = vector.load %arg12[%c0_27, %c0_28] : memref<1x24xf32, #tpu.memory_space<vmem>>, vector<1x24xf32>
    %36 = arith.addf %34, %35 : vector<1x24xf32>
    %cst_29 = arith.constant 0.000000e+00 : f32
    %37 = vector.broadcast %cst_29 : f32 to vector<1x24xf32>
    %38 = arith.maximumf %36, %37 : vector<1x24xf32>
    %c0_30 = arith.constant 0 : index
    %c0_31 = arith.constant 0 : index
    %39 = vector.load %arg13[%c0_30, %c0_31] : memref<24x144xf32, #tpu.memory_space<vmem>>, vector<24x144xf32>
    %cst_32 = arith.constant dense<0.000000e+00> : vector<1x144xf32>
    %40 = tpu.matmul %38, %39, %cst_32 {dimension_numbers = #tpu.dot_dimension_numbers<[1], [0], [0], [1], [0, 0, 1, 1], [], []>} : vector<1x24xf32>, vector<24x144xf32>, vector<1x144xf32> -> vector<1x144xf32>
    %c0_33 = arith.constant 0 : index
    %c0_34 = arith.constant 0 : index
    %41 = vector.load %arg14[%c0_33, %c0_34] : memref<1x144xf32, #tpu.memory_space<vmem>>, vector<1x144xf32>
    %42 = arith.addf %40, %41 : vector<1x144xf32>
    %43 = vector.broadcast %42 : vector<1x144xf32> to vector<4x144xf32>
    %44 = arith.mulf %10, %43 : vector<4x144xf32>
    %45 = arith.truncf %44 : vector<4x144xf32> to vector<4x144xbf16>
    %cst_35 = arith.constant dense<0.000000e+00> : vector<4x64xf32>
    %46 = tpu.matmul %45, %7, %cst_35 {dimension_numbers = #tpu.dot_dimension_numbers<[1], [0], [0], [1], [0, 0, 1, 1], [], []>} : vector<4x144xbf16>, vector<144x64xbf16>, vector<4x64xf32> -> vector<4x64xf32>
    %cst_36 = arith.constant dense<0.000000e+00> : vector<4x36xf32>
    %47 = tpu.matmul %46, %26, %cst_36 {dimension_numbers = #tpu.dot_dimension_numbers<[1], [0], [0], [1], [0, 0, 1, 1], [], []>} : vector<4x64xf32>, vector<64x36xf32>, vector<4x36xf32> -> vector<4x36xf32>
    %cst_37 = arith.constant 1.11111116 : f32
    %48 = vector.broadcast %cst_37 : f32 to vector<4x36xf32>
    %49 = arith.mulf %47, %48 : vector<4x36xf32>
    %cst_38 = arith.constant dense<0xFF800000> : vector<4xf32>
    %50 = vector.multi_reduction <maximumf>, %49, %cst_38 [1] : vector<4x36xf32> to vector<4xf32>
    %51 = vector.shape_cast %50 : vector<4xf32> to vector<4x1xf32>
    %52 = vector.broadcast %51 : vector<4x1xf32> to vector<4x36xf32>
    %53 = arith.subf %49, %52 : vector<4x36xf32>
    %54 = math.exp %53 : vector<4x36xf32>
    %cst_39 = arith.constant dense<0.000000e+00> : vector<4xf32>
    %55 = vector.multi_reduction <add>, %54, %cst_39 [1] : vector<4x36xf32> to vector<4xf32>
    %56 = vector.shape_cast %55 : vector<4xf32> to vector<4x1xf32>
    %57 = tpu.reciprocal %56 {approx = true} : vector<4x1xf32> -> vector<4x1xf32>
    %58 = vector.broadcast %57 : vector<4x1xf32> to vector<4x36xf32>
    %59 = arith.mulf %54, %58 : vector<4x36xf32>
    %cst_40 = arith.constant 1.000000e+00 : f32
    %60 = vector.broadcast %cst_40 : f32 to vector<4x36xf32>
    %61 = arith.addf %59, %60 : vector<4x36xf32>
    %cst_41 = arith.constant dense<0.000000e+00> : vector<4x64xf32>
    %62 = tpu.matmul %61, %1, %cst_41 {dimension_numbers = #tpu.dot_dimension_numbers<[1], [0], [0], [1], [0, 0, 1, 1], [], []>} : vector<4x36xf32>, vector<36x64xf32>, vector<4x64xf32> -> vector<4x64xf32>
    %cst_42 = arith.constant 0.027777778 : f32
    %63 = vector.broadcast %cst_42 : f32 to vector<4x64xf32>
    %64 = arith.mulf %62, %63 : vector<4x64xf32>
    %c0_43 = arith.constant 0 : index
    %c0_44 = arith.constant 0 : index
    %c0_45 = arith.constant 0 : index
    %c0_46 = arith.constant 0 : index
    %65 = vector.load %arg16[%c0_43, %c0_44, %c0_45, %c0_46] : memref<1x1x4x64xf32, #tpu.memory_space<vmem>>, vector<1x1x4x64xf32>
    %66 = vector.shape_cast %65 : vector<1x1x4x64xf32> to vector<4x64xf32>
    %67 = vector.shape_cast %64 : vector<4x64xf32> to vector<1x1x4x64xf32>
    tpu.vector_store %arg16[%c0_43, %c0_44, %c0_45, %c0_46], %67 {strides = array<i32>} : memref<1x1x4x64xf32, #tpu.memory_space<vmem>>, vector<1x1x4x64xf32>,
    %68 = arith.mulf %64, %64 : vector<4x64xf32>
    %cst_47 = arith.constant dense<0.000000e+00> : vector<4xf32>
    %69 = vector.multi_reduction <add>, %68, %cst_47 [1] : vector<4x64xf32> to vector<4xf32>
    %70 = vector.shape_cast %69 : vector<4xf32> to vector<4x1xf32>
    %cst_48 = arith.constant 1.000000e-24 : f32
    %71 = vector.broadcast %cst_48 : f32 to vector<4x1xf32>
    %72 = arith.maximumf %70, %71 : vector<4x1xf32>
    %73 = math.rsqrt %72 : vector<4x1xf32>
    %74 = vector.broadcast %73 : vector<4x1xf32> to vector<4x64xf32>
    %75 = arith.mulf %64, %74 : vector<4x64xf32>
    %76 = arith.truncf %75 : vector<4x64xf32> to vector<4x64xbf16>
    %cst_49 = arith.constant dense<0.000000e+00> : vector<4x144xf32>
    %77 = tpu.matmul %76, %5, %cst_49 {dimension_numbers = #tpu.dot_dimension_numbers<[1], [0], [0], [1], [0, 0, 1, 1], [], []>} : vector<4x64xbf16>, vector<64x144xbf16>, vector<4x144xf32> -> vector<4x144xf32>
    %78 = arith.mulf %77, %10 : vector<4x144xf32>
    %cst_50 = arith.constant dense<0.000000e+00> : vector<144xf32>
    %79 = vector.multi_reduction <add>, %78, %cst_50 [0] : vector<4x144xf32> to vector<144xf32>
    %80 = vector.shape_cast %79 : vector<144xf32> to vector<1x144xf32>
    %cst_51 = arith.constant 7.000000e+00 : f32
    %81 = vector.broadcast %cst_51 : f32 to vector<1x144xf32>
    %82 = arith.mulf %81, %80 : vector<1x144xf32>
    %c0_52 = arith.constant 0 : index
    %c0_53 = arith.constant 0 : index
    %c0_54 = arith.constant 0 : index
    %c0_55 = arith.constant 0 : index
    %83 = vector.load %arg17[%c0_52, %c0_53, %c0_54, %c0_55] : memref<1x1x1x144xf32, #tpu.memory_space<vmem>>, vector<1x1x1x144xf32>
    %84 = vector.shape_cast %83 : vector<1x1x1x144xf32> to vector<1x144xf32>
    %85 = vector.shape_cast %82 : vector<1x144xf32> to vector<1x1x1x144xf32>
    tpu.vector_store %arg17[%c0_52, %c0_53, %c0_54, %c0_55], %85 {strides = array<i32>} : memref<1x1x1x144xf32, #tpu.memory_space<vmem>>, vector<1x1x1x144xf32>,
    %cst_56 = arith.constant dense<0.000000e+00> : vector<4x36xf32>
    %86 = tpu.matmul %9, %26, %cst_56 {dimension_numbers = #tpu.dot_dimension_numbers<[1], [0], [0], [1], [0, 0, 1, 1], [], []>} : vector<4x64xf32>, vector<64x36xf32>, vector<4x36xf32> -> vector<4x36xf32>
    %c0_57 = arith.constant 0 : index
    %c0_58 = arith.constant 0 : index
    %87 = vector.load %arg7[%c0_57, %c0_58] : memref<36x6xf32, #tpu.memory_space<vmem>>, vector<36x6xf32>
    %cst_59 = arith.constant dense<0.000000e+00> : vector<4x6xf32>
    %88 = tpu.matmul %86, %87, %cst_59 {dimension_numbers = #tpu.dot_dimension_numbers<[1], [0], [0], [1], [0, 0, 1, 1], [], []>} : vector<4x36xf32>, vector<36x6xf32>, vector<4x6xf32> -> vector<4x6xf32>
    %c0_60 = arith.constant 0 : index
    %c0_61 = arith.constant 0 : index
    %89 = vector.load %arg8[%c0_60, %c0_61] : memref<1x6xf32, #tpu.memory_space<vmem>>, vector<1x6xf32>
    %90 = vector.broadcast %89 : vector<1x6xf32> to vector<4x6xf32>
    %91 = arith.addf %88, %90 : vector<4x6xf32>
    %cst_62 = arith.constant 0.000000e+00 : f32
    %92 = vector.broadcast %cst_62 : f32 to vector<4x6xf32>
    %93 = arith.maximumf %91, %92 : vector<4x6xf32>
    %c0_63 = arith.constant 0 : index
    %c0_64 = arith.constant 0 : index
    %94 = vector.load %arg9[%c0_63, %c0_64] : memref<6x36xf32, #tpu.memory_space<vmem>>, vector<6x36xf32>
    %cst_65 = arith.constant dense<0.000000e+00> : vector<4x36xf32>
    %95 = tpu.matmul %93, %94, %cst_65 {dimension_numbers = #tpu.dot_dimension_numbers<[1], [0], [0], [1], [0, 0, 1, 1], [], []>} : vector<4x6xf32>, vector<6x36xf32>, vector<4x36xf32> -> vector<4x36xf32>
    %c0_66 = arith.constant 0 : index
    %c0_67 = arith.constant 0 : index
    %96 = vector.load %arg10[%c0_66, %c0_67] : memref<1x36xf32, #tpu.memory_space<vmem>>, vector<1x36xf32>
    %97 = vector.broadcast %96 : vector<1x36xf32> to vector<4x36xf32>
    %98 = arith.addf %95, %97 : vector<4x36xf32>
    %cst_68 = arith.constant dense<0.000000e+00> : vector<4x64xf32>
    %99 = tpu.matmul %98, %18, %cst_68 {dimension_numbers = #tpu.dot_dimension_numbers<[1], [0], [0], [1], [0, 0, 1, 1], [], []>} : vector<4x36xf32>, vector<36x64xf32>, vector<4x64xf32> -> vector<4x64xf32>
    %100 = arith.truncf %99 : vector<4x64xf32> to vector<4x64xbf16>
    %cst_69 = arith.constant dense<0.000000e+00> : vector<4x144xf32>
    %101 = tpu.matmul %100, %5, %cst_69 {dimension_numbers = #tpu.dot_dimension_numbers<[1], [0], [0], [1], [0, 0, 1, 1], [], []>} : vector<4x64xbf16>, vector<64x144xbf16>, vector<4x144xf32> -> vector<4x144xf32>
    %cst_70 = arith.constant 1.11111116 : f32
    %102 = vector.broadcast %cst_70 : f32 to vector<4x144xf32>
    %103 = arith.mulf %101, %102 : vector<4x144xf32>
    %cst_71 = arith.constant 0.000000e+00 : f32
    %104 = vector.broadcast %cst_71 : f32 to vector<4x144xf32>
    %105 = arith.cmpf ogt, %10, %104 : vector<4x144xf32>
    %cst_72 = arith.constant -1.000000e+30 : f32
    %106 = vector.broadcast %cst_72 : f32 to vector<4x144xf32>
    %107 = arith.select %105, %103, %106 : vector<4x144xi1>, vector<4x144xf32>
    %cst_73 = arith.constant dense<0xFF800000> : vector<4xf32>
    %108 = vector.multi_reduction <maximumf>, %107, %cst_73 [1] : vector<4x144xf32> to vector<4xf32>
    %109 = vector.shape_cast %108 : vector<4xf32> to vector<4x1xf32>
    %110 = vector.broadcast %109 : vector<4x1xf32> to vector<4x144xf32>
    %111 = arith.subf %107, %110 : vector<4x144xf32>
    %112 = math.exp %111 : vector<4x144xf32>
    %cst_74 = arith.constant dense<0.000000e+00> : vector<4xf32>
    %113 = vector.multi_reduction <add>, %112, %cst_74 [1] : vector<4x144xf32> to vector<4xf32>
    %114 = vector.shape_cast %113 : vector<4xf32> to vector<4x1xf32>
    %115 = tpu.reciprocal %114 {approx = true} : vector<4x1xf32> -> vector<4x1xf32>
    %116 = vector.broadcast %115 : vector<4x1xf32> to vector<4x144xf32>
    %117 = arith.mulf %112, %116 : vector<4x144xf32>
    %cst_75 = arith.constant dense<0.000000e+00> : vector<144xf32>
    %118 = vector.multi_reduction <add>, %117, %cst_75 [0] : vector<4x144xf32> to vector<144xf32>
    %119 = vector.shape_cast %118 : vector<144xf32> to vector<1x144xf32>
    %cst_76 = arith.constant 1.000000e+00 : f32
    %120 = vector.broadcast %cst_76 : f32 to vector<1x144xf32>
    %121 = arith.addf %119, %120 : vector<1x144xf32>
    %c0_77 = arith.constant 0 : index
    %c0_78 = arith.constant 0 : index
    %c0_79 = arith.constant 0 : index
    %c0_80 = arith.constant 0 : index
    %122 = vector.load %arg18[%c0_77, %c0_78, %c0_79, %c0_80] : memref<1x1x1x144xf32, #tpu.memory_space<vmem>>, vector<1x1x1x144xf32>
    %123 = vector.shape_cast %122 : vector<1x1x1x144xf32> to vector<1x144xf32>
    %124 = vector.shape_cast %121 : vector<1x144xf32> to vector<1x1x1x144xf32>
    tpu.vector_store %arg18[%c0_77, %c0_78, %c0_79, %c0_80], %124 {strides = array<i32>} : memref<1x1x1x144xf32, #tpu.memory_space<vmem>>, vector<1x1x1x144xf32>,
    return
  }
  func.func @transform_0(%arg0: i32, %arg1: i32) -> (i32, i32, i32, i32) {
    %c0_i32 = arith.constant 0 : i32
    %c0_i32_0 = arith.constant 0 : i32
    %c0_i32_1 = arith.constant 0 : i32
    return %arg0, %arg1, %c0_i32, %c0_i32_0 : i32, i32, i32, i32
  }
  func.func @transform_1(%arg0: i32, %arg1: i32) -> (i32, i32, i32, i32) {
    %c0_i32 = arith.constant 0 : i32
    %c0_i32_0 = arith.constant 0 : i32
    %c0_i32_1 = arith.constant 0 : i32
    return %arg0, %arg1, %c0_i32, %c0_i32_0 : i32, i32, i32, i32
  }
  func.func @transform_2(%arg0: i32, %arg1: i32) -> (i32, i32, i32) {
    %c0_i32 = arith.constant 0 : i32
    %c0_i32_0 = arith.constant 0 : i32
    %c0_i32_1 = arith.constant 0 : i32
    return %arg0, %c0_i32, %c0_i32_0 : i32, i32, i32
  }
  func.func @transform_3(%arg0: i32, %arg1: i32) -> (i32, i32, i32) {
    %c0_i32 = arith.constant 0 : i32
    %c0_i32_0 = arith.constant 0 : i32
    %c0_i32_1 = arith.constant 0 : i32
    return %arg0, %c0_i32, %c0_i32_0 : i32, i32, i32
  }
  func.func @transform_4(%arg0: i32, %arg1: i32) -> (i32, i32, i32) {
    %c0_i32 = arith.constant 0 : i32
    %c0_i32_0 = arith.constant 0 : i32
    %c0_i32_1 = arith.constant 0 : i32
    return %arg0, %c0_i32, %c0_i32_0 : i32, i32, i32
  }
  func.func @transform_5(%arg0: i32, %arg1: i32) -> (i32, i32) {
    %c0_i32 = arith.constant 0 : i32
    %c0_i32_0 = arith.constant 0 : i32
    %c0_i32_1 = arith.constant 0 : i32
    return %c0_i32, %c0_i32_0 : i32, i32
  }
  func.func @transform_6(%arg0: i32, %arg1: i32) -> (i32, i32) {
    %c0_i32 = arith.constant 0 : i32
    %c0_i32_0 = arith.constant 0 : i32
    %c0_i32_1 = arith.constant 0 : i32
    return %c0_i32, %c0_i32_0 : i32, i32
  }
  func.func @transform_7(%arg0: i32, %arg1: i32) -> (i32, i32) {
    %c0_i32 = arith.constant 0 : i32
    %c0_i32_0 = arith.constant 0 : i32
    %c0_i32_1 = arith.constant 0 : i32
    return %c0_i32, %c0_i32_0 : i32, i32
  }
  func.func @transform_8(%arg0: i32, %arg1: i32) -> (i32, i32) {
    %c0_i32 = arith.constant 0 : i32
    %c0_i32_0 = arith.constant 0 : i32
    %c0_i32_1 = arith.constant 0 : i32
    return %c0_i32, %c0_i32_0 : i32, i32
  }
  func.func @transform_9(%arg0: i32, %arg1: i32) -> (i32, i32) {
    %c0_i32 = arith.constant 0 : i32
    %c0_i32_0 = arith.constant 0 : i32
    %c0_i32_1 = arith.constant 0 : i32
    return %c0_i32, %c0_i32_0 : i32, i32
  }
  func.func @transform_10(%arg0: i32, %arg1: i32) -> (i32, i32) {
    %c0_i32 = arith.constant 0 : i32
    %c0_i32_0 = arith.constant 0 : i32
    %c0_i32_1 = arith.constant 0 : i32
    return %c0_i32, %c0_i32_0 : i32, i32
  }
  func.func @transform_11(%arg0: i32, %arg1: i32) -> (i32, i32) {
    %c0_i32 = arith.constant 0 : i32
    %c0_i32_0 = arith.constant 0 : i32
    %c0_i32_1 = arith.constant 0 : i32
    return %c0_i32, %c0_i32_0 : i32, i32
  }
  func.func @transform_12(%arg0: i32, %arg1: i32) -> (i32, i32) {
    %c0_i32 = arith.constant 0 : i32
    %c0_i32_0 = arith.constant 0 : i32
    %c0_i32_1 = arith.constant 0 : i32
    return %c0_i32, %c0_i32_0 : i32, i32
  }
  func.func @transform_13(%arg0: i32, %arg1: i32) -> (i32, i32) {
    %c0_i32 = arith.constant 0 : i32
    %c0_i32_0 = arith.constant 0 : i32
    %c0_i32_1 = arith.constant 0 : i32
    return %c0_i32, %c0_i32_0 : i32, i32
  }
  func.func @transform_14(%arg0: i32, %arg1: i32) -> (i32, i32, i32, i32) {
    %c0_i32 = arith.constant 0 : i32
    %c0_i32_0 = arith.constant 0 : i32
    %c0_i32_1 = arith.constant 0 : i32
    return %arg0, %arg1, %c0_i32, %c0_i32_0 : i32, i32, i32, i32
  }
  func.func @transform_15(%arg0: i32, %arg1: i32) -> (i32, i32, i32, i32) {
    %c0_i32 = arith.constant 0 : i32
    %c0_i32_0 = arith.constant 0 : i32
    %c0_i32_1 = arith.constant 0 : i32
    return %arg0, %arg1, %c0_i32, %c0_i32_0 : i32, i32, i32, i32
  }
  func.func @transform_16(%arg0: i32, %arg1: i32) -> (i32, i32, i32, i32) {
    %c0_i32 = arith.constant 0 : i32
    %c0_i32_0 = arith.constant 0 : i32
    %c0_i32_1 = arith.constant 0 : i32
    return %arg0, %arg1, %c0_i32, %c0_i32_0 : i32, i32, i32, i32
  }
}

</mosaic_0001>

<bundles_post_ra>
// kernel: model_forward.4
= control target key start
LH: loop header
LB: loop body
LE: loop exit
PB: predicated region body
PF: predicated region fallthrough
CT: control target
= control target key end

     0   :  { %s2070_s12 = smov 0   ;;  %s2072_s13 = smov 0   ;;  %s2554_s0 = inlined_call_operand.vmem [shape: bf16[32,27], index: 0, kind: input, shape index: {}]   ;;  %s2555_s1 = inlined_call_operand.vmem [shape: bf16[27,16128], index: 1, kind: input, shape index: {}]   ;;  %s2556_s2 = inlined_call_operand.vmem [shape: f32[32,1], index: 2, kind: input, shape index: {}]   ;;  %s2557_s3 = inlined_call_operand.vmem [shape: bf16[32,16128], index: 3, kind: output, shape index: {}]  }
   0x1   :  { %s2074_s14 = smov 0   ;;  %s2076_s15 = smov 0  }
   0x2   :  { %s2078_s16 = smov 0  }
   0x3 LB: > { %s22_s17 = sadd.s32 1, %s2042_s15  ;;  %s1761_s18 = sadd.s32 4294967295, %s2046_s16   ;;  %s2046_s16 = sphi %s2078_s16, %s13_s16   ;;  %s2042_s15 = sphi %s2076_s15, %s2562_s15   ;;  %s2038_s14 = sphi %s2074_s14, %s2561_s14   ;;  %s2034_s13 = sphi %s2072_s13, %s2560_s13   ;;  %s2030_s12 = sphi %s2070_s12, %s2559_s12  }
   0x4   : > { %p23_p0 = scmp.ge.s32.totalorder %s22_s17, 7  ;;  %p65_p1 = scmp.ne.s32.totalorder %s2034_s13, %s2030_s12 }
   0x5   : > { %p66_p2 = scmp.eq.s32.totalorder %s2046_s16, 0  ;;  %p123_p4 = scmp.eq.s32.totalorder %s1761_s18, 6 }
   0x6   : > { %s2564_s17 = smov (%p23_p0, %s22_s17), 0  ;;  %s58_s20 = sadd.s32 1, %s2034_s13 }
   0x7   : > { %p67_p3 = por %p66_p2, %p65_p1  ;;  %s55_s19 = ssub.s32 %s2042_s15, %s2564_s17 }
   0x8   : > { %p56_p5 = scmp.eq.s32.totalorder %s55_s19, 0  ;;  %p2105_p6 = por %p123_p4, %p65_p1 }
   0x9   : > { %p1766_p7 = scmp.ge.s32.totalorder %s2046_s16, 7 }
   0xa   : > { %s2110_s22 = scalar_select %p56_p5, %s2034_s13, %s58_s20  }
   0xb   : > { %163 = sbr.rel (%p1766_p7) target bundleno = 41 (0x29), region = 24 }
  0x12   : > { %166 = sbr.rel (!%p67_p3) target bundleno = 41 (0x29), region = 28  ;;  %s168_s23 = sand.u32 (%p67_p3), 1, %s2034_s13  }
  0x13   : > { %s1864_s24 = smul.u32 (%p67_p3), 72, %s2042_s15 }
  0x14   : > { %s1906_s25 = smul.u32 (%p67_p3), 288, %s168_s23 }
  0x15   : > { %s2118_s28 = scalar_lea.vmem (%p67_p3), %s2555_s1, %s1864_s24 }
  0x16   : > { %v186_v0 = vld [vmem:[%s2118_s28] sm:$0xff] (%p67_p3)  ;;  %v188_v1 = vld [vmem:[%s2118_s28 + $0x8] sm:$0xff] (%p67_p3)  ;;  %v190_v2 = vld [vmem:[%s2118_s28 + $0x10] sm:$0xff] (%p67_p3)  ;;  %s2123_s29 = scalar_lea.vmem (%p67_p3), [#allocation2], %s1906_s25 }
  0x17   : > { %187 = vst [vmem:[%s2123_s29] sm:$0xff] (%p67_p3), %v186_v0  ;;  %189 = vst [vmem:[%s2123_s29 + $0x8] sm:$0xff] (%p67_p3), %v188_v1  ;;  %v192_v3 = vld [vmem:[%s2118_s28 + $0x18] sm:$0xff] (%p67_p3)  ;;  %v194_v4 = vld [vmem:[%s2118_s28 + $0x20] sm:$0xff] (%p67_p3) }
  0x18   : > { %191 = vst [vmem:[%s2123_s29 + $0x10] sm:$0xff] (%p67_p3), %v190_v2  ;;  %v196_v5 = vld [vmem:[%s2118_s28 + $0x28] sm:$0xff] (%p67_p3)  ;;  %193 = vst [vmem:[%s2123_s29 + $0x18] sm:$0xff] (%p67_p3), %v192_v3  ;;  %v198_v6 = vld [vmem:[%s2118_s28 + $0x30] sm:$0xff] (%p67_p3) }
  0x19   : > { %195 = vst [vmem:[%s2123_s29 + $0x20] sm:$0xff] %v194_v4  ;;  %197 = vst [vmem:[%s2123_s29 + $0x28] sm:$0xff] %v196_v5  ;;  %v200_v7 = vld [vmem:[%s2118_s28 + $0x38] sm:$0xff]  ;;  %v202_v8 = vld [vmem:[%s2118_s28 + $0x40] sm:$0xff] }
  0x1a   : > { %199 = vst [vmem:[%s2123_s29 + $0x30] sm:$0xff] %v198_v6  ;;  %201 = vst [vmem:[%s2123_s29 + $0x38] sm:$0xff] %v200_v7  ;;  %v204_v9 = vld [vmem:[%s2118_s28 + $0x1f8] sm:$0xff]  ;;  %v206_v10 = vld [vmem:[%s2118_s28 + $0x200] sm:$0xff] }
  0x1b   : > { %203 = vst [vmem:[%s2123_s29 + $0x40] sm:$0xff] %v202_v8  ;;  %v208_v11 = vld [vmem:[%s2118_s28 + $0x208] sm:$0xff]  ;;  %205 = vst [vmem:[%s2123_s29 + $0x48] sm:$0xff] %v204_v9  ;;  %v210_v12 = vld [vmem:[%s2118_s28 + $0x210] sm:$0xff] }
  0x1c   : > { %207 = vst [vmem:[%s2123_s29 + $0x50] sm:$0xff] %v206_v10  ;;  %209 = vst [vmem:[%s2123_s29 + $0x58] sm:$0xff] %v208_v11  ;;  %v212_v13 = vld [vmem:[%s2118_s28 + $0x218] sm:$0xff]  ;;  %v214_v14 = vld [vmem:[%s2118_s28 + $0x220] sm:$0xff] }
  0x1d   : > { %211 = vst [vmem:[%s2123_s29 + $0x60] sm:$0xff] %v210_v12  ;;  %213 = vst [vmem:[%s2123_s29 + $0x68] sm:$0xff] %v212_v13  ;;  %v216_v15 = vld [vmem:[%s2118_s28 + $0x228] sm:$0xff]  ;;  %v218_v16 = vld [vmem:[%s2118_s28 + $0x230] sm:$0xff] }
  0x1e   : > { %215 = vst [vmem:[%s2123_s29 + $0x70] sm:$0xff] %v214_v14  ;;  %v220_v17 = vld [vmem:[%s2118_s28 + $0x238] sm:$0xff]  ;;  %217 = vst [vmem:[%s2123_s29 + $0x78] sm:$0xff] %v216_v15  ;;  %v222_v18 = vld [vmem:[%s2118_s28 + $0x3f0] sm:$0xff] }
  0x1f   : > { %219 = vst [vmem:[%s2123_s29 + $0x80] sm:$0xff] %v218_v16  ;;  %221 = vst [vmem:[%s2123_s29 + $0x88] sm:$0xff] %v220_v17  ;;  %v224_v19 = vld [vmem:[%s2118_s28 + $0x3f8] sm:$0xff]  ;;  %v226_v20 = vld [vmem:[%s2118_s28 + $0x400] sm:$0xff] }
  0x20   : > { %223 = vst [vmem:[%s2123_s29 + $0x90] sm:$0xff] %v222_v18  ;;  %225 = vst [vmem:[%s2123_s29 + $0x98] sm:$0xff] %v224_v19  ;;  %v228_v21 = vld [vmem:[%s2118_s28 + $0x408] sm:$0xff]  ;;  %v230_v22 = vld [vmem:[%s2118_s28 + $0x410] sm:$0xff] }
  0x21   : > { %227 = vst [vmem:[%s2123_s29 + $0xa0] sm:$0xff] %v226_v20  ;;  %v232_v23 = vld [vmem:[%s2118_s28 + $0x418] sm:$0xff]  ;;  %229 = vst [vmem:[%s2123_s29 + $0xa8] sm:$0xff] %v228_v21  ;;  %v234_v24 = vld [vmem:[%s2118_s28 + $0x420] sm:$0xff] }
  0x22   : > { %231 = vst [vmem:[%s2123_s29 + $0xb0] sm:$0xff] %v230_v22  ;;  %233 = vst [vmem:[%s2123_s29 + $0xb8] sm:$0xff] %v232_v23  ;;  %v236_v25 = vld [vmem:[%s2118_s28 + $0x428] sm:$0xff]  ;;  %v238_v26 = vld [vmem:[%s2118_s28 + $0x430] sm:$0xff] }
  0x23   : > { %235 = vst [vmem:[%s2123_s29 + $0xc0] sm:$0xff] %v234_v24  ;;  %237 = vst [vmem:[%s2123_s29 + $0xc8] sm:$0xff] %v236_v25  ;;  %v240_v27 = vld [vmem:[%s2118_s28 + $0x5e8] sm:$0xff]  ;;  %v242_v28 = vld [vmem:[%s2118_s28 + $0x5f0] sm:$0xff] }
  0x24   : > { %239 = vst [vmem:[%s2123_s29 + $0xd0] sm:$0xff] %v238_v26  ;;  %v244_v29 = vld [vmem:[%s2118_s28 + $0x5f8] sm:$0xff]  ;;  %241 = vst [vmem:[%s2123_s29 + $0xd8] sm:$0xff] %v240_v27  ;;  %v246_v30 = vld [vmem:[%s2118_s28 + $0x600] sm:$0xff] }
  0x25   : > { %243 = vst [vmem:[%s2123_s29 + $0xe0] sm:$0xff] %v242_v28  ;;  %245 = vst [vmem:[%s2123_s29 + $0xe8] sm:$0xff] %v244_v29  ;;  %v248_v31 = vld [vmem:[%s2118_s28 + $0x608] sm:$0xff]  ;;  %v250_v32 = vld [vmem:[%s2118_s28 + $0x610] sm:$0xff] }
  0x26   : > { %247 = vst [vmem:[%s2123_s29 + $0xf0] sm:$0xff] %v246_v30  ;;  %249 = vst [vmem:[%s2123_s29 + $0xf8] sm:$0xff] %v248_v31  ;;  %v252_v33 = vld [vmem:[%s2118_s28 + $0x618] sm:$0xff]  ;;  %v254_v34 = vld [vmem:[%s2118_s28 + $0x620] sm:$0xff] }
  0x27   : > { %251 = vst [vmem:[%s2123_s29 + $0x100] sm:$0xff] %v250_v32  ;;  %v256_v35 = vld [vmem:[%s2118_s28 + $0x628] sm:$0xff]  ;;  %253 = vst [vmem:[%s2123_s29 + $0x108] sm:$0xff] %v252_v33 }
  0x28   : > { %255 = vst [vmem:[%s2123_s29 + $0x110] sm:$0xff] %v254_v34  ;;  %257 = vst [vmem:[%s2123_s29 + $0x118] sm:$0xff] %v256_v35 }
  0x29 PF: > { %p1768_p8 = scmp.ge.s32.totalorder %s2046_s16, 1  ;;  %p262_p9 = scmp.lt.s32.totalorder %s2046_s16, 8 }
  0x2b   : > { %p263_p10 = pnand %p1768_p8, %p262_p9 }
  0x2c   : > { %s269_s30 = sand.u32 (!%p263_p10), 1, %s2030_s12   ;;  %vm560_vm0 = vcmask (!%p263_p10), 1044480   ;;  %v2048_v36 = vmov (!%p263_p10), 0   ;;  %vm561_vm1 = vcmask (!%p263_p10), 1045504   ;;  %v2049_v37 = vmov (!%p263_p10), 65535   ;;  %v359_v39 = vld [vmem:[%s2556_s2 + $0x10] sm:$0xff] (!%p263_p10) }
  0x2d   : > { %266 = sbr.rel (%p263_p10) target bundleno = 365 (0x16d), region = 51  ;;  %650 = vmatprep.mubr.bf16.mxu0 (!%p263_p10), %v2048_v36  ;;  %660 = vmatprep.mubr.bf16.mxu1 (!%p263_p10), %v2048_v36  ;;  %v562_v38 = vsel (!%p263_p10), %vm560_vm0, 4294967295, %v2049_v37  ;;  %v357_v40 = vld [vmem:[%s2556_s2] sm:$0xff] (!%p263_p10)  ;;  %v2228_v49 = vld [vmem:[%s2554_s0 + $0x8] sm:$0xff] (!%p263_p10)   ;;  %vm553_vm2 = vcmask (!%p263_p10), 220160   ;;  %v360_v12 = vld [vmem:[%s2556_s2 + $0x18] sm:$0xff] (!%p263_p10) }
  0x2e   : > { %s2197_s4 = smul.u32 (!%p263_p10), 288, %s269_s30  ;;  %1951 = vset.pattern.permute.xlu1 (!%p263_p10), %v2048_v36  ;;  %1950 = vset.pattern.permute.xlu0 (!%p263_p10), %v2048_v36  ;;  %v2214_v43 = vsel (!%p263_p10), %vm561_vm1, %v562_v38, 0  ;;  %v2223_v48 = vld [vmem:[%s2554_s0] sm:$0xff] (!%p263_p10)   ;;  %v358_v13 = vld [vmem:[%s2556_s2 + $0x8] sm:$0xff] (!%p263_p10) }
  0x2f   : > { %373 = vperm.xlu1 (!%p263_p10), %1951, %v359_v39   ;;  %363 = vperm.xlu0 (!%p263_p10), %1950, %v357_v40  }
  0x30   : > { %s2210_s9 = scalar_lea.vmem (!%p263_p10), [#allocation2], %s2197_s4  ;;  %s2353_s25 = scalar_lea.vmem (!%p263_p10), [#allocation3], %s2197_s4 }
  0x31   : > { %v1952_v41 = vld [vmem:[%s2210_s9 + $0x4] ss:$72 sps:$4 sm:$0xff] (!%p263_p10)   ;;  %v1954_v42 = vld [vmem:[%s2210_s9] ss:$72 sps:$4 sm:$0xff] (!%p263_p10)   ;;  %v1963_v52 = vld [vmem:[%s2210_s9 + $0x10] ss:$72 sps:$4 sm:$0xff] (!%p263_p10)  }
  0x32   : > { %618 = vmatprep.subr.bf16.mxu0 (!%p263_p10), %v1952_v41  ;;  %1902 = vmatprep.subr.bf16.mxu1 (!%p263_p10), %v1952_v41  ;;  %v1955_v44 = vld [vmem:[%s2210_s9 + $0x94] ss:$72 sps:$4 sm:$0x3f] (!%p263_p10)   ;;  %v1957_v45 = vld [vmem:[%s2210_s9 + $0x90] ss:$72 sps:$4 sm:$0x3f] (!%p263_p10)  }
  0x33   : > { %619 = vmatpush1.bf16.msra.mxu0 (!%p263_p10), %v1954_v42  ;;  %1904 = vmatpush1.bf16.msra.mxu1 (!%p263_p10), %v1954_v42  ;;  %v568_v46 = vand.u32 (!%p263_p10), %v1955_v44, %v2214_v43  ;;  %v565_v47 = vand.u32 (!%p263_p10), %v1957_v45, %v2214_v43  ;;  %v1962_v50 = vld [vmem:[%s2210_s9 + $0xc] ss:$72 sps:$4 sm:$0xff] (!%p263_p10)   ;;  %v1960_v51 = vld [vmem:[%s2210_s9 + $0x8] ss:$72 sps:$4 sm:$0xff] (!%p263_p10)   ;;  %v1974_v62 = vld [vmem:[%s2210_s9 + $0x1c] ss:$72 sps:$4 sm:$0xff] (!%p263_p10)  }
  0x34   : > { %v1965_v53 = vld [vmem:[%s2210_s9 + $0x14] ss:$72 sps:$4 sm:$0xff]   ;;  %v1966_v54 = vld [vmem:[%s2210_s9 + $0x98] ss:$72 sps:$4 sm:$0x3f]   ;;  %378 = vperm.xlu1 %1951, %v360_v12   ;;  %368 = vperm.xlu0 %1950, %v358_v13   ;;  %s1901_s26 = smul.u32 (%p2105_p6), 72, %s2038_s14 }
  0x35   : > { %620 = vmatprep.subr.bf16.mxu0 %v568_v46  ;;  %1903 = vmatprep.subr.bf16.mxu1 %v568_v46  ;;  %v1968_v55 = vld [vmem:[%s2210_s9 + $0x9c] ss:$72 sps:$4 sm:$0x3f]   ;;  %v1969_v56 = vld [vmem:[%s2210_s9 + $0xa0] ss:$72 sps:$4 sm:$0x3f]   ;;  %v571_v60 = vand.u32 %v1966_v54, %v2214_v43 }
  0x36   : > { %v1971_v57 = vld [vmem:[%s2210_s9 + $0xa4] ss:$72 sps:$4 sm:$0x3f]   ;;  %v574_v58 = vand.u32 %v1968_v55, %v2214_v43  ;;  %v577_v61 = vand.u32 %v1969_v56, %v2214_v43  ;;  %v1972_v0 = vld [vmem:[%s2210_s9 + $0x18] ss:$72 sps:$4 sm:$0xff]   ;;  %s2471_s28 = scalar_lea.vmem (%p2105_p6), %s2557_s3, %s1901_s26 }
  0x37   : > { %621 = vmatpush1.bf16.msra.mxu0 %v565_v47  ;;  %1905 = vmatpush1.bf16.msra.mxu1 %v565_v47  ;;  %v580_v59 = vand.u32 %v1971_v57, %v2214_v43  ;;  %v1977_v63 = vld [vmem:[%s2210_s9 + $0x24] ss:$72 sps:$4 sm:$0xff]   ;;  %v1978_v1 = vld [vmem:[%s2210_s9 + $0xa8] ss:$72 sps:$4 sm:$0x3f]  }
  0x38   : > { %671 = vmatprep.subr.bf16.mxu1 %v1962_v50  ;;  %724 = vmatprep.subr.bf16.mxu0 %v1965_v53  ;;  %v1980_v2 = vld [vmem:[%s2210_s9 + $0xac] ss:$72 sps:$4 sm:$0x3f]   ;;  %v1975_v4 = vld [vmem:[%s2210_s9 + $0x20] ss:$72 sps:$4 sm:$0xff]   ;;  %v583_v8 = vand.u32 %v1978_v1, %v2214_v43 }
  0x39   : > { %v1983_v3 = vld [vmem:[%s2210_s9 + $0xb4] ss:$72 sps:$4 sm:$0x3f]   ;;  %v1981_v5 = vld [vmem:[%s2210_s9 + $0xb0] ss:$72 sps:$4 sm:$0x3f]   ;;  %v586_v6 = vand.u32 %v1980_v2, %v2214_v43 }
  0x3a   : > { %1807 = vmatmul.mubr.msk.bf16.vlgmr.msra.gmra.mrb[0].mxu0 %vm553_vm2, %v2223_v48  ;;  %1808 = vmatmul.mubr.msk.bf16.vlgmr.msra.gmra.mrb[0].mxu1 %vm553_vm2, %v2228_v49  ;;  %v592_v7 = vand.u32 %v1983_v3, %v2214_v43  ;;  %v589_v9 = vand.u32 %v1981_v5, %v2214_v43  ;;  %v1986_v10 = vld [vmem:[%s2210_s9 + $0x2c] ss:$72 sps:$4 sm:$0xff]   ;;  %v1992_v14 = vld [vmem:[%s2210_s9 + $0xbc] ss:$72 sps:$4 sm:$0x3f]  }
  0x3b   : > { %672 = vmatpush1.bf16.msra.mxu1 %v1960_v51  ;;  %725 = vmatpush1.bf16.msra.mxu0 %v1963_v52  ;;  %v1989_v11 = vld [vmem:[%s2210_s9 + $0x34] ss:$72 sps:$4 sm:$0xff]   ;;  %v1995_v15 = vld [vmem:[%s2210_s9 + $0xc4] ss:$72 sps:$4 sm:$0x3f]   ;;  %v598_v20 = vand.u32 %v1992_v14, %v2214_v43 }
  0x3c   : > { %673 = vmatprep.subr.bf16.mxu1 %v574_v58  ;;  %726 = vmatprep.subr.bf16.mxu0 %v580_v59  ;;  %v1984_v16 = vld [vmem:[%s2210_s9 + $0x28] ss:$72 sps:$4 sm:$0xff]   ;;  %v1990_v18 = vld [vmem:[%s2210_s9 + $0xb8] ss:$72 sps:$4 sm:$0x3f]   ;;  %v604_v21 = vand.u32 %v1995_v15, %v2214_v43 }
  0x3d   : > { %703 = vmatprep.mubr.bf16.mxu1 %v2048_v36  ;;  %756 = vmatprep.mubr.bf16.mxu0 %v2048_v36  ;;  %v1987_v17 = vld [vmem:[%s2210_s9 + $0x30] ss:$72 sps:$4 sm:$0xff]   ;;  %v1993_v19 = vld [vmem:[%s2210_s9 + $0xc0] ss:$72 sps:$4 sm:$0x3f]   ;;  %v595_v22 = vand.u32 %v1990_v18, %v2214_v43 }
  0x3e   : > { %v601_v23 = vand.u32 %v1993_v19, %v2214_v43  ;;  %v1998_v24 = vld [vmem:[%s2210_s9 + $0x3c] ss:$72 sps:$4 sm:$0xff]   ;;  %v2004_v26 = vld [vmem:[%s2210_s9 + $0xcc] ss:$72 sps:$4 sm:$0x3f]  }
  0x3f   : > { %674 = vmatpush1.bf16.msra.mxu1 %v571_v60  ;;  %727 = vmatpush1.bf16.msra.mxu0 %v577_v61  ;;  %v2001_v25 = vld [vmem:[%s2210_s9 + $0x44] ss:$72 sps:$4 sm:$0xff]   ;;  %v2007_v27 = vld [vmem:[%s2210_s9 + $0xd4] ss:$72 sps:$4 sm:$0x3f]   ;;  %v610_v32 = vand.u32 %v2004_v26, %v2214_v43 }
  0x40   : > { %777 = vmatprep.subr.bf16.mxu1 %v1974_v62  ;;  %830 = vmatprep.subr.bf16.mxu0 %v1977_v63  ;;  %v1996_v28 = vld [vmem:[%s2210_s9 + $0x38] ss:$72 sps:$4 sm:$0xff]   ;;  %v2002_v30 = vld [vmem:[%s2210_s9 + $0xc8] ss:$72 sps:$4 sm:$0x3f]   ;;  %v616_v33 = vand.u32 %v2007_v27, %v2214_v43 }
  0x41   : > { %v1999_v29 = vld [vmem:[%s2210_s9 + $0x40] ss:$72 sps:$4 sm:$0xff]   ;;  %v2005_v31 = vld [vmem:[%s2210_s9 + $0xd0] ss:$72 sps:$4 sm:$0x3f]   ;;  %v607_v34 = vand.u32 %v2002_v30, %v2214_v43 }
  0x42   : > { %1809 = vmatmul.mubr.msk.bf16.vlgmr.msra.gmra.mrb[4].mxu1 %vm553_vm2, %v2223_v48  ;;  %1811 = vmatmul.mubr.msk.bf16.vlgmr.msra.gmra.mrb[4].mxu0 %vm553_vm2, %v2223_v48  ;;  %v613_v35 = vand.u32 %v2005_v31, %v2214_v43 }
  0x43   : > { %778 = vmatpush1.bf16.msra.mxu1 %v1972_v0  ;;  %831 = vmatpush1.bf16.msra.mxu0 %v1975_v4 }
  0x44   : > { %713 = vmatprep.mubr.bf16.mxu1 %v2048_v36  ;;  %766 = vmatprep.mubr.bf16.mxu0 %v2048_v36 }
  0x45   : > { %779 = vmatprep.subr.bf16.mxu1 %v586_v6  ;;  %832 = vmatprep.subr.bf16.mxu0 %v592_v7 }
  0x47   : > { %780 = vmatpush1.bf16.msra.mxu1 %v583_v8  ;;  %833 = vmatpush1.bf16.msra.mxu0 %v589_v9 }
  0x48   : > { %883 = vmatprep.subr.bf16.mxu1 %v1986_v10  ;;  %936 = vmatprep.subr.bf16.mxu0 %v1989_v11 }
  0x4a   : > { %1810 = vmatmul.mubr.msk.bf16.gmra.mrb[8].mxu1 %vm553_vm2, %v2228_v49  ;;  %1812 = vmatmul.mubr.msk.bf16.gmra.mrb[8].mxu0 %vm553_vm2, %v2228_v49 }
  0x4b   : > { %809 = vmatprep.mubr.bf16.mxu1 %v2048_v36  ;;  %862 = vmatprep.mubr.bf16.mxu0 %v2048_v36 }
  0x52   : > { %1813 = vmatmul.mubr.msk.bf16.vlgmr.msra.gmra.mrb[12].mxu1 %vm553_vm2, %v2223_v48  ;;  %1815 = vmatmul.mubr.msk.bf16.vlgmr.msra.gmra.mrb[12].mxu0 %vm553_vm2, %v2223_v48 }
  0x53   : > { %884 = vmatpush1.bf16.msra.mxu1 %v1984_v16  ;;  %937 = vmatpush1.bf16.msra.mxu0 %v1987_v17 }
  0x54   : > { %819 = vmatprep.mubr.bf16.mxu1 %v2048_v36  ;;  %872 = vmatprep.mubr.bf16.mxu0 %v2048_v36 }
  0x55   : > { %885 = vmatprep.subr.bf16.mxu1 %v598_v20  ;;  %938 = vmatprep.subr.bf16.mxu0 %v604_v21 }
  0x57   : > { %886 = vmatpush1.bf16.msra.mxu1 %v595_v22  ;;  %939 = vmatpush1.bf16.msra.mxu0 %v601_v23 }
  0x58   : > { %989 = vmatprep.subr.bf16.mxu1 %v1998_v24  ;;  %1042 = vmatprep.subr.bf16.mxu0 %v2001_v25 }
  0x5a   : > { %1814 = vmatmul.mubr.msk.bf16.gmra.mrb[16].mxu1 %vm553_vm2, %v2228_v49  ;;  %1816 = vmatmul.mubr.msk.bf16.gmra.mrb[16].mxu0 %vm553_vm2, %v2228_v49 }
  0x5b   : > { %915 = vmatprep.mubr.bf16.mxu1 %v2048_v36  ;;  %968 = vmatprep.mubr.bf16.mxu0 %v2048_v36 }
  0x62   : > { %1817 = vmatmul.mubr.msk.bf16.vlgmr.msra.gmra.mrb[20].mxu1 %vm553_vm2, %v2223_v48  ;;  %1819 = vmatmul.mubr.msk.bf16.vlgmr.msra.gmra.mrb[20].mxu0 %vm553_vm2, %v2223_v48 }
  0x63   : > { %990 = vmatpush1.bf16.msra.mxu1 %v1996_v28  ;;  %1043 = vmatpush1.bf16.msra.mxu0 %v1999_v29 }
  0x64   : > { %925 = vmatprep.mubr.bf16.mxu1 %v2048_v36  ;;  %978 = vmatprep.mubr.bf16.mxu0 %v2048_v36 }
  0x65   : > { %991 = vmatprep.subr.bf16.mxu1 %v610_v32  ;;  %1044 = vmatprep.subr.bf16.mxu0 %v616_v33 }
  0x67   : > { %992 = vmatpush1.bf16.msra.mxu1 %v607_v34  ;;  %1045 = vmatpush1.bf16.msra.mxu0 %v613_v35 }
  0x6a   : > { %1818 = vmatmul.mubr.msk.bf16.gmra.mrb[24].mxu1 %vm553_vm2, %v2228_v49  ;;  %1820 = vmatmul.mubr.msk.bf16.gmra.mrb[24].mxu0 %vm553_vm2, %v2228_v49 }
  0x6b   : > { %1021 = vmatprep.mubr.bf16.mxu1 %v2048_v36  ;;  %1074 = vmatprep.mubr.bf16.mxu0 %v2048_v36 }
  0x72   : > { %1821 = vmatmul.mubr.msk.bf16.vlgmr.msra.gmra.mrb[28].mxu1 %vm553_vm2, %v2223_v48  ;;  %1823 = vmatmul.mubr.msk.bf16.vlgmr.msra.gmra.mrb[28].mxu0 %vm553_vm2, %v2223_v48 }
  0x73   : > { %1031 = vmatprep.mubr.bf16.mxu1 %v2048_v36  ;;  %1084 = vmatprep.mubr.bf16.mxu0 %v2048_v36 }
  0x7a   : > { %1822 = vmatmul.mubr.msk.bf16.gmra.mrb[32].mxu1 %vm553_vm2, %v2228_v49  ;;  %1824 = vmatmul.mubr.msk.bf16.gmra.mrb[32].mxu0 %vm553_vm2, %v2228_v49 }
  0xae   : > { %v2336_v37 = vpop.permute.xlu1 %373  ;;  %v2338_v38 = vpop.permute.xlu0 %363 }
  0xb3   : > { %v2340_v39 = vpop.permute.xlu1 %378  ;;  %v2342_v40 = vpop.permute.xlu0 %368 }
 0x10d   : > { %v652_v41 = vpop.f32.mrb[0].mxu0  ;;  %v662_v42 = vpop.f32.mrb[0].mxu1 }
 0x10e   : > { %v653_v43 = vadd.f32 %v652_v41, %v2338_v38  ;;  %v663_v36 = vadd.f32 %v662_v42, %v2336_v37  ;;  %v654_v44 = vpop.f32.mrb[1].mxu0  ;;  %v664_v45 = vpop.f32.mrb[1].mxu1 }
 0x10f   : > { %v655_v46 = vadd.f32 %v654_v44, %v2338_v38  ;;  %v665_v47 = vadd.f32 %v664_v45, %v2336_v37  ;;  %v656_v48 = vpop.f32.mrb[2].mxu0  ;;  %v666_v49 = vpop.f32.mrb[2].mxu1 }
 0x110   : > { %vm1095_vm3 = vcmp.ge.f32.partialorder %v653_v43, 0.0  ;;  %v1167_v50 = vmul.f32 0.1, %v653_v43  ;;  %vm1131_vm4 = vcmp.ge.f32.partialorder %v663_v36, 0.0  ;;  %v1203_v51 = vmul.f32 0.1, %v663_v36 }
 0x111   : > { %vm1096_vm5 = vcmp.ge.f32.partialorder %v655_v46, 0.0  ;;  %v1168_v52 = vmul.f32 0.1, %v655_v46  ;;  %vm1132_vm6 = vcmp.ge.f32.partialorder %v665_v47, 0.0  ;;  %v1204_v53 = vmul.f32 0.1, %v665_v47 }
 0x112   : > { %v1239_v54 = vsel %vm1095_vm3, %v653_v43, %v1167_v50  ;;  %v1275_v55 = vsel %vm1131_vm4, %v663_v36, %v1203_v51  ;;  %v657_v56 = vadd.f32 %v656_v48, %v2342_v40  ;;  %v667_v57 = vadd.f32 %v666_v49, %v2340_v39  ;;  %v658_v58 = vpop.f32.mrb[3].mxu0  ;;  %v668_v59 = vpop.f32.mrb[3].mxu1 }
 0x113   : > { %v1240_v60 = vsel %vm1096_vm5, %v655_v46, %v1168_v52  ;;  %v1276_v61 = vsel %vm1132_vm6, %v665_v47, %v1204_v53  ;;  %v659_v62 = vadd.f32 %v658_v58, %v2342_v40  ;;  %v669_v63 = vadd.f32 %v668_v59, %v2340_v39 }
 0x114   : > { %v1865_v0 = vpack.c.bf16 %v1240_v60, %v1239_v54  ;;  %v1883_v1 = vpack.c.bf16 %v1276_v61, %v1275_v55  ;;  %vm1113_vm7 = vcmp.ge.f32.partialorder %v657_v56, 0.0  ;;  %v1185_v2 = vmul.f32 0.1, %v657_v56 }
 0x115   : > { %vm1149_vm8 = vcmp.ge.f32.partialorder %v667_v57, 0.0  ;;  %v1221_v3 = vmul.f32 0.1, %v667_v57  ;;  %vm1114_vm9 = vcmp.ge.f32.partialorder %v659_v62, 0.0  ;;  %v1186_v4 = vmul.f32 0.1, %v659_v62 }
 0x116   : > { %1527 = vst [vmem:[%s2353_s25] sm:$0xff] %v1865_v0  ;;  %1545 = vst [vmem:[%s2353_s25 + $0x90] sm:$0xff] %v1883_v1  ;;  %v1257_v5 = vsel %vm1113_vm7, %v657_v56, %v1185_v2  ;;  %vm1150_vm10 = vcmp.ge.f32.partialorder %v669_v63, 0.0  ;;  %v1222_v6 = vmul.f32 0.1, %v669_v63  ;;  %v705_v7 = vpop.f32.mrb[4].mxu1  ;;  %v758_v8 = vpop.f32.mrb[4].mxu0 }
 0x117   : > { %v1293_v9 = vsel %vm1149_vm8, %v667_v57, %v1221_v3  ;;  %v1258_v10 = vsel %vm1114_vm9, %v659_v62, %v1186_v4  ;;  %v706_v11 = vadd.f32 %v705_v7, %v2338_v38  ;;  %v759_v12 = vadd.f32 %v758_v8, %v2338_v38  ;;  %v707_v13 = vpop.f32.mrb[5].mxu1  ;;  %v760_v14 = vpop.f32.mrb[5].mxu0 }
 0x118   : > { %v1874_v15 = vpack.c.bf16 %v1258_v10, %v1257_v5  ;;  %v1294_v16 = vsel %vm1150_vm10, %v669_v63, %v1222_v6  ;;  %v708_v17 = vadd.f32 %v707_v13, %v2338_v38  ;;  %v761_v18 = vadd.f32 %v760_v14, %v2338_v38  ;;  %v709_v19 = vpop.f32.mrb[6].mxu1  ;;  %v762_v20 = vpop.f32.mrb[6].mxu0 }
 0x119   : > { %v1892_v21 = vpack.c.bf16 %v1294_v16, %v1293_v9  ;;  %vm1097_vm11 = vcmp.ge.f32.partialorder %v706_v11, 0.0  ;;  %v1169_v22 = vmul.f32 0.1, %v706_v11  ;;  %vm1099_vm12 = vcmp.ge.f32.partialorder %v759_v12, 0.0  ;;  %v711_v23 = vpop.f32.mrb[7].mxu1  ;;  %v764_v24 = vpop.f32.mrb[7].mxu0 }
 0x11a   : > { %1536 = vst [vmem:[%s2353_s25 + $0x48] sm:$0xff] %v1874_v15  ;;  %v1171_v25 = vmul.f32 0.1, %v759_v12  ;;  %vm1098_vm13 = vcmp.ge.f32.partialorder %v708_v17, 0.0  ;;  %v1170_v26 = vmul.f32 0.1, %v708_v17  ;;  %v710_v29 = vadd.f32 %v709_v19, %v2342_v40 }
 0x11b   : > { %vm1100_vm14 = vcmp.ge.f32.partialorder %v761_v18, 0.0  ;;  %1554 = vst [vmem:[%s2353_s25 + $0xd8] sm:$0xff] %v1892_v21  ;;  %v1241_v27 = vsel %vm1097_vm11, %v706_v11, %v1169_v22  ;;  %v1172_v28 = vmul.f32 0.1, %v761_v18  ;;  %v763_v30 = vadd.f32 %v762_v20, %v2342_v40 }
 0x11c   : > { %v1243_v31 = vsel %vm1099_vm12, %v759_v12, %v1171_v25  ;;  %v1242_v32 = vsel %vm1098_vm13, %v708_v17, %v1170_v26  ;;  %v712_v33 = vadd.f32 %v711_v23, %v2342_v40  ;;  %v765_v34 = vadd.f32 %v764_v24, %v2342_v40 }
 0x11d   : > { %v1866_v35 = vpack.c.bf16 %v1242_v32, %v1241_v27  ;;  %v1244_v41 = vsel %vm1100_vm14, %v761_v18, %v1172_v28  ;;  %vm1115_vm15 = vcmp.ge.f32.partialorder %v710_v29, 0.0  ;;  %v1187_v42 = vmul.f32 0.1, %v710_v29  ;;  %v715_v43 = vpop.f32.mrb[8].mxu1  ;;  %v768_v36 = vpop.f32.mrb[8].mxu0 }
 0x11e   : > { %v1867_v44 = vpack.c.bf16 %v1244_v41, %v1243_v31  ;;  %vm1117_vm0 = vcmp.ge.f32.partialorder %v763_v30, 0.0  ;;  %v1189_v45 = vmul.f32 0.1, %v763_v30  ;;  %vm1116_vm1 = vcmp.ge.f32.partialorder %v712_v33, 0.0  ;;  %v717_v46 = vpop.f32.mrb[9].mxu1  ;;  %v770_v47 = vpop.f32.mrb[9].mxu0 }
 0x11f   : > { %1528 = vst [vmem:[%s2353_s25 + $0x8] sm:$0xff] %v1866_v35  ;;  %v1259_v48 = vsel %vm1115_vm15, %v710_v29, %v1187_v42  ;;  %v1188_v49 = vmul.f32 0.1, %v712_v33  ;;  %vm1118_vm2 = vcmp.ge.f32.partialorder %v765_v34, 0.0  ;;  %v1190_v50 = vmul.f32 0.1, %v765_v34 }
 0x120   : > { %v719_v51 = vpop.f32.mrb[10].mxu1  ;;  %1529 = vst [vmem:[%s2353_s25 + $0x10] sm:$0xff] %v1867_v44  ;;  %v1261_v52 = vsel %vm1117_vm0, %v763_v30, %v1189_v45  ;;  %v716_v53 = vadd.f32 %v715_v43, %v2336_v37  ;;  %v769_v54 = vadd.f32 %v768_v36, %v2336_v37  ;;  %v718_v55 = vadd.f32 %v717_v46, %v2336_v37  ;;  %v772_v56 = vpop.f32.mrb[10].mxu0 }
 0x121   : > { %v721_v57 = vpop.f32.mrb[11].mxu1  ;;  %v1260_v58 = vsel %vm1116_vm1, %v712_v33, %v1188_v49  ;;  %v1262_v59 = vsel %vm1118_vm2, %v765_v34, %v1190_v50  ;;  %v771_v60 = vadd.f32 %v770_v47, %v2336_v37  ;;  %v720_v61 = vadd.f32 %v719_v51, %v2340_v39  ;;  %v774_v62 = vpop.f32.mrb[11].mxu0 }
 0x122   : > { %v1875_v63 = vpack.c.bf16 %v1260_v58, %v1259_v48  ;;  %v1876_v0 = vpack.c.bf16 %v1262_v59, %v1261_v52  ;;  %vm1133_vm3 = vcmp.ge.f32.partialorder %v716_v53, 0.0  ;;  %v1205_v1 = vmul.f32 0.1, %v716_v53 }
 0x123   : > { %vm1135_vm4 = vcmp.ge.f32.partialorder %v769_v54, 0.0  ;;  %v1207_v2 = vmul.f32 0.1, %v769_v54  ;;  %vm1134_vm5 = vcmp.ge.f32.partialorder %v718_v55, 0.0  ;;  %v1206_v3 = vmul.f32 0.1, %v718_v55 }
 0x124   : > { %1537 = vst [vmem:[%s2353_s25 + $0x50] sm:$0xff] %v1875_v63  ;;  %1538 = vst [vmem:[%s2353_s25 + $0x58] sm:$0xff] %v1876_v0  ;;  %v1277_v4 = vsel %vm1133_vm3, %v716_v53, %v1205_v1  ;;  %vm1136_vm6 = vcmp.ge.f32.partialorder %v771_v60, 0.0  ;;  %v1208_v5 = vmul.f32 0.1, %v771_v60  ;;  %vm1151_vm7 = vcmp.ge.f32.partialorder %v720_v61, 0.0 }
 0x125   : > { %v1279_v6 = vsel %vm1135_vm4, %v769_v54, %v1207_v2  ;;  %v1278_v7 = vsel %vm1134_vm5, %v718_v55, %v1206_v3  ;;  %v1223_v8 = vmul.f32 0.1, %v720_v61  ;;  %v773_v9 = vadd.f32 %v772_v56, %v2340_v39  ;;  %v811_v10 = vpop.f32.mrb[12].mxu1  ;;  %v864_v11 = vpop.f32.mrb[12].mxu0 }
 0x126   : > { %v1884_v12 = vpack.c.bf16 %v1278_v7, %v1277_v4  ;;  %v1280_v13 = vsel %vm1136_vm6, %v771_v60, %v1208_v5  ;;  %v722_v14 = vadd.f32 %v721_v57, %v2340_v39  ;;  %v775_v15 = vadd.f32 %v774_v62, %v2340_v39  ;;  %v813_v16 = vpop.f32.mrb[13].mxu1  ;;  %v866_v17 = vpop.f32.mrb[13].mxu0 }
 0x127   : > { %v1885_v18 = vpack.c.bf16 %v1280_v13, %v1279_v6  ;;  %v1295_v19 = vsel %vm1151_vm7, %v720_v61, %v1223_v8  ;;  %vm1153_vm8 = vcmp.ge.f32.partialorder %v773_v9, 0.0  ;;  %v1225_v20 = vmul.f32 0.1, %v773_v9  ;;  %v815_v21 = vpop.f32.mrb[14].mxu1  ;;  %v868_v22 = vpop.f32.mrb[14].mxu0 }
 0x128   : > { %1546 = vst [vmem:[%s2353_s25 + $0x98] sm:$0xff] %v1884_v12  ;;  %vm1152_vm9 = vcmp.ge.f32.partialorder %v722_v14, 0.0  ;;  %v1224_v23 = vmul.f32 0.1, %v722_v14  ;;  %vm1154_vm10 = vcmp.ge.f32.partialorder %v775_v15, 0.0  ;;  %v812_v26 = vadd.f32 %v811_v10, %v2338_v38  ;;  %v817_v29 = vpop.f32.mrb[15].mxu1 }
 0x129   : > { %v1226_v24 = vmul.f32 0.1, %v775_v15  ;;  %1547 = vst [vmem:[%s2353_s25 + $0xa0] sm:$0xff] %v1885_v18  ;;  %v1297_v25 = vsel %vm1153_vm8, %v773_v9, %v1225_v20  ;;  %v865_v27 = vadd.f32 %v864_v11, %v2338_v38  ;;  %v814_v28 = vadd.f32 %v813_v16, %v2338_v38  ;;  %v870_v30 = vpop.f32.mrb[15].mxu0 }
 0x12a   : > { %v1296_v31 = vsel %vm1152_vm9, %v722_v14, %v1224_v23  ;;  %v867_v33 = vadd.f32 %v866_v17, %v2338_v38  ;;  %v816_v34 = vadd.f32 %v815_v21, %v2342_v40  ;;  %vm1101_vm11 = vcmp.ge.f32.partialorder %v812_v26, 0.0 }
 0x12b   : > { %v1298_v32 = vsel %vm1154_vm10, %v775_v15, %v1226_v24  ;;  %v1893_v35 = vpack.c.bf16 %v1296_v31, %v1295_v19  ;;  %v1173_v42 = vmul.f32 0.1, %v812_v26  ;;  %vm1103_vm12 = vcmp.ge.f32.partialorder %v865_v27, 0.0 }
 0x12c   : > { %v1894_v41 = vpack.c.bf16 %v1298_v32, %v1297_v25  ;;  %v1175_v43 = vmul.f32 0.1, %v865_v27  ;;  %vm1102_vm13 = vcmp.ge.f32.partialorder %v814_v28, 0.0  ;;  %v1174_v36 = vmul.f32 0.1, %v814_v28 }
 0x12d   : > { %1555 = vst [vmem:[%s2353_s25 + $0xe0] sm:$0xff] %v1893_v35  ;;  %v1245_v44 = vsel %vm1101_vm11, %v812_v26, %v1173_v42  ;;  %vm1104_vm14 = vcmp.ge.f32.partialorder %v867_v33, 0.0  ;;  %v1176_v45 = vmul.f32 0.1, %v867_v33  ;;  %vm1119_vm15 = vcmp.ge.f32.partialorder %v816_v34, 0.0  ;;  %v821_v46 = vpop.f32.mrb[16].mxu1 }
 0x12e   : > { %1556 = vst [vmem:[%s2353_s25 + $0xe8] sm:$0xff] %v1894_v41  ;;  %v874_v47 = vpop.f32.mrb[16].mxu0  ;;  %v1247_v48 = vsel %vm1103_vm12, %v865_v27, %v1175_v43  ;;  %v1246_v49 = vsel %vm1102_vm13, %v814_v28, %v1174_v36  ;;  %v1191_v50 = vmul.f32 0.1, %v816_v34  ;;  %v869_v51 = vadd.f32 %v868_v22, %v2342_v40  ;;  %v823_v52 = vpop.f32.mrb[17].mxu1 }
 0x12f   : > { %v876_v53 = vpop.f32.mrb[17].mxu0  ;;  %v1868_v54 = vpack.c.bf16 %v1246_v49, %v1245_v44  ;;  %v1248_v55 = vsel %vm1104_vm14, %v867_v33, %v1176_v45  ;;  %v818_v56 = vadd.f32 %v817_v29, %v2342_v40  ;;  %v871_v57 = vadd.f32 %v870_v30, %v2342_v40  ;;  %v825_v58 = vpop.f32.mrb[18].mxu1 }
 0x130   : > { %v878_v59 = vpop.f32.mrb[18].mxu0  ;;  %v1869_v60 = vpack.c.bf16 %v1248_v55, %v1247_v48  ;;  %v1263_v61 = vsel %vm1119_vm15, %v816_v34, %v1191_v50  ;;  %vm1121_vm0 = vcmp.ge.f32.partialorder %v869_v51, 0.0  ;;  %v1193_v62 = vmul.f32 0.1, %v869_v51  ;;  %v827_v63 = vpop.f32.mrb[19].mxu1 }
 0x131   : > { %v880_v0 = vpop.f32.mrb[19].mxu0  ;;  %1530 = vst [vmem:[%s2353_s25 + $0x18] sm:$0xff] %v1868_v54  ;;  %vm1120_vm1 = vcmp.ge.f32.partialorder %v818_v56, 0.0  ;;  %v1192_v1 = vmul.f32 0.1, %v818_v56  ;;  %vm1122_vm2 = vcmp.ge.f32.partialorder %v871_v57, 0.0  ;;  %v822_v4 = vadd.f32 %v821_v46, %v2336_v37 }
 0x132   : > { %v1194_v2 = vmul.f32 0.1, %v871_v57  ;;  %1531 = vst [vmem:[%s2353_s25 + $0x20] sm:$0xff] %v1869_v60  ;;  %v1265_v3 = vsel %vm1121_vm0, %v869_v51, %v1193_v62  ;;  %v875_v5 = vadd.f32 %v874_v47, %v2336_v37  ;;  %v824_v6 = vadd.f32 %v823_v52, %v2336_v37 }
 0x133   : > { %v1264_v7 = vsel %vm1120_vm1, %v818_v56, %v1192_v1  ;;  %v877_v9 = vadd.f32 %v876_v53, %v2336_v37  ;;  %v826_v10 = vadd.f32 %v825_v58, %v2340_v39  ;;  %vm1137_vm3 = vcmp.ge.f32.partialorder %v822_v4, 0.0 }
 0x134   : > { %v1266_v8 = vsel %vm1122_vm2, %v871_v57, %v1194_v2  ;;  %v1877_v11 = vpack.c.bf16 %v1264_v7, %v1263_v61  ;;  %v1209_v13 = vmul.f32 0.1, %v822_v4  ;;  %vm1139_vm4 = vcmp.ge.f32.partialorder %v875_v5, 0.0 }
 0x135   : > { %v1878_v12 = vpack.c.bf16 %v1266_v8, %v1265_v3  ;;  %v1211_v14 = vmul.f32 0.1, %v875_v5  ;;  %vm1138_vm5 = vcmp.ge.f32.partialorder %v824_v6, 0.0  ;;  %v1210_v15 = vmul.f32 0.1, %v824_v6  ;;  %v917_v18 = vpop.f32.mrb[20].mxu1 }
 0x136   : > { %1539 = vst [vmem:[%s2353_s25 + $0x60] sm:$0xff] %v1877_v11  ;;  %v1281_v16 = vsel %vm1137_vm3, %v822_v4, %v1209_v13  ;;  %vm1140_vm6 = vcmp.ge.f32.partialorder %v877_v9, 0.0  ;;  %v1212_v17 = vmul.f32 0.1, %v877_v9  ;;  %vm1155_vm7 = vcmp.ge.f32.partialorder %v826_v10, 0.0  ;;  %v970_v19 = vpop.f32.mrb[20].mxu0 }
 0x137   : > { %1540 = vst [vmem:[%s2353_s25 + $0x68] sm:$0xff] %v1878_v12  ;;  %v1283_v20 = vsel %vm1139_vm4, %v875_v5, %v1211_v14  ;;  %v1282_v21 = vsel %vm1138_vm5, %v824_v6, %v1210_v15  ;;  %v1227_v22 = vmul.f32 0.1, %v826_v10  ;;  %v879_v23 = vadd.f32 %v878_v59, %v2340_v39  ;;  %v919_v24 = vpop.f32.mrb[21].mxu1  ;;  %v972_v25 = vpop.f32.mrb[21].mxu0 }
 0x138   : > { %v1886_v26 = vpack.c.bf16 %v1282_v21, %v1281_v16  ;;  %v1284_v27 = vsel %vm1140_vm6, %v877_v9, %v1212_v17  ;;  %v828_v28 = vadd.f32 %v827_v63, %v2340_v39  ;;  %v881_v29 = vadd.f32 %v880_v0, %v2340_v39  ;;  %v921_v30 = vpop.f32.mrb[22].mxu1  ;;  %v974_v31 = vpop.f32.mrb[22].mxu0 }
 0x139   : > { %v1887_v32 = vpack.c.bf16 %v1284_v27, %v1283_v20  ;;  %v1299_v33 = vsel %vm1155_vm7, %v826_v10, %v1227_v22  ;;  %vm1157_vm8 = vcmp.ge.f32.partialorder %v879_v23, 0.0  ;;  %v1229_v34 = vmul.f32 0.1, %v879_v23  ;;  %v923_v35 = vpop.f32.mrb[23].mxu1  ;;  %v976_v41 = vpop.f32.mrb[23].mxu0 }
 0x13a   : > { %1548 = vst [vmem:[%s2353_s25 + $0xa8] sm:$0xff] %v1886_v26  ;;  %vm1156_vm9 = vcmp.ge.f32.partialorder %v828_v28, 0.0  ;;  %v1228_v42 = vmul.f32 0.1, %v828_v28  ;;  %vm1158_vm10 = vcmp.ge.f32.partialorder %v881_v29, 0.0  ;;  %v918_v44 = vadd.f32 %v917_v18, %v2338_v38 }
 0x13b   : > { %v1230_v43 = vmul.f32 0.1, %v881_v29  ;;  %1549 = vst [vmem:[%s2353_s25 + $0xb0] sm:$0xff] %v1887_v32  ;;  %v1301_v36 = vsel %vm1157_vm8, %v879_v23, %v1229_v34  ;;  %v971_v45 = vadd.f32 %v970_v19, %v2338_v38  ;;  %v920_v46 = vadd.f32 %v919_v24, %v2338_v38 }
 0x13c   : > { %v1300_v47 = vsel %vm1156_vm9, %v828_v28, %v1228_v42  ;;  %v973_v49 = vadd.f32 %v972_v25, %v2338_v38  ;;  %v922_v50 = vadd.f32 %v921_v30, %v2342_v40  ;;  %vm1105_vm11 = vcmp.ge.f32.partialorder %v918_v44, 0.0 }
 0x13d   : > { %v1302_v48 = vsel %vm1158_vm10, %v881_v29, %v1230_v43  ;;  %v1895_v51 = vpack.c.bf16 %v1300_v47, %v1299_v33  ;;  %v1177_v53 = vmul.f32 0.1, %v918_v44  ;;  %v927_v54 = vpop.f32.mrb[24].mxu1  ;;  %v980_v55 = vpop.f32.mrb[24].mxu0  ;;  %vm1107_vm12 = vcmp.ge.f32.partialorder %v971_v45, 0.0 }
 0x13e   : > { %v1896_v52 = vpack.c.bf16 %v1302_v48, %v1301_v36  ;;  %v1179_v56 = vmul.f32 0.1, %v971_v45  ;;  %vm1106_vm13 = vcmp.ge.f32.partialorder %v920_v46, 0.0  ;;  %v1178_v57 = vmul.f32 0.1, %v920_v46  ;;  %v929_v60 = vpop.f32.mrb[25].mxu1 }
 0x13f   : > { %1557 = vst [vmem:[%s2353_s25 + $0xf0] sm:$0xff] %v1895_v51  ;;  %v1249_v58 = vsel %vm1105_vm11, %v918_v44, %v1177_v53  ;;  %vm1108_vm14 = vcmp.ge.f32.partialorder %v973_v49, 0.0  ;;  %v1180_v59 = vmul.f32 0.1, %v973_v49  ;;  %vm1123_vm15 = vcmp.ge.f32.partialorder %v922_v50, 0.0  ;;  %v982_v61 = vpop.f32.mrb[25].mxu0 }
 0x140   : > { %1558 = vst [vmem:[%s2353_s25 + $0xf8] sm:$0xff] %v1896_v52  ;;  %v1251_v62 = vsel %vm1107_vm12, %v971_v45, %v1179_v56  ;;  %v1250_v63 = vsel %vm1106_vm13, %v920_v46, %v1178_v57  ;;  %v1195_v0 = vmul.f32 0.1, %v922_v50  ;;  %v975_v1 = vadd.f32 %v974_v31, %v2342_v40  ;;  %v931_v2 = vpop.f32.mrb[26].mxu1  ;;  %v984_v3 = vpop.f32.mrb[26].mxu0 }
 0x141   : > { %v1870_v4 = vpack.c.bf16 %v1250_v63, %v1249_v58  ;;  %v1252_v5 = vsel %vm1108_vm14, %v973_v49, %v1180_v59  ;;  %v924_v6 = vadd.f32 %v923_v35, %v2342_v40  ;;  %v977_v7 = vadd.f32 %v976_v41, %v2342_v40  ;;  %v933_v8 = vpop.f32.mrb[27].mxu1  ;;  %v986_v9 = vpop.f32.mrb[27].mxu0 }
 0x142   : > { %v1871_v10 = vpack.c.bf16 %v1252_v5, %v1251_v62  ;;  %v1267_v11 = vsel %vm1123_vm15, %v922_v50, %v1195_v0  ;;  %vm1125_vm0 = vcmp.ge.f32.partialorder %v975_v1, 0.0  ;;  %v1197_v12 = vmul.f32 0.1, %v975_v1 }
 0x143   : > { %1532 = vst [vmem:[%s2353_s25 + $0x28] sm:$0xff] %v1870_v4  ;;  %vm1124_vm1 = vcmp.ge.f32.partialorder %v924_v6, 0.0  ;;  %v1196_v13 = vmul.f32 0.1, %v924_v6  ;;  %vm1126_vm2 = vcmp.ge.f32.partialorder %v977_v7, 0.0  ;;  %v928_v16 = vadd.f32 %v927_v54, %v2336_v37 }
 0x144   : > { %v1198_v14 = vmul.f32 0.1, %v977_v7  ;;  %1533 = vst [vmem:[%s2353_s25 + $0x30] sm:$0xff] %v1871_v10  ;;  %v1269_v15 = vsel %vm1125_vm0, %v975_v1, %v1197_v12  ;;  %v981_v17 = vadd.f32 %v980_v55, %v2336_v37  ;;  %v930_v18 = vadd.f32 %v929_v60, %v2336_v37 }
 0x145   : > { %v1268_v19 = vsel %vm1124_vm1, %v924_v6, %v1196_v13  ;;  %v983_v21 = vadd.f32 %v982_v61, %v2336_v37  ;;  %v932_v22 = vadd.f32 %v931_v2, %v2340_v39  ;;  %v1023_v23 = vpop.f32.mrb[28].mxu1  ;;  %v1076_v24 = vpop.f32.mrb[28].mxu0  ;;  %vm1141_vm3 = vcmp.ge.f32.partialorder %v928_v16, 0.0 }
 0x146   : > { %v1270_v20 = vsel %vm1126_vm2, %v977_v7, %v1198_v14  ;;  %v1879_v25 = vpack.c.bf16 %v1268_v19, %v1267_v11  ;;  %v1213_v27 = vmul.f32 0.1, %v928_v16  ;;  %v1025_v28 = vpop.f32.mrb[29].mxu1  ;;  %v1078_v29 = vpop.f32.mrb[29].mxu0  ;;  %vm1143_vm4 = vcmp.ge.f32.partialorder %v981_v17, 0.0 }
 0x147   : > { %v1880_v26 = vpack.c.bf16 %v1270_v20, %v1269_v15  ;;  %v1215_v30 = vmul.f32 0.1, %v981_v17  ;;  %vm1142_vm5 = vcmp.ge.f32.partialorder %v930_v18, 0.0  ;;  %v1214_v31 = vmul.f32 0.1, %v930_v18  ;;  %v1027_v34 = vpop.f32.mrb[30].mxu1 }
 0x148   : > { %1541 = vst [vmem:[%s2353_s25 + $0x70] sm:$0xff] %v1879_v25  ;;  %v1285_v32 = vsel %vm1141_vm3, %v928_v16, %v1213_v27  ;;  %vm1144_vm6 = vcmp.ge.f32.partialorder %v983_v21, 0.0  ;;  %v1216_v33 = vmul.f32 0.1, %v983_v21  ;;  %vm1159_vm7 = vcmp.ge.f32.partialorder %v932_v22, 0.0  ;;  %v1080_v35 = vpop.f32.mrb[30].mxu0 }
 0x149   : > { %1542 = vst [vmem:[%s2353_s25 + $0x78] sm:$0xff] %v1880_v26  ;;  %v1287_v41 = vsel %vm1143_vm4, %v981_v17, %v1215_v30  ;;  %v1286_v42 = vsel %vm1142_vm5, %v930_v18, %v1214_v31  ;;  %v1231_v43 = vmul.f32 0.1, %v932_v22  ;;  %v985_v36 = vadd.f32 %v984_v3, %v2340_v39  ;;  %v1029_v44 = vpop.f32.mrb[31].mxu1  ;;  %v1082_v45 = vpop.f32.mrb[31].mxu0 }
 0x14a   : > { %v1888_v46 = vpack.c.bf16 %v1286_v42, %v1285_v32  ;;  %v1288_v47 = vsel %vm1144_vm6, %v983_v21, %v1216_v33  ;;  %v934_v48 = vadd.f32 %v933_v8, %v2340_v39  ;;  %v987_v49 = vadd.f32 %v986_v9, %v2340_v39 }
 0x14b   : > { %v1889_v50 = vpack.c.bf16 %v1288_v47, %v1287_v41  ;;  %v1303_v51 = vsel %vm1159_vm7, %v932_v22, %v1231_v43  ;;  %vm1161_vm8 = vcmp.ge.f32.partialorder %v985_v36, 0.0  ;;  %v1233_v52 = vmul.f32 0.1, %v985_v36 }
 0x14c   : > { %1550 = vst [vmem:[%s2353_s25 + $0xb8] sm:$0xff] %v1888_v46  ;;  %vm1160_vm9 = vcmp.ge.f32.partialorder %v934_v48, 0.0  ;;  %v1232_v53 = vmul.f32 0.1, %v934_v48  ;;  %vm1162_vm10 = vcmp.ge.f32.partialorder %v987_v49, 0.0  ;;  %v1024_v56 = vadd.f32 %v1023_v23, %v2338_v38 }
 0x14d   : > { %v1234_v54 = vmul.f32 0.1, %v987_v49  ;;  %1551 = vst [vmem:[%s2353_s25 + $0xc0] sm:$0xff] %v1889_v50  ;;  %v1305_v55 = vsel %vm1161_vm8, %v985_v36, %v1233_v52  ;;  %v1077_v57 = vadd.f32 %v1076_v24, %v2338_v38  ;;  %v1026_v58 = vadd.f32 %v1025_v28, %v2338_v38  ;;  %v1033_v59 = vpop.f32.mrb[32].mxu1  ;;  %v1086_v60 = vpop.f32.mrb[32].mxu0 }
 0x14e   : > { %v1304_v61 = vsel %vm1160_vm9, %v934_v48, %v1232_v53  ;;  %v1079_v63 = vadd.f32 %v1078_v29, %v2338_v38  ;;  %v1028_v0 = vadd.f32 %v1027_v34, %v2342_v40  ;;  %v1035_v1 = vpop.f32.mrb[33].mxu1  ;;  %v1088_v2 = vpop.f32.mrb[33].mxu0  ;;  %vm1109_vm11 = vcmp.ge.f32.partialorder %v1024_v56, 0.0 }
 0x14f   : > { %v1306_v62 = vsel %vm1162_vm10, %v987_v49, %v1234_v54  ;;  %v1897_v3 = vpack.c.bf16 %v1304_v61, %v1303_v51  ;;  %v1181_v5 = vmul.f32 0.1, %v1024_v56  ;;  %v1037_v6 = vpop.f32.mrb[34].mxu1  ;;  %v1090_v7 = vpop.f32.mrb[34].mxu0  ;;  %vm1111_vm12 = vcmp.ge.f32.partialorder %v1077_v57, 0.0  ;;  %v1590_v61 = vld [vmem:[%s2353_s25 + $0x8] sm:$0xff] (%p2105_p6) }
 0x150   : > { %v1898_v4 = vpack.c.bf16 %v1306_v62, %v1305_v55  ;;  %v1183_v8 = vmul.f32 0.1, %v1077_v57  ;;  %vm1110_vm13 = vcmp.ge.f32.partialorder %v1026_v58, 0.0  ;;  %v1182_v9 = vmul.f32 0.1, %v1026_v58  ;;  %v1039_v38 = vpop.f32.mrb[35].mxu1 }
 0x151   : > { %1559 = vst [vmem:[%s2353_s25 + $0x100] sm:$0xff] %v1897_v3  ;;  %v1253_v10 = vsel %vm1109_vm11, %v1024_v56, %v1181_v5  ;;  %vm1112_vm14 = vcmp.ge.f32.partialorder %v1079_v63, 0.0  ;;  %v1184_v11 = vmul.f32 0.1, %v1079_v63  ;;  %vm1127_vm15 = vcmp.ge.f32.partialorder %v1028_v0, 0.0  ;;  %v1092_v12 = vpop.f32.mrb[35].mxu0 }
 0x152   : > { %1560 = vst [vmem:[%s2353_s25 + $0x108] sm:$0xff] %v1898_v4  ;;  %v1255_v13 = vsel %vm1111_vm12, %v1077_v57, %v1183_v8  ;;  %v1254_v14 = vsel %vm1110_vm13, %v1026_v58, %v1182_v9  ;;  %v1199_v15 = vmul.f32 0.1, %v1028_v0  ;;  %v1081_v16 = vadd.f32 %v1080_v35, %v2342_v40  ;;  %v1592_v62 = vld [vmem:[%s2353_s25 + $0x10] sm:$0xff] (%p2105_p6)  ;;  %1591 = vst [vmem:[%s2471_s28 + $0x8] sm:$0xff] (%p2105_p6), %v1590_v61  ;;  %v1606_v5 = vld [vmem:[%s2353_s25 + $0x48] sm:$0xff] (%p2105_p6) }
 0x153   : > { %v1872_v17 = vpack.c.bf16 %v1254_v14, %v1253_v10  ;;  %v1256_v18 = vsel %vm1112_vm14, %v1079_v63, %v1184_v11  ;;  %v1030_v19 = vadd.f32 %v1029_v44, %v2342_v40  ;;  %v1083_v20 = vadd.f32 %v1082_v45, %v2342_v40  ;;  %v1594_v63 = vld [vmem:[%s2353_s25 + $0x18] sm:$0xff] (%p2105_p6)  ;;  %1593 = vst [vmem:[%s2471_s28 + $0x10] sm:$0xff] (%p2105_p6), %v1592_v62  ;;  %v1612_v8 = vld [vmem:[%s2353_s25 + $0x60] sm:$0xff] (%p2105_p6)  ;;  %v1614_v9 = vld [vmem:[%s2353_s25 + $0x68] sm:$0xff] (%p2105_p6) }
 0x154   : > { %v1873_v21 = vpack.c.bf16 %v1256_v18, %v1255_v13  ;;  %v1271_v22 = vsel %vm1127_vm15, %v1028_v0, %v1199_v15  ;;  %vm1129_vm0 = vcmp.ge.f32.partialorder %v1081_v16, 0.0  ;;  %v1201_v23 = vmul.f32 0.1, %v1081_v16  ;;  %v1596_v0 = vld [vmem:[%s2353_s25 + $0x20] sm:$0xff] (%p2105_p6)  ;;  %1595 = vst [vmem:[%s2471_s28 + $0x18] sm:$0xff] (%p2105_p6), %v1594_v63  ;;  %1607 = vst [vmem:[%s2471_s28 + $0x1f8] sm:$0xff] (%p2105_p6), %v1606_v5 }
 0x155   : > { %1534 = vst [vmem:[%s2353_s25 + $0x38] sm:$0xff] %v1872_v17  ;;  %vm1128_vm1 = vcmp.ge.f32.partialorder %v1030_v19, 0.0  ;;  %v1200_v24 = vmul.f32 0.1, %v1030_v19  ;;  %vm1130_vm2 = vcmp.ge.f32.partialorder %v1083_v20, 0.0  ;;  %v1034_v27 = vadd.f32 %v1033_v59, %v2336_v37  ;;  %1597 = vst [vmem:[%s2471_s28 + $0x20] sm:$0xff] (%p2105_p6), %v1596_v0 }
 0x156   : > { %v1202_v25 = vmul.f32 0.1, %v1083_v20  ;;  %1535 = vst [vmem:[%s2353_s25 + $0x40] sm:$0xff] %v1873_v21  ;;  %v1273_v26 = vsel %vm1129_vm0, %v1081_v16, %v1201_v23  ;;  %v1087_v28 = vadd.f32 %v1086_v60, %v2336_v37  ;;  %v1036_v29 = vadd.f32 %v1035_v1, %v2336_v37  ;;  %v1598_v1 = vld [vmem:[%s2353_s25 + $0x28] sm:$0xff] (%p2105_p6)  ;;  %v1616_v10 = vld [vmem:[%s2353_s25 + $0x70] sm:$0xff] (%p2105_p6)  ;;  %1613 = vst [vmem:[%s2471_s28 + $0x210] sm:$0xff] (%p2105_p6), %v1612_v8 }
 0x157   : > { %v1272_v40 = vsel %vm1128_vm1, %v1030_v19, %v1200_v24  ;;  %v1089_v31 = vadd.f32 %v1088_v2, %v2336_v37  ;;  %v1038_v32 = vadd.f32 %v1037_v6, %v2340_v39  ;;  %vm1145_vm3 = vcmp.ge.f32.partialorder %v1034_v27, 0.0  ;;  %v1600_v2 = vld [vmem:[%s2353_s25 + $0x30] sm:$0xff] (%p2105_p6)  ;;  %1599 = vst [vmem:[%s2471_s28 + $0x28] sm:$0xff] (%p2105_p6), %v1598_v1  ;;  %1615 = vst [vmem:[%s2471_s28 + $0x218] sm:$0xff] (%p2105_p6), %v1614_v9  ;;  %v1618_v11 = vld [vmem:[%s2353_s25 + $0x78] sm:$0xff] (%p2105_p6) }
 0x158   : > { %v1274_v30 = vsel %vm1130_vm2, %v1083_v20, %v1202_v25  ;;  %v1881_v33 = vpack.c.bf16 %v1272_v40, %v1271_v22  ;;  %v1217_v35 = vmul.f32 0.1, %v1034_v27  ;;  %vm1147_vm4 = vcmp.ge.f32.partialorder %v1087_v28, 0.0  ;;  %1601 = vst [vmem:[%s2471_s28 + $0x30] sm:$0xff] (%p2105_p6), %v1600_v2  ;;  %v1608_v6 = vld [vmem:[%s2353_s25 + $0x50] sm:$0xff] (%p2105_p6)  ;;  %1617 = vst [vmem:[%s2471_s28 + $0x220] sm:$0xff] (%p2105_p6), %v1616_v10 }
 0x159   : > { %v1882_v34 = vpack.c.bf16 %v1274_v30, %v1273_v26  ;;  %v1219_v41 = vmul.f32 0.1, %v1087_v28  ;;  %vm1146_vm5 = vcmp.ge.f32.partialorder %v1036_v29, 0.0  ;;  %v1218_v42 = vmul.f32 0.1, %v1036_v29  ;;  %1609 = vst [vmem:[%s2471_s28 + $0x200] sm:$0xff] (%p2105_p6), %v1608_v6 }
 0x15a   : > { %1543 = vst [vmem:[%s2353_s25 + $0x80] sm:$0xff] %v1881_v33  ;;  %v1289_v43 = vsel %vm1145_vm3, %v1034_v27, %v1217_v35  ;;  %vm1148_vm6 = vcmp.ge.f32.partialorder %v1089_v31, 0.0  ;;  %v1220_v36 = vmul.f32 0.1, %v1089_v31  ;;  %vm1163_vm7 = vcmp.ge.f32.partialorder %v1038_v32, 0.0  ;;  %1619 = vst [vmem:[%s2471_s28 + $0x228] sm:$0xff] (%p2105_p6), %v1618_v11 }
 0x15b   : > { %1544 = vst [vmem:[%s2353_s25 + $0x88] sm:$0xff] %v1882_v34  ;;  %v1291_v44 = vsel %vm1147_vm4, %v1087_v28, %v1219_v41  ;;  %v1290_v45 = vsel %vm1146_vm5, %v1036_v29, %v1218_v42  ;;  %v1235_v37 = vmul.f32 0.1, %v1038_v32  ;;  %v1091_v46 = vadd.f32 %v1090_v7, %v2340_v39  ;;  %v1610_v7 = vld [vmem:[%s2353_s25 + $0x58] sm:$0xff] (%p2105_p6)  ;;  %v1624_v13 = vld [vmem:[%s2353_s25 + $0x90] sm:$0xff] (%p2105_p6)  ;;  %v1628_v15 = vld [vmem:[%s2353_s25 + $0xa0] sm:$0xff] (%p2105_p6) }
 0x15c   : > { %v1890_v47 = vpack.c.bf16 %v1290_v45, %v1289_v43  ;;  %v1292_v48 = vsel %vm1148_vm6, %v1089_v31, %v1220_v36  ;;  %v1040_v49 = vadd.f32 %v1039_v38, %v2340_v39  ;;  %v1093_v50 = vadd.f32 %v1092_v12, %v2340_v39  ;;  %v1588_v39 = vld [vmem:[%s2353_s25] sm:$0xff] (%p2105_p6)  ;;  %v1602_v3 = vld [vmem:[%s2353_s25 + $0x38] sm:$0xff] (%p2105_p6)  ;;  %1611 = vst [vmem:[%s2471_s28 + $0x208] sm:$0xff] (%p2105_p6), %v1610_v7  ;;  %v1630_v16 = vld [vmem:[%s2353_s25 + $0xa8] sm:$0xff] (%p2105_p6) }
 0x15d   : > { %v1891_v51 = vpack.c.bf16 %v1292_v48, %v1291_v44  ;;  %v1307_v52 = vsel %vm1163_vm7, %v1038_v32, %v1235_v37  ;;  %vm1165_vm8 = vcmp.ge.f32.partialorder %v1091_v46, 0.0  ;;  %v1237_v53 = vmul.f32 0.1, %v1091_v46  ;;  %v1604_v4 = vld [vmem:[%s2353_s25 + $0x40] sm:$0xff] (%p2105_p6)  ;;  %1589 = vst [vmem:[%s2471_s28] sm:$0xff] (%p2105_p6), %v1588_v39  ;;  %1603 = vst [vmem:[%s2471_s28 + $0x38] sm:$0xff] (%p2105_p6), %v1602_v3  ;;  %v1626_v14 = vld [vmem:[%s2353_s25 + $0x98] sm:$0xff] (%p2105_p6) }
 0x15e   : > { %1552 = vst [vmem:[%s2353_s25 + $0xc8] sm:$0xff] %v1890_v47  ;;  %vm1164_vm9 = vcmp.ge.f32.partialorder %v1040_v49, 0.0  ;;  %v1236_v54 = vmul.f32 0.1, %v1040_v49  ;;  %vm1166_vm10 = vcmp.ge.f32.partialorder %v1093_v50, 0.0  ;;  %1569 = sbr.rel (!%p2105_p6) target bundleno = 365 (0x16d), region = 59 }
 0x15f   : > { %v1238_v55 = vmul.f32 0.1, %v1093_v50  ;;  %1553 = vst [vmem:[%s2353_s25 + $0xd0] sm:$0xff] %v1891_v51  ;;  %v1309_v56 = vsel %vm1165_vm8, %v1091_v46, %v1237_v53  ;;  %1605 = vst [vmem:[%s2471_s28 + $0x40] sm:$0xff] (%p2105_p6), %v1604_v4  ;;  %v1632_v17 = vld [vmem:[%s2353_s25 + $0xb0] sm:$0xff] (%p2105_p6)  ;;  %v1634_v18 = vld [vmem:[%s2353_s25 + $0xb8] sm:$0xff] (%p2105_p6) }
 0x160   : > { %v1308_v57 = vsel %vm1164_vm9, %v1040_v49, %v1236_v54  ;;  %1625 = vst [vmem:[%s2471_s28 + $0x3f0] sm:$0xff] (%p2105_p6), %v1624_v13  ;;  %1627 = vst [vmem:[%s2471_s28 + $0x3f8] sm:$0xff] (%p2105_p6), %v1626_v14  ;;  %v1636_v19 = vld [vmem:[%s2353_s25 + $0xc0] sm:$0xff] (%p2105_p6)  ;;  %v1642_v22 = vld [vmem:[%s2353_s25 + $0xd8] sm:$0xff] (%p2105_p6) }
 0x161   : > { %v1310_v58 = vsel %vm1166_vm10, %v1093_v50, %v1238_v55  ;;  %v1899_v59 = vpack.c.bf16 %v1308_v57, %v1307_v52  ;;  %v1620_v38 = vld [vmem:[%s2353_s25 + $0x80] sm:$0xff] (%p2105_p6)  ;;  %1629 = vst [vmem:[%s2471_s28 + $0x400] sm:$0xff] (%p2105_p6), %v1628_v15  ;;  %1631 = vst [vmem:[%s2471_s28 + $0x408] sm:$0xff] (%p2105_p6), %v1630_v16  ;;  %v1646_v24 = vld [vmem:[%s2353_s25 + $0xe8] sm:$0xff] (%p2105_p6) }
 0x162   : > { %v1900_v60 = vpack.c.bf16 %v1310_v58, %v1309_v56  ;;  %v1622_v12 = vld [vmem:[%s2353_s25 + $0x88] sm:$0xff] (%p2105_p6)  ;;  %1621 = vst [vmem:[%s2471_s28 + $0x230] sm:$0xff] (%p2105_p6), %v1620_v38  ;;  %1633 = vst [vmem:[%s2471_s28 + $0x410] sm:$0xff] (%p2105_p6), %v1632_v17  ;;  %v1644_v23 = vld [vmem:[%s2353_s25 + $0xe0] sm:$0xff] (%p2105_p6) }
 0x163   : > { %1561 = vst [vmem:[%s2353_s25 + $0x110] sm:$0xff] %v1899_v59  ;;  %1623 = vst [vmem:[%s2471_s28 + $0x238] sm:$0xff] (%p2105_p6), %v1622_v12  ;;  %v1648_v25 = vld [vmem:[%s2353_s25 + $0xf0] sm:$0xff] (%p2105_p6)  ;;  %v1650_v26 = vld [vmem:[%s2353_s25 + $0xf8] sm:$0xff] (%p2105_p6) }
 0x164   : > { %1562 = vst [vmem:[%s2353_s25 + $0x118] sm:$0xff] %v1900_v60  ;;  %1635 = vst [vmem:[%s2471_s28 + $0x418] sm:$0xff] (%p2105_p6), %v1634_v18  ;;  %v1652_v27 = vld [vmem:[%s2353_s25 + $0x100] sm:$0xff] (%p2105_p6)  ;;  %v1654_v28 = vld [vmem:[%s2353_s25 + $0x108] sm:$0xff] (%p2105_p6) }
 0x165   : > { %v1638_v20 = vld [vmem:[%s2353_s25 + $0xc8] sm:$0xff]  ;;  %1637 = vst [vmem:[%s2471_s28 + $0x420] sm:$0xff] %v1636_v19  ;;  %1643 = vst [vmem:[%s2471_s28 + $0x5e8] sm:$0xff] %v1642_v22 }
 0x166   : > { %v1640_v21 = vld [vmem:[%s2353_s25 + $0xd0] sm:$0xff]  ;;  %1639 = vst [vmem:[%s2471_s28 + $0x428] sm:$0xff] %v1638_v20  ;;  %1645 = vst [vmem:[%s2471_s28 + $0x5f0] sm:$0xff] %v1644_v23 }
 0x167   : > { %1641 = vst [vmem:[%s2471_s28 + $0x430] sm:$0xff] %v1640_v21  ;;  %1647 = vst [vmem:[%s2471_s28 + $0x5f8] sm:$0xff] %v1646_v24 }
 0x168   : > { %1649 = vst [vmem:[%s2471_s28 + $0x600] sm:$0xff] %v1648_v25  ;;  %1651 = vst [vmem:[%s2471_s28 + $0x608] sm:$0xff] %v1650_v26 }
 0x169   : > { %1653 = vst [vmem:[%s2471_s28 + $0x610] sm:$0xff] %v1652_v27  ;;  %1655 = vst [vmem:[%s2471_s28 + $0x618] sm:$0xff] %v1654_v28 }
 0x16a   : > { %v1656_v29 = vld [vmem:[%s2353_s25 + $0x110] sm:$0xff] }
 0x16b   : > { %v1658_v40 = vld [vmem:[%s2353_s25 + $0x118] sm:$0xff]  ;;  %1657 = vst [vmem:[%s2471_s28 + $0x620] sm:$0xff] %v1656_v29 }
 0x16c   : > { %1659 = vst [vmem:[%s2471_s28 + $0x628] sm:$0xff] %v1658_v40 }
 0x16d PF: > { %s13_s16 = sadd.s32 1, %s2046_s16   ;;  %s2559_s12 = smov %s2034_s13 }
 0x16e   : > { %p10_p11 = scmp.ge.s32.totalorder %s13_s16, 9   ;;  %s2560_s13 = smov %s2110_s22 }
 0x16f   : > { %s2561_s14 = smov %s2042_s15  ;;  %s2562_s15 = smov %s2564_s17 }
 0x170   :  { %12 = sbr.rel (!%p10_p11) target bundleno = 3 (0x3), region = 119 }

// kernel: model_forward.5
= control target key start
LH: loop header
LB: loop body
LE: loop exit
PB: predicated region body
PF: predicated region fallthrough
CT: control target
= control target key end

     0   :  { %8 = vsyncpa [#allocation3], 0  ;;  %s7577_s12 = smov 0   ;;  %s7579_s13 = smov 0   ;;  %s8640_s0 = inlined_call_operand.vmem [shape: bf16[64,288], index: 0, kind: input, shape index: {}]   ;;  %s8641_s1 = inlined_call_operand.hbm [shape: bf16[288,4032], index: 1, kind: input, shape index: {}]   ;;  %s8642_s2 = inlined_call_operand.vmem [shape: f32[64,1], index: 2, kind: input, shape index: {}]   ;;  %s8643_s3 = inlined_call_operand.vmem [shape: bf16[64,4032], index: 3, kind: output, shape index: {}]  }
   0x1   :  { %s7581_s14 = smov 0  }
   0x2 LB: > { %s6415_s15 = sadd.s32 4294967295, %s7551_s14   ;;  %s26_s16 = sadd.s32 1, %s7547_s13  ;;  %s7551_s14 = sphi %s7581_s14, %s14_s14   ;;  %s7547_s13 = sphi %s7579_s13, %s8655_s13   ;;  %s7543_s12 = sphi %s7577_s12, %s8654_s12  }
   0x3   : > { %p28_p0 = scmp.ge.s32.totalorder %s26_s16, 2  ;;  %p6417_p1 = scmp.ge.s32.totalorder %s7551_s14, 1 }
   0x4   : > { %p137_p2 = scmp.lt.s32.totalorder %s7551_s14, 3  ;;  %p7602_p4 = scmp.eq.s32.totalorder %s6415_s15, 0 }
   0x5   : > { %s8657_s16 = smov (%p28_p0, %s26_s16), 0  ;;  %s7553_s19 = smov [#allocation2]  }
   0x6   : > { %p7598_p3 = pnand %p6417_p1, %p137_p2  ;;  %s152_s20 = sshll.u32 %s7553_s19, 4  ;;  %s153_s20 = int_to_ptr.vmem [resolvable:$true] %s152_s20 }
   0x7   : > { %s8648_s18 = scalar_select %p7602_p4, 1, 0 }
   0x8   : > { %s8647_s17 = scalar_select %p7598_p3, 1, 0 }
   0x9   : > { %p7435_p5 = pneg %p7598_p3  ;;  %s7497_s24 = scalar_lea.hbm %s8641_s1, 73728 }
   0xa   : > { %p7498_p7 = scmp.ne.s32.totalorder %s8641_s1, %s7497_s24  ;;  %p7504_p11 = scmp.lt.u32.totalorder %s7497_s24, %s8641_s1 }
   0xb   : > { %p7610_p6 = pnand %p7602_p4, %p7435_p5 }
   0xd   : > { %p7499_p8 = pneg %p7610_p6 }
   0xf   : > { %p7500_p9 = pnand %p7499_p8, %p7498_p7 }
  0x11   : > { %p7501_p10 = pneg %p7500_p9 }
  0x13   : > { %p7506_p12 = pnand %p7504_p11, %p7501_p10 }
  0x15   : > { %7509 = shalt.err (!%p7506_p12)
}
  0x16   : > { %s7510_s29 = scalar_lea.vmem %s153_s20, 73728  ;;  %p7518_p2 = scmp.lt.s32.totalorder %s153_s20, %s153_s20 }
  0x17   : > { %p7511_p13 = scmp.ne.s32.totalorder %s153_s20, %s7510_s29  ;;  %p7519_p5 = scmp.lt.s32.totalorder %s7510_s29, %s7510_s29 }
  0x19   : > { %p7513_p0 = pnand %p7511_p13, %p7499_p8  ;;  %p7520_p4 = por %p7519_p5, %p7518_p2 }
  0x1b   : > { %p7514_p1 = pneg %p7513_p0 }
  0x1d   : > { %p7521_p3 = pnand %p7520_p4, %p7514_p1 }
  0x1f   : > { %7524 = shalt.err (!%p7521_p3)
}
  0x20   : > { %s7554_s30 = smov 2048   ;;  %s7555_s4 = smov 128  }
  0x21   : > { %7438 = dma.hbm_to_vmem [thread:$0]  (!%p7610_p6), %s8641_s1, 73728, %s153_s20, [#allocation3], %s7554_s30, %s7554_s30, %s7555_s4  }
  0x22   : > { %p8650_p7 = scmp.ne.s32.totalorder %s8647_s17, 0 }
  0x23   : > { %p8651_p9 = scmp.ne.s32.totalorder (!%p8650_p7), %s8648_s18, 0 }
  0x24   : > { %187 = sbr.rel (%p8650_p7) target bundleno = 923 (0x39b), region = 32 }
  0x2b   : > { %7538 = dma.done.wait (%p8651_p9), [#allocation3], 73728  }
  0x2c   : > { %7540 = vsyncadd (%p8651_p9), [#allocation3], 4294893568  ;;  %v7556_v0 = vmov 0   ;;  %v257_v1 = vld [vmem:[#allocation2] sm:$0xff]  ;;  %v258_v3 = vld [vmem:[#allocation2 + $0x8] sm:$0xff]  ;;  %s6422_s7 = sshll.u32 %s7543_s12, 2 }
  0x2d   : > { %7469 = vset.pattern.permute.xlu0 %v7556_v0  ;;  %7470 = vset.pattern.permute.xlu1 %v7556_v0  ;;  %v273_v2 = vld [vmem:[#allocation2 + $0x80] sm:$0xff]  ;;  %v274_v5 = vld [vmem:[#allocation2 + $0x88] sm:$0xff]  ;;  %p223_p3 = scmp.lt.s32.totalorder %s6422_s7, 7  ;;  %vm3767_vm0 = vcmask 261120  }
  0x2e   : > { %v6436_v4 = vcombine.high %v257_v1, %v273_v2  ;;  %v6435_v6 = vcombine.low %v257_v1, %v273_v2  ;;  %v289_v7 = vld [vmem:[#allocation2 + $0x100] sm:$0xff]  ;;  %v6438_v9 = vcombine.high %v258_v3, %v274_v5  ;;  %v6437_v10 = vcombine.low %v258_v3, %v274_v5  ;;  %v290_v12 = vld [vmem:[#allocation2 + $0x108] sm:$0xff] }
  0x2f   : > { %v305_v8 = vld [vmem:[#allocation2 + $0x180] sm:$0xff]  ;;  %v306_v13 = vld [vmem:[#allocation2 + $0x188] sm:$0xff]  ;;  %s8659_s7 = smov (!%p223_p3, %s6422_s7), 7 }
  0x30   : > { %v6468_v11 = vcombine.high %v289_v7, %v305_v8  ;;  %v321_v14 = vld [vmem:[#allocation2 + $0x200] sm:$0xff]  ;;  %3774 = vmatprep.subr.bf16.mxu0 %v6436_v4  ;;  %v6470_v15 = vcombine.high %v290_v12, %v306_v13  ;;  %v322_v17 = vld [vmem:[#allocation2 + $0x208] sm:$0xff]  ;;  %3880 = vmatprep.subr.bf16.mxu1 %v6438_v9  ;;  %v6467_v19 = vcombine.low %v289_v7, %v305_v8  ;;  %s7430_s8 = smul.u32 12, %s8659_s7  ;;  %s6425_s12 = sshll.u32 %s8659_s7, 3 }
  0x31   : > { %v337_v16 = vld [vmem:[#allocation2 + $0x280] sm:$0xff]  ;;  %v338_v18 = vld [vmem:[#allocation2 + $0x288] sm:$0xff]  ;;  %3775 = vmatpush1.bf16.msra.mxu0 %v6435_v6  ;;  %3881 = vmatpush1.bf16.msra.mxu1 %v6437_v10  ;;  %v6469_v20 = vcombine.low %v290_v12, %v306_v13  ;;  %s7656_s18 = scalar_lea.vmem %s8642_s2, %s6425_s12  ;;  %s7109_s19 = sshll.u32 %s8659_s7, 7 }
  0x32   : > { %3776 = vmatprep.subr.bf16.mxu0 %v6468_v11  ;;  %v6500_v21 = vcombine.high %v321_v14, %v337_v16  ;;  %3882 = vmatprep.subr.bf16.mxu1 %v6470_v15  ;;  %v6502_v22 = vcombine.high %v322_v17, %v338_v18  ;;  %v353_v23 = vld [vmem:[#allocation2 + $0x300] sm:$0xff]  ;;  %v354_v25 = vld [vmem:[#allocation2 + $0x308] sm:$0xff]  ;;  %v6499_v27 = vcombine.low %v321_v14, %v337_v16  ;;  %s7645_s11 = scalar_lea.vmem %s8640_s0, %s7430_s8  ;;  %s7819_s22 = scalar_lea.vmem %s8643_s3, %s7109_s19 }
  0x33   : > { %v369_v24 = vld [vmem:[#allocation2 + $0x380] sm:$0xff]  ;;  %v370_v26 = vld [vmem:[#allocation2 + $0x388] sm:$0xff]  ;;  %v6501_v28 = vcombine.low %v322_v17, %v338_v18 }
  0x34   : > { %v6532_v29 = vcombine.high %v353_v23, %v369_v24  ;;  %v6534_v30 = vcombine.high %v354_v25, %v370_v26  ;;  %v385_v31 = vld [vmem:[#allocation2 + $0x400] sm:$0xff]  ;;  %v386_v33 = vld [vmem:[#allocation2 + $0x408] sm:$0xff]  ;;  %v6531_v35 = vcombine.low %v353_v23, %v369_v24  ;;  %v6533_v36 = vcombine.low %v354_v25, %v370_v26 }
  0x35   : > { %3777 = vmatpush1.bf16.msra.mxu0 %v6467_v19  ;;  %3883 = vmatpush1.bf16.msra.mxu1 %v6469_v20  ;;  %v401_v32 = vld [vmem:[#allocation2 + $0x480] sm:$0xff]  ;;  %v402_v34 = vld [vmem:[#allocation2 + $0x488] sm:$0xff] }
  0x36   : > { %3778 = vmatprep.subr.bf16.mxu0 %v6500_v21  ;;  %3884 = vmatprep.subr.bf16.mxu1 %v6502_v22  ;;  %v6564_v37 = vcombine.high %v385_v31, %v401_v32  ;;  %v6566_v38 = vcombine.high %v386_v33, %v402_v34  ;;  %v417_v39 = vld [vmem:[#allocation2 + $0x500] sm:$0xff]  ;;  %v418_v41 = vld [vmem:[#allocation2 + $0x508] sm:$0xff]  ;;  %v6563_v43 = vcombine.low %v385_v31, %v401_v32 }
  0x37   : > { %v433_v40 = vld [vmem:[#allocation2 + $0x580] sm:$0xff]  ;;  %v434_v42 = vld [vmem:[#allocation2 + $0x588] sm:$0xff]  ;;  %v6565_v44 = vcombine.low %v386_v33, %v402_v34 }
  0x38   : > { %v6596_v45 = vcombine.high %v417_v39, %v433_v40  ;;  %v6598_v46 = vcombine.high %v418_v41, %v434_v42  ;;  %v449_v47 = vld [vmem:[#allocation2 + $0x600] sm:$0xff]  ;;  %v450_v49 = vld [vmem:[#allocation2 + $0x608] sm:$0xff]  ;;  %v6595_v51 = vcombine.low %v417_v39, %v433_v40  ;;  %v6597_v52 = vcombine.low %v418_v41, %v434_v42 }
  0x39   : > { %3779 = vmatpush1.bf16.msra.mxu0 %v6499_v27  ;;  %3885 = vmatpush1.bf16.msra.mxu1 %v6501_v28  ;;  %v465_v48 = vld [vmem:[#allocation2 + $0x680] sm:$0xff]  ;;  %v466_v50 = vld [vmem:[#allocation2 + $0x688] sm:$0xff] }
  0x3a   : > { %3780 = vmatprep.subr.bf16.mxu0 %v6532_v29  ;;  %3886 = vmatprep.subr.bf16.mxu1 %v6534_v30  ;;  %v6628_v53 = vcombine.high %v449_v47, %v465_v48  ;;  %v6630_v54 = vcombine.high %v450_v49, %v466_v50  ;;  %v481_v55 = vld [vmem:[#allocation2 + $0x700] sm:$0xff]  ;;  %v482_v58 = vld [vmem:[#allocation2 + $0x708] sm:$0xff]  ;;  %v6627_v60 = vcombine.low %v449_v47, %v465_v48 }
  0x3b   : > { %v497_v56 = vld [vmem:[#allocation2 + $0x780] sm:$0xff]  ;;  %v498_v59 = vld [vmem:[#allocation2 + $0x788] sm:$0xff]  ;;  %v6629_v61 = vcombine.low %v450_v49, %v466_v50 }
  0x3c   : > { %v7648_v57 = vld [vmem:[%s7645_s11 + $0x4] ss:$12 sps:$4 sm:$0xff]   ;;  %v6660_v62 = vcombine.high %v481_v55, %v497_v56  ;;  %v6662_v63 = vcombine.high %v482_v58, %v498_v59  ;;  %v514_v3 = vld [vmem:[#allocation2 + $0x808] sm:$0xff]  ;;  %v6659_v5 = vcombine.low %v481_v55, %v497_v56  ;;  %v6661_v6 = vcombine.low %v482_v58, %v498_v59 }
  0x3d   : > { %3781 = vmatpush1.bf16.msra.mxu0 %v6531_v35  ;;  %3887 = vmatpush1.bf16.msra.mxu1 %v6533_v36  ;;  %v513_v1 = vld [vmem:[#allocation2 + $0x800] sm:$0xff]  ;;  %v530_v4 = vld [vmem:[#allocation2 + $0x888] sm:$0xff] }
  0x3e   : > { %3782 = vmatprep.subr.bf16.mxu0 %v6564_v37  ;;  %3888 = vmatprep.subr.bf16.mxu1 %v6566_v38  ;;  %v529_v2 = vld [vmem:[#allocation2 + $0x880] sm:$0xff]  ;;  %v6694_v8 = vcombine.high %v514_v3, %v530_v4  ;;  %v546_v11 = vld [vmem:[#allocation2 + $0x908] sm:$0xff]  ;;  %v6693_v14 = vcombine.low %v514_v3, %v530_v4  ;;  %v835_v4 = vld [vmem:[%s7656_s18 + $0x10] sm:$0xff] }
  0x3f   : > { %3806 = vmatprep.mubr.bf16.mxu0 %v7648_v57  ;;  %3912 = vmatprep.mubr.bf16.mxu1 %v7648_v57  ;;  %v6692_v7 = vcombine.high %v513_v1, %v529_v2  ;;  %v545_v9 = vld [vmem:[#allocation2 + $0x900] sm:$0xff]  ;;  %v562_v12 = vld [vmem:[#allocation2 + $0x988] sm:$0xff]  ;;  %v6691_v13 = vcombine.low %v513_v1, %v529_v2 }
  0x40   : > { %v561_v10 = vld [vmem:[#allocation2 + $0x980] sm:$0xff]  ;;  %v6726_v16 = vcombine.high %v546_v11, %v562_v12  ;;  %v578_v19 = vld [vmem:[#allocation2 + $0xa08] sm:$0xff]  ;;  %v6725_v22 = vcombine.low %v546_v11, %v562_v12  ;;  %849 = vperm.xlu1 %7470, %v835_v4  }
  0x41   : > { %3783 = vmatpush1.bf16.msra.mxu0 %v6563_v43  ;;  %3889 = vmatpush1.bf16.msra.mxu1 %v6565_v44  ;;  %v6724_v15 = vcombine.high %v545_v9, %v561_v10  ;;  %v577_v17 = vld [vmem:[#allocation2 + $0xa00] sm:$0xff]  ;;  %v594_v20 = vld [vmem:[#allocation2 + $0xa88] sm:$0xff]  ;;  %v6723_v21 = vcombine.low %v545_v9, %v561_v10  ;;  %v836_v10 = vld [vmem:[%s7656_s18 + $0x18] sm:$0xff] }
  0x42   : > { %3784 = vmatprep.subr.bf16.mxu0 %v6596_v45  ;;  %3890 = vmatprep.subr.bf16.mxu1 %v6598_v46  ;;  %v593_v18 = vld [vmem:[#allocation2 + $0xa80] sm:$0xff]  ;;  %v6758_v24 = vcombine.high %v578_v19, %v594_v20  ;;  %v610_v27 = vld [vmem:[#allocation2 + $0xb08] sm:$0xff]  ;;  %v6757_v30 = vcombine.low %v578_v19, %v594_v20 }
  0x43   : > { %v6756_v23 = vcombine.high %v577_v17, %v593_v18  ;;  %v609_v25 = vld [vmem:[#allocation2 + $0xb00] sm:$0xff]  ;;  %v626_v28 = vld [vmem:[#allocation2 + $0xb88] sm:$0xff]  ;;  %v6755_v29 = vcombine.low %v577_v17, %v593_v18 }
  0x44   : > { %v625_v26 = vld [vmem:[#allocation2 + $0xb80] sm:$0xff]  ;;  %v6790_v32 = vcombine.high %v610_v27, %v626_v28  ;;  %v642_v35 = vld [vmem:[#allocation2 + $0xc08] sm:$0xff]  ;;  %v6789_v38 = vcombine.low %v610_v27, %v626_v28  ;;  %854 = vperm.xlu1 %7470, %v836_v10   ;;  %v260_v27 = vld [vmem:[#allocation2 + $0x18] sm:$0xff] }
  0x45   : > { %3785 = vmatpush1.bf16.msra.mxu0 %v6595_v51  ;;  %3891 = vmatpush1.bf16.msra.mxu1 %v6597_v52  ;;  %v6788_v31 = vcombine.high %v609_v25, %v625_v26  ;;  %v641_v33 = vld [vmem:[#allocation2 + $0xc00] sm:$0xff]  ;;  %v658_v36 = vld [vmem:[#allocation2 + $0xc88] sm:$0xff]  ;;  %v6787_v37 = vcombine.low %v609_v25, %v625_v26  ;;  %v275_v25 = vld [vmem:[#allocation2 + $0x90] sm:$0xff] }
  0x46   : > { %3786 = vmatprep.subr.bf16.mxu0 %v6628_v53  ;;  %3892 = vmatprep.subr.bf16.mxu1 %v6630_v54  ;;  %v657_v34 = vld [vmem:[#allocation2 + $0xc80] sm:$0xff]  ;;  %v6822_v40 = vcombine.high %v642_v35, %v658_v36  ;;  %v674_v43 = vld [vmem:[#allocation2 + $0xd08] sm:$0xff]  ;;  %v6821_v46 = vcombine.low %v642_v35, %v658_v36  ;;  %v276_v28 = vld [vmem:[#allocation2 + $0x98] sm:$0xff] }
  0x47   : > { %v6820_v39 = vcombine.high %v641_v33, %v657_v34  ;;  %v673_v41 = vld [vmem:[#allocation2 + $0xd00] sm:$0xff]  ;;  %v690_v44 = vld [vmem:[#allocation2 + $0xd88] sm:$0xff]  ;;  %v6819_v45 = vcombine.low %v641_v33, %v657_v34  ;;  %v291_v34 = vld [vmem:[#allocation2 + $0x110] sm:$0xff] }
  0x48   : > { %v689_v42 = vld [vmem:[#allocation2 + $0xd80] sm:$0xff]  ;;  %v6854_v48 = vcombine.high %v674_v43, %v690_v44  ;;  %v706_v51 = vld [vmem:[#allocation2 + $0xe08] sm:$0xff]  ;;  %v6853_v54 = vcombine.low %v674_v43, %v690_v44  ;;  %v307_v35 = vld [vmem:[#allocation2 + $0x190] sm:$0xff] }
  0x49   : > { %3787 = vmatpush1.bf16.msra.mxu0 %v6627_v60  ;;  %3893 = vmatpush1.bf16.msra.mxu1 %v6629_v61  ;;  %v6852_v47 = vcombine.high %v673_v41, %v689_v42  ;;  %v705_v49 = vld [vmem:[#allocation2 + $0xe00] sm:$0xff]  ;;  %v722_v52 = vld [vmem:[#allocation2 + $0xe88] sm:$0xff]  ;;  %v6851_v53 = vcombine.low %v673_v41, %v689_v42  ;;  %v6472_v41 = vcombine.high %v291_v34, %v307_v35  ;;  %v323_v43 = vld [vmem:[#allocation2 + $0x210] sm:$0xff] }
  0x4a   : > { %3788 = vmatprep.subr.bf16.mxu0 %v6660_v62  ;;  %3894 = vmatprep.subr.bf16.mxu1 %v6662_v63  ;;  %v721_v50 = vld [vmem:[#allocation2 + $0xe80] sm:$0xff]  ;;  %v6886_v56 = vcombine.high %v706_v51, %v722_v52  ;;  %v738_v61 = vld [vmem:[#allocation2 + $0xf08] sm:$0xff]  ;;  %v6885_v2 = vcombine.low %v706_v51, %v722_v52  ;;  %v339_v44 = vld [vmem:[#allocation2 + $0x290] sm:$0xff] }
  0x4b   : > { %v6884_v55 = vcombine.high %v705_v49, %v721_v50  ;;  %v737_v58 = vld [vmem:[#allocation2 + $0xf00] sm:$0xff]  ;;  %v754_v62 = vld [vmem:[#allocation2 + $0xf88] sm:$0xff]  ;;  %v6883_v63 = vcombine.low %v705_v49, %v721_v50  ;;  %v6504_v49 = vcombine.high %v323_v43, %v339_v44  ;;  %v355_v51 = vld [vmem:[#allocation2 + $0x310] sm:$0xff] }
  0x4c   : > { %v753_v59 = vld [vmem:[#allocation2 + $0xf80] sm:$0xff]  ;;  %v834_v1 = vld [vmem:[%s7656_s18 + $0x8] sm:$0xff]  ;;  %v6917_v12 = vcombine.low %v738_v61, %v754_v62  ;;  %v371_v52 = vld [vmem:[#allocation2 + $0x390] sm:$0xff] }
  0x4d   : > { %3789 = vmatpush1.bf16.msra.mxu0 %v6659_v5  ;;  %3895 = vmatpush1.bf16.msra.mxu1 %v6661_v6  ;;  %v833_v60 = vld [vmem:[%s7656_s18] sm:$0xff]  ;;  %v6916_v3 = vcombine.high %v737_v58, %v753_v59  ;;  %v6918_v5 = vcombine.high %v738_v61, %v754_v62  ;;  %v786_v9 = vld [vmem:[#allocation2 + $0x1088] sm:$0xff]  ;;  %v6915_v11 = vcombine.low %v737_v58, %v753_v59  ;;  %v387_v61 = vld [vmem:[#allocation2 + $0x410] sm:$0xff] }
  0x4e   : > { %3790 = vmatprep.subr.bf16.mxu0 %v6692_v7  ;;  %3896 = vmatprep.subr.bf16.mxu1 %v6694_v8  ;;  %v769_v6 = vld [vmem:[#allocation2 + $0x1000] sm:$0xff]  ;;  %v770_v8 = vld [vmem:[#allocation2 + $0x1008] sm:$0xff]  ;;  %v6536_v59 = vcombine.high %v355_v51, %v371_v52  ;;  %v403_v62 = vld [vmem:[#allocation2 + $0x490] sm:$0xff] }
  0x4f   : > { %839 = vperm.xlu0 %7469, %v833_v60   ;;  %v785_v7 = vld [vmem:[#allocation2 + $0x1080] sm:$0xff]  ;;  %v802_v19 = vld [vmem:[#allocation2 + $0x1108] sm:$0xff]  ;;  %v6568_v4 = vcombine.high %v387_v61, %v403_v62  ;;  %v6567_v10 = vcombine.low %v387_v61, %v403_v62  ;;  %v627_v61 = vld [vmem:[#allocation2 + $0xb90] sm:$0xff] }
  0x50   : > { %v817_v17 = vld [vmem:[#allocation2 + $0x1180] sm:$0xff]  ;;  %v6947_v18 = vcombine.low %v769_v6, %v785_v7  ;;  %v818_v20 = vld [vmem:[#allocation2 + $0x1188] sm:$0xff]  ;;  %v612_v62 = vld [vmem:[#allocation2 + $0xb18] sm:$0xff] }
  0x51   : > { %3791 = vmatpush1.bf16.msra.mxu0 %v6691_v13  ;;  %3897 = vmatpush1.bf16.msra.mxu1 %v6693_v14  ;;  %v6948_v13 = vcombine.high %v769_v6, %v785_v7  ;;  %v6950_v14 = vcombine.high %v770_v8, %v786_v9  ;;  %v6982_v26 = vcombine.high %v802_v19, %v818_v20  ;;  %v7673_v33 = vld [vmem:[%s7645_s11 + $0x18] ss:$12 sps:$4 sm:$0xff]   ;;  %v7680_v36 = vld [vmem:[%s7645_s11 + $0x8] ss:$12 sps:$4 sm:$0xff]  }
  0x52   : > { %3792 = vmatprep.subr.bf16.mxu0 %v6724_v15  ;;  %3898 = vmatprep.subr.bf16.mxu1 %v6726_v16  ;;  %v7663_v15 = vld [vmem:[%s7645_s11] ss:$12 sps:$4 sm:$0xff]   ;;  %v419_v6 = vld [vmem:[#allocation2 + $0x510] sm:$0xff] }
  0x53   : > { %844 = vperm.xlu0 %7469, %v834_v1   ;;  %v801_v16 = vld [vmem:[#allocation2 + $0x1100] sm:$0xff]  ;;  %v404_v1 = vld [vmem:[#allocation2 + $0x498] sm:$0xff]  ;;  %v435_v7 = vld [vmem:[#allocation2 + $0x590] sm:$0xff] }
  0x55   : > { %3793 = vmatpush1.bf16.msra.mxu0 %v6723_v21  ;;  %3899 = vmatpush1.bf16.msra.mxu1 %v6725_v22  ;;  %v6949_v21 = vcombine.low %v770_v8, %v786_v9  ;;  %v7666_v22 = vld [vmem:[%s7645_s11 + $0x1c] ss:$12 sps:$4 sm:$0xff]  }
  0x56   : > { %3794 = vmatprep.subr.bf16.mxu0 %v6756_v23  ;;  %3900 = vmatprep.subr.bf16.mxu1 %v6758_v24  ;;  %v6980_v23 = vcombine.high %v801_v16, %v817_v17  ;;  %v259_v24 = vld [vmem:[#allocation2 + $0x10] sm:$0xff]  ;;  %v420_v8 = vld [vmem:[#allocation2 + $0x518] sm:$0xff] }
  0x57   : > { %v436_v9 = vld [vmem:[#allocation2 + $0x598] sm:$0xff] }
  0x59   : > { %3795 = vmatpush1.bf16.msra.mxu0 %v6755_v29  ;;  %3901 = vmatpush1.bf16.msra.mxu1 %v6757_v30  ;;  %v6979_v29 = vcombine.low %v801_v16, %v817_v17  ;;  %v6981_v30 = vcombine.low %v802_v19, %v818_v20  ;;  %v467_v16 = vld [vmem:[#allocation2 + $0x690] sm:$0xff]  ;;  %v452_v17 = vld [vmem:[#allocation2 + $0x618] sm:$0xff]  ;;  %v6599_v19 = vcombine.low %v419_v6, %v435_v7 }
  0x5a   : > { %3796 = vmatprep.subr.bf16.mxu0 %v6788_v31  ;;  %3902 = vmatprep.subr.bf16.mxu1 %v6790_v32  ;;  %v6440_v31 = vcombine.high %v259_v24, %v275_v25  ;;  %v6442_v32 = vcombine.high %v260_v27, %v276_v28  ;;  %v6601_v20 = vcombine.low %v420_v8, %v436_v9 }
  0x5d   : > { %3797 = vmatpush1.bf16.msra.mxu0 %v6787_v37  ;;  %3903 = vmatpush1.bf16.msra.mxu1 %v6789_v38  ;;  %v292_v37 = vld [vmem:[#allocation2 + $0x118] sm:$0xff] }
  0x5e   : > { %3798 = vmatprep.subr.bf16.mxu0 %v6820_v39  ;;  %3904 = vmatprep.subr.bf16.mxu1 %v6822_v40  ;;  %v308_v38 = vld [vmem:[#allocation2 + $0x198] sm:$0xff]  ;;  %v6439_v39 = vcombine.low %v259_v24, %v275_v25  ;;  %v6441_v40 = vcombine.low %v260_v27, %v276_v28  ;;  %v483_v24 = vld [vmem:[#allocation2 + $0x710] sm:$0xff] }
  0x5f   : > { %v6474_v42 = vcombine.high %v292_v37, %v308_v38  ;;  %v499_v25 = vld [vmem:[#allocation2 + $0x790] sm:$0xff]  ;;  %v500_v27 = vld [vmem:[#allocation2 + $0x798] sm:$0xff] }
  0x61   : > { %3799 = vmatpush1.bf16.msra.mxu0 %v6819_v45  ;;  %3905 = vmatpush1.bf16.msra.mxu1 %v6821_v46  ;;  %v324_v45 = vld [vmem:[#allocation2 + $0x218] sm:$0xff] }
  0x62   : > { %3800 = vmatprep.subr.bf16.mxu0 %v6852_v47  ;;  %3906 = vmatprep.subr.bf16.mxu1 %v6854_v48  ;;  %v340_v46 = vld [vmem:[#allocation2 + $0x298] sm:$0xff]  ;;  %v6471_v47 = vcombine.low %v291_v34, %v307_v35  ;;  %v6473_v48 = vcombine.low %v292_v37, %v308_v38  ;;  %v531_v34 = vld [vmem:[#allocation2 + $0x890] sm:$0xff]  ;;  %v6663_v38 = vcombine.low %v483_v24, %v499_v25 }
  0x63   : > { %v6506_v50 = vcombine.high %v324_v45, %v340_v46  ;;  %v6505_v58 = vcombine.low %v324_v45, %v340_v46  ;;  %v516_v35 = vld [vmem:[#allocation2 + $0x818] sm:$0xff] }
  0x64   : > { %v532_v37 = vld [vmem:[#allocation2 + $0x898] sm:$0xff] }
  0x65   : > { %3801 = vmatpush1.bf16.msra.mxu0 %v6851_v53  ;;  %3907 = vmatpush1.bf16.msra.mxu1 %v6853_v54  ;;  %v7689_v53 = vld [vmem:[%s7645_s11 + $0x20] ss:$12 sps:$4 sm:$0xff]   ;;  %v356_v54 = vld [vmem:[#allocation2 + $0x318] sm:$0xff] }
  0x66   : > { %3802 = vmatprep.subr.bf16.mxu0 %v6884_v55  ;;  %3908 = vmatprep.subr.bf16.mxu1 %v6886_v56  ;;  %v372_v55 = vld [vmem:[#allocation2 + $0x398] sm:$0xff]  ;;  %v6503_v56 = vcombine.low %v323_v43, %v339_v44  ;;  %v563_v43 = vld [vmem:[#allocation2 + $0x990] sm:$0xff] }
  0x67   : > { %v6538_v60 = vcombine.high %v356_v54, %v372_v55  ;;  %v548_v44 = vld [vmem:[#allocation2 + $0x918] sm:$0xff] }
  0x68   : > { %v564_v45 = vld [vmem:[#allocation2 + $0x998] sm:$0xff] }
  0x69   : > { %3803 = vmatpush1.bf16.msra.mxu0 %v6883_v63  ;;  %3909 = vmatpush1.bf16.msra.mxu1 %v6885_v2  ;;  %v388_v63 = vld [vmem:[#allocation2 + $0x418] sm:$0xff]  ;;  %v6535_v2 = vcombine.low %v355_v51, %v371_v52  ;;  %v595_v51 = vld [vmem:[#allocation2 + $0xa90] sm:$0xff] }
  0x6a   : > { %3804 = vmatprep.subr.bf16.mxu0 %v6916_v3  ;;  %3910 = vmatprep.subr.bf16.mxu1 %v6918_v5  ;;  %v6537_v3 = vcombine.low %v356_v54, %v372_v55  ;;  %v6570_v5 = vcombine.high %v388_v63, %v404_v1  ;;  %v580_v52 = vld [vmem:[#allocation2 + $0xa18] sm:$0xff] }
  0x6b   : > { %v596_v54 = vld [vmem:[#allocation2 + $0xa98] sm:$0xff] }
  0x6d   : > { %3805 = vmatpush1.bf16.msra.mxu0 %v6915_v11  ;;  %3911 = vmatpush1.bf16.msra.mxu1 %v6917_v12  ;;  %v6569_v11 = vcombine.low %v388_v63, %v404_v1  ;;  %v6600_v12 = vcombine.high %v419_v6, %v435_v7  ;;  %v628_v63 = vld [vmem:[#allocation2 + $0xb98] sm:$0xff]  ;;  %v659_v6 = vld [vmem:[#allocation2 + $0xc90] sm:$0xff] }
  0x6e   : > { %3827 = vmatprep.subr.bf16.mxu0 %v6948_v13  ;;  %3933 = vmatprep.subr.bf16.mxu1 %v6950_v14  ;;  %v6602_v13 = vcombine.high %v420_v8, %v436_v9  ;;  %v451_v14 = vld [vmem:[#allocation2 + $0x610] sm:$0xff]  ;;  %v644_v7 = vld [vmem:[#allocation2 + $0xc18] sm:$0xff] }
  0x6f   : > { %v6631_v28 = vcombine.low %v451_v14, %v467_v16  ;;  %v660_v8 = vld [vmem:[#allocation2 + $0xc98] sm:$0xff] }
  0x70   : > { %3807 = vmatmul.mubr.bf16.vlgmr.msra.gmra.mrb[0].mxu0 %v7663_v15  ;;  %3913 = vmatmul.mubr.bf16.vlgmr.msra.gmra.mrb[0].mxu1 %v7663_v15 }
  0x71   : > { %3828 = vmatpush1.bf16.msra.mxu0 %v6947_v18  ;;  %3934 = vmatpush1.bf16.msra.mxu1 %v6949_v21  ;;  %v468_v18 = vld [vmem:[#allocation2 + $0x698] sm:$0xff]  ;;  %v6632_v21 = vcombine.high %v451_v14, %v467_v16  ;;  %v691_v14 = vld [vmem:[#allocation2 + $0xd90] sm:$0xff] }
  0x72   : > { %3816 = vmatprep.mubr.bf16.mxu0 %v7666_v22  ;;  %3922 = vmatprep.mubr.bf16.mxu1 %v7666_v22  ;;  %v676_v16 = vld [vmem:[#allocation2 + $0xd18] sm:$0xff] }
  0x73   : > { %3829 = vmatprep.subr.bf16.mxu0 %v6980_v23  ;;  %3935 = vmatprep.subr.bf16.mxu1 %v6982_v26  ;;  %v6634_v23 = vcombine.high %v452_v17, %v468_v18  ;;  %v484_v26 = vld [vmem:[#allocation2 + $0x718] sm:$0xff] }
  0x75   : > { %3830 = vmatpush1.bf16.msra.mxu0 %v6979_v29  ;;  %3936 = vmatpush1.bf16.msra.mxu1 %v6981_v30  ;;  %v6633_v29 = vcombine.low %v452_v17, %v468_v18  ;;  %v6664_v30 = vcombine.high %v483_v24, %v499_v25  ;;  %v692_v17 = vld [vmem:[#allocation2 + $0xd98] sm:$0xff]  ;;  %v723_v24 = vld [vmem:[#allocation2 + $0xe90] sm:$0xff] }
  0x76   : > { %3986 = vmatprep.subr.bf16.mxu0 %v6440_v31  ;;  %4092 = vmatprep.subr.bf16.mxu1 %v6442_v32  ;;  %v6666_v31 = vcombine.high %v484_v26, %v500_v27  ;;  %v515_v32 = vld [vmem:[#allocation2 + $0x810] sm:$0xff]  ;;  %v708_v25 = vld [vmem:[#allocation2 + $0xe18] sm:$0xff] }
  0x77   : > { %v6695_v46 = vcombine.low %v515_v32, %v531_v34 }
  0x78   : > { %3817 = vmatmul.mubr.bf16.gmra.mrb[4].mxu0 %v7673_v33  ;;  %3923 = vmatmul.mubr.bf16.gmra.mrb[4].mxu1 %v7673_v33 }
  0x79   : > { %3859 = vmatprep.mubr.bf16.mxu0 %v7556_v0  ;;  %3965 = vmatprep.mubr.bf16.mxu1 %v7556_v0 }
  0x80   : > { %7011 = vmatmul.mubr.msk.bf16.vlgmr.msra.gmra.mrb[0].mxu0 %vm3767_vm0, %v7680_v36  ;;  %7013 = vmatmul.mubr.msk.bf16.vlgmr.msra.gmra.mrb[0].mxu1 %vm3767_vm0, %v7680_v36 }
  0x81   : > { %3987 = vmatpush1.bf16.msra.mxu0 %v6439_v39  ;;  %4093 = vmatpush1.bf16.msra.mxu1 %v6441_v40  ;;  %v6665_v39 = vcombine.low %v484_v26, %v500_v27  ;;  %v6696_v40 = vcombine.high %v515_v32, %v531_v34  ;;  %v724_v26 = vld [vmem:[#allocation2 + $0xe98] sm:$0xff]  ;;  %v755_v32 = vld [vmem:[#allocation2 + $0xf90] sm:$0xff] }
  0x82   : > { %3988 = vmatprep.subr.bf16.mxu0 %v6472_v41  ;;  %4094 = vmatprep.subr.bf16.mxu1 %v6474_v42  ;;  %v6698_v41 = vcombine.high %v516_v35, %v532_v37  ;;  %v547_v42 = vld [vmem:[#allocation2 + $0x910] sm:$0xff]  ;;  %v740_v34 = vld [vmem:[#allocation2 + $0xf18] sm:$0xff] }
  0x83   : > { %3869 = vmatprep.mubr.bf16.mxu0 %v7556_v0  ;;  %3975 = vmatprep.mubr.bf16.mxu1 %v7556_v0  ;;  %v6727_v55 = vcombine.low %v547_v42, %v563_v43 }
  0x85   : > { %3989 = vmatpush1.bf16.msra.mxu0 %v6471_v47  ;;  %4095 = vmatpush1.bf16.msra.mxu1 %v6473_v48  ;;  %v6697_v47 = vcombine.low %v516_v35, %v532_v37  ;;  %v6728_v48 = vcombine.high %v547_v42, %v563_v43  ;;  %v756_v35 = vld [vmem:[#allocation2 + $0xf98] sm:$0xff]  ;;  %v787_v42 = vld [vmem:[#allocation2 + $0x1090] sm:$0xff] }
  0x86   : > { %3990 = vmatprep.subr.bf16.mxu0 %v6504_v49  ;;  %4096 = vmatprep.subr.bf16.mxu1 %v6506_v50  ;;  %v6730_v49 = vcombine.high %v548_v44, %v564_v45  ;;  %v579_v50 = vld [vmem:[#allocation2 + $0xa10] sm:$0xff]  ;;  %v772_v43 = vld [vmem:[#allocation2 + $0x1018] sm:$0xff] }
  0x87   : > { %v6759_v1 = vcombine.low %v579_v50, %v595_v51 }
  0x88   : > { %7012 = vmatmul.mubr.msk.bf16.gmra.mrb[4].mxu0 %vm3767_vm0, %v7689_v53  ;;  %7014 = vmatmul.mubr.msk.bf16.gmra.mrb[4].mxu1 %vm3767_vm0, %v7689_v53 }
  0x89   : > { %3991 = vmatpush1.bf16.msra.mxu0 %v6503_v56  ;;  %4097 = vmatpush1.bf16.msra.mxu1 %v6505_v58  ;;  %v6729_v56 = vcombine.low %v548_v44, %v564_v45  ;;  %v6760_v58 = vcombine.high %v579_v50, %v595_v51  ;;  %v788_v44 = vld [vmem:[#allocation2 + $0x1098] sm:$0xff]  ;;  %v819_v50 = vld [vmem:[#allocation2 + $0x1190] sm:$0xff] }
  0x8a   : > { %3992 = vmatprep.subr.bf16.mxu0 %v6536_v59  ;;  %4098 = vmatprep.subr.bf16.mxu1 %v6538_v60  ;;  %v6762_v59 = vcombine.high %v580_v52, %v596_v54  ;;  %v611_v60 = vld [vmem:[#allocation2 + $0xb10] sm:$0xff] }
  0x8b   : > { %4018 = vmatprep.mubr.bf16.mxu0 %v7648_v57  ;;  %4124 = vmatprep.mubr.bf16.mxu1 %v7648_v57  ;;  %v6791_v9 = vcombine.low %v611_v60, %v627_v61 }
  0x8d   : > { %3993 = vmatpush1.bf16.msra.mxu0 %v6535_v2  ;;  %4099 = vmatpush1.bf16.msra.mxu1 %v6537_v3  ;;  %v6761_v2 = vcombine.low %v580_v52, %v596_v54  ;;  %v6792_v3 = vcombine.high %v611_v60, %v627_v61  ;;  %v804_v52 = vld [vmem:[#allocation2 + $0x1118] sm:$0xff]  ;;  %v262_v61 = vld [vmem:[#allocation2 + $0x28] sm:$0xff] }
  0x8e   : > { %3994 = vmatprep.subr.bf16.mxu0 %v6568_v4  ;;  %4100 = vmatprep.subr.bf16.mxu1 %v6570_v5  ;;  %v6794_v4 = vcombine.high %v612_v62, %v628_v63  ;;  %v643_v5 = vld [vmem:[#allocation2 + $0xc10] sm:$0xff]  ;;  %v820_v54 = vld [vmem:[#allocation2 + $0x1198] sm:$0xff] }
  0x8f   : > { %v6823_v18 = vcombine.low %v643_v5, %v659_v6  ;;  %v6986_v60 = vcombine.high %v804_v52, %v820_v54 }
  0x91   : > { %3995 = vmatpush1.bf16.msra.mxu0 %v6567_v10  ;;  %4101 = vmatpush1.bf16.msra.mxu1 %v6569_v11  ;;  %v6793_v10 = vcombine.low %v612_v62, %v628_v63  ;;  %v6824_v11 = vcombine.high %v643_v5, %v659_v6  ;;  %v278_v62 = vld [vmem:[#allocation2 + $0xa8] sm:$0xff]  ;;  %v309_v5 = vld [vmem:[#allocation2 + $0x1a0] sm:$0xff] }
  0x92   : > { %3996 = vmatprep.subr.bf16.mxu0 %v6600_v12  ;;  %4102 = vmatprep.subr.bf16.mxu1 %v6602_v13  ;;  %v6826_v12 = vcombine.high %v644_v7, %v660_v8  ;;  %v675_v13 = vld [vmem:[#allocation2 + $0xd10] sm:$0xff]  ;;  %v294_v6 = vld [vmem:[#allocation2 + $0x128] sm:$0xff] }
  0x93   : > { %v6855_v27 = vcombine.low %v675_v13, %v691_v14 }
  0x95   : > { %3997 = vmatpush1.bf16.msra.mxu0 %v6599_v19  ;;  %4103 = vmatpush1.bf16.msra.mxu1 %v6601_v20  ;;  %v6825_v19 = vcombine.low %v644_v7, %v660_v8  ;;  %v6856_v20 = vcombine.high %v675_v13, %v691_v14  ;;  %v310_v7 = vld [vmem:[#allocation2 + $0x1a8] sm:$0xff]  ;;  %v341_v13 = vld [vmem:[#allocation2 + $0x2a0] sm:$0xff] }
  0x96   : > { %3998 = vmatprep.subr.bf16.mxu0 %v6632_v21  ;;  %4104 = vmatprep.subr.bf16.mxu1 %v6634_v23  ;;  %v6858_v21 = vcombine.high %v676_v16, %v692_v17  ;;  %v707_v23 = vld [vmem:[#allocation2 + $0xe10] sm:$0xff]  ;;  %v326_v14 = vld [vmem:[#allocation2 + $0x228] sm:$0xff] }
  0x97   : > { %v6887_v37 = vcombine.low %v707_v23, %v723_v24 }
  0x99   : > { %3999 = vmatpush1.bf16.msra.mxu0 %v6631_v28  ;;  %4105 = vmatpush1.bf16.msra.mxu1 %v6633_v29  ;;  %v6857_v28 = vcombine.low %v676_v16, %v692_v17  ;;  %v6888_v29 = vcombine.high %v707_v23, %v723_v24  ;;  %v342_v16 = vld [vmem:[#allocation2 + $0x2a8] sm:$0xff]  ;;  %v373_v23 = vld [vmem:[#allocation2 + $0x3a0] sm:$0xff] }
  0x9a   : > { %4000 = vmatprep.subr.bf16.mxu0 %v6664_v30  ;;  %4106 = vmatprep.subr.bf16.mxu1 %v6666_v31  ;;  %v6890_v30 = vcombine.high %v708_v25, %v724_v26  ;;  %v739_v31 = vld [vmem:[#allocation2 + $0xf10] sm:$0xff]  ;;  %v358_v24 = vld [vmem:[#allocation2 + $0x328] sm:$0xff] }
  0x9b   : > { %v6919_v45 = vcombine.low %v739_v31, %v755_v32 }
  0x9d   : > { %4001 = vmatpush1.bf16.msra.mxu0 %v6663_v38  ;;  %4107 = vmatpush1.bf16.msra.mxu1 %v6665_v39  ;;  %v6889_v38 = vcombine.low %v708_v25, %v724_v26  ;;  %v6920_v39 = vcombine.high %v739_v31, %v755_v32  ;;  %v374_v25 = vld [vmem:[#allocation2 + $0x3a8] sm:$0xff]  ;;  %v405_v31 = vld [vmem:[#allocation2 + $0x4a0] sm:$0xff] }
  0x9e   : > { %4002 = vmatprep.subr.bf16.mxu0 %v6696_v40  ;;  %4108 = vmatprep.subr.bf16.mxu1 %v6698_v41  ;;  %v6922_v40 = vcombine.high %v740_v34, %v756_v35  ;;  %v771_v41 = vld [vmem:[#allocation2 + $0x1010] sm:$0xff]  ;;  %v390_v32 = vld [vmem:[#allocation2 + $0x428] sm:$0xff] }
  0x9f   : > { %v6951_v51 = vcombine.low %v771_v41, %v787_v42 }
  0xa1   : > { %4003 = vmatpush1.bf16.msra.mxu0 %v6695_v46  ;;  %4109 = vmatpush1.bf16.msra.mxu1 %v6697_v47  ;;  %v6921_v46 = vcombine.low %v740_v34, %v756_v35  ;;  %v6952_v47 = vcombine.high %v771_v41, %v787_v42  ;;  %v406_v34 = vld [vmem:[#allocation2 + $0x4a8] sm:$0xff]  ;;  %v437_v41 = vld [vmem:[#allocation2 + $0x5a0] sm:$0xff] }
  0xa2   : > { %4004 = vmatprep.subr.bf16.mxu0 %v6728_v48  ;;  %4110 = vmatprep.subr.bf16.mxu1 %v6730_v49  ;;  %v6954_v48 = vcombine.high %v772_v43, %v788_v44  ;;  %v803_v49 = vld [vmem:[#allocation2 + $0x1110] sm:$0xff]  ;;  %v422_v42 = vld [vmem:[#allocation2 + $0x528] sm:$0xff] }
  0xa3   : > { %v6983_v63 = vcombine.low %v803_v49, %v819_v50 }
  0xa5   : > { %4005 = vmatpush1.bf16.msra.mxu0 %v6727_v55  ;;  %4111 = vmatpush1.bf16.msra.mxu1 %v6729_v56  ;;  %v6953_v55 = vcombine.low %v772_v43, %v788_v44  ;;  %v6984_v56 = vcombine.high %v803_v49, %v819_v50  ;;  %v438_v43 = vld [vmem:[#allocation2 + $0x5a8] sm:$0xff]  ;;  %v469_v49 = vld [vmem:[#allocation2 + $0x6a0] sm:$0xff] }
  0xa6   : > { %4006 = vmatprep.subr.bf16.mxu0 %v6760_v58  ;;  %4112 = vmatprep.subr.bf16.mxu1 %v6762_v59  ;;  %v261_v58 = vld [vmem:[#allocation2 + $0x20] sm:$0xff]  ;;  %v454_v50 = vld [vmem:[#allocation2 + $0x628] sm:$0xff] }
  0xa7   : > { %v277_v59 = vld [vmem:[#allocation2 + $0xa0] sm:$0xff] }
  0xa8   : > { %v6443_v8 = vcombine.low %v261_v58, %v277_v59 }
  0xa9   : > { %4007 = vmatpush1.bf16.msra.mxu0 %v6759_v1  ;;  %4113 = vmatpush1.bf16.msra.mxu1 %v6761_v2  ;;  %v6985_v1 = vcombine.low %v804_v52, %v820_v54  ;;  %v6444_v2 = vcombine.high %v261_v58, %v277_v59  ;;  %v6605_v54 = vcombine.low %v422_v42, %v438_v43  ;;  %v501_v58 = vld [vmem:[#allocation2 + $0x7a0] sm:$0xff]  ;;  %v486_v59 = vld [vmem:[#allocation2 + $0x728] sm:$0xff] }
  0xaa   : > { %4008 = vmatprep.subr.bf16.mxu0 %v6792_v3  ;;  %4114 = vmatprep.subr.bf16.mxu1 %v6794_v4  ;;  %v6446_v3 = vcombine.high %v262_v61, %v278_v62  ;;  %v293_v4 = vld [vmem:[#allocation2 + $0x120] sm:$0xff] }
  0xab   : > { %v6475_v17 = vcombine.low %v293_v4, %v309_v5 }
  0xad   : > { %4009 = vmatpush1.bf16.msra.mxu0 %v6791_v9  ;;  %4115 = vmatpush1.bf16.msra.mxu1 %v6793_v10  ;;  %v6445_v9 = vcombine.low %v262_v61, %v278_v62  ;;  %v6476_v10 = vcombine.high %v293_v4, %v309_v5  ;;  %v518_v4 = vld [vmem:[#allocation2 + $0x828] sm:$0xff] }
  0xae   : > { %4010 = vmatprep.subr.bf16.mxu0 %v6824_v11  ;;  %4116 = vmatprep.subr.bf16.mxu1 %v6826_v12  ;;  %v6478_v11 = vcombine.high %v294_v6, %v310_v7  ;;  %v325_v12 = vld [vmem:[#allocation2 + $0x220] sm:$0xff]  ;;  %v534_v5 = vld [vmem:[#allocation2 + $0x8a8] sm:$0xff] }
  0xaf   : > { %v6507_v26 = vcombine.low %v325_v12, %v341_v13 }
  0xb1   : > { %4011 = vmatpush1.bf16.msra.mxu0 %v6823_v18  ;;  %4117 = vmatpush1.bf16.msra.mxu1 %v6825_v19  ;;  %v6477_v18 = vcombine.low %v294_v6, %v310_v7  ;;  %v6508_v19 = vcombine.high %v325_v12, %v341_v13  ;;  %v550_v12 = vld [vmem:[#allocation2 + $0x928] sm:$0xff] }
  0xb2   : > { %4012 = vmatprep.subr.bf16.mxu0 %v6856_v20  ;;  %4118 = vmatprep.subr.bf16.mxu1 %v6858_v21  ;;  %v6510_v20 = vcombine.high %v326_v14, %v342_v16  ;;  %v357_v21 = vld [vmem:[#allocation2 + $0x320] sm:$0xff]  ;;  %v566_v13 = vld [vmem:[#allocation2 + $0x9a8] sm:$0xff] }
  0xb3   : > { %v6539_v35 = vcombine.low %v357_v21, %v373_v23 }
  0xb5   : > { %4013 = vmatpush1.bf16.msra.mxu0 %v6855_v27  ;;  %4119 = vmatpush1.bf16.msra.mxu1 %v6857_v28  ;;  %v6509_v27 = vcombine.low %v326_v14, %v342_v16  ;;  %v6540_v28 = vcombine.high %v357_v21, %v373_v23  ;;  %v6701_v16 = vcombine.low %v518_v4, %v534_v5  ;;  %v582_v21 = vld [vmem:[#allocation2 + $0xa28] sm:$0xff] }
  0xb6   : > { %4014 = vmatprep.subr.bf16.mxu0 %v6888_v29  ;;  %4120 = vmatprep.subr.bf16.mxu1 %v6890_v30  ;;  %v6542_v29 = vcombine.high %v358_v24, %v374_v25  ;;  %v389_v30 = vld [vmem:[#allocation2 + $0x420] sm:$0xff]  ;;  %v598_v23 = vld [vmem:[#allocation2 + $0xaa8] sm:$0xff] }
  0xb7   : > { %v6571_v44 = vcombine.low %v389_v30, %v405_v31 }
  0xb9   : > { %4015 = vmatpush1.bf16.msra.mxu0 %v6887_v37  ;;  %4121 = vmatpush1.bf16.msra.mxu1 %v6889_v38  ;;  %v6541_v37 = vcombine.low %v358_v24, %v374_v25  ;;  %v6572_v38 = vcombine.high %v389_v30, %v405_v31  ;;  %v6733_v25 = vcombine.low %v550_v12, %v566_v13  ;;  %v614_v30 = vld [vmem:[#allocation2 + $0xb28] sm:$0xff] }
  0xba   : > { %4016 = vmatprep.subr.bf16.mxu0 %v6920_v39  ;;  %4122 = vmatprep.subr.bf16.mxu1 %v6922_v40  ;;  %v6574_v39 = vcombine.high %v390_v32, %v406_v34  ;;  %v421_v40 = vld [vmem:[#allocation2 + $0x520] sm:$0xff]  ;;  %v630_v31 = vld [vmem:[#allocation2 + $0xba8] sm:$0xff] }
  0xbb   : > { %v6603_v52 = vcombine.low %v421_v40, %v437_v41 }
  0xbd   : > { %4017 = vmatpush1.bf16.msra.mxu0 %v6919_v45  ;;  %4123 = vmatpush1.bf16.msra.mxu1 %v6921_v46  ;;  %v6573_v45 = vcombine.low %v390_v32, %v406_v34  ;;  %v6604_v46 = vcombine.high %v421_v40, %v437_v41  ;;  %v6765_v34 = vcombine.low %v582_v21, %v598_v23  ;;  %v646_v40 = vld [vmem:[#allocation2 + $0xc28] sm:$0xff] }
  0xbe   : > { %4039 = vmatprep.subr.bf16.mxu0 %v6952_v47  ;;  %4145 = vmatprep.subr.bf16.mxu1 %v6954_v48  ;;  %v6606_v47 = vcombine.high %v422_v42, %v438_v43  ;;  %v453_v48 = vld [vmem:[#allocation2 + $0x620] sm:$0xff]  ;;  %v662_v41 = vld [vmem:[#allocation2 + $0xca8] sm:$0xff]  ;;  %v6797_v43 = vcombine.low %v614_v30, %v630_v31 }
  0xbf   : > { %v6635_v61 = vcombine.low %v453_v48, %v469_v49 }
  0xc0   : > { %4019 = vmatmul.mubr.bf16.vlgmr.msra.gmra.mrb[8].mxu0 %v7663_v15  ;;  %4125 = vmatmul.mubr.bf16.vlgmr.msra.gmra.mrb[8].mxu1 %v7663_v15 }
  0xc1   : > { %4040 = vmatpush1.bf16.msra.mxu0 %v6951_v51  ;;  %4146 = vmatpush1.bf16.msra.mxu1 %v6953_v55  ;;  %v470_v51 = vld [vmem:[#allocation2 + $0x6a8] sm:$0xff]  ;;  %v6636_v55 = vcombine.high %v453_v48, %v469_v49 }
  0xc2   : > { %4028 = vmatprep.mubr.bf16.mxu0 %v7666_v22  ;;  %4134 = vmatprep.mubr.bf16.mxu1 %v7666_v22  ;;  %v6637_v62 = vcombine.low %v454_v50, %v470_v51  ;;  %v678_v48 = vld [vmem:[#allocation2 + $0xd28] sm:$0xff] }
  0xc3   : > { %4041 = vmatprep.subr.bf16.mxu0 %v6984_v56  ;;  %4147 = vmatprep.subr.bf16.mxu1 %v6986_v60  ;;  %v485_v56 = vld [vmem:[#allocation2 + $0x720] sm:$0xff]  ;;  %v502_v60 = vld [vmem:[#allocation2 + $0x7a8] sm:$0xff] }
  0xc4   : > { %v6667_v6 = vcombine.low %v485_v56, %v501_v58  ;;  %v6669_v7 = vcombine.low %v486_v59, %v502_v60  ;;  %v694_v49 = vld [vmem:[#allocation2 + $0xda8] sm:$0xff] }
  0xc5   : > { %4042 = vmatpush1.bf16.msra.mxu0 %v6983_v63  ;;  %4148 = vmatpush1.bf16.msra.mxu1 %v6985_v1  ;;  %v6668_v63 = vcombine.high %v485_v56, %v501_v58  ;;  %v6670_v1 = vcombine.high %v486_v59, %v502_v60  ;;  %v710_v56 = vld [vmem:[#allocation2 + $0xe28] sm:$0xff]  ;;  %v6861_v60 = vcombine.low %v678_v48, %v694_v49 }
  0xc6   : > { %4198 = vmatprep.subr.bf16.mxu0 %v6444_v2  ;;  %4304 = vmatprep.subr.bf16.mxu1 %v6446_v3  ;;  %v517_v2 = vld [vmem:[#allocation2 + $0x820] sm:$0xff]  ;;  %v726_v58 = vld [vmem:[#allocation2 + $0xea8] sm:$0xff] }
  0xc7   : > { %v533_v3 = vld [vmem:[#allocation2 + $0x8a0] sm:$0xff] }
  0xc8   : > { %4029 = vmatmul.mubr.bf16.gmra.mrb[12].mxu0 %v7673_v33  ;;  %4135 = vmatmul.mubr.bf16.gmra.mrb[12].mxu1 %v7673_v33  ;;  %v6699_v14 = vcombine.low %v517_v2, %v533_v3 }
  0xc9   : > { %4071 = vmatprep.mubr.bf16.mxu0 %v7556_v0  ;;  %4177 = vmatprep.mubr.bf16.mxu1 %v7556_v0 }
  0xd0   : > { %7015 = vmatmul.mubr.msk.bf16.vlgmr.msra.gmra.mrb[8].mxu0 %vm3767_vm0, %v7680_v36  ;;  %7017 = vmatmul.mubr.msk.bf16.vlgmr.msra.gmra.mrb[8].mxu1 %vm3767_vm0, %v7680_v36 }
  0xd1   : > { %4199 = vmatpush1.bf16.msra.mxu0 %v6443_v8  ;;  %4305 = vmatpush1.bf16.msra.mxu1 %v6445_v9  ;;  %v6700_v8 = vcombine.high %v517_v2, %v533_v3  ;;  %v6702_v9 = vcombine.high %v518_v4, %v534_v5  ;;  %v742_v2 = vld [vmem:[#allocation2 + $0xf28] sm:$0xff]  ;;  %v6893_v5 = vcombine.low %v710_v56, %v726_v58 }
  0xd2   : > { %4200 = vmatprep.subr.bf16.mxu0 %v6476_v10  ;;  %4306 = vmatprep.subr.bf16.mxu1 %v6478_v11  ;;  %v549_v10 = vld [vmem:[#allocation2 + $0x920] sm:$0xff]  ;;  %v758_v3 = vld [vmem:[#allocation2 + $0xfa8] sm:$0xff] }
  0xd3   : > { %4081 = vmatprep.mubr.bf16.mxu0 %v7556_v0  ;;  %4187 = vmatprep.mubr.bf16.mxu1 %v7556_v0  ;;  %v565_v11 = vld [vmem:[#allocation2 + $0x9a0] sm:$0xff] }
  0xd4   : > { %v6731_v24 = vcombine.low %v549_v10, %v565_v11 }
  0xd5   : > { %4201 = vmatpush1.bf16.msra.mxu0 %v6475_v17  ;;  %4307 = vmatpush1.bf16.msra.mxu1 %v6477_v18  ;;  %v6732_v17 = vcombine.high %v549_v10, %v565_v11  ;;  %v6734_v18 = vcombine.high %v550_v12, %v566_v13  ;;  %v774_v10 = vld [vmem:[#allocation2 + $0x1028] sm:$0xff]  ;;  %v6925_v13 = vcombine.low %v742_v2, %v758_v3 }
  0xd6   : > { %4202 = vmatprep.subr.bf16.mxu0 %v6508_v19  ;;  %4308 = vmatprep.subr.bf16.mxu1 %v6510_v20  ;;  %v581_v19 = vld [vmem:[#allocation2 + $0xa20] sm:$0xff]  ;;  %v790_v11 = vld [vmem:[#allocation2 + $0x10a8] sm:$0xff] }
  0xd7   : > { %v597_v20 = vld [vmem:[#allocation2 + $0xaa0] sm:$0xff] }
  0xd8   : > { %7016 = vmatmul.mubr.msk.bf16.gmra.mrb[12].mxu0 %vm3767_vm0, %v7689_v53  ;;  %7018 = vmatmul.mubr.msk.bf16.gmra.mrb[12].mxu1 %vm3767_vm0, %v7689_v53  ;;  %v6763_v32 = vcombine.low %v581_v19, %v597_v20 }
  0xd9   : > { %4203 = vmatpush1.bf16.msra.mxu0 %v6507_v26  ;;  %4309 = vmatpush1.bf16.msra.mxu1 %v6509_v27  ;;  %v6764_v26 = vcombine.high %v581_v19, %v597_v20  ;;  %v6766_v27 = vcombine.high %v582_v21, %v598_v23  ;;  %v806_v20 = vld [vmem:[#allocation2 + $0x1128] sm:$0xff]  ;;  %v6957_v23 = vcombine.low %v774_v10, %v790_v11 }
  0xda   : > { %4204 = vmatprep.subr.bf16.mxu0 %v6540_v28  ;;  %4310 = vmatprep.subr.bf16.mxu1 %v6542_v29  ;;  %v613_v28 = vld [vmem:[#allocation2 + $0xb20] sm:$0xff]  ;;  %v822_v21 = vld [vmem:[#allocation2 + $0x11a8] sm:$0xff] }
  0xdb   : > { %4230 = vmatprep.mubr.bf16.mxu0 %v7648_v57  ;;  %4336 = vmatprep.mubr.bf16.mxu1 %v7648_v57  ;;  %v6638_v57 = vcombine.high %v454_v50, %v470_v51  ;;  %v629_v29 = vld [vmem:[#allocation2 + $0xba0] sm:$0xff]  ;;  %v6829_v51 = vcombine.low %v646_v40, %v662_v41 }
  0xdc   : > { %v6795_v42 = vcombine.low %v613_v28, %v629_v29 }
  0xdd   : > { %4205 = vmatpush1.bf16.msra.mxu0 %v6539_v35  ;;  %4311 = vmatpush1.bf16.msra.mxu1 %v6541_v37  ;;  %v6796_v35 = vcombine.high %v613_v28, %v629_v29  ;;  %v6798_v37 = vcombine.high %v614_v30, %v630_v31  ;;  %v264_v28 = vld [vmem:[#allocation2 + $0x38] sm:$0xff]  ;;  %v6989_v31 = vcombine.low %v806_v20, %v822_v21 }
  0xde   : > { %4206 = vmatprep.subr.bf16.mxu0 %v6572_v38  ;;  %4312 = vmatprep.subr.bf16.mxu1 %v6574_v39  ;;  %v645_v38 = vld [vmem:[#allocation2 + $0xc20] sm:$0xff]  ;;  %v280_v29 = vld [vmem:[#allocation2 + $0xb8] sm:$0xff] }
  0xdf   : > { %v661_v39 = vld [vmem:[#allocation2 + $0xca0] sm:$0xff] }
  0xe0   : > { %v6827_v50 = vcombine.low %v645_v38, %v661_v39 }
  0xe1   : > { %4207 = vmatpush1.bf16.msra.mxu0 %v6571_v44  ;;  %4313 = vmatpush1.bf16.msra.mxu1 %v6573_v45  ;;  %v6828_v44 = vcombine.high %v645_v38, %v661_v39  ;;  %v6830_v45 = vcombine.high %v646_v40, %v662_v41  ;;  %v312_v38 = vld [vmem:[#allocation2 + $0x1b8] sm:$0xff]  ;;  %v6449_v39 = vcombine.low %v264_v28, %v280_v29 }
  0xe2   : > { %4208 = vmatprep.subr.bf16.mxu0 %v6604_v46  ;;  %4314 = vmatprep.subr.bf16.mxu1 %v6606_v47  ;;  %v677_v46 = vld [vmem:[#allocation2 + $0xd20] sm:$0xff] }
  0xe3   : > { %v693_v47 = vld [vmem:[#allocation2 + $0xda0] sm:$0xff] }
  0xe4   : > { %v6859_v59 = vcombine.low %v677_v46, %v693_v47 }
  0xe5   : > { %4209 = vmatpush1.bf16.msra.mxu0 %v6603_v52  ;;  %4315 = vmatpush1.bf16.msra.mxu1 %v6605_v54  ;;  %v6860_v52 = vcombine.high %v677_v46, %v693_v47  ;;  %v6862_v54 = vcombine.high %v678_v48, %v694_v49  ;;  %v359_v49 = vld [vmem:[#allocation2 + $0x330] sm:$0xff] }
  0xe6   : > { %4210 = vmatprep.subr.bf16.mxu0 %v6636_v55  ;;  %4316 = vmatprep.subr.bf16.mxu1 %v6638_v57  ;;  %v709_v55 = vld [vmem:[#allocation2 + $0xe20] sm:$0xff] }
  0xe7   : > { %v725_v57 = vld [vmem:[#allocation2 + $0xea0] sm:$0xff] }
  0xe8   : > { %v6891_v4 = vcombine.low %v709_v55, %v725_v57 }
  0xe9   : > { %4211 = vmatpush1.bf16.msra.mxu0 %v6635_v61  ;;  %4317 = vmatpush1.bf16.msra.mxu1 %v6637_v62  ;;  %v6892_v61 = vcombine.high %v709_v55, %v725_v57  ;;  %v6894_v62 = vcombine.high %v710_v56, %v726_v58  ;;  %v391_v56 = vld [vmem:[#allocation2 + $0x430] sm:$0xff] }
  0xea   : > { %4212 = vmatprep.subr.bf16.mxu0 %v6668_v63  ;;  %4318 = vmatprep.subr.bf16.mxu1 %v6670_v1  ;;  %v741_v63 = vld [vmem:[#allocation2 + $0xf20] sm:$0xff]  ;;  %v407_v58 = vld [vmem:[#allocation2 + $0x4b0] sm:$0xff] }
  0xeb   : > { %v757_v1 = vld [vmem:[#allocation2 + $0xfa0] sm:$0xff] }
  0xec   : > { %v6923_v12 = vcombine.low %v741_v63, %v757_v1 }
  0xed   : > { %4213 = vmatpush1.bf16.msra.mxu0 %v6667_v6  ;;  %4319 = vmatpush1.bf16.msra.mxu1 %v6669_v7  ;;  %v6924_v6 = vcombine.high %v741_v63, %v757_v1  ;;  %v6926_v7 = vcombine.high %v742_v2, %v758_v3  ;;  %v6576_v63 = vcombine.high %v391_v56, %v407_v58  ;;  %v423_v2 = vld [vmem:[#allocation2 + $0x530] sm:$0xff] }
  0xee   : > { %4214 = vmatprep.subr.bf16.mxu0 %v6700_v8  ;;  %4320 = vmatprep.subr.bf16.mxu1 %v6702_v9  ;;  %v773_v8 = vld [vmem:[#allocation2 + $0x1020] sm:$0xff]  ;;  %v439_v3 = vld [vmem:[#allocation2 + $0x5b0] sm:$0xff] }
  0xef   : > { %v789_v9 = vld [vmem:[#allocation2 + $0x10a0] sm:$0xff] }
  0xf0   : > { %v6955_v19 = vcombine.low %v773_v8, %v789_v9 }
  0xf1   : > { %4215 = vmatpush1.bf16.msra.mxu0 %v6699_v14  ;;  %4321 = vmatpush1.bf16.msra.mxu1 %v6701_v16  ;;  %v6956_v14 = vcombine.high %v773_v8, %v789_v9  ;;  %v6958_v16 = vcombine.high %v774_v10, %v790_v11  ;;  %v6608_v8 = vcombine.high %v423_v2, %v439_v3  ;;  %v455_v10 = vld [vmem:[#allocation2 + $0x630] sm:$0xff] }
  0xf2   : > { %4216 = vmatprep.subr.bf16.mxu0 %v6732_v17  ;;  %4322 = vmatprep.subr.bf16.mxu1 %v6734_v18  ;;  %v805_v17 = vld [vmem:[#allocation2 + $0x1120] sm:$0xff]  ;;  %v471_v11 = vld [vmem:[#allocation2 + $0x6b0] sm:$0xff] }
  0xf3   : > { %v821_v18 = vld [vmem:[#allocation2 + $0x11a0] sm:$0xff] }
  0xf4   : > { %v6987_v30 = vcombine.low %v805_v17, %v821_v18 }
  0xf5   : > { %4217 = vmatpush1.bf16.msra.mxu0 %v6731_v24  ;;  %4323 = vmatpush1.bf16.msra.mxu1 %v6733_v25  ;;  %v6988_v24 = vcombine.high %v805_v17, %v821_v18  ;;  %v263_v25 = vld [vmem:[#allocation2 + $0x30] sm:$0xff]  ;;  %v6640_v17 = vcombine.high %v455_v10, %v471_v11 }
  0xf6   : > { %4218 = vmatprep.subr.bf16.mxu0 %v6764_v26  ;;  %4324 = vmatprep.subr.bf16.mxu1 %v6766_v27  ;;  %v279_v26 = vld [vmem:[#allocation2 + $0xb0] sm:$0xff]  ;;  %v6990_v27 = vcombine.high %v806_v20, %v822_v21  ;;  %v488_v21 = vld [vmem:[#allocation2 + $0x738] sm:$0xff] }
  0xf7   : > { %v503_v20 = vld [vmem:[#allocation2 + $0x7b0] sm:$0xff] }
  0xf9   : > { %4219 = vmatpush1.bf16.msra.mxu0 %v6763_v32  ;;  %4325 = vmatpush1.bf16.msra.mxu1 %v6765_v34  ;;  %v6448_v32 = vcombine.high %v263_v25, %v279_v26  ;;  %v6450_v34 = vcombine.high %v264_v28, %v280_v29  ;;  %v519_v28 = vld [vmem:[#allocation2 + $0x830] sm:$0xff] }
  0xfa   : > { %4220 = vmatprep.subr.bf16.mxu0 %v6796_v35  ;;  %4326 = vmatprep.subr.bf16.mxu1 %v6798_v37  ;;  %v311_v35 = vld [vmem:[#allocation2 + $0x1b0] sm:$0xff]  ;;  %v296_v37 = vld [vmem:[#allocation2 + $0x138] sm:$0xff] }
  0xfb   : > { %v6482_v41 = vcombine.high %v296_v37, %v312_v38  ;;  %v6481_v46 = vcombine.low %v296_v37, %v312_v38  ;;  %v535_v29 = vld [vmem:[#allocation2 + $0x8b0] sm:$0xff] }
  0xfc   : > { %v551_v37 = vld [vmem:[#allocation2 + $0x930] sm:$0xff] }
  0xfd   : > { %4221 = vmatpush1.bf16.msra.mxu0 %v6795_v42  ;;  %4327 = vmatpush1.bf16.msra.mxu1 %v6797_v43  ;;  %v327_v42 = vld [vmem:[#allocation2 + $0x230] sm:$0xff] }
  0xfe   : > { %4222 = vmatprep.subr.bf16.mxu0 %v6828_v44  ;;  %4328 = vmatprep.subr.bf16.mxu1 %v6830_v45  ;;  %v343_v43 = vld [vmem:[#allocation2 + $0x2b0] sm:$0xff]  ;;  %v328_v44 = vld [vmem:[#allocation2 + $0x238] sm:$0xff] }
  0xff   : > { %v344_v45 = vld [vmem:[#allocation2 + $0x2b8] sm:$0xff]  ;;  %v6512_v47 = vcombine.high %v327_v42, %v343_v43  ;;  %v567_v38 = vld [vmem:[#allocation2 + $0x9b0] sm:$0xff] }
 0x100   : > { %v6514_v48 = vcombine.high %v328_v44, %v344_v45 }
 0x101   : > { %4223 = vmatpush1.bf16.msra.mxu0 %v6827_v50  ;;  %4329 = vmatpush1.bf16.msra.mxu1 %v6829_v51  ;;  %v375_v50 = vld [vmem:[#allocation2 + $0x3b0] sm:$0xff]  ;;  %v360_v51 = vld [vmem:[#allocation2 + $0x338] sm:$0xff] }
 0x102   : > { %4224 = vmatprep.subr.bf16.mxu0 %v6860_v52  ;;  %4330 = vmatprep.subr.bf16.mxu1 %v6862_v54  ;;  %v376_v52 = vld [vmem:[#allocation2 + $0x3b8] sm:$0xff]  ;;  %v6511_v54 = vcombine.low %v327_v42, %v343_v43  ;;  %v6544_v55 = vcombine.high %v359_v49, %v375_v50  ;;  %v6736_v42 = vcombine.high %v551_v37, %v567_v38 }
 0x103   : > { %v6546_v57 = vcombine.high %v360_v51, %v376_v52 }
 0x105   : > { %4225 = vmatpush1.bf16.msra.mxu0 %v6859_v59  ;;  %4331 = vmatpush1.bf16.msra.mxu1 %v6861_v60  ;;  %v392_v59 = vld [vmem:[#allocation2 + $0x438] sm:$0xff] }
 0x106   : > { %4226 = vmatprep.subr.bf16.mxu0 %v6892_v61  ;;  %4332 = vmatprep.subr.bf16.mxu1 %v6894_v62  ;;  %v408_v60 = vld [vmem:[#allocation2 + $0x4b8] sm:$0xff]  ;;  %v6543_v61 = vcombine.low %v359_v49, %v375_v50  ;;  %v6545_v62 = vcombine.low %v360_v51, %v376_v52  ;;  %v615_v51 = vld [vmem:[#allocation2 + $0xb30] sm:$0xff] }
 0x107   : > { %v6578_v1 = vcombine.high %v392_v59, %v408_v60  ;;  %v631_v52 = vld [vmem:[#allocation2 + $0xbb0] sm:$0xff] }
 0x109   : > { %4227 = vmatpush1.bf16.msra.mxu0 %v6891_v4  ;;  %4333 = vmatpush1.bf16.msra.mxu1 %v6893_v5  ;;  %v7736_v4 = vld [vmem:[%s7645_s11 + $0x4] ss:$12 sps:$4 sm:$0xff]   ;;  %v424_v5 = vld [vmem:[#allocation2 + $0x538] sm:$0xff] }
 0x10a   : > { %4228 = vmatprep.subr.bf16.mxu0 %v6924_v6  ;;  %4334 = vmatprep.subr.bf16.mxu1 %v6926_v7  ;;  %v440_v6 = vld [vmem:[#allocation2 + $0x5b8] sm:$0xff]  ;;  %v6577_v7 = vcombine.low %v392_v59, %v408_v60  ;;  %v647_v59 = vld [vmem:[#allocation2 + $0xc30] sm:$0xff] }
 0x10b   : > { %v6610_v9 = vcombine.high %v424_v5, %v440_v6  ;;  %v663_v60 = vld [vmem:[#allocation2 + $0xcb0] sm:$0xff] }
 0x10d   : > { %4229 = vmatpush1.bf16.msra.mxu0 %v6923_v12  ;;  %4335 = vmatpush1.bf16.msra.mxu1 %v6925_v13  ;;  %v456_v12 = vld [vmem:[#allocation2 + $0x638] sm:$0xff] }
 0x10e   : > { %4251 = vmatprep.subr.bf16.mxu0 %v6956_v14  ;;  %4357 = vmatprep.subr.bf16.mxu1 %v6958_v16  ;;  %v472_v13 = vld [vmem:[#allocation2 + $0x6b8] sm:$0xff]  ;;  %v6607_v14 = vcombine.low %v423_v2, %v439_v3  ;;  %v6609_v16 = vcombine.low %v424_v5, %v440_v6  ;;  %v6832_v2 = vcombine.high %v647_v59, %v663_v60  ;;  %v679_v5 = vld [vmem:[#allocation2 + $0xd30] sm:$0xff] }
 0x10f   : > { %v6642_v18 = vcombine.high %v456_v12, %v472_v13  ;;  %v695_v6 = vld [vmem:[#allocation2 + $0xdb0] sm:$0xff] }
 0x110   : > { %4231 = vmatmul.mubr.bf16.vlgmr.msra.gmra.mrb[16].mxu0 %v7663_v15  ;;  %4337 = vmatmul.mubr.bf16.vlgmr.msra.gmra.mrb[16].mxu1 %v7663_v15  ;;  %v295_v15 = vld [vmem:[#allocation2 + $0x130] sm:$0xff] }
 0x111   : > { %4252 = vmatpush1.bf16.msra.mxu0 %v6955_v19  ;;  %4358 = vmatpush1.bf16.msra.mxu1 %v6957_v23  ;;  %v6480_v40 = vcombine.high %v295_v15, %v311_v35  ;;  %v487_v19 = vld [vmem:[#allocation2 + $0x730] sm:$0xff]  ;;  %v504_v23 = vld [vmem:[#allocation2 + $0x7b8] sm:$0xff] }
 0x112   : > { %4240 = vmatprep.mubr.bf16.mxu0 %v7666_v22  ;;  %4346 = vmatprep.mubr.bf16.mxu1 %v7666_v22  ;;  %v6447_v22 = vcombine.low %v263_v25, %v279_v26  ;;  %v6641_v25 = vcombine.low %v456_v12, %v472_v13  ;;  %v6672_v26 = vcombine.high %v487_v19, %v503_v20  ;;  %v7746_v12 = vld [vmem:[#allocation2 + $0xe38] sm:$0xff] }
 0x113   : > { %4253 = vmatprep.subr.bf16.mxu0 %v6988_v24  ;;  %4359 = vmatprep.subr.bf16.mxu1 %v6990_v27  ;;  %v6639_v24 = vcombine.low %v455_v10, %v471_v11  ;;  %v6674_v27 = vcombine.high %v488_v21, %v504_v23  ;;  %v7742_v10 = vld [vmem:[#allocation2 + $0xe30] sm:$0xff] }
 0x114   : > { %v7744_v11 = vld [vmem:[#allocation2 + $0xeb0] sm:$0xff] }
 0x115   : > { %4254 = vmatpush1.bf16.msra.mxu0 %v6987_v30  ;;  %4360 = vmatpush1.bf16.msra.mxu1 %v6989_v31  ;;  %v520_v30 = vld [vmem:[#allocation2 + $0x838] sm:$0xff] }
 0x116   : > { %4410 = vmatprep.subr.bf16.mxu0 %v6448_v32  ;;  %4516 = vmatprep.subr.bf16.mxu1 %v6450_v34  ;;  %v536_v31 = vld [vmem:[#allocation2 + $0x8b8] sm:$0xff]  ;;  %v6671_v32 = vcombine.low %v487_v19, %v503_v20  ;;  %v6673_v34 = vcombine.low %v488_v21, %v504_v23  ;;  %v7758_v23 = vld [vmem:[#allocation2 + $0x1030] sm:$0xff] }
 0x117   : > { %v7754_v20 = vld [vmem:[#allocation2 + $0xf38] sm:$0xff] }
 0x118   : > { %4241 = vmatmul.mubr.bf16.gmra.mrb[20].mxu0 %v7673_v33  ;;  %4347 = vmatmul.mubr.bf16.gmra.mrb[20].mxu1 %v7673_v33  ;;  %v6479_v33 = vcombine.low %v295_v15, %v311_v35  ;;  %v6704_v15 = vcombine.high %v519_v28, %v535_v29  ;;  %v6706_v35 = vcombine.high %v520_v30, %v536_v31  ;;  %v7756_v21 = vld [vmem:[#allocation2 + $0xfb8] sm:$0xff] }
 0x119   : > { %4283 = vmatprep.mubr.bf16.mxu0 %v7556_v0  ;;  %4389 = vmatprep.mubr.bf16.mxu1 %v7556_v0 }
 0x120   : > { %7019 = vmatmul.mubr.msk.bf16.vlgmr.msra.gmra.mrb[16].mxu0 %vm3767_vm0, %v7680_v36  ;;  %7021 = vmatmul.mubr.msk.bf16.vlgmr.msra.gmra.mrb[16].mxu1 %vm3767_vm0, %v7680_v36  ;;  %v6513_v36 = vcombine.low %v328_v44, %v344_v45  ;;  %v583_v44 = vld [vmem:[#allocation2 + $0xa30] sm:$0xff] }
 0x121   : > { %4411 = vmatpush1.bf16.msra.mxu0 %v6447_v22  ;;  %4517 = vmatpush1.bf16.msra.mxu1 %v6449_v39  ;;  %v552_v22 = vld [vmem:[#allocation2 + $0x938] sm:$0xff]  ;;  %v599_v45 = vld [vmem:[#allocation2 + $0xab0] sm:$0xff] }
 0x122   : > { %4412 = vmatprep.subr.bf16.mxu0 %v6480_v40  ;;  %4518 = vmatprep.subr.bf16.mxu1 %v6482_v41  ;;  %v568_v39 = vld [vmem:[#allocation2 + $0x9b8] sm:$0xff]  ;;  %v6703_v40 = vcombine.low %v519_v28, %v535_v29  ;;  %v6705_v41 = vcombine.low %v520_v30, %v536_v31  ;;  %v6768_v49 = vcombine.high %v583_v44, %v599_v45 }
 0x123   : > { %4293 = vmatprep.mubr.bf16.mxu0 %v7556_v0  ;;  %4399 = vmatprep.mubr.bf16.mxu1 %v7556_v0  ;;  %v6738_v43 = vcombine.high %v552_v22, %v568_v39  ;;  %v7764_v28 = vld [vmem:[#allocation2 + $0x10b8] sm:$0xff]  ;;  %v6895_v29 = vcombine.low %v7742_v10, %v7744_v11  ;;  %v6896_v30 = vcombine.high %v7742_v10, %v7744_v11  ;;  %v7822_v10 = vld [vmem:[#allocation2 + $0x40] sm:$0xff] }
 0x125   : > { %4413 = vmatpush1.bf16.msra.mxu0 %v6479_v33  ;;  %4519 = vmatpush1.bf16.msra.mxu1 %v6481_v46  ;;  %v584_v33 = vld [vmem:[#allocation2 + $0xa38] sm:$0xff] }
 0x126   : > { %4414 = vmatprep.subr.bf16.mxu0 %v6512_v47  ;;  %4520 = vmatprep.subr.bf16.mxu1 %v6514_v48  ;;  %v600_v46 = vld [vmem:[#allocation2 + $0xab8] sm:$0xff]  ;;  %v6735_v47 = vcombine.low %v551_v37, %v567_v38  ;;  %v6737_v48 = vcombine.low %v552_v22, %v568_v39  ;;  %v6929_v22 = vcombine.low %v7754_v20, %v7756_v21 }
 0x127   : > { %v6770_v50 = vcombine.high %v584_v33, %v600_v46  ;;  %v7786_v39 = vld [vmem:[#allocation2 + $0x1138] sm:$0xff] }
 0x128   : > { %7020 = vmatmul.mubr.msk.bf16.gmra.mrb[20].mxu0 %vm3767_vm0, %v7689_v53  ;;  %7022 = vmatmul.mubr.msk.bf16.gmra.mrb[20].mxu1 %vm3767_vm0, %v7689_v53  ;;  %v6575_v53 = vcombine.low %v391_v56, %v407_v58  ;;  %v6800_v56 = vcombine.high %v615_v51, %v631_v52 }
 0x129   : > { %4415 = vmatpush1.bf16.msra.mxu0 %v6511_v54  ;;  %4521 = vmatpush1.bf16.msra.mxu1 %v6513_v36  ;;  %v616_v54 = vld [vmem:[#allocation2 + $0xb38] sm:$0xff] }
 0x12a   : > { %4416 = vmatprep.subr.bf16.mxu0 %v6544_v55  ;;  %4522 = vmatprep.subr.bf16.mxu1 %v6546_v57  ;;  %v632_v36 = vld [vmem:[#allocation2 + $0xbb8] sm:$0xff]  ;;  %v6767_v55 = vcombine.low %v583_v44, %v599_v45  ;;  %v6769_v57 = vcombine.low %v584_v33, %v600_v46 }
 0x12b   : > { %4442 = vmatprep.mubr.bf16.mxu0 %v7736_v4  ;;  %4548 = vmatprep.mubr.bf16.mxu1 %v7736_v4  ;;  %v6802_v58 = vcombine.high %v616_v54, %v632_v36 }
 0x12d   : > { %4417 = vmatpush1.bf16.msra.mxu0 %v6543_v61  ;;  %4523 = vmatpush1.bf16.msra.mxu1 %v6545_v62  ;;  %v648_v61 = vld [vmem:[#allocation2 + $0xc38] sm:$0xff] }
 0x12e   : > { %4418 = vmatprep.subr.bf16.mxu0 %v6576_v63  ;;  %4524 = vmatprep.subr.bf16.mxu1 %v6578_v1  ;;  %v664_v62 = vld [vmem:[#allocation2 + $0xcb8] sm:$0xff]  ;;  %v6799_v63 = vcombine.low %v615_v51, %v631_v52  ;;  %v6801_v1 = vcombine.low %v616_v54, %v632_v36 }
 0x12f   : > { %v6834_v3 = vcombine.high %v648_v61, %v664_v62  ;;  %v6833_v13 = vcombine.low %v648_v61, %v664_v62 }
 0x131   : > { %4419 = vmatpush1.bf16.msra.mxu0 %v6575_v53  ;;  %4525 = vmatpush1.bf16.msra.mxu1 %v6577_v7  ;;  %v680_v53 = vld [vmem:[#allocation2 + $0xd38] sm:$0xff] }
 0x132   : > { %4420 = vmatprep.subr.bf16.mxu0 %v6608_v8  ;;  %4526 = vmatprep.subr.bf16.mxu1 %v6610_v9  ;;  %v696_v7 = vld [vmem:[#allocation2 + $0xdb8] sm:$0xff]  ;;  %v6831_v8 = vcombine.low %v647_v59, %v663_v60  ;;  %v7740_v9 = vpop.permute.xlu0 %839 }
 0x133   : > { %v6866_v19 = vcombine.high %v680_v53, %v696_v7 }
 0x135   : > { %4421 = vmatpush1.bf16.msra.mxu0 %v6607_v14  ;;  %4527 = vmatpush1.bf16.msra.mxu1 %v6609_v16  ;;  %v6864_v14 = vcombine.high %v679_v5, %v695_v6  ;;  %v7748_v16 = vld [vmem:[#allocation2 + $0xeb8] sm:$0xff] }
 0x136   : > { %4422 = vmatprep.subr.bf16.mxu0 %v6640_v17  ;;  %4528 = vmatprep.subr.bf16.mxu1 %v6642_v18  ;;  %v7750_v17 = vld [vmem:[#allocation2 + $0xf30] sm:$0xff]  ;;  %v6897_v31 = vcombine.low %v7746_v12, %v7748_v16 }
 0x137   : > { %v7752_v18 = vld [vmem:[#allocation2 + $0xfb0] sm:$0xff] }
 0x138   : > { %v6927_v37 = vcombine.low %v7750_v17, %v7752_v18  ;;  %v6928_v38 = vcombine.high %v7750_v17, %v7752_v18 }
 0x139   : > { %4423 = vmatpush1.bf16.msra.mxu0 %v6639_v24  ;;  %4529 = vmatpush1.bf16.msra.mxu1 %v6641_v25  ;;  %v6863_v24 = vcombine.low %v679_v5, %v695_v6  ;;  %v6865_v25 = vcombine.low %v680_v53, %v696_v7 }
 0x13a   : > { %4424 = vmatprep.subr.bf16.mxu0 %v6672_v26  ;;  %4530 = vmatprep.subr.bf16.mxu1 %v6674_v27  ;;  %v7760_v26 = vld [vmem:[#allocation2 + $0x10b0] sm:$0xff]  ;;  %v7762_v27 = vld [vmem:[#allocation2 + $0x1038] sm:$0xff] }
 0x13b   : > { %v6959_v44 = vcombine.low %v7758_v23, %v7760_v26  ;;  %v6960_v45 = vcombine.high %v7758_v23, %v7760_v26  ;;  %v6961_v33 = vcombine.low %v7762_v27, %v7764_v28 }
 0x13d   : > { %4425 = vmatpush1.bf16.msra.mxu0 %v6671_v32  ;;  %4531 = vmatpush1.bf16.msra.mxu1 %v6673_v34  ;;  %v6898_v32 = vcombine.high %v7746_v12, %v7748_v16  ;;  %v7774_v34 = vld [vmem:[#allocation2 + $0x1130] sm:$0xff]  ;;  %v7826_v16 = vld [vmem:[#allocation2 + $0xc0] sm:$0xff] }
 0x13e   : > { %4426 = vmatprep.subr.bf16.mxu0 %v6704_v15  ;;  %4532 = vmatprep.subr.bf16.mxu1 %v6706_v35  ;;  %v7776_v15 = vld [vmem:[#allocation2 + $0x11b0] sm:$0xff]  ;;  %v7778_v35 = vpop.permute.xlu1 %849 }
 0x13f   : > { %v6992_v51 = vcombine.high %v7774_v34, %v7776_v15 }
 0x141   : > { %4427 = vmatpush1.bf16.msra.mxu0 %v6703_v40  ;;  %4533 = vmatpush1.bf16.msra.mxu1 %v6705_v41  ;;  %v7788_v40 = vld [vmem:[#allocation2 + $0x11b8] sm:$0xff] }
 0x142   : > { %4428 = vmatprep.subr.bf16.mxu0 %v6736_v42  ;;  %4534 = vmatprep.subr.bf16.mxu1 %v6738_v43  ;;  %v7790_v42 = vpop.permute.xlu0 %844  ;;  %v6930_v43 = vcombine.high %v7754_v20, %v7756_v21 }
 0x145   : > { %4429 = vmatpush1.bf16.msra.mxu0 %v6735_v47  ;;  %4535 = vmatpush1.bf16.msra.mxu1 %v6737_v48 }
 0x146   : > { %4430 = vmatprep.subr.bf16.mxu0 %v6768_v49  ;;  %4536 = vmatprep.subr.bf16.mxu1 %v6770_v50  ;;  %v6962_v49 = vcombine.high %v7762_v27, %v7764_v28  ;;  %v6991_v50 = vcombine.low %v7774_v34, %v7776_v15  ;;  %v297_v34 = vld [vmem:[#allocation2 + $0x140] sm:$0xff] }
 0x147   : > { %v313_v15 = vld [vmem:[#allocation2 + $0x1c0] sm:$0xff] }
 0x149   : > { %4431 = vmatpush1.bf16.msra.mxu0 %v6767_v55  ;;  %4537 = vmatpush1.bf16.msra.mxu1 %v6769_v57  ;;  %v6993_v57 = vcombine.low %v7786_v39, %v7788_v40 }
 0x14a   : > { %4432 = vmatprep.subr.bf16.mxu0 %v6800_v56  ;;  %4538 = vmatprep.subr.bf16.mxu1 %v6802_v58  ;;  %v6994_v56 = vcombine.high %v7786_v39, %v7788_v40  ;;  %v298_v39 = vld [vmem:[#allocation2 + $0x148] sm:$0xff] }
 0x14b   : > { %v314_v40 = vld [vmem:[#allocation2 + $0x1c8] sm:$0xff] }
 0x14d   : > { %4433 = vmatpush1.bf16.msra.mxu0 %v6799_v63  ;;  %4539 = vmatpush1.bf16.msra.mxu1 %v6801_v1 }
 0x14e   : > { %4434 = vmatprep.subr.bf16.mxu0 %v6832_v2  ;;  %4540 = vmatprep.subr.bf16.mxu1 %v6834_v3 }
 0x151   : > { %4435 = vmatpush1.bf16.msra.mxu0 %v6831_v8  ;;  %4541 = vmatpush1.bf16.msra.mxu1 %v6833_v13 }
 0x152   : > { %4436 = vmatprep.subr.bf16.mxu0 %v6864_v14  ;;  %4542 = vmatprep.subr.bf16.mxu1 %v6866_v19  ;;  %v7828_v19 = vld [vmem:[#allocation2 + $0x48] sm:$0xff] }
 0x153   : > { %v3861_v41 = vpop.f32.mrb[0].mxu0  ;;  %v3967_v47 = vpop.f32.mrb[0].mxu1 }
 0x154   : > { %v7174_v46 = vadd.f32 %v3861_v41, %v7740_v9  ;;  %v3863_v48 = vpop.f32.mrb[1].mxu0  ;;  %v7182_v52 = vadd.f32 %v3967_v47, %v7740_v9  ;;  %v3969_v36 = vpop.f32.mrb[1].mxu1 }
 0x155   : > { %4437 = vmatpush1.bf16.msra.mxu0 %v6863_v24  ;;  %v7175_v54 = vadd.f32 %v3863_v48, %v7740_v9  ;;  %v3865_v55 = vpop.f32.mrb[2].mxu0  ;;  %4543 = vmatpush1.bf16.msra.mxu1 %v6865_v25  ;;  %v7183_v59 = vadd.f32 %v3969_v36, %v7740_v9  ;;  %v3971_v61 = vpop.f32.mrb[2].mxu1  ;;  %v7830_v24 = vld [vmem:[#allocation2 + $0xc8] sm:$0xff] }
 0x156   : > { %vm5470_vm1 = vcmp.ge.f32.partialorder %v7174_v46, 0.0  ;;  %v5598_v58 = vmul.f32 0.1, %v7174_v46  ;;  %v7176_v60 = vadd.f32 %v3865_v55, %v7790_v42  ;;  %4438 = vmatprep.subr.bf16.mxu0 %v6896_v30  ;;  %v3867_v62 = vpop.f32.mrb[3].mxu0  ;;  %vm5472_vm2 = vcmp.ge.f32.partialorder %v7182_v52, 0.0  ;;  %4544 = vmatprep.subr.bf16.mxu1 %v6898_v32  ;;  %v3973_v5 = vpop.f32.mrb[3].mxu1 }
 0x157   : > { %v5600_v63 = vmul.f32 0.1, %v7182_v52  ;;  %vm5471_vm3 = vcmp.ge.f32.partialorder %v7175_v54, 0.0  ;;  %v5599_v1 = vmul.f32 0.1, %v7175_v54  ;;  %vm5473_vm4 = vcmp.ge.f32.partialorder %v7183_v59, 0.0 }
 0x158   : > { %v5726_v2 = vsel %vm5470_vm1, %v7174_v46, %v5598_v58  ;;  %v5601_v3 = vmul.f32 0.1, %v7183_v59  ;;  %vm5502_vm5 = vcmp.ge.f32.partialorder %v7176_v60, 0.0  ;;  %v5630_v7 = vmul.f32 0.1, %v7176_v60  ;;  %v7834_v46 = vpop.permute.xlu1 %854 }
 0x159   : > { %v5728_v6 = vsel %vm5472_vm2, %v7182_v52, %v5600_v63  ;;  %v5727_v53 = vsel %vm5471_vm3, %v7175_v54, %v5599_v1  ;;  %v7184_v8 = vadd.f32 %v3971_v61, %v7790_v42  ;;  %4439 = vmatpush1.bf16.msra.mxu0 %v6895_v29  ;;  %v7177_v13 = vadd.f32 %v3867_v62, %v7790_v42  ;;  %v7857_v63 = vld [vmem:[%s7645_s11] ss:$12 sps:$4 sm:$0xff]  }
 0x15a   : > { %v7110_v11 = vpack.c.bf16 %v5727_v53, %v5726_v2  ;;  %v5729_v12 = vsel %vm5473_vm4, %v7183_v59, %v5601_v3  ;;  %v7185_v14 = vadd.f32 %v3973_v5, %v7790_v42  ;;  %4545 = vmatpush1.bf16.msra.mxu1 %v6897_v31  ;;  %v5758_v29 = vsel %vm5502_vm5, %v7176_v60, %v5630_v7 }
 0x15b   : > { %v7111_v25 = vpack.c.bf16 %v5729_v12, %v5728_v6  ;;  %vm5504_vm6 = vcmp.ge.f32.partialorder %v7184_v8, 0.0  ;;  %v5632_v30 = vmul.f32 0.1, %v7184_v8  ;;  %4440 = vmatprep.subr.bf16.mxu0 %v6928_v38  ;;  %4546 = vmatprep.subr.bf16.mxu1 %v6930_v43  ;;  %v3871_v32 = vpop.f32.mrb[4].mxu0  ;;  %vm5503_vm7 = vcmp.ge.f32.partialorder %v7177_v13, 0.0  ;;  %v3977_v52 = vpop.f32.mrb[4].mxu1 }
 0x15c   : > { %6238 = vst [vmem:[%s7819_s22] sm:$0xff] %v7110_v11  ;;  %v5631_v41 = vmul.f32 0.1, %v7177_v13  ;;  %vm5505_vm8 = vcmp.ge.f32.partialorder %v7185_v14, 0.0  ;;  %v5633_v31 = vmul.f32 0.1, %v7185_v14  ;;  %v7178_v48 = vadd.f32 %v3871_v32, %v7778_v35  ;;  %v3873_v54 = vpop.f32.mrb[5].mxu0 }
 0x15d   : > { %6239 = vst [vmem:[%s7819_s22 + $0x8] sm:$0xff] %v7111_v25  ;;  %v5760_v47 = vsel %vm5504_vm6, %v7184_v8, %v5632_v30  ;;  %4441 = vmatpush1.bf16.msra.mxu0 %v6927_v37  ;;  %v6452_v38 = vcombine.high %v7822_v10, %v7826_v16  ;;  %v6454_v43 = vcombine.high %v7828_v19, %v7830_v24  ;;  %v3979_v18 = vpop.f32.mrb[5].mxu1  ;;  %v3875_v37 = vpop.f32.mrb[6].mxu0  ;;  %v7875_v12 = vld [vmem:[%s7645_s11 + $0x1c] ss:$12 sps:$4 sm:$0xff]  }
 0x15e   : > { %v5759_v36 = vsel %vm5503_vm7, %v7177_v13, %v5631_v41  ;;  %v5761_v55 = vsel %vm5505_vm8, %v7185_v14, %v5633_v31  ;;  %4547 = vmatpush1.bf16.msra.mxu1 %v6929_v22  ;;  %v7186_v58 = vadd.f32 %v3977_v52, %v7778_v35  ;;  %v7179_v17 = vadd.f32 %v3873_v54, %v7778_v35  ;;  %v3981_v62 = vpop.f32.mrb[6].mxu1  ;;  %v3877_v20 = vpop.f32.mrb[7].mxu0  ;;  %v7895_v30 = vld [vmem:[%s7645_s11 + $0x18] ss:$12 sps:$4 sm:$0xff]   ;;  %v330_v52 = vld [vmem:[#allocation2 + $0x248] sm:$0xff] }
 0x15f   : > { %v7126_v59 = vpack.c.bf16 %v5759_v36, %v5758_v29  ;;  %v7127_v60 = vpack.c.bf16 %v5761_v55, %v5760_v47  ;;  %vm5534_vm9 = vcmp.ge.f32.partialorder %v7178_v48, 0.0  ;;  %v5662_v61 = vmul.f32 0.1, %v7178_v48  ;;  %4463 = vmatprep.subr.bf16.mxu0 %v6960_v45  ;;  %4569 = vmatprep.subr.bf16.mxu1 %v6962_v49  ;;  %v3983_v49 = vpop.f32.mrb[7].mxu1  ;;  %v329_v31 = vld [vmem:[#allocation2 + $0x240] sm:$0xff]  ;;  %v346_v54 = vld [vmem:[#allocation2 + $0x2c8] sm:$0xff] }
 0x160   : > { %vm5536_vm10 = vcmp.ge.f32.partialorder %v7186_v58, 0.0  ;;  %v5664_v21 = vmul.f32 0.1, %v7186_v58  ;;  %vm5535_vm11 = vcmp.ge.f32.partialorder %v7179_v17, 0.0  ;;  %v5663_v22 = vmul.f32 0.1, %v7179_v17  ;;  %4443 = vmatmul.mubr.bf16.vlgmr.msra.gmra.mrb[24].mxu0 %v7857_v63 }
 0x161   : > { %6257 = vst [vmem:[%s7819_s22 + $0x80] sm:$0xff] %v7126_v59  ;;  %6258 = vst [vmem:[%s7819_s22 + $0x88] sm:$0xff] %v7127_v60  ;;  %v5790_v1 = vsel %vm5534_vm9, %v7178_v48, %v5662_v61  ;;  %v7187_v2 = vadd.f32 %v3979_v18, %v7778_v35  ;;  %v7180_v45 = vadd.f32 %v3875_v37, %v7834_v46  ;;  %4549 = vmatmul.mubr.bf16.vlgmr.msra.gmra.mrb[24].mxu1 %v7857_v63  ;;  %v345_v47 = vld [vmem:[#allocation2 + $0x2c0] sm:$0xff]  ;;  %v7911_v48 = vld [vmem:[%s7645_s11 + $0x8] ss:$12 sps:$4 sm:$0xff]  }
 0x162   : > { %v7188_v3 = vadd.f32 %v3981_v62, %v7834_v46  ;;  %v5792_v5 = vsel %vm5536_vm10, %v7186_v58, %v5664_v21  ;;  %v5791_v6 = vsel %vm5535_vm11, %v7179_v17, %v5663_v22  ;;  %v7181_v53 = vadd.f32 %v3877_v20, %v7834_v46  ;;  %4464 = vmatpush1.bf16.msra.mxu0 %v6959_v44  ;;  %v362_v36 = vld [vmem:[#allocation2 + $0x348] sm:$0xff]  ;;  %v393_v59 = vld [vmem:[#allocation2 + $0x440] sm:$0xff] }
 0x163   : > { %v7189_v7 = vadd.f32 %v3983_v49, %v7834_v46  ;;  %v7142_v8 = vpack.c.bf16 %v5791_v6, %v5790_v1  ;;  %vm5537_vm12 = vcmp.ge.f32.partialorder %v7187_v2, 0.0  ;;  %v5665_v11 = vmul.f32 0.1, %v7187_v2  ;;  %4570 = vmatpush1.bf16.msra.mxu1 %v6961_v33  ;;  %4452 = vmatprep.mubr.bf16.mxu0 %v7875_v12  ;;  %v378_v55 = vld [vmem:[#allocation2 + $0x3c8] sm:$0xff]  ;;  %v409_v60 = vld [vmem:[#allocation2 + $0x4c0] sm:$0xff] }
 0x164   : > { %vm5566_vm13 = vcmp.ge.f32.partialorder %v7180_v45, 0.0  ;;  %v5694_v13 = vmul.f32 0.1, %v7180_v45  ;;  %vm5568_vm14 = vcmp.ge.f32.partialorder %v7188_v3, 0.0  ;;  %v5696_v14 = vmul.f32 0.1, %v7188_v3  ;;  %4558 = vmatprep.mubr.bf16.mxu1 %v7875_v12  ;;  %4465 = vmatprep.subr.bf16.mxu0 %v6992_v51 }
 0x165   : > { %vm5567_vm15 = vcmp.ge.f32.partialorder %v7181_v53, 0.0  ;;  %6273 = vst [vmem:[%s7819_s22 + $0x100] sm:$0xff] %v7142_v8  ;;  %v5793_v23 = vsel %vm5537_vm12, %v7187_v2, %v5665_v11  ;;  %v5695_v26 = vmul.f32 0.1, %v7181_v53  ;;  %vm5569_vm1 = vcmp.ge.f32.partialorder %v7189_v7, 0.0  ;;  %4571 = vmatprep.subr.bf16.mxu1 %v6994_v56  ;;  %v394_v62 = vld [vmem:[#allocation2 + $0x448] sm:$0xff] }
 0x166   : > { %v5697_v27 = vmul.f32 0.1, %v7189_v7  ;;  %v7143_v28 = vpack.c.bf16 %v5793_v23, %v5792_v5  ;;  %v5822_v44 = vsel %vm5566_vm13, %v7180_v45, %v5694_v13  ;;  %v5824_v33 = vsel %vm5568_vm14, %v7188_v3, %v5696_v14  ;;  %4466 = vmatpush1.bf16.msra.mxu0 %v6991_v50  ;;  %v7920_v61 = vld [vmem:[%s7645_s11 + $0x20] ss:$12 sps:$4 sm:$0xff]  }
 0x167   : > { %v5823_v51 = vsel %vm5567_vm15, %v7181_v53, %v5695_v26  ;;  %4572 = vmatpush1.bf16.msra.mxu1 %v6993_v57  ;;  %4622 = vmatprep.subr.bf16.mxu0 %v6452_v38  ;;  %v6451_v50 = vcombine.low %v7822_v10, %v7826_v16  ;;  %v6453_v57 = vcombine.low %v7828_v19, %v7830_v24  ;;  %v361_v24 = vld [vmem:[#allocation2 + $0x340] sm:$0xff]  ;;  %v410_v20 = vld [vmem:[#allocation2 + $0x4c8] sm:$0xff] }
 0x168   : > { %v5825_v25 = vsel %vm5569_vm1, %v7189_v7, %v5697_v27  ;;  %6274 = vst [vmem:[%s7819_s22 + $0x108] sm:$0xff] %v7143_v28  ;;  %v7158_v29 = vpack.c.bf16 %v5823_v51, %v5822_v44  ;;  %4453 = vmatmul.mubr.bf16.gmra.mrb[28].mxu0 %v7895_v30  ;;  %4728 = vmatprep.subr.bf16.mxu1 %v6454_v43  ;;  %v377_v43 = vld [vmem:[#allocation2 + $0x3c0] sm:$0xff]  ;;  %v426_v49 = vld [vmem:[#allocation2 + $0x548] sm:$0xff] }
 0x169   : > { %v7159_v56 = vpack.c.bf16 %v5825_v25, %v5824_v33  ;;  %4559 = vmatmul.mubr.bf16.gmra.mrb[28].mxu1 %v7895_v30  ;;  %4495 = vmatprep.mubr.bf16.mxu0 %v7556_v0  ;;  %v6484_v32 = vcombine.high %v297_v34, %v313_v15  ;;  %v6486_v41 = vcombine.high %v298_v39, %v314_v40  ;;  %v425_v45 = vld [vmem:[#allocation2 + $0x540] sm:$0xff]  ;;  %v442_v5 = vld [vmem:[#allocation2 + $0x5c8] sm:$0xff] }
 0x16a   : > { %6289 = vst [vmem:[%s7819_s22 + $0x180] sm:$0xff] %v7158_v29  ;;  %4601 = vmatprep.mubr.bf16.mxu1 %v7556_v0  ;;  %v6483_v38 = vcombine.low %v297_v34, %v313_v15  ;;  %v6485_v10 = vcombine.low %v298_v39, %v314_v40  ;;  %v6516_v16 = vcombine.high %v329_v31, %v345_v47  ;;  %v441_v3 = vld [vmem:[#allocation2 + $0x5c0] sm:$0xff]  ;;  %v458_v14 = vld [vmem:[#allocation2 + $0x648] sm:$0xff] }
 0x16b   : > { %6290 = vst [vmem:[%s7819_s22 + $0x188] sm:$0xff] %v7159_v56  ;;  %v6518_v19 = vcombine.high %v330_v52, %v346_v54  ;;  %v6515_v58 = vcombine.low %v329_v31, %v345_v47  ;;  %v6517_v17 = vcombine.low %v330_v52, %v346_v54  ;;  %v6548_v18 = vcombine.high %v361_v24, %v377_v43  ;;  %v457_v11 = vld [vmem:[#allocation2 + $0x640] sm:$0xff]  ;;  %v474_v23 = vld [vmem:[#allocation2 + $0x6c8] sm:$0xff] }
 0x16c   : > { %v6550_v37 = vcombine.high %v362_v36, %v378_v55  ;;  %v6547_v21 = vcombine.low %v361_v24, %v377_v43  ;;  %v6549_v22 = vcombine.low %v362_v36, %v378_v55  ;;  %v6580_v1 = vcombine.high %v393_v59, %v409_v60  ;;  %v473_v13 = vld [vmem:[#allocation2 + $0x6c0] sm:$0xff]  ;;  %v490_v51 = vld [vmem:[#allocation2 + $0x748] sm:$0xff] }
 0x16d   : > { %v6582_v2 = vcombine.high %v394_v62, %v410_v20  ;;  %v6579_v6 = vcombine.low %v393_v59, %v409_v60  ;;  %v6581_v53 = vcombine.low %v394_v62, %v410_v20  ;;  %v6612_v7 = vcombine.high %v425_v45, %v441_v3  ;;  %v489_v44 = vld [vmem:[#allocation2 + $0x740] sm:$0xff]  ;;  %v506_v25 = vld [vmem:[#allocation2 + $0x7c8] sm:$0xff] }
 0x16e   : > { %v6614_v8 = vcombine.high %v426_v49, %v442_v5  ;;  %v6611_v26 = vcombine.low %v425_v45, %v441_v3  ;;  %v6613_v27 = vcombine.low %v426_v49, %v442_v5  ;;  %v6644_v28 = vcombine.high %v457_v11, %v473_v13  ;;  %v505_v33 = vld [vmem:[#allocation2 + $0x7c0] sm:$0xff] }
 0x16f   : > { %v6643_v29 = vcombine.low %v457_v11, %v473_v13  ;;  %v6645_v56 = vcombine.low %v458_v14, %v474_v23  ;;  %v6676_v34 = vcombine.high %v489_v44, %v505_v33  ;;  %v6678_v15 = vcombine.high %v490_v51, %v506_v25  ;;  %v521_v39 = vld [vmem:[#allocation2 + $0x840] sm:$0xff] }
 0x170   : > { %7023 = vmatmul.mubr.msk.bf16.vlgmr.msra.gmra.mrb[24].mxu0 %vm3767_vm0, %v7911_v48  ;;  %v537_v40 = vld [vmem:[#allocation2 + $0x8c0] sm:$0xff] }
 0x171   : > { %7025 = vmatmul.mubr.msk.bf16.vlgmr.msra.gmra.mrb[24].mxu1 %vm3767_vm0, %v7911_v48  ;;  %4623 = vmatpush1.bf16.msra.mxu0 %v6451_v50  ;;  %v522_v50 = vld [vmem:[#allocation2 + $0x848] sm:$0xff]  ;;  %v6708_v31 = vcombine.high %v521_v39, %v537_v40  ;;  %v553_v52 = vld [vmem:[#allocation2 + $0x940] sm:$0xff] }
 0x172   : > { %4729 = vmatpush1.bf16.msra.mxu1 %v6453_v57  ;;  %4624 = vmatprep.subr.bf16.mxu0 %v6484_v32  ;;  %v538_v57 = vld [vmem:[#allocation2 + $0x8c8] sm:$0xff]  ;;  %v6675_v32 = vcombine.low %v489_v44, %v505_v33  ;;  %v569_v54 = vld [vmem:[#allocation2 + $0x9c0] sm:$0xff] }
 0x173   : > { %4730 = vmatprep.subr.bf16.mxu1 %v6486_v41  ;;  %4505 = vmatprep.mubr.bf16.mxu0 %v7556_v0  ;;  %v6677_v41 = vcombine.low %v490_v51, %v506_v25  ;;  %v6710_v47 = vcombine.high %v522_v50, %v538_v57  ;;  %v6740_v24 = vcombine.high %v553_v52, %v569_v54  ;;  %v585_v36 = vld [vmem:[#allocation2 + $0xa40] sm:$0xff]  ;;  %v7932_v33 = vld [vmem:[#allocation2 + $0xe48] sm:$0xff] }
 0x174   : > { %4611 = vmatprep.mubr.bf16.mxu1 %v7556_v0  ;;  %v601_v55 = vld [vmem:[#allocation2 + $0xac0] sm:$0xff] }
 0x175   : > { %4625 = vmatpush1.bf16.msra.mxu0 %v6483_v38  ;;  %v554_v38 = vld [vmem:[#allocation2 + $0x948] sm:$0xff]  ;;  %v6772_v59 = vcombine.high %v585_v36, %v601_v55  ;;  %v617_v62 = vld [vmem:[#allocation2 + $0xb40] sm:$0xff] }
 0x176   : > { %4731 = vmatpush1.bf16.msra.mxu1 %v6485_v10  ;;  %4626 = vmatprep.subr.bf16.mxu0 %v6516_v16  ;;  %v570_v10 = vld [vmem:[#allocation2 + $0x9c8] sm:$0xff]  ;;  %v6707_v16 = vcombine.low %v521_v39, %v537_v40  ;;  %v633_v20 = vld [vmem:[#allocation2 + $0xbc0] sm:$0xff] }
 0x177   : > { %4732 = vmatprep.subr.bf16.mxu1 %v6518_v19  ;;  %v6709_v19 = vcombine.low %v522_v50, %v538_v57  ;;  %v6742_v43 = vcombine.high %v554_v38, %v570_v10  ;;  %v6804_v45 = vcombine.high %v617_v62, %v633_v20  ;;  %v649_v49 = vld [vmem:[#allocation2 + $0xc40] sm:$0xff]  ;;  %v7940_v39 = vld [vmem:[#allocation2 + $0xf48] sm:$0xff] }
 0x178   : > { %7024 = vmatmul.mubr.msk.bf16.gmra.mrb[28].mxu0 %vm3767_vm0, %v7920_v61  ;;  %v665_v5 = vld [vmem:[#allocation2 + $0xcc0] sm:$0xff]  ;;  %v7942_v40 = vld [vmem:[#allocation2 + $0xfc8] sm:$0xff] }
 0x179   : > { %7026 = vmatmul.mubr.msk.bf16.gmra.mrb[28].mxu1 %vm3767_vm0, %v7920_v61  ;;  %4627 = vmatpush1.bf16.msra.mxu0 %v6515_v58  ;;  %v586_v58 = vld [vmem:[#allocation2 + $0xa48] sm:$0xff]  ;;  %v6836_v11 = vcombine.high %v649_v49, %v665_v5  ;;  %v7930_v44 = vld [vmem:[#allocation2 + $0xec0] sm:$0xff] }
 0x17a   : > { %4733 = vmatpush1.bf16.msra.mxu1 %v6517_v17  ;;  %4628 = vmatprep.subr.bf16.mxu0 %v6548_v18  ;;  %v602_v17 = vld [vmem:[#allocation2 + $0xac8] sm:$0xff]  ;;  %v6739_v18 = vcombine.low %v553_v52, %v569_v54  ;;  %v7944_v50 = vld [vmem:[#allocation2 + $0x1040] sm:$0xff] }
 0x17b   : > { %4734 = vmatprep.subr.bf16.mxu1 %v6550_v37  ;;  %4654 = vmatprep.mubr.bf16.mxu0 %v7736_v4  ;;  %v6741_v37 = vcombine.low %v554_v38, %v570_v10  ;;  %v6774_v60 = vcombine.high %v586_v58, %v602_v17 }
 0x17c   : > { %4760 = vmatprep.mubr.bf16.mxu1 %v7736_v4  ;;  %v6646_v4 = vcombine.high %v458_v14, %v474_v23  ;;  %v681_v14 = vld [vmem:[#allocation2 + $0xd40] sm:$0xff] }
 0x17d   : > { %4629 = vmatpush1.bf16.msra.mxu0 %v6547_v21  ;;  %v618_v21 = vld [vmem:[#allocation2 + $0xb48] sm:$0xff]  ;;  %v697_v23 = vld [vmem:[#allocation2 + $0xdc0] sm:$0xff] }
 0x17e   : > { %4735 = vmatpush1.bf16.msra.mxu1 %v6549_v22  ;;  %4630 = vmatprep.subr.bf16.mxu0 %v6580_v1  ;;  %v634_v22 = vld [vmem:[#allocation2 + $0xbc8] sm:$0xff]  ;;  %v6771_v1 = vcombine.low %v585_v36, %v601_v55  ;;  %v6868_v25 = vcombine.high %v681_v14, %v697_v23  ;;  %v6867_v57 = vcombine.low %v681_v14, %v697_v23 }
 0x17f   : > { %4736 = vmatprep.subr.bf16.mxu1 %v6582_v2  ;;  %v6773_v2 = vcombine.low %v586_v58, %v602_v17  ;;  %v6806_v3 = vcombine.high %v618_v21, %v634_v22  ;;  %v6933_v36 = vcombine.low %v7940_v39, %v7942_v40  ;;  %v7970_v55 = vld [vmem:[#allocation2 + $0x1148] sm:$0xff] }
 0x180   : > { %v7972_v58 = vld [vmem:[#allocation2 + $0x11c8] sm:$0xff] }
 0x181   : > { %4631 = vmatpush1.bf16.msra.mxu0 %v6579_v6  ;;  %v650_v6 = vld [vmem:[#allocation2 + $0xc48] sm:$0xff] }
 0x182   : > { %4737 = vmatpush1.bf16.msra.mxu1 %v6581_v53  ;;  %4632 = vmatprep.subr.bf16.mxu0 %v6612_v7  ;;  %v666_v53 = vld [vmem:[#allocation2 + $0xcc8] sm:$0xff]  ;;  %v6803_v7 = vcombine.low %v617_v62, %v633_v20 }
 0x183   : > { %4738 = vmatprep.subr.bf16.mxu1 %v6614_v8  ;;  %v6805_v8 = vcombine.low %v618_v21, %v634_v22  ;;  %v6838_v13 = vcombine.high %v650_v6, %v666_v53  ;;  %v6837_v51 = vcombine.low %v650_v6, %v666_v53  ;;  %v6997_v6 = vcombine.low %v7970_v55, %v7972_v58 }
 0x184   : > { %v6998_v53 = vcombine.high %v7970_v55, %v7972_v58  ;;  %v300_v55 = vld [vmem:[#allocation2 + $0x158] sm:$0xff] }
 0x185   : > { %4633 = vmatpush1.bf16.msra.mxu0 %v6611_v26  ;;  %v682_v26 = vld [vmem:[#allocation2 + $0xd48] sm:$0xff]  ;;  %v316_v58 = vld [vmem:[#allocation2 + $0x1d8] sm:$0xff] }
 0x186   : > { %4739 = vmatpush1.bf16.msra.mxu1 %v6613_v27  ;;  %4634 = vmatprep.subr.bf16.mxu0 %v6644_v28  ;;  %v698_v27 = vld [vmem:[#allocation2 + $0xdc8] sm:$0xff]  ;;  %v6835_v28 = vcombine.low %v649_v49, %v665_v5 }
 0x187   : > { %4740 = vmatprep.subr.bf16.mxu1 %v6646_v4  ;;  %v7928_v4 = vld [vmem:[#allocation2 + $0xe40] sm:$0xff] }
 0x188   : > { %v6899_v52 = vcombine.low %v7928_v4, %v7930_v44  ;;  %v6900_v54 = vcombine.high %v7928_v4, %v7930_v44 }
 0x189   : > { %4635 = vmatpush1.bf16.msra.mxu0 %v6643_v29  ;;  %v7934_v29 = vld [vmem:[#allocation2 + $0xec8] sm:$0xff] }
 0x18a   : > { %4741 = vmatpush1.bf16.msra.mxu1 %v6645_v56  ;;  %4636 = vmatprep.subr.bf16.mxu0 %v6676_v34  ;;  %v7936_v56 = vld [vmem:[#allocation2 + $0xf40] sm:$0xff]  ;;  %v6901_v38 = vcombine.low %v7932_v33, %v7934_v29  ;;  %v6902_v10 = vcombine.high %v7932_v33, %v7934_v29  ;;  %v7998_v29 = vld [vmem:[#allocation2 + $0x50] sm:$0xff] }
 0x18b   : > { %4742 = vmatprep.subr.bf16.mxu1 %v6678_v15  ;;  %v7938_v34 = vld [vmem:[#allocation2 + $0xfc0] sm:$0xff]  ;;  %v6870_v15 = vcombine.high %v682_v26, %v698_v27 }
 0x18d   : > { %4637 = vmatpush1.bf16.msra.mxu0 %v6675_v32  ;;  %v6869_v32 = vcombine.low %v682_v26, %v698_v27 }
 0x18e   : > { %4743 = vmatpush1.bf16.msra.mxu1 %v6677_v41  ;;  %4638 = vmatprep.subr.bf16.mxu0 %v6708_v31  ;;  %v7946_v41 = vld [vmem:[#allocation2 + $0x10c0] sm:$0xff]  ;;  %v7948_v31 = vld [vmem:[#allocation2 + $0x1048] sm:$0xff] }
 0x18f   : > { %4744 = vmatprep.subr.bf16.mxu1 %v6710_v47  ;;  %v7950_v47 = vld [vmem:[#allocation2 + $0x10c8] sm:$0xff] }
 0x190   : > { %v6966_v22 = vcombine.high %v7948_v31, %v7950_v47 }
 0x191   : > { %4639 = vmatpush1.bf16.msra.mxu0 %v6707_v16  ;;  %v7960_v16 = vld [vmem:[#allocation2 + $0x1140] sm:$0xff] }
 0x192   : > { %4745 = vmatpush1.bf16.msra.mxu1 %v6709_v19  ;;  %4640 = vmatprep.subr.bf16.mxu0 %v6740_v24  ;;  %v7962_v19 = vld [vmem:[#allocation2 + $0x11c0] sm:$0xff]  ;;  %v6931_v24 = vcombine.low %v7936_v56, %v7938_v34 }
 0x193   : > { %4746 = vmatprep.subr.bf16.mxu1 %v6742_v43  ;;  %v6932_v43 = vcombine.high %v7936_v56, %v7938_v34 }
 0x195   : > { %4641 = vmatpush1.bf16.msra.mxu0 %v6739_v18  ;;  %v6934_v18 = vcombine.high %v7940_v39, %v7942_v40 }
 0x196   : > { %4747 = vmatpush1.bf16.msra.mxu1 %v6741_v37  ;;  %4642 = vmatprep.subr.bf16.mxu0 %v6772_v59  ;;  %v6963_v37 = vcombine.low %v7944_v50, %v7946_v41  ;;  %v6964_v59 = vcombine.high %v7944_v50, %v7946_v41 }
 0x197   : > { %4748 = vmatprep.subr.bf16.mxu1 %v6774_v60  ;;  %v6965_v60 = vcombine.low %v7948_v31, %v7950_v47 }
 0x199   : > { %4643 = vmatpush1.bf16.msra.mxu0 %v6771_v1  ;;  %v6995_v1 = vcombine.low %v7960_v16, %v7962_v19 }
 0x19a   : > { %4749 = vmatpush1.bf16.msra.mxu1 %v6773_v2  ;;  %4644 = vmatprep.subr.bf16.mxu0 %v6804_v45  ;;  %v6996_v2 = vcombine.high %v7960_v16, %v7962_v19  ;;  %v299_v16 = vld [vmem:[#allocation2 + $0x150] sm:$0xff] }
 0x19b   : > { %4750 = vmatprep.subr.bf16.mxu1 %v6806_v3  ;;  %v315_v19 = vld [vmem:[#allocation2 + $0x1d0] sm:$0xff] }
 0x19d   : > { %4645 = vmatpush1.bf16.msra.mxu0 %v6803_v7 }
 0x19e   : > { %4751 = vmatpush1.bf16.msra.mxu1 %v6805_v8  ;;  %4646 = vmatprep.subr.bf16.mxu0 %v6836_v11 }
 0x19f   : > { %4752 = vmatprep.subr.bf16.mxu1 %v6838_v13 }
 0x1a1   : > { %4647 = vmatpush1.bf16.msra.mxu0 %v6835_v28 }
 0x1a2   : > { %4753 = vmatpush1.bf16.msra.mxu1 %v6837_v51  ;;  %4648 = vmatprep.subr.bf16.mxu0 %v6868_v25 }
 0x1a3   : > { %4754 = vmatprep.subr.bf16.mxu1 %v6870_v15  ;;  %v4073_v17 = vpop.f32.mrb[8].mxu0  ;;  %v4179_v20 = vpop.f32.mrb[8].mxu1 }
 0x1a4   : > { %v7190_v62 = vadd.f32 %v4073_v17, %v7740_v9  ;;  %v4075_v21 = vpop.f32.mrb[9].mxu0  ;;  %v7198_v45 = vadd.f32 %v4179_v20, %v7740_v9  ;;  %v4181_v49 = vpop.f32.mrb[9].mxu1  ;;  %v8004_v17 = vld [vmem:[#allocation2 + $0x58] sm:$0xff] }
 0x1a5   : > { %4649 = vmatpush1.bf16.msra.mxu0 %v6867_v57  ;;  %v7191_v3 = vadd.f32 %v4075_v21, %v7740_v9  ;;  %v4077_v5 = vpop.f32.mrb[10].mxu0  ;;  %v7199_v8 = vadd.f32 %v4181_v49, %v7740_v9  ;;  %v4183_v13 = vpop.f32.mrb[10].mxu1 }
 0x1a6   : > { %4755 = vmatpush1.bf16.msra.mxu1 %v6869_v32  ;;  %vm5474_vm2 = vcmp.ge.f32.partialorder %v7190_v62, 0.0  ;;  %v5602_v7 = vmul.f32 0.1, %v7190_v62  ;;  %v7192_v11 = vadd.f32 %v4077_v5, %v7790_v42  ;;  %4650 = vmatprep.subr.bf16.mxu0 %v6900_v54  ;;  %v4079_v14 = vpop.f32.mrb[11].mxu0  ;;  %vm5476_vm3 = vcmp.ge.f32.partialorder %v7198_v45, 0.0  ;;  %v4185_v4 = vpop.f32.mrb[11].mxu1 }
 0x1a7   : > { %v5604_v23 = vmul.f32 0.1, %v7198_v45  ;;  %vm5475_vm4 = vcmp.ge.f32.partialorder %v7191_v3, 0.0  ;;  %v5603_v26 = vmul.f32 0.1, %v7191_v3  ;;  %4756 = vmatprep.subr.bf16.mxu1 %v6902_v10  ;;  %vm5477_vm5 = vcmp.ge.f32.partialorder %v7199_v8, 0.0 }
 0x1a8   : > { %v5730_v27 = vsel %vm5474_vm2, %v7190_v62, %v5602_v7  ;;  %v5605_v28 = vmul.f32 0.1, %v7199_v8  ;;  %vm5506_vm6 = vcmp.ge.f32.partialorder %v7192_v11, 0.0  ;;  %v5634_v51 = vmul.f32 0.1, %v7192_v11  ;;  %v8002_v10 = vld [vmem:[#allocation2 + $0xd0] sm:$0xff] }
 0x1a9   : > { %v5732_v44 = vsel %vm5476_vm3, %v7198_v45, %v5604_v23  ;;  %v5731_v33 = vsel %vm5475_vm4, %v7191_v3, %v5603_v26  ;;  %v7200_v25 = vadd.f32 %v4183_v13, %v7790_v42  ;;  %4651 = vmatpush1.bf16.msra.mxu0 %v6899_v52  ;;  %v7193_v32 = vadd.f32 %v4079_v14, %v7790_v42  ;;  %v8006_v62 = vld [vmem:[#allocation2 + $0xd8] sm:$0xff] }
 0x1aa   : > { %v7112_v15 = vpack.c.bf16 %v5731_v33, %v5730_v27  ;;  %v5733_v57 = vsel %vm5477_vm5, %v7199_v8, %v5605_v28  ;;  %v7201_v54 = vadd.f32 %v4185_v4, %v7790_v42  ;;  %4757 = vmatpush1.bf16.msra.mxu1 %v6901_v38  ;;  %v5762_v52 = vsel %vm5506_vm6, %v7192_v11, %v5634_v51 }
 0x1ab   : > { %v7113_v20 = vpack.c.bf16 %v5733_v57, %v5732_v44  ;;  %vm5508_vm7 = vcmp.ge.f32.partialorder %v7200_v25, 0.0  ;;  %v5636_v21 = vmul.f32 0.1, %v7200_v25  ;;  %4652 = vmatprep.subr.bf16.mxu0 %v6932_v43  ;;  %4758 = vmatprep.subr.bf16.mxu1 %v6934_v18  ;;  %v4083_v45 = vpop.f32.mrb[12].mxu0  ;;  %vm5507_vm8 = vcmp.ge.f32.partialorder %v7193_v32, 0.0  ;;  %v4189_v7 = vpop.f32.mrb[12].mxu1 }
 0x1ac   : > { %6240 = vst [vmem:[%s7819_s22 + $0x10] sm:$0xff] %v7112_v15  ;;  %v5635_v3 = vmul.f32 0.1, %v7193_v32  ;;  %vm5509_vm9 = vcmp.ge.f32.partialorder %v7201_v54, 0.0  ;;  %v5637_v38 = vmul.f32 0.1, %v7201_v54  ;;  %v7194_v5 = vadd.f32 %v4083_v45, %v7778_v35 }
 0x1ad   : > { %6241 = vst [vmem:[%s7819_s22 + $0x18] sm:$0xff] %v7113_v20  ;;  %v5764_v49 = vsel %vm5508_vm7, %v7200_v25, %v5636_v21  ;;  %4653 = vmatpush1.bf16.msra.mxu0 %v6931_v24  ;;  %v4085_v8 = vpop.f32.mrb[13].mxu0  ;;  %v6456_v43 = vcombine.high %v7998_v29, %v8002_v10  ;;  %v6458_v18 = vcombine.high %v8004_v17, %v8006_v62  ;;  %v4191_v34 = vpop.f32.mrb[13].mxu1 }
 0x1ae   : > { %v5763_v11 = vsel %vm5507_vm8, %v7193_v32, %v5635_v3  ;;  %v5765_v13 = vsel %vm5509_vm9, %v7201_v54, %v5637_v38  ;;  %4759 = vmatpush1.bf16.msra.mxu1 %v6933_v36  ;;  %v7202_v14 = vadd.f32 %v4189_v7, %v7778_v35  ;;  %v7195_v56 = vadd.f32 %v4085_v8, %v7778_v35  ;;  %v4087_v24 = vpop.f32.mrb[14].mxu0  ;;  %v4193_v28 = vpop.f32.mrb[14].mxu1  ;;  %v331_v3 = vld [vmem:[#allocation2 + $0x250] sm:$0xff]  ;;  %v332_v38 = vld [vmem:[#allocation2 + $0x258] sm:$0xff] }
 0x1af   : > { %v7128_v23 = vpack.c.bf16 %v5763_v11, %v5762_v52  ;;  %v7129_v26 = vpack.c.bf16 %v5765_v13, %v5764_v49  ;;  %vm5538_vm10 = vcmp.ge.f32.partialorder %v7194_v5, 0.0  ;;  %v5666_v27 = vmul.f32 0.1, %v7194_v5  ;;  %4675 = vmatprep.subr.bf16.mxu0 %v6964_v59  ;;  %4781 = vmatprep.subr.bf16.mxu1 %v6966_v22  ;;  %v4089_v39 = vpop.f32.mrb[15].mxu0  ;;  %v4195_v51 = vpop.f32.mrb[15].mxu1  ;;  %v348_v49 = vld [vmem:[#allocation2 + $0x2d8] sm:$0xff] }
 0x1b0   : > { %vm5540_vm11 = vcmp.ge.f32.partialorder %v7202_v14, 0.0  ;;  %v5668_v40 = vmul.f32 0.1, %v7202_v14  ;;  %vm5539_vm12 = vcmp.ge.f32.partialorder %v7195_v56, 0.0  ;;  %v5667_v36 = vmul.f32 0.1, %v7195_v56  ;;  %4655 = vmatmul.mubr.bf16.vlgmr.msra.gmra.mrb[32].mxu0 %v7857_v63 }
 0x1b1   : > { %6259 = vst [vmem:[%s7819_s22 + $0x90] sm:$0xff] %v7128_v23  ;;  %6260 = vst [vmem:[%s7819_s22 + $0x98] sm:$0xff] %v7129_v26  ;;  %v5794_v4 = vsel %vm5538_vm10, %v7194_v5, %v5666_v27  ;;  %v7203_v44 = vadd.f32 %v4191_v34, %v7778_v35  ;;  %v7196_v33 = vadd.f32 %v4087_v24, %v7834_v46  ;;  %4761 = vmatmul.mubr.bf16.vlgmr.msra.gmra.mrb[32].mxu1 %v7857_v63  ;;  %v379_v7 = vld [vmem:[#allocation2 + $0x3d0] sm:$0xff]  ;;  %v364_v8 = vld [vmem:[#allocation2 + $0x358] sm:$0xff] }
 0x1b2   : > { %v7204_v59 = vadd.f32 %v4193_v28, %v7834_v46  ;;  %v5796_v22 = vsel %vm5540_vm11, %v7202_v14, %v5668_v40  ;;  %v5795_v25 = vsel %vm5539_vm12, %v7195_v56, %v5667_v36  ;;  %v7197_v15 = vadd.f32 %v4089_v39, %v7834_v46  ;;  %4676 = vmatpush1.bf16.msra.mxu0 %v6963_v37  ;;  %v395_v14 = vld [vmem:[#allocation2 + $0x450] sm:$0xff]  ;;  %v396_v34 = vld [vmem:[#allocation2 + $0x458] sm:$0xff] }
 0x1b3   : > { %v7205_v57 = vadd.f32 %v4195_v51, %v7834_v46  ;;  %v7144_v32 = vpack.c.bf16 %v5795_v25, %v5794_v4  ;;  %vm5541_vm13 = vcmp.ge.f32.partialorder %v7203_v44, 0.0  ;;  %v5669_v54 = vmul.f32 0.1, %v7203_v44  ;;  %4782 = vmatpush1.bf16.msra.mxu1 %v6965_v60  ;;  %4664 = vmatprep.mubr.bf16.mxu0 %v7875_v12  ;;  %v411_v56 = vld [vmem:[#allocation2 + $0x4d0] sm:$0xff]  ;;  %v412_v24 = vld [vmem:[#allocation2 + $0x4d8] sm:$0xff] }
 0x1b4   : > { %vm5570_vm14 = vcmp.ge.f32.partialorder %v7196_v33, 0.0  ;;  %v5698_v63 = vmul.f32 0.1, %v7196_v33  ;;  %vm5572_vm15 = vcmp.ge.f32.partialorder %v7204_v59, 0.0  ;;  %v5700_v20 = vmul.f32 0.1, %v7204_v59  ;;  %4770 = vmatprep.mubr.bf16.mxu1 %v7875_v12  ;;  %4677 = vmatprep.subr.bf16.mxu0 %v6996_v2 }
 0x1b5   : > { %vm5571_vm1 = vcmp.ge.f32.partialorder %v7197_v15, 0.0  ;;  %6275 = vst [vmem:[%s7819_s22 + $0x110] sm:$0xff] %v7144_v32  ;;  %v5797_v50 = vsel %vm5541_vm13, %v7203_v44, %v5669_v54  ;;  %v5699_v41 = vmul.f32 0.1, %v7197_v15  ;;  %vm5573_vm2 = vcmp.ge.f32.partialorder %v7205_v57, 0.0  ;;  %4783 = vmatprep.subr.bf16.mxu1 %v6998_v53  ;;  %v427_v39 = vld [vmem:[#allocation2 + $0x550] sm:$0xff] }
 0x1b6   : > { %v5701_v37 = vmul.f32 0.1, %v7205_v57  ;;  %v7145_v31 = vpack.c.bf16 %v5797_v50, %v5796_v22  ;;  %v5826_v47 = vsel %vm5570_vm14, %v7196_v33, %v5698_v63  ;;  %v5828_v12 = vsel %vm5572_vm15, %v7204_v59, %v5700_v20  ;;  %4678 = vmatpush1.bf16.msra.mxu0 %v6995_v1  ;;  %v443_v40 = vld [vmem:[#allocation2 + $0x5d0] sm:$0xff]  ;;  %v428_v4 = vld [vmem:[#allocation2 + $0x558] sm:$0xff] }
 0x1b7   : > { %v5827_v60 = vsel %vm5571_vm1, %v7197_v15, %v5699_v41  ;;  %4784 = vmatpush1.bf16.msra.mxu1 %v6997_v6  ;;  %4834 = vmatprep.subr.bf16.mxu0 %v6456_v43  ;;  %v6455_v1 = vcombine.low %v7998_v29, %v8002_v10  ;;  %v6457_v6 = vcombine.low %v8004_v17, %v8006_v62  ;;  %v363_v62 = vld [vmem:[#allocation2 + $0x350] sm:$0xff]  ;;  %v380_v43 = vld [vmem:[#allocation2 + $0x3d8] sm:$0xff] }
 0x1b8   : > { %v5829_v2 = vsel %vm5573_vm2, %v7205_v57, %v5701_v37  ;;  %6276 = vst [vmem:[%s7819_s22 + $0x118] sm:$0xff] %v7145_v31  ;;  %v7160_v52 = vpack.c.bf16 %v5827_v60, %v5826_v47  ;;  %4665 = vmatmul.mubr.bf16.gmra.mrb[36].mxu0 %v7895_v30  ;;  %4940 = vmatprep.subr.bf16.mxu1 %v6458_v18  ;;  %v8086_v36 = vld [vmem:[%s7645_s11 + $0x4] ss:$12 sps:$4 sm:$0xff]   ;;  %v444_v44 = vld [vmem:[#allocation2 + $0x5d8] sm:$0xff] }
 0x1b9   : > { %v7161_v53 = vpack.c.bf16 %v5829_v2, %v5828_v12  ;;  %4771 = vmatmul.mubr.bf16.gmra.mrb[36].mxu1 %v7895_v30  ;;  %4707 = vmatprep.mubr.bf16.mxu0 %v7556_v0  ;;  %v6488_v21 = vcombine.high %v299_v16, %v315_v19  ;;  %v6490_v45 = vcombine.high %v300_v55, %v316_v58  ;;  %v347_v30 = vld [vmem:[#allocation2 + $0x2d0] sm:$0xff]  ;;  %v460_v15 = vld [vmem:[#allocation2 + $0x658] sm:$0xff] }
 0x1ba   : > { %6291 = vst [vmem:[%s7819_s22 + $0x190] sm:$0xff] %v7160_v52  ;;  %4813 = vmatprep.mubr.bf16.mxu1 %v7556_v0  ;;  %v6487_v5 = vcombine.low %v299_v16, %v315_v19  ;;  %v6489_v29 = vcombine.low %v300_v55, %v316_v58  ;;  %v6520_v10 = vcombine.high %v331_v3, %v347_v30  ;;  %v459_v22 = vld [vmem:[#allocation2 + $0x650] sm:$0xff]  ;;  %v476_v57 = vld [vmem:[#allocation2 + $0x6d8] sm:$0xff] }
 0x1bb   : > { %6292 = vst [vmem:[%s7819_s22 + $0x198] sm:$0xff] %v7161_v53  ;;  %v6522_v17 = vcombine.high %v332_v38, %v348_v49  ;;  %v6519_v18 = vcombine.low %v331_v3, %v347_v30  ;;  %v6552_v11 = vcombine.high %v363_v62, %v379_v7  ;;  %v6554_v13 = vcombine.high %v364_v8, %v380_v43  ;;  %v475_v25 = vld [vmem:[#allocation2 + $0x6d0] sm:$0xff]  ;;  %v492_v37 = vld [vmem:[#allocation2 + $0x758] sm:$0xff] }
 0x1bc   : > { %v6551_v23 = vcombine.low %v363_v62, %v379_v7  ;;  %v6553_v26 = vcombine.low %v364_v8, %v380_v43  ;;  %v6584_v27 = vcombine.high %v395_v14, %v411_v56  ;;  %v6586_v28 = vcombine.high %v396_v34, %v412_v24  ;;  %v491_v50 = vld [vmem:[#allocation2 + $0x750] sm:$0xff]  ;;  %v508_v31 = vld [vmem:[#allocation2 + $0x7d8] sm:$0xff] }
 0x1bd   : > { %v6585_v33 = vcombine.low %v396_v34, %v412_v24  ;;  %v6616_v59 = vcombine.high %v427_v39, %v443_v40  ;;  %v6618_v51 = vcombine.high %v428_v4, %v444_v44  ;;  %v6615_v32 = vcombine.low %v427_v39, %v443_v40  ;;  %v507_v41 = vld [vmem:[#allocation2 + $0x7d0] sm:$0xff]  ;;  %v524_v16 = vld [vmem:[#allocation2 + $0x858] sm:$0xff] }
 0x1be   : > { %v6617_v54 = vcombine.low %v428_v4, %v444_v44  ;;  %v6648_v63 = vcombine.high %v459_v22, %v475_v25  ;;  %v6650_v20 = vcombine.high %v460_v15, %v476_v57  ;;  %v6647_v47 = vcombine.low %v459_v22, %v475_v25  ;;  %v523_v52 = vld [vmem:[#allocation2 + $0x850] sm:$0xff]  ;;  %v540_v19 = vld [vmem:[#allocation2 + $0x8d8] sm:$0xff] }
 0x1bf   : > { %v6649_v12 = vcombine.low %v460_v15, %v476_v57  ;;  %v6680_v60 = vcombine.high %v491_v50, %v507_v41  ;;  %v6682_v2 = vcombine.high %v492_v37, %v508_v31  ;;  %v539_v53 = vld [vmem:[#allocation2 + $0x8d0] sm:$0xff]  ;;  %v6679_v55 = vcombine.low %v491_v50, %v507_v41  ;;  %v556_v3 = vld [vmem:[#allocation2 + $0x958] sm:$0xff] }
 0x1c0   : > { %7027 = vmatmul.mubr.msk.bf16.vlgmr.msra.gmra.mrb[32].mxu0 %vm3767_vm0, %v7911_v48  ;;  %v6681_v58 = vcombine.low %v492_v37, %v508_v31  ;;  %v572_v30 = vld [vmem:[#allocation2 + $0x9d8] sm:$0xff]  ;;  %v8090_v57 = vld [vmem:[#allocation2 + $0xe50] sm:$0xff] }
 0x1c1   : > { %7029 = vmatmul.mubr.msk.bf16.vlgmr.msra.gmra.mrb[32].mxu1 %vm3767_vm0, %v7911_v48  ;;  %4835 = vmatpush1.bf16.msra.mxu0 %v6455_v1  ;;  %v6521_v48 = vcombine.low %v332_v38, %v348_v49  ;;  %v6712_v1 = vcombine.high %v523_v52, %v539_v53  ;;  %v6711_v38 = vcombine.low %v523_v52, %v539_v53  ;;  %v588_v62 = vld [vmem:[#allocation2 + $0xa58] sm:$0xff]  ;;  %v8098_v41 = vld [vmem:[#allocation2 + $0xf50] sm:$0xff] }
 0x1c2   : > { %4941 = vmatpush1.bf16.msra.mxu1 %v6457_v6  ;;  %4836 = vmatprep.subr.bf16.mxu0 %v6488_v21  ;;  %v6714_v6 = vcombine.high %v524_v16, %v540_v19  ;;  %v555_v21 = vld [vmem:[#allocation2 + $0x950] sm:$0xff]  ;;  %v6713_v49 = vcombine.low %v524_v16, %v540_v19  ;;  %v604_v7 = vld [vmem:[#allocation2 + $0xad8] sm:$0xff]  ;;  %v6745_v43 = vcombine.low %v556_v3, %v572_v30 }
 0x1c3   : > { %4942 = vmatprep.subr.bf16.mxu1 %v6490_v45  ;;  %4717 = vmatprep.mubr.bf16.mxu0 %v7556_v0  ;;  %v571_v45 = vld [vmem:[#allocation2 + $0x9d0] sm:$0xff]  ;;  %v6777_v24 = vcombine.low %v588_v62, %v604_v7  ;;  %v652_v39 = vld [vmem:[#allocation2 + $0xc58] sm:$0xff] }
 0x1c4   : > { %4823 = vmatprep.mubr.bf16.mxu1 %v7556_v0  ;;  %v6743_v8 = vcombine.low %v555_v21, %v571_v45  ;;  %v668_v40 = vld [vmem:[#allocation2 + $0xcd8] sm:$0xff]  ;;  %v8100_v37 = vld [vmem:[#allocation2 + $0xfd0] sm:$0xff] }
 0x1c5   : > { %4837 = vmatpush1.bf16.msra.mxu0 %v6487_v5  ;;  %v6744_v5 = vcombine.high %v555_v21, %v571_v45  ;;  %v684_v22 = vld [vmem:[#allocation2 + $0xd58] sm:$0xff]  ;;  %v8108_v53 = vld [vmem:[#allocation2 + $0x10d0] sm:$0xff] }
 0x1c6   : > { %4943 = vmatpush1.bf16.msra.mxu1 %v6489_v29  ;;  %4838 = vmatprep.subr.bf16.mxu0 %v6520_v10  ;;  %v6746_v29 = vcombine.high %v556_v3, %v572_v30  ;;  %v587_v10 = vld [vmem:[#allocation2 + $0xa50] sm:$0xff]  ;;  %v700_v25 = vld [vmem:[#allocation2 + $0xdd8] sm:$0xff]  ;;  %v6935_v3 = vcombine.low %v8098_v41, %v8100_v37  ;;  %v6936_v30 = vcombine.high %v8098_v41, %v8100_v37 }
 0x1c7   : > { %4944 = vmatprep.subr.bf16.mxu1 %v6522_v17  ;;  %v603_v17 = vld [vmem:[#allocation2 + $0xad0] sm:$0xff]  ;;  %v8096_v50 = vld [vmem:[#allocation2 + $0xed8] sm:$0xff]  ;;  %v6874_v31 = vcombine.high %v684_v22, %v700_v25  ;;  %v6873_v52 = vcombine.low %v684_v22, %v700_v25 }
 0x1c8   : > { %7028 = vmatmul.mubr.msk.bf16.gmra.mrb[36].mxu0 %vm3767_vm0, %v7920_v61  ;;  %v6775_v34 = vcombine.low %v587_v10, %v603_v17  ;;  %v8110_v16 = vld [vmem:[#allocation2 + $0x1058] sm:$0xff]  ;;  %v8122_v21 = vld [vmem:[#allocation2 + $0x1150] sm:$0xff] }
 0x1c9   : > { %7030 = vmatmul.mubr.msk.bf16.gmra.mrb[36].mxu1 %vm3767_vm0, %v7920_v61  ;;  %4839 = vmatpush1.bf16.msra.mxu0 %v6519_v18  ;;  %v6583_v61 = vcombine.low %v395_v14, %v411_v56  ;;  %v6776_v18 = vcombine.high %v587_v10, %v603_v17  ;;  %v620_v14 = vld [vmem:[#allocation2 + $0xb58] sm:$0xff]  ;;  %v8124_v45 = vld [vmem:[#allocation2 + $0x11d0] sm:$0xff] }
 0x1ca   : > { %4945 = vmatpush1.bf16.msra.mxu1 %v6521_v48  ;;  %4840 = vmatprep.subr.bf16.mxu0 %v6552_v11  ;;  %v6778_v48 = vcombine.high %v588_v62, %v604_v7  ;;  %v619_v11 = vld [vmem:[#allocation2 + $0xb50] sm:$0xff]  ;;  %v636_v56 = vld [vmem:[#allocation2 + $0xbd8] sm:$0xff] }
 0x1cb   : > { %4946 = vmatprep.subr.bf16.mxu1 %v6554_v13  ;;  %4866 = vmatprep.mubr.bf16.mxu0 %v8086_v36  ;;  %v635_v13 = vld [vmem:[#allocation2 + $0xbd0] sm:$0xff]  ;;  %v6809_v44 = vcombine.low %v620_v14, %v636_v56  ;;  %v8112_v19 = vld [vmem:[#allocation2 + $0x10d8] sm:$0xff] }
 0x1cc   : > { %4972 = vmatprep.mubr.bf16.mxu1 %v8086_v36  ;;  %v6807_v4 = vcombine.low %v619_v11, %v635_v13  ;;  %v6969_v7 = vcombine.low %v8110_v16, %v8112_v19 }
 0x1cd   : > { %4841 = vmatpush1.bf16.msra.mxu0 %v6551_v23  ;;  %v6808_v23 = vcombine.high %v619_v11, %v635_v13  ;;  %v6999_v11 = vcombine.low %v8122_v21, %v8124_v45  ;;  %v7000_v13 = vcombine.high %v8122_v21, %v8124_v45  ;;  %v301_v21 = vld [vmem:[#allocation2 + $0x160] sm:$0xff] }
 0x1ce   : > { %4947 = vmatpush1.bf16.msra.mxu1 %v6553_v26  ;;  %4842 = vmatprep.subr.bf16.mxu0 %v6584_v27  ;;  %v6810_v26 = vcombine.high %v620_v14, %v636_v56  ;;  %v651_v27 = vld [vmem:[#allocation2 + $0xc50] sm:$0xff]  ;;  %v317_v45 = vld [vmem:[#allocation2 + $0x1e0] sm:$0xff] }
 0x1cf   : > { %4948 = vmatprep.subr.bf16.mxu1 %v6586_v28  ;;  %v667_v28 = vld [vmem:[#allocation2 + $0xcd0] sm:$0xff] }
 0x1d0   : > { %v6839_v15 = vcombine.low %v651_v27, %v667_v28 }
 0x1d1   : > { %4843 = vmatpush1.bf16.msra.mxu0 %v6583_v61  ;;  %v6840_v61 = vcombine.high %v651_v27, %v667_v28 }
 0x1d2   : > { %4949 = vmatpush1.bf16.msra.mxu1 %v6585_v33  ;;  %4844 = vmatprep.subr.bf16.mxu0 %v6616_v59  ;;  %v6842_v33 = vcombine.high %v652_v39, %v668_v40  ;;  %v683_v59 = vld [vmem:[#allocation2 + $0xd50] sm:$0xff] }
 0x1d3   : > { %4950 = vmatprep.subr.bf16.mxu1 %v6618_v51  ;;  %v699_v51 = vld [vmem:[#allocation2 + $0xdd0] sm:$0xff] }
 0x1d5   : > { %4845 = vmatpush1.bf16.msra.mxu0 %v6615_v32  ;;  %v8092_v32 = vld [vmem:[#allocation2 + $0xed0] sm:$0xff] }
 0x1d6   : > { %4951 = vmatpush1.bf16.msra.mxu1 %v6617_v54  ;;  %4846 = vmatprep.subr.bf16.mxu0 %v6648_v63  ;;  %v8094_v54 = vld [vmem:[#allocation2 + $0xe58] sm:$0xff]  ;;  %v6841_v63 = vcombine.low %v652_v39, %v668_v40 }
 0x1d7   : > { %4952 = vmatprep.subr.bf16.mxu1 %v6650_v20  ;;  %v6872_v20 = vcombine.high %v683_v59, %v699_v51 }
 0x1d9   : > { %4847 = vmatpush1.bf16.msra.mxu0 %v6647_v47  ;;  %v8102_v47 = vld [vmem:[#allocation2 + $0xf58] sm:$0xff] }
 0x1da   : > { %4953 = vmatpush1.bf16.msra.mxu1 %v6649_v12  ;;  %4848 = vmatprep.subr.bf16.mxu0 %v6680_v60  ;;  %v8104_v12 = vld [vmem:[#allocation2 + $0xfd8] sm:$0xff]  ;;  %v8106_v60 = vld [vmem:[#allocation2 + $0x1050] sm:$0xff] }
 0x1db   : > { %4954 = vmatprep.subr.bf16.mxu1 %v6682_v2  ;;  %v6871_v2 = vcombine.low %v683_v59, %v699_v51  ;;  %v6938_v10 = vcombine.high %v8102_v47, %v8104_v12  ;;  %v6967_v17 = vcombine.low %v8106_v60, %v8108_v53  ;;  %v6968_v62 = vcombine.high %v8106_v60, %v8108_v53 }
 0x1dd   : > { %4849 = vmatpush1.bf16.msra.mxu0 %v6679_v55  ;;  %v6903_v55 = vcombine.low %v8090_v57, %v8092_v32 }
 0x1de   : > { %4955 = vmatpush1.bf16.msra.mxu1 %v6681_v58  ;;  %4850 = vmatprep.subr.bf16.mxu0 %v6712_v1  ;;  %v6904_v58 = vcombine.high %v8090_v57, %v8092_v32  ;;  %v6905_v1 = vcombine.low %v8094_v54, %v8096_v50  ;;  %v8160_v32 = vld [vmem:[#allocation2 + $0x60] sm:$0xff] }
 0x1df   : > { %4956 = vmatprep.subr.bf16.mxu1 %v6714_v6  ;;  %v6906_v6 = vcombine.high %v8094_v54, %v8096_v50 }
 0x1e1   : > { %4851 = vmatpush1.bf16.msra.mxu0 %v6711_v38  ;;  %v6937_v38 = vcombine.low %v8102_v47, %v8104_v12 }
 0x1e2   : > { %4957 = vmatpush1.bf16.msra.mxu1 %v6713_v49  ;;  %4852 = vmatprep.subr.bf16.mxu0 %v6744_v5  ;;  %v8132_v49 = vld [vmem:[#allocation2 + $0x1158] sm:$0xff] }
 0x1e3   : > { %4958 = vmatprep.subr.bf16.mxu1 %v6746_v29  ;;  %v8134_v5 = vld [vmem:[#allocation2 + $0x11d8] sm:$0xff] }
 0x1e5   : > { %4853 = vmatpush1.bf16.msra.mxu0 %v6743_v8 }
 0x1e6   : > { %4959 = vmatpush1.bf16.msra.mxu1 %v6745_v43  ;;  %4854 = vmatprep.subr.bf16.mxu0 %v6776_v18 }
 0x1e7   : > { %4960 = vmatprep.subr.bf16.mxu1 %v6778_v48  ;;  %v6970_v48 = vcombine.high %v8110_v16, %v8112_v19 }
 0x1e9   : > { %4855 = vmatpush1.bf16.msra.mxu0 %v6775_v34 }
 0x1ea   : > { %4961 = vmatpush1.bf16.msra.mxu1 %v6777_v24  ;;  %4856 = vmatprep.subr.bf16.mxu0 %v6808_v23  ;;  %v7001_v23 = vcombine.low %v8132_v49, %v8134_v5 }
 0x1eb   : > { %4962 = vmatprep.subr.bf16.mxu1 %v6810_v26  ;;  %v7002_v26 = vcombine.high %v8132_v49, %v8134_v5  ;;  %v302_v49 = vld [vmem:[#allocation2 + $0x168] sm:$0xff] }
 0x1ec   : > { %v318_v5 = vld [vmem:[#allocation2 + $0x1e8] sm:$0xff] }
 0x1ed   : > { %4857 = vmatpush1.bf16.msra.mxu0 %v6807_v4 }
 0x1ee   : > { %4963 = vmatpush1.bf16.msra.mxu1 %v6809_v44  ;;  %4858 = vmatprep.subr.bf16.mxu0 %v6840_v61 }
 0x1ef   : > { %4964 = vmatprep.subr.bf16.mxu1 %v6842_v33 }
 0x1f1   : > { %4859 = vmatpush1.bf16.msra.mxu0 %v6839_v15 }
 0x1f2   : > { %4965 = vmatpush1.bf16.msra.mxu1 %v6841_v63  ;;  %4860 = vmatprep.subr.bf16.mxu0 %v6872_v20 }
 0x1f3   : > { %4966 = vmatprep.subr.bf16.mxu1 %v6874_v31  ;;  %v4285_v29 = vpop.f32.mrb[16].mxu0  ;;  %v4391_v43 = vpop.f32.mrb[16].mxu1  ;;  %v8164_v31 = vld [vmem:[#allocation2 + $0xe0] sm:$0xff] }
 0x1f4   : > { %v7206_v8 = vadd.f32 %v4285_v29, %v7740_v9  ;;  %v4287_v18 = vpop.f32.mrb[17].mxu0  ;;  %v7214_v14 = vadd.f32 %v4391_v43, %v7740_v9  ;;  %v4393_v34 = vpop.f32.mrb[17].mxu1 }
 0x1f5   : > { %4861 = vmatpush1.bf16.msra.mxu0 %v6871_v2  ;;  %v7207_v56 = vadd.f32 %v4287_v18, %v7740_v9  ;;  %v4289_v24 = vpop.f32.mrb[18].mxu0  ;;  %v7215_v28 = vadd.f32 %v4393_v34, %v7740_v9  ;;  %v4395_v40 = vpop.f32.mrb[18].mxu1  ;;  %v8166_v2 = vld [vmem:[#allocation2 + $0x68] sm:$0xff] }
 0x1f6   : > { %4967 = vmatpush1.bf16.msra.mxu1 %v6873_v52  ;;  %vm5478_vm3 = vcmp.ge.f32.partialorder %v7206_v8, 0.0  ;;  %v5606_v27 = vmul.f32 0.1, %v7206_v8  ;;  %v7208_v39 = vadd.f32 %v4289_v24, %v7790_v42  ;;  %4862 = vmatprep.subr.bf16.mxu0 %v6904_v58  ;;  %v4291_v4 = vpop.f32.mrb[19].mxu0  ;;  %vm5480_vm4 = vcmp.ge.f32.partialorder %v7214_v14, 0.0  ;;  %v4397_v51 = vpop.f32.mrb[19].mxu1 }
 0x1f7   : > { %v5608_v44 = vmul.f32 0.1, %v7214_v14  ;;  %vm5479_vm5 = vcmp.ge.f32.partialorder %v7207_v56, 0.0  ;;  %v5607_v61 = vmul.f32 0.1, %v7207_v56  ;;  %4968 = vmatprep.subr.bf16.mxu1 %v6906_v6  ;;  %vm5481_vm6 = vcmp.ge.f32.partialorder %v7215_v28, 0.0 }
 0x1f8   : > { %v5734_v33 = vsel %vm5478_vm3, %v7206_v8, %v5606_v27  ;;  %v5609_v59 = vmul.f32 0.1, %v7215_v28  ;;  %vm5510_vm7 = vcmp.ge.f32.partialorder %v7208_v39, 0.0  ;;  %v5638_v15 = vmul.f32 0.1, %v7208_v39  ;;  %v8168_v52 = vld [vmem:[#allocation2 + $0xe8] sm:$0xff] }
 0x1f9   : > { %v5736_v22 = vsel %vm5480_vm4, %v7214_v14, %v5608_v44  ;;  %v5735_v25 = vsel %vm5479_vm5, %v7207_v56, %v5607_v61  ;;  %v7216_v57 = vadd.f32 %v4395_v40, %v7790_v42  ;;  %4863 = vmatpush1.bf16.msra.mxu0 %v6903_v55  ;;  %v7209_v20 = vadd.f32 %v4291_v4, %v7790_v42  ;;  %v8193_v44 = vld [vmem:[%s7645_s11] ss:$12 sps:$4 sm:$0xff]  }
 0x1fa   : > { %v7114_v54 = vpack.c.bf16 %v5735_v25, %v5734_v33  ;;  %v5737_v63 = vsel %vm5481_vm6, %v7215_v28, %v5609_v59  ;;  %v7217_v50 = vadd.f32 %v4397_v51, %v7790_v42  ;;  %4969 = vmatpush1.bf16.msra.mxu1 %v6905_v1  ;;  %v5766_v55 = vsel %vm5510_vm7, %v7208_v39, %v5638_v15 }
 0x1fb   : > { %v7115_v58 = vpack.c.bf16 %v5737_v63, %v5736_v22  ;;  %vm5512_vm8 = vcmp.ge.f32.partialorder %v7216_v57, 0.0  ;;  %v5640_v6 = vmul.f32 0.1, %v7216_v57  ;;  %4864 = vmatprep.subr.bf16.mxu0 %v6936_v30  ;;  %4970 = vmatprep.subr.bf16.mxu1 %v6938_v10  ;;  %v4295_v29 = vpop.f32.mrb[20].mxu0  ;;  %vm5511_vm9 = vcmp.ge.f32.partialorder %v7209_v20, 0.0  ;;  %v4401_v14 = vpop.f32.mrb[20].mxu1 }
 0x1fc   : > { %6242 = vst [vmem:[%s7819_s22 + $0x20] sm:$0xff] %v7114_v54  ;;  %v5639_v8 = vmul.f32 0.1, %v7209_v20  ;;  %vm5513_vm10 = vcmp.ge.f32.partialorder %v7217_v50, 0.0  ;;  %v5641_v1 = vmul.f32 0.1, %v7217_v50  ;;  %v7210_v18 = vadd.f32 %v4295_v29, %v7778_v35 }
 0x1fd   : > { %6243 = vst [vmem:[%s7819_s22 + $0x28] sm:$0xff] %v7115_v58  ;;  %v5768_v43 = vsel %vm5512_vm8, %v7216_v57, %v5640_v6  ;;  %4865 = vmatpush1.bf16.msra.mxu0 %v6935_v3  ;;  %v4297_v56 = vpop.f32.mrb[21].mxu0  ;;  %v6460_v30 = vcombine.high %v8160_v32, %v8164_v31  ;;  %v6462_v10 = vcombine.high %v8166_v2, %v8168_v52  ;;  %v4403_v37 = vpop.f32.mrb[21].mxu1  ;;  %v8211_v63 = vld [vmem:[%s7645_s11 + $0x1c] ss:$12 sps:$4 sm:$0xff]  }
 0x1fe   : > { %v5767_v34 = vsel %vm5511_vm9, %v7209_v20, %v5639_v8  ;;  %v5769_v24 = vsel %vm5513_vm10, %v7217_v50, %v5641_v1  ;;  %4971 = vmatpush1.bf16.msra.mxu1 %v6937_v38  ;;  %v7218_v27 = vadd.f32 %v4401_v14, %v7778_v35  ;;  %v7211_v41 = vadd.f32 %v4297_v56, %v7778_v35  ;;  %v4299_v3 = vpop.f32.mrb[22].mxu0  ;;  %v4405_v4 = vpop.f32.mrb[22].mxu1  ;;  %v8231_v6 = vld [vmem:[%s7645_s11 + $0x18] ss:$12 sps:$4 sm:$0xff]   ;;  %v334_v14 = vld [vmem:[#allocation2 + $0x268] sm:$0xff] }
 0x1ff   : > { %v7130_v28 = vpack.c.bf16 %v5767_v34, %v5766_v55  ;;  %v7131_v39 = vpack.c.bf16 %v5769_v24, %v5768_v43  ;;  %vm5542_vm11 = vcmp.ge.f32.partialorder %v7210_v18, 0.0  ;;  %v5670_v40 = vmul.f32 0.1, %v7210_v18  ;;  %4887 = vmatprep.subr.bf16.mxu0 %v6968_v62  ;;  %4993 = vmatprep.subr.bf16.mxu1 %v6970_v48  ;;  %v4301_v47 = vpop.f32.mrb[23].mxu0  ;;  %v4407_v48 = vpop.f32.mrb[23].mxu1  ;;  %v333_v1 = vld [vmem:[#allocation2 + $0x260] sm:$0xff] }
 0x200   : > { %vm5544_vm12 = vcmp.ge.f32.partialorder %v7218_v27, 0.0  ;;  %v5672_v12 = vmul.f32 0.1, %v7218_v27  ;;  %vm5543_vm13 = vcmp.ge.f32.partialorder %v7211_v41, 0.0  ;;  %v5671_v38 = vmul.f32 0.1, %v7211_v41  ;;  %4867 = vmatmul.mubr.bf16.vlgmr.msra.gmra.mrb[40].mxu0 %v8193_v44 }
 0x201   : > { %6261 = vst [vmem:[%s7819_s22 + $0xa0] sm:$0xff] %v7130_v28  ;;  %6262 = vst [vmem:[%s7819_s22 + $0xa8] sm:$0xff] %v7131_v39  ;;  %v5798_v61 = vsel %vm5542_vm11, %v7210_v18, %v5670_v40  ;;  %v7219_v33 = vadd.f32 %v4403_v37, %v7778_v35  ;;  %v7212_v62 = vadd.f32 %v4299_v3, %v7834_v46  ;;  %4973 = vmatmul.mubr.bf16.vlgmr.msra.gmra.mrb[40].mxu1 %v8193_v44  ;;  %v349_v43 = vld [vmem:[#allocation2 + $0x2e0] sm:$0xff]  ;;  %v8247_v18 = vld [vmem:[%s7645_s11 + $0x8] ss:$12 sps:$4 sm:$0xff]  }
 0x202   : > { %v7220_v59 = vadd.f32 %v4405_v4, %v7834_v46  ;;  %v5800_v51 = vsel %vm5544_vm12, %v7218_v27, %v5672_v12  ;;  %v5799_v22 = vsel %vm5543_vm13, %v7211_v41, %v5671_v38  ;;  %v7213_v25 = vadd.f32 %v4301_v47, %v7834_v46  ;;  %4888 = vmatpush1.bf16.msra.mxu0 %v6967_v17  ;;  %v350_v56 = vld [vmem:[#allocation2 + $0x2e8] sm:$0xff]  ;;  %v397_v28 = vld [vmem:[#allocation2 + $0x460] sm:$0xff] }
 0x203   : > { %v7221_v15 = vadd.f32 %v4407_v48, %v7834_v46  ;;  %v7146_v57 = vpack.c.bf16 %v5799_v22, %v5798_v61  ;;  %vm5545_vm14 = vcmp.ge.f32.partialorder %v7219_v33, 0.0  ;;  %v5673_v54 = vmul.f32 0.1, %v7219_v33  ;;  %4994 = vmatpush1.bf16.msra.mxu1 %v6969_v7  ;;  %4876 = vmatprep.mubr.bf16.mxu0 %v8211_v63  ;;  %v366_v34 = vld [vmem:[#allocation2 + $0x368] sm:$0xff]  ;;  %v413_v39 = vld [vmem:[#allocation2 + $0x4e0] sm:$0xff] }
 0x204   : > { %vm5574_vm15 = vcmp.ge.f32.partialorder %v7212_v62, 0.0  ;;  %v5702_v20 = vmul.f32 0.1, %v7212_v62  ;;  %vm5576_vm1 = vcmp.ge.f32.partialorder %v7220_v59, 0.0  ;;  %v5704_v50 = vmul.f32 0.1, %v7220_v59  ;;  %4982 = vmatprep.mubr.bf16.mxu1 %v8211_v63  ;;  %4889 = vmatprep.subr.bf16.mxu0 %v7000_v13 }
 0x205   : > { %vm5575_vm2 = vcmp.ge.f32.partialorder %v7213_v25, 0.0  ;;  %6277 = vst [vmem:[%s7819_s22 + $0x120] sm:$0xff] %v7146_v57  ;;  %v5801_v60 = vsel %vm5545_vm14, %v7219_v33, %v5673_v54  ;;  %v5703_v53 = vmul.f32 0.1, %v7213_v25  ;;  %vm5577_vm3 = vcmp.ge.f32.partialorder %v7221_v15, 0.0  ;;  %4995 = vmatprep.subr.bf16.mxu1 %v7002_v26  ;;  %v382_v24 = vld [vmem:[#allocation2 + $0x3e8] sm:$0xff] }
 0x206   : > { %v5705_v16 = vmul.f32 0.1, %v7221_v15  ;;  %v7147_v19 = vpack.c.bf16 %v5801_v60, %v5800_v51  ;;  %v5830_v17 = vsel %vm5574_vm15, %v7212_v62, %v5702_v20  ;;  %v5832_v7 = vsel %vm5576_vm1, %v7220_v59, %v5704_v50  ;;  %4890 = vmatpush1.bf16.msra.mxu0 %v6999_v11  ;;  %v8256_v40 = vld [vmem:[%s7645_s11 + $0x20] ss:$12 sps:$4 sm:$0xff]  }
 0x207   : > { %v5831_v13 = vsel %vm5575_vm2, %v7213_v25, %v5703_v53  ;;  %4996 = vmatpush1.bf16.msra.mxu1 %v7001_v23  ;;  %5046 = vmatprep.subr.bf16.mxu0 %v6460_v30  ;;  %v6459_v11 = vcombine.low %v8160_v32, %v8164_v31  ;;  %v6461_v23 = vcombine.low %v8166_v2, %v8168_v52  ;;  %v365_v52 = vld [vmem:[#allocation2 + $0x360] sm:$0xff]  ;;  %v398_v4 = vld [vmem:[#allocation2 + $0x468] sm:$0xff] }
 0x208   : > { %v5833_v58 = vsel %vm5577_vm3, %v7221_v15, %v5705_v16  ;;  %6278 = vst [vmem:[%s7819_s22 + $0x128] sm:$0xff] %v7147_v19  ;;  %v7162_v55 = vpack.c.bf16 %v5831_v13, %v5830_v17  ;;  %4877 = vmatmul.mubr.bf16.gmra.mrb[44].mxu0 %v8231_v6  ;;  %5152 = vmatprep.subr.bf16.mxu1 %v6462_v10  ;;  %v381_v10 = vld [vmem:[#allocation2 + $0x3e0] sm:$0xff]  ;;  %v414_v47 = vld [vmem:[#allocation2 + $0x4e8] sm:$0xff] }
 0x209   : > { %v7163_v26 = vpack.c.bf16 %v5833_v58, %v5832_v7  ;;  %4983 = vmatmul.mubr.bf16.gmra.mrb[44].mxu1 %v8231_v6  ;;  %4919 = vmatprep.mubr.bf16.mxu0 %v7556_v0  ;;  %v6492_v29 = vcombine.high %v301_v21, %v317_v45  ;;  %v6494_v8 = vcombine.high %v302_v49, %v318_v5  ;;  %v429_v62 = vld [vmem:[#allocation2 + $0x560] sm:$0xff]  ;;  %v430_v48 = vld [vmem:[#allocation2 + $0x568] sm:$0xff] }
 0x20a   : > { %6293 = vst [vmem:[%s7819_s22 + $0x1a0] sm:$0xff] %v7162_v55  ;;  %5025 = vmatprep.mubr.bf16.mxu1 %v7556_v0  ;;  %v6491_v30 = vcombine.low %v301_v21, %v317_v45  ;;  %v6493_v32 = vcombine.low %v302_v49, %v318_v5  ;;  %v6524_v31 = vcombine.high %v333_v1, %v349_v43  ;;  %v445_v59 = vld [vmem:[#allocation2 + $0x5e0] sm:$0xff]  ;;  %v446_v51 = vld [vmem:[#allocation2 + $0x5e8] sm:$0xff] }
 0x20b   : > { %6294 = vst [vmem:[%s7819_s22 + $0x1a8] sm:$0xff] %v7163_v26  ;;  %v6526_v2 = vcombine.high %v334_v14, %v350_v56  ;;  %v6523_v27 = vcombine.low %v333_v1, %v349_v43  ;;  %v6525_v41 = vcombine.low %v334_v14, %v350_v56  ;;  %v6556_v37 = vcombine.high %v365_v52, %v381_v10  ;;  %v461_v54 = vld [vmem:[#allocation2 + $0x660] sm:$0xff]  ;;  %v462_v50 = vld [vmem:[#allocation2 + $0x668] sm:$0xff] }
 0x20c   : > { %v6558_v3 = vcombine.high %v366_v34, %v382_v24  ;;  %v6555_v12 = vcombine.low %v365_v52, %v381_v10  ;;  %v6557_v38 = vcombine.low %v366_v34, %v382_v24  ;;  %v6588_v61 = vcombine.high %v397_v28, %v413_v39  ;;  %v477_v20 = vld [vmem:[#allocation2 + $0x6e0] sm:$0xff]  ;;  %v478_v60 = vld [vmem:[#allocation2 + $0x6e8] sm:$0xff] }
 0x20d   : > { %v6590_v33 = vcombine.high %v398_v4, %v414_v47  ;;  %v6587_v22 = vcombine.low %v397_v28, %v413_v39  ;;  %v6589_v25 = vcombine.low %v398_v4, %v414_v47  ;;  %v6620_v15 = vcombine.high %v429_v62, %v445_v59  ;;  %v493_v17 = vld [vmem:[#allocation2 + $0x760] sm:$0xff]  ;;  %v494_v13 = vld [vmem:[#allocation2 + $0x768] sm:$0xff] }
 0x20e   : > { %v6622_v57 = vcombine.high %v430_v48, %v446_v51  ;;  %v6619_v53 = vcombine.low %v429_v62, %v445_v59  ;;  %v6621_v16 = vcombine.low %v430_v48, %v446_v51  ;;  %v6652_v19 = vcombine.high %v461_v54, %v477_v20  ;;  %v509_v7 = vld [vmem:[#allocation2 + $0x7e0] sm:$0xff]  ;;  %v510_v58 = vld [vmem:[#allocation2 + $0x7e8] sm:$0xff] }
 0x20f   : > { %v6651_v55 = vcombine.low %v461_v54, %v477_v20  ;;  %v6653_v26 = vcombine.low %v462_v50, %v478_v60  ;;  %v6684_v21 = vcombine.high %v493_v17, %v509_v7  ;;  %v6686_v45 = vcombine.high %v494_v13, %v510_v58  ;;  %v525_v49 = vld [vmem:[#allocation2 + $0x860] sm:$0xff] }
 0x210   : > { %7031 = vmatmul.mubr.msk.bf16.vlgmr.msra.gmra.mrb[40].mxu0 %vm3767_vm0, %v8247_v18  ;;  %v541_v5 = vld [vmem:[#allocation2 + $0x8e0] sm:$0xff] }
 0x211   : > { %7033 = vmatmul.mubr.msk.bf16.vlgmr.msra.gmra.mrb[40].mxu1 %vm3767_vm0, %v8247_v18  ;;  %5047 = vmatpush1.bf16.msra.mxu0 %v6459_v11  ;;  %v526_v11 = vld [vmem:[#allocation2 + $0x868] sm:$0xff]  ;;  %v6716_v1 = vcombine.high %v525_v49, %v541_v5  ;;  %v557_v14 = vld [vmem:[#allocation2 + $0x960] sm:$0xff] }
 0x212   : > { %5153 = vmatpush1.bf16.msra.mxu1 %v6461_v23  ;;  %5048 = vmatprep.subr.bf16.mxu0 %v6492_v29  ;;  %v542_v23 = vld [vmem:[#allocation2 + $0x8e8] sm:$0xff]  ;;  %v6683_v29 = vcombine.low %v493_v17, %v509_v7  ;;  %v573_v56 = vld [vmem:[#allocation2 + $0x9e0] sm:$0xff] }
 0x213   : > { %5154 = vmatprep.subr.bf16.mxu1 %v6494_v8  ;;  %4929 = vmatprep.mubr.bf16.mxu0 %v7556_v0  ;;  %v6685_v8 = vcombine.low %v494_v13, %v510_v58  ;;  %v6718_v43 = vcombine.high %v526_v11, %v542_v23  ;;  %v6748_v52 = vcombine.high %v557_v14, %v573_v56  ;;  %v589_v34 = vld [vmem:[#allocation2 + $0xa60] sm:$0xff]  ;;  %v8268_v7 = vld [vmem:[#allocation2 + $0xe68] sm:$0xff] }
 0x214   : > { %5035 = vmatprep.mubr.bf16.mxu1 %v7556_v0  ;;  %v605_v24 = vld [vmem:[#allocation2 + $0xae0] sm:$0xff] }
 0x215   : > { %5049 = vmatpush1.bf16.msra.mxu0 %v6491_v30  ;;  %v558_v30 = vld [vmem:[#allocation2 + $0x968] sm:$0xff]  ;;  %v6780_v28 = vcombine.high %v589_v34, %v605_v24  ;;  %v621_v4 = vld [vmem:[#allocation2 + $0xb60] sm:$0xff] }
 0x216   : > { %5155 = vmatpush1.bf16.msra.mxu1 %v6493_v32  ;;  %5050 = vmatprep.subr.bf16.mxu0 %v6524_v31  ;;  %v574_v32 = vld [vmem:[#allocation2 + $0x9e8] sm:$0xff]  ;;  %v6715_v31 = vcombine.low %v525_v49, %v541_v5  ;;  %v637_v47 = vld [vmem:[#allocation2 + $0xbe0] sm:$0xff] }
 0x217   : > { %5156 = vmatprep.subr.bf16.mxu1 %v6526_v2  ;;  %v6717_v2 = vcombine.low %v526_v11, %v542_v23  ;;  %v6750_v10 = vcombine.high %v558_v30, %v574_v32  ;;  %v6812_v62 = vcombine.high %v621_v4, %v637_v47  ;;  %v653_v48 = vld [vmem:[#allocation2 + $0xc60] sm:$0xff]  ;;  %v8276_v49 = vld [vmem:[#allocation2 + $0xf68] sm:$0xff] }
 0x218   : > { %7032 = vmatmul.mubr.msk.bf16.gmra.mrb[44].mxu0 %vm3767_vm0, %v8256_v40  ;;  %v669_v51 = vld [vmem:[#allocation2 + $0xce0] sm:$0xff]  ;;  %v8278_v5 = vld [vmem:[#allocation2 + $0xfe8] sm:$0xff] }
 0x219   : > { %7034 = vmatmul.mubr.msk.bf16.gmra.mrb[44].mxu1 %vm3767_vm0, %v8256_v40  ;;  %5051 = vmatpush1.bf16.msra.mxu0 %v6523_v27  ;;  %v590_v27 = vld [vmem:[#allocation2 + $0xa68] sm:$0xff]  ;;  %v6844_v54 = vcombine.high %v653_v48, %v669_v51  ;;  %v8266_v17 = vld [vmem:[#allocation2 + $0xee0] sm:$0xff] }
 0x21a   : > { %5157 = vmatpush1.bf16.msra.mxu1 %v6525_v41  ;;  %5052 = vmatprep.subr.bf16.mxu0 %v6556_v37  ;;  %v606_v41 = vld [vmem:[#allocation2 + $0xae8] sm:$0xff]  ;;  %v6747_v37 = vcombine.low %v557_v14, %v573_v56  ;;  %v8280_v11 = vld [vmem:[#allocation2 + $0x1060] sm:$0xff] }
 0x21b   : > { %5158 = vmatprep.subr.bf16.mxu1 %v6558_v3  ;;  %5078 = vmatprep.mubr.bf16.mxu0 %v8086_v36  ;;  %v6749_v3 = vcombine.low %v558_v30, %v574_v32  ;;  %v6782_v39 = vcombine.high %v590_v27, %v606_v41 }
 0x21c   : > { %5184 = vmatprep.mubr.bf16.mxu1 %v8086_v36  ;;  %v6654_v36 = vcombine.high %v462_v50, %v478_v60  ;;  %v685_v50 = vld [vmem:[#allocation2 + $0xd60] sm:$0xff] }
 0x21d   : > { %5053 = vmatpush1.bf16.msra.mxu0 %v6555_v12  ;;  %v622_v12 = vld [vmem:[#allocation2 + $0xb68] sm:$0xff]  ;;  %v701_v60 = vld [vmem:[#allocation2 + $0xde0] sm:$0xff] }
 0x21e   : > { %5159 = vmatpush1.bf16.msra.mxu1 %v6557_v38  ;;  %5054 = vmatprep.subr.bf16.mxu0 %v6588_v61  ;;  %v638_v38 = vld [vmem:[#allocation2 + $0xbe8] sm:$0xff]  ;;  %v6779_v61 = vcombine.low %v589_v34, %v605_v24  ;;  %v6876_v58 = vcombine.high %v685_v50, %v701_v60  ;;  %v6875_v23 = vcombine.low %v685_v50, %v701_v60 }
 0x21f   : > { %5160 = vmatprep.subr.bf16.mxu1 %v6590_v33  ;;  %v6781_v33 = vcombine.low %v590_v27, %v606_v41  ;;  %v6814_v59 = vcombine.high %v622_v12, %v638_v38  ;;  %v6941_v34 = vcombine.low %v8276_v49, %v8278_v5  ;;  %v8306_v24 = vld [vmem:[#allocation2 + $0x1168] sm:$0xff] }
 0x220   : > { %v8308_v27 = vld [vmem:[#allocation2 + $0x11e8] sm:$0xff] }
 0x221   : > { %5055 = vmatpush1.bf16.msra.mxu0 %v6587_v22  ;;  %v654_v22 = vld [vmem:[#allocation2 + $0xc68] sm:$0xff] }
 0x222   : > { %5161 = vmatpush1.bf16.msra.mxu1 %v6589_v25  ;;  %5056 = vmatprep.subr.bf16.mxu0 %v6620_v15  ;;  %v670_v25 = vld [vmem:[#allocation2 + $0xce8] sm:$0xff]  ;;  %v6811_v15 = vcombine.low %v621_v4, %v637_v47 }
 0x223   : > { %5162 = vmatprep.subr.bf16.mxu1 %v6622_v57  ;;  %v6813_v57 = vcombine.low %v622_v12, %v638_v38  ;;  %v6846_v20 = vcombine.high %v654_v22, %v670_v25  ;;  %v6845_v13 = vcombine.low %v654_v22, %v670_v25  ;;  %v7005_v22 = vcombine.low %v8306_v24, %v8308_v27 }
 0x224   : > { %v7006_v25 = vcombine.high %v8306_v24, %v8308_v27  ;;  %v304_v24 = vld [vmem:[#allocation2 + $0x178] sm:$0xff] }
 0x225   : > { %5057 = vmatpush1.bf16.msra.mxu0 %v6619_v53  ;;  %v686_v53 = vld [vmem:[#allocation2 + $0xd68] sm:$0xff]  ;;  %v320_v27 = vld [vmem:[#allocation2 + $0x1f8] sm:$0xff] }
 0x226   : > { %5163 = vmatpush1.bf16.msra.mxu1 %v6621_v16  ;;  %5058 = vmatprep.subr.bf16.mxu0 %v6652_v19  ;;  %v702_v16 = vld [vmem:[#allocation2 + $0xde8] sm:$0xff]  ;;  %v6843_v19 = vcombine.low %v653_v48, %v669_v51 }
 0x227   : > { %5164 = vmatprep.subr.bf16.mxu1 %v6654_v36  ;;  %v8264_v36 = vld [vmem:[#allocation2 + $0xe60] sm:$0xff] }
 0x228   : > { %v6907_v14 = vcombine.low %v8264_v36, %v8266_v17  ;;  %v6908_v56 = vcombine.high %v8264_v36, %v8266_v17 }
 0x229   : > { %5059 = vmatpush1.bf16.msra.mxu0 %v6651_v55  ;;  %v8270_v55 = vld [vmem:[#allocation2 + $0xee8] sm:$0xff] }
 0x22a   : > { %5165 = vmatpush1.bf16.msra.mxu1 %v6653_v26  ;;  %5060 = vmatprep.subr.bf16.mxu0 %v6684_v21  ;;  %v8272_v26 = vld [vmem:[#allocation2 + $0xf60] sm:$0xff]  ;;  %v6909_v30 = vcombine.low %v8268_v7, %v8270_v55  ;;  %v6910_v32 = vcombine.high %v8268_v7, %v8270_v55  ;;  %v8334_v55 = vld [vmem:[#allocation2 + $0x70] sm:$0xff] }
 0x22b   : > { %5166 = vmatprep.subr.bf16.mxu1 %v6686_v45  ;;  %v8274_v21 = vld [vmem:[#allocation2 + $0xfe0] sm:$0xff]  ;;  %v6878_v45 = vcombine.high %v686_v53, %v702_v16 }
 0x22d   : > { %5061 = vmatpush1.bf16.msra.mxu0 %v6683_v29  ;;  %v6877_v29 = vcombine.low %v686_v53, %v702_v16 }
 0x22e   : > { %5167 = vmatpush1.bf16.msra.mxu1 %v6685_v8  ;;  %5062 = vmatprep.subr.bf16.mxu0 %v6716_v1  ;;  %v8282_v8 = vld [vmem:[#allocation2 + $0x10e0] sm:$0xff]  ;;  %v8284_v1 = vld [vmem:[#allocation2 + $0x1068] sm:$0xff] }
 0x22f   : > { %5168 = vmatprep.subr.bf16.mxu1 %v6718_v43  ;;  %v8286_v43 = vld [vmem:[#allocation2 + $0x10e8] sm:$0xff] }
 0x230   : > { %v6974_v38 = vcombine.high %v8284_v1, %v8286_v43 }
 0x231   : > { %5063 = vmatpush1.bf16.msra.mxu0 %v6715_v31  ;;  %v8296_v31 = vld [vmem:[#allocation2 + $0x1160] sm:$0xff] }
 0x232   : > { %5169 = vmatpush1.bf16.msra.mxu1 %v6717_v2  ;;  %5064 = vmatprep.subr.bf16.mxu0 %v6748_v52  ;;  %v8298_v2 = vld [vmem:[#allocation2 + $0x11e0] sm:$0xff]  ;;  %v6939_v52 = vcombine.low %v8272_v26, %v8274_v21 }
 0x233   : > { %5170 = vmatprep.subr.bf16.mxu1 %v6750_v10  ;;  %v6940_v10 = vcombine.high %v8272_v26, %v8274_v21 }
 0x235   : > { %5065 = vmatpush1.bf16.msra.mxu0 %v6747_v37  ;;  %v6942_v37 = vcombine.high %v8276_v49, %v8278_v5 }
 0x236   : > { %5171 = vmatpush1.bf16.msra.mxu1 %v6749_v3  ;;  %5066 = vmatprep.subr.bf16.mxu0 %v6780_v28  ;;  %v6971_v3 = vcombine.low %v8280_v11, %v8282_v8  ;;  %v6972_v28 = vcombine.high %v8280_v11, %v8282_v8 }
 0x237   : > { %5172 = vmatprep.subr.bf16.mxu1 %v6782_v39  ;;  %v6973_v39 = vcombine.low %v8284_v1, %v8286_v43 }
 0x239   : > { %5067 = vmatpush1.bf16.msra.mxu0 %v6779_v61  ;;  %v7003_v61 = vcombine.low %v8296_v31, %v8298_v2 }
 0x23a   : > { %5173 = vmatpush1.bf16.msra.mxu1 %v6781_v33  ;;  %5068 = vmatprep.subr.bf16.mxu0 %v6812_v62  ;;  %v7004_v33 = vcombine.high %v8296_v31, %v8298_v2  ;;  %v303_v31 = vld [vmem:[#allocation2 + $0x170] sm:$0xff] }
 0x23b   : > { %5174 = vmatprep.subr.bf16.mxu1 %v6814_v59  ;;  %v319_v2 = vld [vmem:[#allocation2 + $0x1f0] sm:$0xff] }
 0x23d   : > { %5069 = vmatpush1.bf16.msra.mxu0 %v6811_v15 }
 0x23e   : > { %5175 = vmatpush1.bf16.msra.mxu1 %v6813_v57  ;;  %5070 = vmatprep.subr.bf16.mxu0 %v6844_v54 }
 0x23f   : > { %5176 = vmatprep.subr.bf16.mxu1 %v6846_v20 }
 0x241   : > { %5071 = vmatpush1.bf16.msra.mxu0 %v6843_v19 }
 0x242   : > { %5177 = vmatpush1.bf16.msra.mxu1 %v6845_v13  ;;  %5072 = vmatprep.subr.bf16.mxu0 %v6876_v58 }
 0x243   : > { %5178 = vmatprep.subr.bf16.mxu1 %v6878_v45  ;;  %v4497_v41 = vpop.f32.mrb[24].mxu0 }
 0x244   : > { %v7222_v4 = vadd.f32 %v4497_v41, %v7740_v9  ;;  %v4603_v47 = vpop.f32.mrb[24].mxu1  ;;  %v4499_v12 = vpop.f32.mrb[25].mxu0  ;;  %v8340_v41 = vld [vmem:[#allocation2 + $0x78] sm:$0xff] }
 0x245   : > { %5073 = vmatpush1.bf16.msra.mxu0 %v6875_v23  ;;  %v7230_v62 = vadd.f32 %v4603_v47, %v7740_v9  ;;  %v7223_v59 = vadd.f32 %v4499_v12, %v7740_v9  ;;  %v4605_v48 = vpop.f32.mrb[25].mxu1  ;;  %v4501_v51 = vpop.f32.mrb[26].mxu0 }
 0x246   : > { %5179 = vmatpush1.bf16.msra.mxu1 %v6877_v29  ;;  %vm5482_vm4 = vcmp.ge.f32.partialorder %v7222_v4, 0.0  ;;  %v5610_v15 = vmul.f32 0.1, %v7222_v4  ;;  %v7231_v57 = vadd.f32 %v4605_v48, %v7740_v9  ;;  %v7224_v54 = vadd.f32 %v4501_v51, %v7790_v42  ;;  %v4607_v20 = vpop.f32.mrb[26].mxu1  ;;  %5074 = vmatprep.subr.bf16.mxu0 %v6908_v56  ;;  %v4503_v50 = vpop.f32.mrb[27].mxu0 }
 0x247   : > { %vm5484_vm5 = vcmp.ge.f32.partialorder %v7230_v62, 0.0  ;;  %v5612_v60 = vmul.f32 0.1, %v7230_v62  ;;  %vm5483_vm6 = vcmp.ge.f32.partialorder %v7223_v59, 0.0  ;;  %v5611_v53 = vmul.f32 0.1, %v7223_v59  ;;  %5180 = vmatprep.subr.bf16.mxu1 %v6910_v32 }
 0x248   : > { %v5738_v16 = vsel %vm5482_vm4, %v7222_v4, %v5610_v15  ;;  %vm5485_vm7 = vcmp.ge.f32.partialorder %v7231_v57, 0.0  ;;  %v5613_v19 = vmul.f32 0.1, %v7231_v57  ;;  %vm5514_vm8 = vcmp.ge.f32.partialorder %v7224_v54, 0.0  ;;  %v4609_v36 = vpop.f32.mrb[27].mxu1  ;;  %v8338_v32 = vld [vmem:[#allocation2 + $0xf0] sm:$0xff] }
 0x249   : > { %v5740_v17 = vsel %vm5484_vm5, %v7230_v62, %v5612_v60  ;;  %v5739_v7 = vsel %vm5483_vm6, %v7223_v59, %v5611_v53  ;;  %v5642_v13 = vmul.f32 0.1, %v7224_v54  ;;  %v7232_v58 = vadd.f32 %v4607_v20, %v7790_v42  ;;  %5075 = vmatpush1.bf16.msra.mxu0 %v6907_v14  ;;  %v8342_v4 = vld [vmem:[#allocation2 + $0xf8] sm:$0xff] }
 0x24a   : > { %v7116_v45 = vpack.c.bf16 %v5739_v7, %v5738_v16  ;;  %v5741_v23 = vsel %vm5485_vm7, %v7231_v57, %v5613_v19  ;;  %v7225_v29 = vadd.f32 %v4503_v50, %v7790_v42  ;;  %v7233_v56 = vadd.f32 %v4609_v36, %v7790_v42  ;;  %5181 = vmatpush1.bf16.msra.mxu1 %v6909_v30 }
 0x24b   : > { %v7117_v47 = vpack.c.bf16 %v5741_v23, %v5740_v17  ;;  %v5770_v14 = vsel %vm5514_vm8, %v7224_v54, %v5642_v13  ;;  %vm5516_vm9 = vcmp.ge.f32.partialorder %v7232_v58, 0.0  ;;  %v5644_v12 = vmul.f32 0.1, %v7232_v58  ;;  %5076 = vmatprep.subr.bf16.mxu0 %v6940_v10  ;;  %5182 = vmatprep.subr.bf16.mxu1 %v6942_v37  ;;  %v4507_v62 = vpop.f32.mrb[28].mxu0 }
 0x24c   : > { %6244 = vst [vmem:[%s7819_s22 + $0x30] sm:$0xff] %v7116_v45  ;;  %vm5515_vm10 = vcmp.ge.f32.partialorder %v7225_v29, 0.0  ;;  %v5643_v59 = vmul.f32 0.1, %v7225_v29  ;;  %vm5517_vm11 = vcmp.ge.f32.partialorder %v7233_v56, 0.0  ;;  %v7226_v51 = vadd.f32 %v4507_v62, %v7778_v35  ;;  %v4613_v15 = vpop.f32.mrb[28].mxu1 }
 0x24d   : > { %v5645_v30 = vmul.f32 0.1, %v7233_v56  ;;  %6245 = vst [vmem:[%s7819_s22 + $0x38] sm:$0xff] %v7117_v47  ;;  %v5772_v48 = vsel %vm5516_vm9, %v7232_v58, %v5644_v12  ;;  %5077 = vmatpush1.bf16.msra.mxu0 %v6939_v52  ;;  %v4509_v57 = vpop.f32.mrb[29].mxu0  ;;  %v6464_v10 = vcombine.high %v8334_v55, %v8338_v32  ;;  %v6466_v37 = vcombine.high %v8340_v41, %v8342_v4  ;;  %v4615_v21 = vpop.f32.mrb[29].mxu1 }
 0x24e   : > { %v5771_v54 = vsel %vm5515_vm10, %v7225_v29, %v5643_v59  ;;  %5183 = vmatpush1.bf16.msra.mxu1 %v6941_v34  ;;  %v7234_v50 = vadd.f32 %v4613_v15, %v7778_v35  ;;  %v7227_v26 = vadd.f32 %v4509_v57, %v7778_v35  ;;  %v4511_v52 = vpop.f32.mrb[30].mxu0  ;;  %vm5546_vm12 = vcmp.ge.f32.partialorder %v7226_v51, 0.0  ;;  %v4617_v19 = vpop.f32.mrb[30].mxu1  ;;  %5099 = vmatprep.subr.bf16.mxu0 %v6972_v28  ;;  %v335_v59 = vld [vmem:[#allocation2 + $0x270] sm:$0xff]  ;;  %v368_v57 = vld [vmem:[#allocation2 + $0x378] sm:$0xff] }
 0x24f   : > { %v5773_v20 = vsel %vm5517_vm11, %v7233_v56, %v5645_v30  ;;  %v7132_v60 = vpack.c.bf16 %v5771_v54, %v5770_v14  ;;  %v5674_v16 = vmul.f32 0.1, %v7226_v51  ;;  %5205 = vmatprep.subr.bf16.mxu1 %v6974_v38  ;;  %v4513_v49 = vpop.f32.mrb[31].mxu0  ;;  %v7235_v17 = vadd.f32 %v4615_v21, %v7778_v35  ;;  %v4619_v13 = vpop.f32.mrb[31].mxu1  ;;  %v336_v30 = vld [vmem:[#allocation2 + $0x278] sm:$0xff]  ;;  %v383_v15 = vld [vmem:[#allocation2 + $0x3f0] sm:$0xff] }
 0x250   : > { %v7133_v53 = vpack.c.bf16 %v5773_v20, %v5772_v48  ;;  %vm5548_vm13 = vcmp.ge.f32.partialorder %v7234_v50, 0.0  ;;  %v5676_v5 = vmul.f32 0.1, %v7234_v50  ;;  %vm5547_vm14 = vcmp.ge.f32.partialorder %v7227_v26, 0.0  ;;  %5079 = vmatmul.mubr.bf16.vlgmr.msra.gmra.mrb[48].mxu0 %v8193_v44  ;;  %v352_v48 = vld [vmem:[#allocation2 + $0x2f8] sm:$0xff] }
 0x251   : > { %v5675_v34 = vmul.f32 0.1, %v7227_v26  ;;  %6263 = vst [vmem:[%s7819_s22 + $0xb0] sm:$0xff] %v7132_v60  ;;  %v5802_v36 = vsel %vm5546_vm12, %v7226_v51, %v5674_v16  ;;  %v7228_v7 = vadd.f32 %v4511_v52, %v7834_v46  ;;  %v7236_v28 = vadd.f32 %v4617_v19, %v7834_v46  ;;  %5185 = vmatmul.mubr.bf16.vlgmr.msra.gmra.mrb[48].mxu1 %v8193_v44  ;;  %v400_v21 = vld [vmem:[#allocation2 + $0x478] sm:$0xff] }
 0x252   : > { %6264 = vst [vmem:[%s7819_s22 + $0xb8] sm:$0xff] %v7133_v53  ;;  %v5804_v38 = vsel %vm5548_vm13, %v7234_v50, %v5676_v5  ;;  %v7229_v45 = vadd.f32 %v4513_v49, %v7834_v46  ;;  %v7237_v23 = vadd.f32 %v4619_v13, %v7834_v46  ;;  %5100 = vmatpush1.bf16.msra.mxu0 %v6971_v3  ;;  %vm5549_vm15 = vcmp.ge.f32.partialorder %v7235_v17, 0.0  ;;  %v399_v50 = vld [vmem:[#allocation2 + $0x470] sm:$0xff]  ;;  %v416_v52 = vld [vmem:[#allocation2 + $0x4f8] sm:$0xff] }
 0x253   : > { %v5803_v58 = vsel %vm5547_vm14, %v7227_v26, %v5675_v34  ;;  %v5677_v56 = vmul.f32 0.1, %v7235_v17  ;;  %vm5578_vm1 = vcmp.ge.f32.partialorder %v7228_v7, 0.0  ;;  %5206 = vmatpush1.bf16.msra.mxu1 %v6973_v39  ;;  %5088 = vmatprep.mubr.bf16.mxu0 %v8211_v63  ;;  %v5706_v44 = vmul.f32 0.1, %v7228_v7  ;;  %v415_v26 = vld [vmem:[#allocation2 + $0x4f0] sm:$0xff] }
 0x254   : > { %v7148_v29 = vpack.c.bf16 %v5803_v58, %v5802_v36  ;;  %vm5580_vm2 = vcmp.ge.f32.partialorder %v7236_v28, 0.0  ;;  %v5708_v47 = vmul.f32 0.1, %v7236_v28  ;;  %vm5579_vm3 = vcmp.ge.f32.partialorder %v7229_v45, 0.0  ;;  %5194 = vmatprep.mubr.bf16.mxu1 %v8211_v63  ;;  %5101 = vmatprep.subr.bf16.mxu0 %v7004_v33  ;;  %v431_v49 = vld [vmem:[#allocation2 + $0x570] sm:$0xff]  ;;  %v432_v36 = vld [vmem:[#allocation2 + $0x578] sm:$0xff] }
 0x255   : > { %v5805_v11 = vsel %vm5549_vm15, %v7235_v17, %v5677_v56  ;;  %v5707_v8 = vmul.f32 0.1, %v7229_v45  ;;  %vm5581_vm4 = vcmp.ge.f32.partialorder %v7237_v23, 0.0  ;;  %v5709_v3 = vmul.f32 0.1, %v7237_v23  ;;  %5207 = vmatprep.subr.bf16.mxu1 %v7006_v25  ;;  %v447_v5 = vld [vmem:[#allocation2 + $0x5f0] sm:$0xff] }
 0x256   : > { %6279 = vst [vmem:[%s7819_s22 + $0x130] sm:$0xff] %v7148_v29  ;;  %v7149_v1 = vpack.c.bf16 %v5805_v11, %v5804_v38  ;;  %v5834_v43 = vsel %vm5578_vm1, %v7228_v7, %v5706_v44  ;;  %v5836_v63 = vsel %vm5580_vm2, %v7236_v28, %v5708_v47  ;;  %5102 = vmatpush1.bf16.msra.mxu0 %v7003_v61  ;;  %v7491_v34 = vld [vmem:[%s7645_s11 + $0x4] ss:$12 sps:$4 sm:$0xff]   ;;  %v448_v17 = vld [vmem:[#allocation2 + $0x5f8] sm:$0xff] }
 0x257   : > { %v5835_v39 = vsel %vm5579_vm3, %v7229_v45, %v5707_v8  ;;  %v5837_v33 = vsel %vm5581_vm4, %v7237_v23, %v5709_v3  ;;  %5208 = vmatpush1.bf16.msra.mxu1 %v7005_v22  ;;  %5258 = vmatprep.subr.bf16.mxu0 %v6464_v10  ;;  %v6463_v61 = vcombine.low %v8334_v55, %v8338_v32  ;;  %v384_v10 = vld [vmem:[#allocation2 + $0x3f8] sm:$0xff]  ;;  %v463_v38 = vld [vmem:[#allocation2 + $0x670] sm:$0xff] }
 0x258   : > { %6280 = vst [vmem:[%s7819_s22 + $0x138] sm:$0xff] %v7149_v1  ;;  %v7164_v14 = vpack.c.bf16 %v5835_v39, %v5834_v43  ;;  %v7165_v25 = vpack.c.bf16 %v5837_v33, %v5836_v63  ;;  %5089 = vmatmul.mubr.bf16.gmra.mrb[52].mxu0 %v8231_v6  ;;  %5364 = vmatprep.subr.bf16.mxu1 %v6466_v37  ;;  %v479_v58 = vld [vmem:[#allocation2 + $0x6f0] sm:$0xff]  ;;  %v464_v45 = vld [vmem:[#allocation2 + $0x678] sm:$0xff] }
 0x259   : > { %5195 = vmatmul.mubr.bf16.gmra.mrb[52].mxu1 %v8231_v6  ;;  %5131 = vmatprep.mubr.bf16.mxu0 %v7556_v0  ;;  %v6465_v22 = vcombine.low %v8340_v41, %v8342_v4  ;;  %v6496_v12 = vcombine.high %v303_v31, %v319_v2  ;;  %v6498_v62 = vcombine.high %v304_v24, %v320_v27  ;;  %v351_v6 = vld [vmem:[#allocation2 + $0x2f0] sm:$0xff]  ;;  %v480_v23 = vld [vmem:[#allocation2 + $0x6f8] sm:$0xff] }
 0x25a   : > { %6295 = vst [vmem:[%s7819_s22 + $0x1b0] sm:$0xff] %v7164_v14  ;;  %6296 = vst [vmem:[%s7819_s22 + $0x1b8] sm:$0xff] %v7165_v25  ;;  %5237 = vmatprep.mubr.bf16.mxu1 %v7556_v0  ;;  %v6495_v51 = vcombine.low %v303_v31, %v319_v2  ;;  %v6497_v55 = vcombine.low %v304_v24, %v320_v27  ;;  %v6528_v32 = vcombine.high %v335_v59, %v351_v6  ;;  %v367_v4 = vld [vmem:[#allocation2 + $0x370] sm:$0xff]  ;;  %v496_v3 = vld [vmem:[#allocation2 + $0x778] sm:$0xff] }
 0x25b   : > { %v6530_v41 = vcombine.high %v336_v30, %v352_v48  ;;  %v6527_v37 = vcombine.low %v335_v59, %v351_v6  ;;  %v6560_v54 = vcombine.high %v367_v4, %v383_v15  ;;  %v6562_v20 = vcombine.high %v368_v57, %v384_v10  ;;  %v495_v11 = vld [vmem:[#allocation2 + $0x770] sm:$0xff]  ;;  %v512_v1 = vld [vmem:[#allocation2 + $0x7f8] sm:$0xff] }
 0x25c   : > { %v6559_v60 = vcombine.low %v367_v4, %v383_v15  ;;  %v6561_v53 = vcombine.low %v368_v57, %v384_v10  ;;  %v6592_v16 = vcombine.high %v399_v50, %v415_v26  ;;  %v6594_v19 = vcombine.high %v400_v21, %v416_v52  ;;  %v511_v8 = vld [vmem:[#allocation2 + $0x7f0] sm:$0xff]  ;;  %v528_v31 = vld [vmem:[#allocation2 + $0x878] sm:$0xff] }
 0x25d   : > { %v6591_v7 = vcombine.low %v399_v50, %v415_v26  ;;  %v6624_v28 = vcombine.high %v431_v49, %v447_v5  ;;  %v6626_v13 = vcombine.high %v432_v36, %v448_v17  ;;  %v6623_v29 = vcombine.low %v431_v49, %v447_v5  ;;  %v527_v14 = vld [vmem:[#allocation2 + $0x870] sm:$0xff]  ;;  %v544_v2 = vld [vmem:[#allocation2 + $0x8f8] sm:$0xff] }
 0x25e   : > { %v6625_v56 = vcombine.low %v432_v36, %v448_v17  ;;  %v6656_v44 = vcombine.high %v463_v38, %v479_v58  ;;  %v6658_v47 = vcombine.high %v464_v45, %v480_v23  ;;  %v6655_v43 = vcombine.low %v463_v38, %v479_v58  ;;  %v543_v25 = vld [vmem:[#allocation2 + $0x8f0] sm:$0xff]  ;;  %v560_v59 = vld [vmem:[#allocation2 + $0x978] sm:$0xff] }
 0x25f   : > { %v6657_v63 = vcombine.low %v464_v45, %v480_v23  ;;  %v6688_v39 = vcombine.high %v495_v11, %v511_v8  ;;  %v6690_v33 = vcombine.high %v496_v3, %v512_v1  ;;  %v6687_v24 = vcombine.low %v495_v11, %v511_v8  ;;  %v576_v6 = vld [vmem:[#allocation2 + $0x9f8] sm:$0xff]  ;;  %v8422_v45 = vld [vmem:[#allocation2 + $0xe70] sm:$0xff] }
 0x260   : > { %7035 = vmatmul.mubr.msk.bf16.vlgmr.msra.gmra.mrb[48].mxu0 %vm3767_vm0, %v8247_v18  ;;  %v6689_v27 = vcombine.low %v496_v3, %v512_v1  ;;  %v592_v4 = vld [vmem:[#allocation2 + $0xa78] sm:$0xff]  ;;  %v6753_v10 = vcombine.low %v560_v59, %v576_v6  ;;  %v8430_v8 = vld [vmem:[#allocation2 + $0xf70] sm:$0xff] }
 0x261   : > { %7037 = vmatmul.mubr.msk.bf16.vlgmr.msra.gmra.mrb[48].mxu1 %vm3767_vm0, %v8247_v18  ;;  %5259 = vmatpush1.bf16.msra.mxu0 %v6463_v61  ;;  %v6529_v18 = vcombine.low %v336_v30, %v352_v48  ;;  %v6720_v61 = vcombine.high %v527_v14, %v543_v25  ;;  %v6719_v30 = vcombine.low %v527_v14, %v543_v25  ;;  %v608_v15 = vld [vmem:[#allocation2 + $0xaf8] sm:$0xff]  ;;  %v8432_v3 = vld [vmem:[#allocation2 + $0xff0] sm:$0xff] }
 0x262   : > { %5365 = vmatpush1.bf16.msra.mxu1 %v6465_v22  ;;  %5260 = vmatprep.subr.bf16.mxu0 %v6496_v12  ;;  %v6722_v22 = vcombine.high %v528_v31, %v544_v2  ;;  %v559_v12 = vld [vmem:[#allocation2 + $0x970] sm:$0xff]  ;;  %v6721_v48 = vcombine.low %v528_v31, %v544_v2  ;;  %v624_v50 = vld [vmem:[#allocation2 + $0xb78] sm:$0xff] }
 0x263   : > { %5366 = vmatprep.subr.bf16.mxu1 %v6498_v62  ;;  %5141 = vmatprep.mubr.bf16.mxu0 %v7556_v0  ;;  %v575_v62 = vld [vmem:[#allocation2 + $0x9f0] sm:$0xff]  ;;  %v640_v26 = vld [vmem:[#allocation2 + $0xbf8] sm:$0xff] }
 0x264   : > { %5247 = vmatprep.mubr.bf16.mxu1 %v7556_v0  ;;  %v6751_v57 = vcombine.low %v559_v12, %v575_v62  ;;  %v656_v49 = vld [vmem:[#allocation2 + $0xc78] sm:$0xff]  ;;  %v6817_v36 = vcombine.low %v624_v50, %v640_v26 }
 0x265   : > { %5261 = vmatpush1.bf16.msra.mxu0 %v6495_v51  ;;  %v6752_v51 = vcombine.high %v559_v12, %v575_v62  ;;  %v672_v5 = vld [vmem:[#allocation2 + $0xcf8] sm:$0xff]  ;;  %v8456_v12 = vld [vmem:[#allocation2 + $0x1170] sm:$0xff] }
 0x266   : > { %5367 = vmatpush1.bf16.msra.mxu1 %v6497_v55  ;;  %5262 = vmatprep.subr.bf16.mxu0 %v6528_v32  ;;  %v6754_v55 = vcombine.high %v560_v59, %v576_v6  ;;  %v591_v32 = vld [vmem:[#allocation2 + $0xa70] sm:$0xff]  ;;  %v704_v38 = vld [vmem:[#allocation2 + $0xdf8] sm:$0xff]  ;;  %v6849_v23 = vcombine.low %v656_v49, %v672_v5  ;;  %v6943_v6 = vcombine.low %v8430_v8, %v8432_v3 }
 0x267   : > { %5368 = vmatprep.subr.bf16.mxu1 %v6530_v41  ;;  %v607_v41 = vld [vmem:[#allocation2 + $0xaf0] sm:$0xff]  ;;  %v8434_v1 = vld [vmem:[#allocation2 + $0xf78] sm:$0xff] }
 0x268   : > { %7036 = vmatmul.mubr.msk.bf16.gmra.mrb[52].mxu0 %vm3767_vm0, %v8256_v40  ;;  %v8446_v2 = vld [vmem:[#allocation2 + $0x1078] sm:$0xff]  ;;  %v8458_v62 = vld [vmem:[#allocation2 + $0x11f0] sm:$0xff] }
 0x269   : > { %7038 = vmatmul.mubr.msk.bf16.gmra.mrb[52].mxu1 %vm3767_vm0, %v8256_v40  ;;  %5263 = vmatpush1.bf16.msra.mxu0 %v6527_v37  ;;  %v6593_v40 = vcombine.low %v400_v21, %v416_v52  ;;  %v6784_v37 = vcombine.high %v591_v32, %v607_v41  ;;  %v6783_v21 = vcombine.low %v591_v32, %v607_v41 }
 0x26a   : > { %5369 = vmatpush1.bf16.msra.mxu1 %v6529_v18  ;;  %5264 = vmatprep.subr.bf16.mxu0 %v6560_v54  ;;  %v6786_v18 = vcombine.high %v592_v4, %v608_v15  ;;  %v623_v54 = vld [vmem:[#allocation2 + $0xb70] sm:$0xff]  ;;  %v6785_v52 = vcombine.low %v592_v4, %v608_v15 }
 0x26b   : > { %5370 = vmatprep.subr.bf16.mxu1 %v6562_v20  ;;  %5290 = vmatprep.mubr.bf16.mxu0 %v7491_v34  ;;  %v639_v20 = vld [vmem:[#allocation2 + $0xbf0] sm:$0xff] }
 0x26c   : > { %5396 = vmatprep.mubr.bf16.mxu1 %v7491_v34  ;;  %v6815_v34 = vcombine.low %v623_v54, %v639_v20 }
 0x26d   : > { %5265 = vmatpush1.bf16.msra.mxu0 %v6559_v60  ;;  %v6816_v60 = vcombine.high %v623_v54, %v639_v20  ;;  %v7007_v20 = vcombine.low %v8456_v12, %v8458_v62 }
 0x26e   : > { %5371 = vmatpush1.bf16.msra.mxu1 %v6561_v53  ;;  %5266 = vmatprep.subr.bf16.mxu0 %v6592_v16  ;;  %v6818_v53 = vcombine.high %v624_v50, %v640_v26  ;;  %v655_v16 = vld [vmem:[#allocation2 + $0xc70] sm:$0xff]  ;;  %v7008_v50 = vcombine.high %v8456_v12, %v8458_v62  ;;  %v7496_v12 = vld [vmem:[%s7645_s11 + $0x20] ss:$12 sps:$4 sm:$0xff]  }
 0x26f   : > { %5372 = vmatprep.subr.bf16.mxu1 %v6594_v19  ;;  %v671_v19 = vld [vmem:[#allocation2 + $0xcf0] sm:$0xff] }
 0x270   : > { %v6848_v17 = vcombine.high %v655_v16, %v671_v19  ;;  %v6847_v58 = vcombine.low %v655_v16, %v671_v19 }
 0x271   : > { %5267 = vmatpush1.bf16.msra.mxu0 %v6591_v7  ;;  %v6850_v7 = vcombine.high %v656_v49, %v672_v5 }
 0x272   : > { %5373 = vmatpush1.bf16.msra.mxu1 %v6593_v40  ;;  %5268 = vmatprep.subr.bf16.mxu0 %v6624_v28  ;;  %v687_v40 = vld [vmem:[#allocation2 + $0xd70] sm:$0xff] }
 0x273   : > { %5374 = vmatprep.subr.bf16.mxu1 %v6626_v13  ;;  %v703_v28 = vld [vmem:[#allocation2 + $0xdf0] sm:$0xff]  ;;  %v688_v13 = vld [vmem:[#allocation2 + $0xd78] sm:$0xff] }
 0x274   : > { %v6882_v11 = vcombine.high %v688_v13, %v704_v38  ;;  %v6881_v14 = vcombine.low %v688_v13, %v704_v38 }
 0x275   : > { %5269 = vmatpush1.bf16.msra.mxu0 %v6623_v29  ;;  %v6880_v29 = vcombine.high %v687_v40, %v703_v28 }
 0x276   : > { %5375 = vmatpush1.bf16.msra.mxu1 %v6625_v56  ;;  %5270 = vmatprep.subr.bf16.mxu0 %v6656_v44  ;;  %v8424_v56 = vld [vmem:[#allocation2 + $0xef0] sm:$0xff]  ;;  %v8426_v44 = vld [vmem:[#allocation2 + $0xe78] sm:$0xff] }
 0x277   : > { %5376 = vmatprep.subr.bf16.mxu1 %v6658_v47  ;;  %v8428_v47 = vld [vmem:[#allocation2 + $0xef8] sm:$0xff]  ;;  %v6911_v25 = vcombine.low %v8422_v45, %v8424_v56  ;;  %v6912_v31 = vcombine.high %v8422_v45, %v8424_v56 }
 0x278   : > { %v8486_v45 = vld [vmem:[#allocation2 + $0x1178] sm:$0xff] }
 0x279   : > { %5271 = vmatpush1.bf16.msra.mxu0 %v6655_v43  ;;  %v8436_v43 = vld [vmem:[#allocation2 + $0xff8] sm:$0xff] }
 0x27a   : > { %5377 = vmatpush1.bf16.msra.mxu1 %v6657_v63  ;;  %5272 = vmatprep.subr.bf16.mxu0 %v6688_v39  ;;  %v8438_v63 = vld [vmem:[#allocation2 + $0x1070] sm:$0xff] }
 0x27b   : > { %5378 = vmatprep.subr.bf16.mxu1 %v6690_v33  ;;  %v8440_v39 = vld [vmem:[#allocation2 + $0x10f0] sm:$0xff]  ;;  %v6879_v33 = vcombine.low %v687_v40, %v703_v28 }
 0x27c   : > { %v6975_v4 = vcombine.low %v8438_v63, %v8440_v39 }
 0x27d   : > { %5273 = vmatpush1.bf16.msra.mxu0 %v6687_v24  ;;  %v8448_v24 = vld [vmem:[#allocation2 + $0x10f8] sm:$0xff] }
 0x27e   : > { %5379 = vmatpush1.bf16.msra.mxu1 %v6689_v27  ;;  %5274 = vmatprep.subr.bf16.mxu0 %v6720_v61  ;;  %v6913_v27 = vcombine.low %v8426_v44, %v8428_v47  ;;  %v6914_v61 = vcombine.high %v8426_v44, %v8428_v47  ;;  %v6977_v15 = vcombine.low %v8446_v2, %v8448_v24 }
 0x27f   : > { %5380 = vmatprep.subr.bf16.mxu1 %v6722_v22  ;;  %v6944_v22 = vcombine.high %v8430_v8, %v8432_v3 }
 0x281   : > { %5275 = vmatpush1.bf16.msra.mxu0 %v6719_v30  ;;  %v6945_v30 = vcombine.low %v8434_v1, %v8436_v43 }
 0x282   : > { %5381 = vmatpush1.bf16.msra.mxu1 %v6721_v48  ;;  %5276 = vmatprep.subr.bf16.mxu0 %v6752_v51  ;;  %v6946_v48 = vcombine.high %v8434_v1, %v8436_v43  ;;  %v6976_v51 = vcombine.high %v8438_v63, %v8440_v39 }
 0x283   : > { %5382 = vmatprep.subr.bf16.mxu1 %v6754_v55 }
 0x285   : > { %5277 = vmatpush1.bf16.msra.mxu0 %v6751_v57  ;;  %v6978_v57 = vcombine.high %v8446_v2, %v8448_v24 }
 0x286   : > { %5383 = vmatpush1.bf16.msra.mxu1 %v6753_v10  ;;  %5278 = vmatprep.subr.bf16.mxu0 %v6784_v37 }
 0x287   : > { %5384 = vmatprep.subr.bf16.mxu1 %v6786_v18 }
 0x289   : > { %5279 = vmatpush1.bf16.msra.mxu0 %v6783_v21 }
 0x28a   : > { %5385 = vmatpush1.bf16.msra.mxu1 %v6785_v52  ;;  %5280 = vmatprep.subr.bf16.mxu0 %v6816_v60 }
 0x28b   : > { %5386 = vmatprep.subr.bf16.mxu1 %v6818_v53 }
 0x28d   : > { %5281 = vmatpush1.bf16.msra.mxu0 %v6815_v34 }
 0x28e   : > { %5387 = vmatpush1.bf16.msra.mxu1 %v6817_v36  ;;  %5282 = vmatprep.subr.bf16.mxu0 %v6848_v17 }
 0x28f   : > { %5388 = vmatprep.subr.bf16.mxu1 %v6850_v7 }
 0x291   : > { %5283 = vmatpush1.bf16.msra.mxu0 %v6847_v58 }
 0x292   : > { %5389 = vmatpush1.bf16.msra.mxu1 %v6849_v23  ;;  %5284 = vmatprep.subr.bf16.mxu0 %v6880_v29  ;;  %v8488_v23 = vld [vmem:[#allocation2 + $0x11f8] sm:$0xff] }
 0x293   : > { %5390 = vmatprep.subr.bf16.mxu1 %v6882_v11  ;;  %v4709_v59 = vpop.f32.mrb[32].mxu0 }
 0x294   : > { %v7238_v55 = vadd.f32 %v4709_v59, %v7740_v9  ;;  %v4815_v32 = vpop.f32.mrb[32].mxu1  ;;  %v4711_v41 = vpop.f32.mrb[33].mxu0 }
 0x295   : > { %5285 = vmatpush1.bf16.msra.mxu0 %v6879_v33  ;;  %v7246_v10 = vadd.f32 %v4815_v32, %v7740_v9  ;;  %v7239_v37 = vadd.f32 %v4711_v41, %v7740_v9  ;;  %v4817_v18 = vpop.f32.mrb[33].mxu1  ;;  %v4713_v54 = vpop.f32.mrb[34].mxu0 }
 0x296   : > { %5391 = vmatpush1.bf16.msra.mxu1 %v6881_v14  ;;  %vm5486_vm5 = vcmp.ge.f32.partialorder %v7238_v55, 0.0  ;;  %v5614_v26 = vmul.f32 0.1, %v7238_v55  ;;  %v7247_v21 = vadd.f32 %v4817_v18, %v7740_v9  ;;  %v7240_v52 = vadd.f32 %v4713_v54, %v7790_v42  ;;  %v4819_v60 = vpop.f32.mrb[34].mxu1  ;;  %5286 = vmatprep.subr.bf16.mxu0 %v6912_v31  ;;  %v4715_v53 = vpop.f32.mrb[35].mxu0 }
 0x297   : > { %vm5488_vm6 = vcmp.ge.f32.partialorder %v7246_v10, 0.0  ;;  %v5616_v16 = vmul.f32 0.1, %v7246_v10  ;;  %vm5487_vm7 = vcmp.ge.f32.partialorder %v7239_v37, 0.0  ;;  %v5615_v19 = vmul.f32 0.1, %v7239_v37  ;;  %5392 = vmatprep.subr.bf16.mxu1 %v6914_v61 }
 0x298   : > { %v5742_v49 = vsel %vm5486_vm5, %v7238_v55, %v5614_v26  ;;  %vm5489_vm8 = vcmp.ge.f32.partialorder %v7247_v21, 0.0  ;;  %v5617_v5 = vmul.f32 0.1, %v7247_v21  ;;  %vm5518_vm9 = vcmp.ge.f32.partialorder %v7240_v52, 0.0  ;;  %v4821_v34 = vpop.f32.mrb[35].mxu1 }
 0x299   : > { %v5744_v36 = vsel %vm5488_vm6, %v7246_v10, %v5616_v16  ;;  %v5743_v17 = vsel %vm5487_vm7, %v7239_v37, %v5615_v19  ;;  %v5646_v7 = vmul.f32 0.1, %v7240_v52  ;;  %v7248_v40 = vadd.f32 %v4819_v60, %v7790_v42  ;;  %5287 = vmatpush1.bf16.msra.mxu0 %v6911_v25  ;;  %v7492_v18 = vld [vmem:[%s7645_s11] ss:$12 sps:$4 sm:$0xff]  }
 0x29a   : > { %v7118_v28 = vpack.c.bf16 %v5743_v17, %v5742_v49  ;;  %v5745_v13 = vsel %vm5489_vm8, %v7247_v21, %v5617_v5  ;;  %v7241_v38 = vadd.f32 %v4715_v53, %v7790_v42  ;;  %v7249_v58 = vadd.f32 %v4821_v34, %v7790_v42  ;;  %5393 = vmatpush1.bf16.msra.mxu1 %v6913_v27  ;;  %v7493_v5 = vld [vmem:[%s7645_s11 + $0x1c] ss:$12 sps:$4 sm:$0xff]  }
 0x29b   : > { %v7119_v29 = vpack.c.bf16 %v5745_v13, %v5744_v36  ;;  %v5774_v56 = vsel %vm5518_vm9, %v7240_v52, %v5646_v7  ;;  %vm5520_vm10 = vcmp.ge.f32.partialorder %v7248_v40, 0.0  ;;  %v5648_v44 = vmul.f32 0.1, %v7248_v40  ;;  %5288 = vmatprep.subr.bf16.mxu0 %v6944_v22  ;;  %5394 = vmatprep.subr.bf16.mxu1 %v6946_v48  ;;  %v4719_v47 = vpop.f32.mrb[36].mxu0  ;;  %v7495_v13 = vld [vmem:[%s7645_s11 + $0x8] ss:$12 sps:$4 sm:$0xff]  }
 0x29c   : > { %6246 = vst [vmem:[%s7819_s22 + $0x40] sm:$0xff] %v7118_v28  ;;  %vm5519_vm11 = vcmp.ge.f32.partialorder %v7241_v38, 0.0  ;;  %v5647_v11 = vmul.f32 0.1, %v7241_v38  ;;  %vm5521_vm12 = vcmp.ge.f32.partialorder %v7249_v58, 0.0  ;;  %v7242_v33 = vadd.f32 %v4719_v47, %v7778_v35  ;;  %v4825_v14 = vpop.f32.mrb[36].mxu1 }
 0x29d   : > { %v5649_v8 = vmul.f32 0.1, %v7249_v58  ;;  %6247 = vst [vmem:[%s7819_s22 + $0x48] sm:$0xff] %v7119_v29  ;;  %v5776_v3 = vsel %vm5520_vm10, %v7248_v40, %v5648_v44  ;;  %5289 = vmatpush1.bf16.msra.mxu0 %v6943_v6  ;;  %v4721_v25 = vpop.f32.mrb[37].mxu0  ;;  %v7009_v31 = vcombine.low %v8486_v45, %v8488_v23  ;;  %v7010_v27 = vcombine.high %v8486_v45, %v8488_v23  ;;  %v4827_v48 = vpop.f32.mrb[37].mxu1 }
 0x29e   : > { %v5775_v61 = vsel %vm5519_vm11, %v7241_v38, %v5647_v11  ;;  %5395 = vmatpush1.bf16.msra.mxu1 %v6945_v30  ;;  %v7250_v59 = vadd.f32 %v4825_v14, %v7778_v35  ;;  %v7243_v6 = vadd.f32 %v4721_v25, %v7778_v35  ;;  %v4723_v55 = vpop.f32.mrb[38].mxu0  ;;  %vm5550_vm13 = vcmp.ge.f32.partialorder %v7242_v33, 0.0  ;;  %v4829_v37 = vpop.f32.mrb[38].mxu1  ;;  %5311 = vmatprep.subr.bf16.mxu0 %v6976_v51  ;;  %v7494_v28 = vld [vmem:[%s7645_s11 + $0x18] ss:$12 sps:$4 sm:$0xff]  }
 0x29f   : > { %v5777_v22 = vsel %vm5521_vm12, %v7249_v58, %v5649_v8  ;;  %v7134_v32 = vpack.c.bf16 %v5775_v61, %v5774_v56  ;;  %v5678_v10 = vmul.f32 0.1, %v7242_v33  ;;  %5417 = vmatprep.subr.bf16.mxu1 %v6978_v57  ;;  %v4725_v1 = vpop.f32.mrb[39].mxu0  ;;  %v7251_v26 = vadd.f32 %v4827_v48, %v7778_v35  ;;  %v4831_v52 = vpop.f32.mrb[39].mxu1 }
 0x2a0   : > { %v7135_v41 = vpack.c.bf16 %v5777_v22, %v5776_v3  ;;  %vm5552_vm14 = vcmp.ge.f32.partialorder %v7250_v59, 0.0  ;;  %v5680_v43 = vmul.f32 0.1, %v7250_v59  ;;  %vm5551_vm15 = vcmp.ge.f32.partialorder %v7243_v6, 0.0  ;;  %5291 = vmatmul.mubr.bf16.vlgmr.msra.gmra.mrb[56].mxu0 %v7492_v18 }
 0x2a1   : > { %v5679_v30 = vmul.f32 0.1, %v7243_v6  ;;  %6265 = vst [vmem:[%s7819_s22 + $0xc0] sm:$0xff] %v7134_v32  ;;  %v5806_v54 = vsel %vm5550_vm13, %v7242_v33, %v5678_v10  ;;  %v7244_v21 = vadd.f32 %v4723_v55, %v7834_v46  ;;  %v7252_v51 = vadd.f32 %v4829_v37, %v7834_v46  ;;  %5397 = vmatmul.mubr.bf16.vlgmr.msra.gmra.mrb[56].mxu1 %v7492_v18 }
 0x2a2   : > { %6266 = vst [vmem:[%s7819_s22 + $0xc8] sm:$0xff] %v7135_v41  ;;  %v5808_v57 = vsel %vm5552_vm14, %v7250_v59, %v5680_v43  ;;  %v7245_v53 = vadd.f32 %v4725_v1, %v7834_v46  ;;  %v7253_v16 = vadd.f32 %v4831_v52, %v7834_v46  ;;  %5312 = vmatpush1.bf16.msra.mxu0 %v6975_v4  ;;  %vm5553_vm1 = vcmp.ge.f32.partialorder %v7251_v26, 0.0 }
 0x2a3   : > { %v5807_v60 = vsel %vm5551_vm15, %v7243_v6, %v5679_v30  ;;  %v5681_v49 = vmul.f32 0.1, %v7251_v26  ;;  %vm5582_vm2 = vcmp.ge.f32.partialorder %v7244_v21, 0.0  ;;  %5418 = vmatpush1.bf16.msra.mxu1 %v6977_v15  ;;  %5300 = vmatprep.mubr.bf16.mxu0 %v7493_v5  ;;  %v5710_v34 = vmul.f32 0.1, %v7244_v21 }
 0x2a4   : > { %v7150_v19 = vpack.c.bf16 %v5807_v60, %v5806_v54  ;;  %vm5584_vm3 = vcmp.ge.f32.partialorder %v7252_v51, 0.0  ;;  %v5712_v36 = vmul.f32 0.1, %v7252_v51  ;;  %vm5583_vm4 = vcmp.ge.f32.partialorder %v7245_v53, 0.0  ;;  %5406 = vmatprep.mubr.bf16.mxu1 %v7493_v5  ;;  %5313 = vmatprep.subr.bf16.mxu0 %v7008_v50 }
 0x2a5   : > { %v5809_v63 = vsel %vm5553_vm1, %v7251_v26, %v5681_v49  ;;  %v5711_v39 = vmul.f32 0.1, %v7245_v53  ;;  %vm5585_vm5 = vcmp.ge.f32.partialorder %v7253_v16, 0.0  ;;  %v5713_v4 = vmul.f32 0.1, %v7253_v16  ;;  %5419 = vmatprep.subr.bf16.mxu1 %v7010_v27 }
 0x2a6   : > { %6281 = vst [vmem:[%s7819_s22 + $0x140] sm:$0xff] %v7150_v19  ;;  %v7151_v2 = vpack.c.bf16 %v5809_v63, %v5808_v57  ;;  %v5838_v24 = vsel %vm5582_vm2, %v7244_v21, %v5710_v34  ;;  %v5840_v15 = vsel %vm5584_vm3, %v7252_v51, %v5712_v36  ;;  %5314 = vmatpush1.bf16.msra.mxu0 %v7007_v20 }
 0x2a7   : > { %v5839_v17 = vsel %vm5583_vm4, %v7245_v53, %v5711_v39  ;;  %v5841_v50 = vsel %vm5585_vm5, %v7253_v16, %v5713_v4  ;;  %5420 = vmatpush1.bf16.msra.mxu1 %v7009_v31 }
 0x2a8   : > { %6282 = vst [vmem:[%s7819_s22 + $0x148] sm:$0xff] %v7151_v2  ;;  %v7166_v7 = vpack.c.bf16 %v5839_v17, %v5838_v24  ;;  %v7167_v40 = vpack.c.bf16 %v5841_v50, %v5840_v15  ;;  %5301 = vmatmul.mubr.bf16.gmra.mrb[60].mxu0 %v7494_v28 }
 0x2a9   : > { %5407 = vmatmul.mubr.bf16.gmra.mrb[60].mxu1 %v7494_v28  ;;  %5343 = vmatprep.mubr.bf16.mxu0 %v7556_v0 }
 0x2aa   : > { %6297 = vst [vmem:[%s7819_s22 + $0x1c0] sm:$0xff] %v7166_v7  ;;  %6298 = vst [vmem:[%s7819_s22 + $0x1c8] sm:$0xff] %v7167_v40  ;;  %5449 = vmatprep.mubr.bf16.mxu1 %v7556_v0 }
 0x2b0   : > { %7039 = vmatmul.mubr.msk.bf16.vlgmr.msra.gmra.mrb[56].mxu0 %vm3767_vm0, %v7495_v13 }
 0x2b1   : > { %7041 = vmatmul.mubr.msk.bf16.vlgmr.msra.gmra.mrb[56].mxu1 %vm3767_vm0, %v7495_v13  ;;  %5353 = vmatprep.mubr.bf16.mxu0 %v7556_v0 }
 0x2b2   : > { %5459 = vmatprep.mubr.bf16.mxu1 %v7556_v0 }
 0x2b8   : > { %7040 = vmatmul.mubr.msk.bf16.gmra.mrb[60].mxu0 %vm3767_vm0, %v7496_v12 }
 0x2b9   : > { %7042 = vmatmul.mubr.msk.bf16.gmra.mrb[60].mxu1 %vm3767_vm0, %v7496_v12 }
 0x2e3   : > { %v4921_v62 = vpop.f32.mrb[40].mxu0 }
 0x2e4   : > { %v7254_v20 = vadd.f32 %v4921_v62, %v7740_v9  ;;  %v5027_v38 = vpop.f32.mrb[40].mxu1  ;;  %v4923_v58 = vpop.f32.mrb[41].mxu0 }
 0x2e5   : > { %v7262_v45 = vadd.f32 %v5027_v38, %v7740_v9  ;;  %v7255_v23 = vadd.f32 %v4923_v58, %v7740_v9  ;;  %v5029_v29 = vpop.f32.mrb[41].mxu1  ;;  %v4925_v56 = vpop.f32.mrb[42].mxu0 }
 0x2e6   : > { %vm5490_vm6 = vcmp.ge.f32.partialorder %v7254_v20, 0.0  ;;  %v5618_v44 = vmul.f32 0.1, %v7254_v20  ;;  %v7263_v0 = vadd.f32 %v5029_v29, %v7740_v9  ;;  %v7256_v47 = vadd.f32 %v4925_v56, %v7790_v42  ;;  %v5031_v11 = vpop.f32.mrb[42].mxu1  ;;  %v4927_v8 = vpop.f32.mrb[43].mxu0 }
 0x2e7   : > { %vm5492_vm0 = vcmp.ge.f32.partialorder %v7262_v45, 0.0  ;;  %v5620_v3 = vmul.f32 0.1, %v7262_v45  ;;  %vm5491_vm7 = vcmp.ge.f32.partialorder %v7255_v23, 0.0  ;;  %v5619_v33 = vmul.f32 0.1, %v7255_v23 }
 0x2e8   : > { %v5746_v14 = vsel %vm5490_vm6, %v7254_v20, %v5618_v44  ;;  %vm5493_vm8 = vcmp.ge.f32.partialorder %v7263_v0, 0.0  ;;  %v5621_v25 = vmul.f32 0.1, %v7263_v0  ;;  %vm5522_vm9 = vcmp.ge.f32.partialorder %v7256_v47, 0.0  ;;  %v5033_v31 = vpop.f32.mrb[43].mxu1 }
 0x2e9   : > { %v5748_v27 = vsel %vm5492_vm0, %v7262_v45, %v5620_v3  ;;  %v5747_v61 = vsel %vm5491_vm7, %v7255_v23, %v5619_v33  ;;  %v5650_v22 = vmul.f32 0.1, %v7256_v47  ;;  %v7264_v59 = vadd.f32 %v5031_v11, %v7790_v42 }
 0x2ea   : > { %v7120_v6 = vpack.c.bf16 %v5747_v61, %v5746_v14  ;;  %v5749_v48 = vsel %vm5493_vm8, %v7263_v0, %v5621_v25  ;;  %v7257_v55 = vadd.f32 %v4927_v8, %v7790_v42  ;;  %v7265_v32 = vadd.f32 %v5033_v31, %v7790_v42 }
 0x2eb   : > { %v7121_v41 = vpack.c.bf16 %v5749_v48, %v5748_v27  ;;  %v5778_v10 = vsel %vm5522_vm9, %v7256_v47, %v5650_v22  ;;  %vm5524_vm10 = vcmp.ge.f32.partialorder %v7264_v59, 0.0  ;;  %v5652_v37 = vmul.f32 0.1, %v7264_v59  ;;  %v4931_v1 = vpop.f32.mrb[44].mxu0 }
 0x2ec   : > { %6248 = vst [vmem:[%s7819_s22 + $0x50] sm:$0xff] %v7120_v6  ;;  %vm5523_vm11 = vcmp.ge.f32.partialorder %v7257_v55, 0.0  ;;  %v5651_v43 = vmul.f32 0.1, %v7257_v55  ;;  %vm5525_vm12 = vcmp.ge.f32.partialorder %v7265_v32, 0.0  ;;  %v7258_v54 = vadd.f32 %v4931_v1, %v7778_v35  ;;  %v5037_v26 = vpop.f32.mrb[44].mxu1 }
 0x2ed   : > { %v5653_v30 = vmul.f32 0.1, %v7265_v32  ;;  %6249 = vst [vmem:[%s7819_s22 + $0x58] sm:$0xff] %v7121_v41  ;;  %v5780_v18 = vsel %vm5524_vm10, %v7264_v59, %v5652_v37  ;;  %v4933_v21 = vpop.f32.mrb[45].mxu0  ;;  %v7266_v57 = vadd.f32 %v5037_v26, %v7778_v35  ;;  %v5039_v53 = vpop.f32.mrb[45].mxu1 }
 0x2ee   : > { %v5779_v51 = vsel %vm5523_vm11, %v7257_v55, %v5651_v43  ;;  %v7259_v60 = vadd.f32 %v4933_v21, %v7778_v35  ;;  %v4935_v16 = vpop.f32.mrb[46].mxu0  ;;  %vm5554_vm13 = vcmp.ge.f32.partialorder %v7258_v54, 0.0  ;;  %v5682_v5 = vmul.f32 0.1, %v7258_v54  ;;  %v5041_v34 = vpop.f32.mrb[46].mxu1 }
 0x2ef   : > { %v5781_v52 = vsel %vm5525_vm12, %v7265_v32, %v5653_v30  ;;  %v7136_v19 = vpack.c.bf16 %v5779_v51, %v5778_v10  ;;  %v4937_v36 = vpop.f32.mrb[47].mxu0  ;;  %vm5556_vm14 = vcmp.ge.f32.partialorder %v7266_v57, 0.0  ;;  %v5684_v63 = vmul.f32 0.1, %v7266_v57  ;;  %v5043_v17 = vpop.f32.mrb[47].mxu1 }
 0x2f0   : > { %v7137_v49 = vpack.c.bf16 %v5781_v52, %v5780_v18  ;;  %vm5555_vm15 = vcmp.ge.f32.partialorder %v7259_v60, 0.0  ;;  %v5683_v39 = vmul.f32 0.1, %v7259_v60  ;;  %v5810_v4 = vsel %vm5554_vm13, %v7258_v54, %v5682_v5 }
 0x2f1   : > { %6267 = vst [vmem:[%s7819_s22 + $0xd0] sm:$0xff] %v7136_v19  ;;  %v7267_v2 = vadd.f32 %v5039_v53, %v7778_v35  ;;  %v7260_v24 = vadd.f32 %v4935_v16, %v7834_v46  ;;  %v7268_v15 = vadd.f32 %v5041_v34, %v7834_v46  ;;  %v5812_v50 = vsel %vm5556_vm14, %v7266_v57, %v5684_v63 }
 0x2f2   : > { %6268 = vst [vmem:[%s7819_s22 + $0xd8] sm:$0xff] %v7137_v49  ;;  %v5811_v7 = vsel %vm5555_vm15, %v7259_v60, %v5683_v39  ;;  %v7261_v40 = vadd.f32 %v4937_v36, %v7834_v46  ;;  %v7269_v28 = vadd.f32 %v5043_v17, %v7834_v46 }
 0x2f3   : > { %v7152_v13 = vpack.c.bf16 %v5811_v7, %v5810_v4  ;;  %vm5557_vm1 = vcmp.ge.f32.partialorder %v7267_v2, 0.0  ;;  %v5685_v12 = vmul.f32 0.1, %v7267_v2  ;;  %vm5586_vm2 = vcmp.ge.f32.partialorder %v7260_v24, 0.0 }
 0x2f4   : > { %v5714_v62 = vmul.f32 0.1, %v7260_v24  ;;  %vm5588_vm3 = vcmp.ge.f32.partialorder %v7268_v15, 0.0  ;;  %v5716_v20 = vmul.f32 0.1, %v7268_v15  ;;  %vm5587_vm4 = vcmp.ge.f32.partialorder %v7261_v40, 0.0 }
 0x2f5   : > { %6283 = vst [vmem:[%s7819_s22 + $0x150] sm:$0xff] %v7152_v13  ;;  %v5813_v38 = vsel %vm5557_vm1, %v7267_v2, %v5685_v12  ;;  %v5715_v58 = vmul.f32 0.1, %v7261_v40  ;;  %vm5589_vm5 = vcmp.ge.f32.partialorder %v7269_v28, 0.0  ;;  %v5717_v45 = vmul.f32 0.1, %v7269_v28 }
 0x2f6   : > { %v7153_v23 = vpack.c.bf16 %v5813_v38, %v5812_v50  ;;  %v5842_v29 = vsel %vm5586_vm2, %v7260_v24, %v5714_v62  ;;  %v5844_v56 = vsel %vm5588_vm3, %v7268_v15, %v5716_v20 }
 0x2f7   : > { %v5843_v44 = vsel %vm5587_vm4, %v7261_v40, %v5715_v58  ;;  %v5845_v0 = vsel %vm5589_vm5, %v7269_v28, %v5717_v45 }
 0x2f8   : > { %6284 = vst [vmem:[%s7819_s22 + $0x158] sm:$0xff] %v7153_v23  ;;  %v7168_v47 = vpack.c.bf16 %v5843_v44, %v5842_v29  ;;  %v7169_v11 = vpack.c.bf16 %v5845_v0, %v5844_v56 }
 0x2fa   : > { %6299 = vst [vmem:[%s7819_s22 + $0x1d0] sm:$0xff] %v7168_v47  ;;  %6300 = vst [vmem:[%s7819_s22 + $0x1d8] sm:$0xff] %v7169_v11 }
 0x333   : > { %v5133_v8 = vpop.f32.mrb[48].mxu0 }
 0x334   : > { %v7270_v3 = vadd.f32 %v5133_v8, %v7740_v9  ;;  %v5239_v33 = vpop.f32.mrb[48].mxu1  ;;  %v5135_v14 = vpop.f32.mrb[49].mxu0 }
 0x335   : > { %v7278_v25 = vadd.f32 %v5239_v33, %v7740_v9  ;;  %v7271_v31 = vadd.f32 %v5135_v14, %v7740_v9  ;;  %v5241_v27 = vpop.f32.mrb[49].mxu1  ;;  %v5137_v61 = vpop.f32.mrb[50].mxu0 }
 0x336   : > { %vm5494_vm6 = vcmp.ge.f32.partialorder %v7270_v3, 0.0  ;;  %v5622_v22 = vmul.f32 0.1, %v7270_v3  ;;  %v7279_v59 = vadd.f32 %v5241_v27, %v7740_v9  ;;  %v7272_v6 = vadd.f32 %v5137_v61, %v7790_v42  ;;  %v5243_v48 = vpop.f32.mrb[50].mxu1  ;;  %v5139_v55 = vpop.f32.mrb[51].mxu0 }
 0x337   : > { %vm5496_vm0 = vcmp.ge.f32.partialorder %v7278_v25, 0.0  ;;  %v5624_v32 = vmul.f32 0.1, %v7278_v25  ;;  %vm5495_vm7 = vcmp.ge.f32.partialorder %v7271_v31, 0.0  ;;  %v5623_v41 = vmul.f32 0.1, %v7271_v31 }
 0x338   : > { %v5750_v10 = vsel %vm5494_vm6, %v7270_v3, %v5622_v22  ;;  %vm5497_vm8 = vcmp.ge.f32.partialorder %v7279_v59, 0.0  ;;  %v5625_v37 = vmul.f32 0.1, %v7279_v59  ;;  %vm5526_vm9 = vcmp.ge.f32.partialorder %v7272_v6, 0.0  ;;  %v5245_v1 = vpop.f32.mrb[51].mxu1 }
 0x339   : > { %v5752_v43 = vsel %vm5496_vm0, %v7278_v25, %v5624_v32  ;;  %v5751_v30 = vsel %vm5495_vm7, %v7271_v31, %v5623_v41  ;;  %v5654_v18 = vmul.f32 0.1, %v7272_v6  ;;  %v7280_v54 = vadd.f32 %v5243_v48, %v7790_v42 }
 0x33a   : > { %v7122_v26 = vpack.c.bf16 %v5751_v30, %v5750_v10  ;;  %v5753_v21 = vsel %vm5497_vm8, %v7279_v59, %v5625_v37  ;;  %v7273_v51 = vadd.f32 %v5139_v55, %v7790_v42  ;;  %v7281_v52 = vadd.f32 %v5245_v1, %v7790_v42 }
 0x33b   : > { %v7123_v57 = vpack.c.bf16 %v5753_v21, %v5752_v43  ;;  %v5782_v60 = vsel %vm5526_vm9, %v7272_v6, %v5654_v18  ;;  %vm5528_vm10 = vcmp.ge.f32.partialorder %v7280_v54, 0.0  ;;  %v5656_v53 = vmul.f32 0.1, %v7280_v54  ;;  %v5143_v16 = vpop.f32.mrb[52].mxu0 }
 0x33c   : > { %6250 = vst [vmem:[%s7819_s22 + $0x60] sm:$0xff] %v7122_v26  ;;  %vm5527_vm11 = vcmp.ge.f32.partialorder %v7273_v51, 0.0  ;;  %v5655_v19 = vmul.f32 0.1, %v7273_v51  ;;  %vm5529_vm12 = vcmp.ge.f32.partialorder %v7281_v52, 0.0  ;;  %v7274_v34 = vadd.f32 %v5143_v16, %v7778_v35  ;;  %v5249_v36 = vpop.f32.mrb[52].mxu1 }
 0x33d   : > { %v5657_v49 = vmul.f32 0.1, %v7281_v52  ;;  %6251 = vst [vmem:[%s7819_s22 + $0x68] sm:$0xff] %v7123_v57  ;;  %v5784_v5 = vsel %vm5528_vm10, %v7280_v54, %v5656_v53  ;;  %v5145_v63 = vpop.f32.mrb[53].mxu0  ;;  %v7282_v2 = vadd.f32 %v5249_v36, %v7778_v35  ;;  %v5251_v15 = vpop.f32.mrb[53].mxu1  ;;  %vm6253_vm6 = vcmask 1043456  }
 0x33e   : > { %v5783_v39 = vsel %vm5527_vm11, %v7273_v51, %v5655_v19  ;;  %v7275_v24 = vadd.f32 %v5145_v63, %v7778_v35  ;;  %v5147_v17 = vpop.f32.mrb[54].mxu0  ;;  %vm5558_vm13 = vcmp.ge.f32.partialorder %v7274_v34, 0.0  ;;  %v5686_v40 = vmul.f32 0.1, %v7274_v34  ;;  %v5253_v28 = vpop.f32.mrb[54].mxu1 }
 0x33f   : > { %v5785_v4 = vsel %vm5529_vm12, %v7281_v52, %v5657_v49  ;;  %v7138_v50 = vpack.c.bf16 %v5783_v39, %v5782_v60  ;;  %v5149_v13 = vpop.f32.mrb[55].mxu0  ;;  %vm5560_vm14 = vcmp.ge.f32.partialorder %v7282_v2, 0.0  ;;  %v5688_v12 = vmul.f32 0.1, %v7282_v2  ;;  %v5255_v23 = vpop.f32.mrb[55].mxu1 }
 0x340   : > { %v7139_v7 = vpack.c.bf16 %v5785_v4, %v5784_v5  ;;  %vm5559_vm15 = vcmp.ge.f32.partialorder %v7275_v24, 0.0  ;;  %v5687_v62 = vmul.f32 0.1, %v7275_v24  ;;  %v5814_v20 = vsel %vm5558_vm13, %v7274_v34, %v5686_v40 }
 0x341   : > { %6269 = vst [vmem:[%s7819_s22 + $0xe0] sm:$0xff] %v7138_v50  ;;  %v7283_v38 = vadd.f32 %v5251_v15, %v7778_v35  ;;  %v7276_v58 = vadd.f32 %v5147_v17, %v7834_v46  ;;  %v7284_v45 = vadd.f32 %v5253_v28, %v7834_v46  ;;  %v5816_v29 = vsel %vm5560_vm14, %v7282_v2, %v5688_v12 }
 0x342   : > { %6270 = vst [vmem:[%s7819_s22 + $0xe8] sm:$0xff] %v7139_v7  ;;  %v5815_v56 = vsel %vm5559_vm15, %v7275_v24, %v5687_v62  ;;  %v7277_v44 = vadd.f32 %v5149_v13, %v7834_v46  ;;  %v7285_v0 = vadd.f32 %v5255_v23, %v7834_v46  ;;  %vm6254_vm0 = vcmask 523268  }
 0x343   : > { %v7154_v47 = vpack.c.bf16 %v5815_v56, %v5814_v20  ;;  %vm5561_vm1 = vcmp.ge.f32.partialorder %v7283_v38, 0.0  ;;  %v5689_v11 = vmul.f32 0.1, %v7283_v38  ;;  %vm5590_vm2 = vcmp.ge.f32.partialorder %v7276_v58, 0.0  ;;  %vm8601_vm12 = vmor %vm6254_vm0, %vm6253_vm6 }
 0x344   : > { %v5718_v8 = vmul.f32 0.1, %v7276_v58  ;;  %vm5592_vm3 = vcmp.ge.f32.partialorder %v7284_v45, 0.0  ;;  %v5720_v3 = vmul.f32 0.1, %v7284_v45  ;;  %vm5591_vm4 = vcmp.ge.f32.partialorder %v7277_v44, 0.0 }
 0x345   : > { %6285 = vst [vmem:[%s7819_s22 + $0x160] sm:$0xff] %v7154_v47  ;;  %v5817_v33 = vsel %vm5561_vm1, %v7283_v38, %v5689_v11  ;;  %v5719_v14 = vmul.f32 0.1, %v7277_v44  ;;  %vm5593_vm5 = vcmp.ge.f32.partialorder %v7285_v0, 0.0  ;;  %v5721_v25 = vmul.f32 0.1, %v7285_v0 }
 0x346   : > { %v7155_v31 = vpack.c.bf16 %v5817_v33, %v5816_v29  ;;  %v5846_v27 = vsel %vm5590_vm2, %v7276_v58, %v5718_v8  ;;  %v5848_v61 = vsel %vm5592_vm3, %v7284_v45, %v5720_v3 }
 0x347   : > { %v5847_v22 = vsel %vm5591_vm4, %v7277_v44, %v5719_v14  ;;  %v5849_v59 = vsel %vm5593_vm5, %v7285_v0, %v5721_v25 }
 0x348   : > { %6286 = vst [vmem:[%s7819_s22 + $0x168] sm:$0xff] %v7155_v31  ;;  %v7170_v6 = vpack.c.bf16 %v5847_v22, %v5846_v27  ;;  %v7171_v48 = vpack.c.bf16 %v5849_v59, %v5848_v61 }
 0x34a   : > { %6301 = vst [vmem:[%s7819_s22 + $0x1e0] sm:$0xff] %v7170_v6  ;;  %6302 = vst [vmem:[%s7819_s22 + $0x1e8] sm:$0xff] %v7171_v48 }
 0x383   : > { %v5345_v55 = vpop.f32.mrb[56].mxu0 }
 0x384   : > { %v7286_v32 = vadd.f32 %v5345_v55, %v7740_v9  ;;  %v5451_v41 = vpop.f32.mrb[56].mxu1  ;;  %v5347_v10 = vpop.f32.mrb[57].mxu0 }
 0x385   : > { %v7294_v37 = vadd.f32 %v5451_v41, %v7740_v9  ;;  %v7287_v1 = vadd.f32 %v5347_v10, %v7740_v9  ;;  %v5453_v43 = vpop.f32.mrb[57].mxu1  ;;  %v5349_v30 = vpop.f32.mrb[58].mxu0 }
 0x386   : > { %vm5498_vm7 = vcmp.ge.f32.partialorder %v7286_v32, 0.0  ;;  %v5626_v18 = vmul.f32 0.1, %v7286_v32  ;;  %v7295_v54 = vadd.f32 %v5453_v43, %v7740_v9  ;;  %v7288_v26 = vadd.f32 %v5349_v30, %v7790_v42  ;;  %v5455_v21 = vpop.f32.mrb[58].mxu1  ;;  %v5351_v51 = vpop.f32.mrb[59].mxu0 }
 0x387   : > { %vm5500_vm8 = vcmp.ge.f32.partialorder %v7294_v37, 0.0  ;;  %v5628_v52 = vmul.f32 0.1, %v7294_v37  ;;  %vm5499_vm9 = vcmp.ge.f32.partialorder %v7287_v1, 0.0  ;;  %v5627_v57 = vmul.f32 0.1, %v7287_v1 }
 0x388   : > { %v5754_v60 = vsel %vm5498_vm7, %v7286_v32, %v5626_v18  ;;  %vm5501_vm10 = vcmp.ge.f32.partialorder %v7295_v54, 0.0  ;;  %v5629_v53 = vmul.f32 0.1, %v7295_v54  ;;  %vm5530_vm11 = vcmp.ge.f32.partialorder %v7288_v26, 0.0  ;;  %v5457_v16 = vpop.f32.mrb[59].mxu1 }
 0x389   : > { %v5756_v19 = vsel %vm5500_vm8, %v7294_v37, %v5628_v52  ;;  %v5755_v49 = vsel %vm5499_vm9, %v7287_v1, %v5627_v57  ;;  %v5658_v5 = vmul.f32 0.1, %v7288_v26  ;;  %v7296_v34 = vadd.f32 %v5455_v21, %v7790_v42 }
 0x38a   : > { %v7124_v9 = vpack.c.bf16 %v5755_v49, %v5754_v60  ;;  %v5757_v36 = vsel %vm5501_vm10, %v7295_v54, %v5629_v53  ;;  %v7289_v39 = vadd.f32 %v5351_v51, %v7790_v42  ;;  %v7297_v4 = vadd.f32 %v5457_v16, %v7790_v42 }
 0x38b   : > { %v7125_v2 = vpack.c.bf16 %v5757_v36, %v5756_v19  ;;  %v5786_v24 = vsel %vm5530_vm11, %v7288_v26, %v5658_v5  ;;  %vm5532_vm13 = vcmp.ge.f32.partialorder %v7296_v34, 0.0  ;;  %v5660_v15 = vmul.f32 0.1, %v7296_v34  ;;  %v5355_v17 = vpop.f32.mrb[60].mxu0 }
 0x38c   : > { %6252 = vst [vmem:[%s7819_s22 + $0x70] sm:$0xff] %v7124_v9  ;;  %vm5531_vm14 = vcmp.ge.f32.partialorder %v7289_v39, 0.0  ;;  %v5659_v50 = vmul.f32 0.1, %v7289_v39  ;;  %vm5533_vm15 = vcmp.ge.f32.partialorder %v7297_v4, 0.0  ;;  %v7290_v28 = vadd.f32 %v5355_v17, %v7778_v35  ;;  %v5461_v13 = vpop.f32.mrb[60].mxu1 }
 0x38d   : > { %v5661_v7 = vmul.f32 0.1, %v7297_v4  ;;  %6256 = vst.msk [vmem:[%s7819_s22 + $0x78] sm:$0xff] %vm8601_vm12, %v7125_v2  ;;  %v5788_v40 = vsel %vm5532_vm13, %v7296_v34, %v5660_v15  ;;  %v5357_v12 = vpop.f32.mrb[61].mxu0  ;;  %v7298_v20 = vadd.f32 %v5461_v13, %v7778_v35  ;;  %v5463_v58 = vpop.f32.mrb[61].mxu1 }
 0x38e   : > { %v5787_v62 = vsel %vm5531_vm14, %v7289_v39, %v5659_v50  ;;  %v7291_v38 = vadd.f32 %v5357_v12, %v7778_v35  ;;  %v5359_v45 = vpop.f32.mrb[62].mxu0  ;;  %vm5562_vm1 = vcmp.ge.f32.partialorder %v7290_v28, 0.0  ;;  %v5690_v56 = vmul.f32 0.1, %v7290_v28  ;;  %v5465_v44 = vpop.f32.mrb[62].mxu1 }
 0x38f   : > { %v5789_v42 = vsel %vm5533_vm15, %v7297_v4, %v5661_v7  ;;  %v7140_v23 = vpack.c.bf16 %v5787_v62, %v5786_v24  ;;  %v5361_v0 = vpop.f32.mrb[63].mxu0  ;;  %vm5564_vm2 = vcmp.ge.f32.partialorder %v7298_v20, 0.0  ;;  %v5692_v47 = vmul.f32 0.1, %v7298_v20  ;;  %v5467_v25 = vpop.f32.mrb[63].mxu1 }
 0x390   : > { %v7141_v29 = vpack.c.bf16 %v5789_v42, %v5788_v40  ;;  %vm5563_vm3 = vcmp.ge.f32.partialorder %v7291_v38, 0.0  ;;  %v5691_v11 = vmul.f32 0.1, %v7291_v38  ;;  %v5818_v8 = vsel %vm5562_vm1, %v7290_v28, %v5690_v56 }
 0x391   : > { %6271 = vst [vmem:[%s7819_s22 + $0xf0] sm:$0xff] %v7140_v23  ;;  %v7299_v3 = vadd.f32 %v5463_v58, %v7778_v35  ;;  %v7292_v33 = vadd.f32 %v5359_v45, %v7834_v46  ;;  %v7300_v14 = vadd.f32 %v5465_v44, %v7834_v46  ;;  %v5820_v31 = vsel %vm5564_vm2, %v7298_v20, %v5692_v47 }
 0x392   : > { %6272 = vst.msk [vmem:[%s7819_s22 + $0xf8] sm:$0xff] %vm8601_vm12, %v7141_v29  ;;  %v5819_v27 = vsel %vm5563_vm3, %v7291_v38, %v5691_v11  ;;  %v7293_v61 = vadd.f32 %v5361_v0, %v7834_v46  ;;  %v7301_v22 = vadd.f32 %v5467_v25, %v7834_v46 }
 0x393   : > { %v7156_v59 = vpack.c.bf16 %v5819_v27, %v5818_v8  ;;  %vm5565_vm4 = vcmp.ge.f32.partialorder %v7299_v3, 0.0  ;;  %v5693_v6 = vmul.f32 0.1, %v7299_v3  ;;  %vm5594_vm5 = vcmp.ge.f32.partialorder %v7292_v33, 0.0 }
 0x394   : > { %v5722_v48 = vmul.f32 0.1, %v7292_v33  ;;  %vm5596_vm6 = vcmp.ge.f32.partialorder %v7300_v14, 0.0  ;;  %v5724_v35 = vmul.f32 0.1, %v7300_v14  ;;  %vm5595_vm0 = vcmp.ge.f32.partialorder %v7293_v61, 0.0 }
 0x395   : > { %6287 = vst [vmem:[%s7819_s22 + $0x170] sm:$0xff] %v7156_v59  ;;  %v5821_v55 = vsel %vm5565_vm4, %v7299_v3, %v5693_v6  ;;  %v5723_v32 = vmul.f32 0.1, %v7293_v61  ;;  %vm5597_vm7 = vcmp.ge.f32.partialorder %v7301_v22, 0.0  ;;  %v5725_v41 = vmul.f32 0.1, %v7301_v22 }
 0x396   : > { %v7157_v10 = vpack.c.bf16 %v5821_v55, %v5820_v31  ;;  %v5850_v37 = vsel %vm5594_vm5, %v7292_v33, %v5722_v48  ;;  %v5852_v1 = vsel %vm5596_vm6, %v7300_v14, %v5724_v35 }
 0x397   : > { %v5851_v46 = vsel %vm5595_vm0, %v7293_v61, %v5723_v32  ;;  %v5853_v43 = vsel %vm5597_vm7, %v7301_v22, %v5725_v41 }
 0x398   : > { %6288 = vst.msk [vmem:[%s7819_s22 + $0x178] sm:$0xff] %vm8601_vm12, %v7157_v10  ;;  %v7172_v30 = vpack.c.bf16 %v5851_v46, %v5850_v37  ;;  %v7173_v18 = vpack.c.bf16 %v5853_v43, %v5852_v1 }
 0x39a   : > { %6303 = vst [vmem:[%s7819_s22 + $0x1f0] sm:$0xff] %v7172_v30  ;;  %6304 = vst.msk [vmem:[%s7819_s22 + $0x1f8] sm:$0xff] %vm8601_vm12, %v7173_v18 }
 0x39b PF: > { %s14_s14 = sadd.s32 1, %s7551_s14   ;;  %s8654_s12 = smov %s7547_s13 }
 0x39c   : > { %p11_p4 = scmp.ge.s32.totalorder %s14_s14, 4   ;;  %s8655_s13 = smov %s8657_s16 }
 0x39e   :  { %13 = sbr.rel (!%p11_p4) target bundleno = 2 (0x2), region = 71 }
 0x3a5   :  { %6338 = vsyncpa [#allocation3], 1 }
 0x3a6   :  { %6340 = vsyncpa [#allocation3 + $0x1], 1 }

// kernel: model_forward.6
= control target key start
LH: loop header
LB: loop body
LE: loop exit
PB: predicated region body
PF: predicated region fallthrough
CT: control target
= control target key end

     0   :  { %s3563_s12 = smov 0   ;;  %s3565_s13 = smov 0   ;;  %s4639_s0 = inlined_call_operand.vmem [shape: bf16[64,576], index: 0, kind: input, shape index: {}]   ;;  %s4640_s1 = inlined_call_operand.vmem [shape: bf16[576,1008], index: 1, kind: input, shape index: {}]   ;;  %s4641_s2 = inlined_call_operand.vmem [shape: f32[64,1], index: 2, kind: input, shape index: {}]   ;;  %s4642_s3 = inlined_call_operand.vmem [shape: bf16[64,1008], index: 3, kind: output, shape index: {}]  }
   0x1   :  { %s3567_s14 = smov 0  }
   0x2 LB: > { %s25_s15 = sadd.s32 1, %s3536_s13  ;;  %p3031_p0 = scmp.ge.s32.totalorder %s3540_s14, 1  ;;  %s3540_s14 = sphi %s3567_s14, %s13_s14   ;;  %s3536_s13 = sphi %s3565_s13, %s4646_s13   ;;  %s3532_s12 = sphi %s3563_s12, %s4645_s12  }
   0x3   : > { %p27_p1 = scmp.ge.s32.totalorder %s25_s15, 2  ;;  %p175_p2 = scmp.lt.s32.totalorder %s3540_s14, 3 }
   0x5   : > { %s4648_s15 = smov (%p27_p1, %s25_s15), 0  ;;  %p176_p3 = pnand %p3031_p0, %p175_p2 }
   0x6   : > { %v259_v0 = vld [vmem:[%s4640_s1] sm:$0xff] (!%p176_p3)  ;;  %v260_v2 = vld [vmem:[%s4640_s1 + $0x8] sm:$0xff] (!%p176_p3)  ;;  %s3032_s17 = sshll.u32 (!%p176_p3), %s3532_s12, 2  ;;  %v3542_v50 = vmov (!%p176_p3), 0   ;;  %vm2061_vm0 = vcmask (!%p176_p3), 523264  }
   0x7   : > { %179 = sbr.rel (%p176_p3) target bundleno = 533 (0x215), region = 32  ;;  %v263_v1 = vld [vmem:[%s4640_s1 + $0x20] sm:$0xff] (!%p176_p3)  ;;  %v264_v4 = vld [vmem:[%s4640_s1 + $0x28] sm:$0xff] (!%p176_p3)  ;;  %p216_p4 = scmp.lt.s32.totalorder (!%p176_p3), %s3032_s17, 7  ;;  %3502 = vset.pattern.permute.xlu0 (!%p176_p3), %v3542_v50  ;;  %3503 = vset.pattern.permute.xlu1 (!%p176_p3), %v3542_v50 }
   0x8   : > { %v3050_v3 = vcombine.high (!%p176_p3), %v259_v0, %v263_v1  ;;  %v3049_v5 = vcombine.low (!%p176_p3), %v259_v0, %v263_v1  ;;  %v267_v6 = vld [vmem:[%s4640_s1 + $0x40] sm:$0xff] (!%p176_p3)  ;;  %v3052_v8 = vcombine.high (!%p176_p3), %v260_v2, %v264_v4  ;;  %v3051_v9 = vcombine.low (!%p176_p3), %v260_v2, %v264_v4  ;;  %v268_v11 = vld [vmem:[%s4640_s1 + $0x48] sm:$0xff] (!%p176_p3) }
   0x9   : > { %v271_v7 = vld [vmem:[%s4640_s1 + $0x60] sm:$0xff] (!%p176_p3)  ;;  %v272_v12 = vld [vmem:[%s4640_s1 + $0x68] sm:$0xff] (!%p176_p3) }
   0xa   : > { %v3058_v10 = vcombine.high (!%p176_p3), %v267_v6, %v271_v7  ;;  %v275_v13 = vld [vmem:[%s4640_s1 + $0x80] sm:$0xff] (!%p176_p3)  ;;  %2068 = vmatprep.subr.bf16.mxu0 (!%p176_p3), %v3050_v3  ;;  %v3060_v14 = vcombine.high (!%p176_p3), %v268_v11, %v272_v12  ;;  %v276_v16 = vld [vmem:[%s4640_s1 + $0x88] sm:$0xff] (!%p176_p3)  ;;  %2227 = vmatprep.subr.bf16.mxu1 (!%p176_p3), %v3052_v8  ;;  %v3057_v18 = vcombine.low (!%p176_p3), %v267_v6, %v271_v7 }
   0xb   : > { %v279_v15 = vld [vmem:[%s4640_s1 + $0xa0] sm:$0xff] (!%p176_p3)  ;;  %v280_v17 = vld [vmem:[%s4640_s1 + $0xa8] sm:$0xff] (!%p176_p3)  ;;  %2069 = vmatpush1.bf16.msra.mxu0 (!%p176_p3), %v3049_v5  ;;  %2228 = vmatpush1.bf16.msra.mxu1 (!%p176_p3), %v3051_v9  ;;  %v3059_v19 = vcombine.low (!%p176_p3), %v268_v11, %v272_v12 }
   0xc   : > { %2070 = vmatprep.subr.bf16.mxu0 (!%p176_p3), %v3058_v10  ;;  %v3066_v20 = vcombine.high (!%p176_p3), %v275_v13, %v279_v15  ;;  %2229 = vmatprep.subr.bf16.mxu1 (!%p176_p3), %v3060_v14  ;;  %v3068_v21 = vcombine.high (!%p176_p3), %v276_v16, %v280_v17  ;;  %v283_v22 = vld [vmem:[%s4640_s1 + $0xc0] sm:$0xff] (!%p176_p3)  ;;  %v284_v24 = vld [vmem:[%s4640_s1 + $0xc8] sm:$0xff] (!%p176_p3)  ;;  %v3065_v26 = vcombine.low (!%p176_p3), %v275_v13, %v279_v15 }
   0xd   : > { %v287_v23 = vld [vmem:[%s4640_s1 + $0xe0] sm:$0xff] (!%p176_p3)  ;;  %v288_v25 = vld [vmem:[%s4640_s1 + $0xe8] sm:$0xff] (!%p176_p3)  ;;  %v3067_v27 = vcombine.low (!%p176_p3), %v276_v16, %v280_v17 }
   0xe   : > { %v3074_v28 = vcombine.high %v283_v22, %v287_v23  ;;  %v3076_v29 = vcombine.high %v284_v24, %v288_v25  ;;  %v291_v30 = vld [vmem:[%s4640_s1 + $0x100] sm:$0xff]  ;;  %v292_v32 = vld [vmem:[%s4640_s1 + $0x108] sm:$0xff]  ;;  %s4650_s17 = smov (!%p216_p4, %s3032_s17), 7  ;;  %v3073_v34 = vcombine.low %v283_v22, %v287_v23  ;;  %v3075_v35 = vcombine.low %v284_v24, %v288_v25 }
   0xf   : > { %2071 = vmatpush1.bf16.msra.mxu0 %v3057_v18  ;;  %2230 = vmatpush1.bf16.msra.mxu1 %v3059_v19  ;;  %v295_v31 = vld [vmem:[%s4640_s1 + $0x120] sm:$0xff]  ;;  %v296_v33 = vld [vmem:[%s4640_s1 + $0x128] sm:$0xff]  ;;  %s3476_s19 = smul.u32 20, %s4650_s17  ;;  %s3035_s9 = sshll.u32 %s4650_s17, 3 }
  0x10   : > { %2072 = vmatprep.subr.bf16.mxu0 %v3066_v20  ;;  %2231 = vmatprep.subr.bf16.mxu1 %v3068_v21  ;;  %v3082_v36 = vcombine.high %v291_v30, %v295_v31  ;;  %v3084_v37 = vcombine.high %v292_v32, %v296_v33  ;;  %v299_v38 = vld [vmem:[%s4640_s1 + $0x140] sm:$0xff]  ;;  %v300_v40 = vld [vmem:[%s4640_s1 + $0x148] sm:$0xff]  ;;  %v3081_v42 = vcombine.low %v291_v30, %v295_v31  ;;  %s3947_s16 = scalar_lea.vmem %s4641_s2, %s3035_s9  ;;  %s3363_s9 = sshll.u32 %s4650_s17, 5 }
  0x11   : > { %v303_v39 = vld [vmem:[%s4640_s1 + $0x160] sm:$0xff]  ;;  %v304_v41 = vld [vmem:[%s4640_s1 + $0x168] sm:$0xff]  ;;  %v3083_v43 = vcombine.low %v292_v32, %v296_v33  ;;  %s3674_s29 = scalar_lea.vmem %s4639_s0, %s3476_s19  ;;  %s4569_s17 = scalar_lea.vmem %s4642_s3, %s3363_s9 }
  0x12   : > { %v3090_v44 = vcombine.high %v299_v38, %v303_v39  ;;  %v3092_v45 = vcombine.high %v300_v40, %v304_v41  ;;  %v307_v46 = vld [vmem:[%s4640_s1 + $0x180] sm:$0xff]  ;;  %v308_v48 = vld [vmem:[%s4640_s1 + $0x188] sm:$0xff]  ;;  %v3089_v51 = vcombine.low %v299_v38, %v303_v39  ;;  %v3091_v52 = vcombine.low %v300_v40, %v304_v41 }
  0x13   : > { %2073 = vmatpush1.bf16.msra.mxu0 %v3065_v26  ;;  %2232 = vmatpush1.bf16.msra.mxu1 %v3067_v27  ;;  %v311_v47 = vld [vmem:[%s4640_s1 + $0x1a0] sm:$0xff]  ;;  %v312_v49 = vld [vmem:[%s4640_s1 + $0x1a8] sm:$0xff] }
  0x14   : > { %2074 = vmatprep.subr.bf16.mxu0 %v3074_v28  ;;  %2233 = vmatprep.subr.bf16.mxu1 %v3076_v29  ;;  %v3098_v53 = vcombine.high %v307_v46, %v311_v47  ;;  %v3100_v54 = vcombine.high %v308_v48, %v312_v49  ;;  %v315_v55 = vld [vmem:[%s4640_s1 + $0x1c0] sm:$0xff]  ;;  %v316_v58 = vld [vmem:[%s4640_s1 + $0x1c8] sm:$0xff]  ;;  %v3097_v60 = vcombine.low %v307_v46, %v311_v47 }
  0x15   : > { %v319_v56 = vld [vmem:[%s4640_s1 + $0x1e0] sm:$0xff]  ;;  %v320_v59 = vld [vmem:[%s4640_s1 + $0x1e8] sm:$0xff]  ;;  %v3099_v61 = vcombine.low %v308_v48, %v312_v49 }
  0x16   : > { %v3685_v57 = vld [vmem:[%s3674_s29 + $0x4] ss:$20 sps:$4 sm:$0xff]   ;;  %v3106_v62 = vcombine.high %v315_v55, %v319_v56  ;;  %v3108_v63 = vcombine.high %v316_v58, %v320_v59  ;;  %v324_v2 = vld [vmem:[%s4640_s1 + $0x208] sm:$0xff]  ;;  %v3105_v4 = vcombine.low %v315_v55, %v319_v56  ;;  %v3107_v5 = vcombine.low %v316_v58, %v320_v59 }
  0x17   : > { %2075 = vmatpush1.bf16.msra.mxu0 %v3073_v34  ;;  %2234 = vmatpush1.bf16.msra.mxu1 %v3075_v35  ;;  %v323_v0 = vld [vmem:[%s4640_s1 + $0x200] sm:$0xff]  ;;  %v328_v3 = vld [vmem:[%s4640_s1 + $0x228] sm:$0xff] }
  0x18   : > { %2076 = vmatprep.subr.bf16.mxu0 %v3082_v36  ;;  %2235 = vmatprep.subr.bf16.mxu1 %v3084_v37  ;;  %v327_v1 = vld [vmem:[%s4640_s1 + $0x220] sm:$0xff]  ;;  %v3116_v7 = vcombine.high %v324_v2, %v328_v3  ;;  %v332_v10 = vld [vmem:[%s4640_s1 + $0x248] sm:$0xff]  ;;  %v3115_v13 = vcombine.low %v324_v2, %v328_v3 }
  0x19   : > { %2100 = vmatprep.mubr.bf16.mxu0 %v3685_v57  ;;  %2259 = vmatprep.mubr.bf16.mxu1 %v3685_v57  ;;  %v3114_v6 = vcombine.high %v323_v0, %v327_v1  ;;  %v331_v8 = vld [vmem:[%s4640_s1 + $0x240] sm:$0xff]  ;;  %v336_v11 = vld [vmem:[%s4640_s1 + $0x268] sm:$0xff]  ;;  %v3113_v12 = vcombine.low %v323_v0, %v327_v1 }
  0x1a   : > { %v335_v9 = vld [vmem:[%s4640_s1 + $0x260] sm:$0xff]  ;;  %v3124_v15 = vcombine.high %v332_v10, %v336_v11  ;;  %v340_v18 = vld [vmem:[%s4640_s1 + $0x288] sm:$0xff]  ;;  %v3123_v21 = vcombine.low %v332_v10, %v336_v11 }
  0x1b   : > { %2077 = vmatpush1.bf16.msra.mxu0 %v3081_v42  ;;  %2236 = vmatpush1.bf16.msra.mxu1 %v3083_v43  ;;  %v3122_v14 = vcombine.high %v331_v8, %v335_v9  ;;  %v339_v16 = vld [vmem:[%s4640_s1 + $0x280] sm:$0xff]  ;;  %v344_v19 = vld [vmem:[%s4640_s1 + $0x2a8] sm:$0xff]  ;;  %v3121_v20 = vcombine.low %v331_v8, %v335_v9 }
  0x1c   : > { %2078 = vmatprep.subr.bf16.mxu0 %v3090_v44  ;;  %2237 = vmatprep.subr.bf16.mxu1 %v3092_v45  ;;  %v343_v17 = vld [vmem:[%s4640_s1 + $0x2a0] sm:$0xff]  ;;  %v3132_v23 = vcombine.high %v340_v18, %v344_v19  ;;  %v348_v26 = vld [vmem:[%s4640_s1 + $0x2c8] sm:$0xff]  ;;  %v3131_v29 = vcombine.low %v340_v18, %v344_v19 }
  0x1d   : > { %v3130_v22 = vcombine.high %v339_v16, %v343_v17  ;;  %v347_v24 = vld [vmem:[%s4640_s1 + $0x2c0] sm:$0xff]  ;;  %v352_v27 = vld [vmem:[%s4640_s1 + $0x2e8] sm:$0xff]  ;;  %v3129_v28 = vcombine.low %v339_v16, %v343_v17 }
  0x1e   : > { %v351_v25 = vld [vmem:[%s4640_s1 + $0x2e0] sm:$0xff]  ;;  %v3140_v31 = vcombine.high %v348_v26, %v352_v27  ;;  %v356_v34 = vld [vmem:[%s4640_s1 + $0x308] sm:$0xff]  ;;  %v3139_v37 = vcombine.low %v348_v26, %v352_v27 }
  0x1f   : > { %2079 = vmatpush1.bf16.msra.mxu0 %v3089_v51  ;;  %2238 = vmatpush1.bf16.msra.mxu1 %v3091_v52  ;;  %v3138_v30 = vcombine.high %v347_v24, %v351_v25  ;;  %v355_v32 = vld [vmem:[%s4640_s1 + $0x300] sm:$0xff]  ;;  %v360_v35 = vld [vmem:[%s4640_s1 + $0x328] sm:$0xff]  ;;  %v3137_v36 = vcombine.low %v347_v24, %v351_v25 }
  0x20   : > { %2080 = vmatprep.subr.bf16.mxu0 %v3098_v53  ;;  %2239 = vmatprep.subr.bf16.mxu1 %v3100_v54  ;;  %v359_v33 = vld [vmem:[%s4640_s1 + $0x320] sm:$0xff]  ;;  %v3148_v39 = vcombine.high %v356_v34, %v360_v35  ;;  %v364_v42 = vld [vmem:[%s4640_s1 + $0x348] sm:$0xff]  ;;  %v3147_v45 = vcombine.low %v356_v34, %v360_v35 }
  0x21   : > { %v3146_v38 = vcombine.high %v355_v32, %v359_v33  ;;  %v363_v40 = vld [vmem:[%s4640_s1 + $0x340] sm:$0xff]  ;;  %v368_v43 = vld [vmem:[%s4640_s1 + $0x368] sm:$0xff]  ;;  %v3145_v44 = vcombine.low %v355_v32, %v359_v33 }
  0x22   : > { %v367_v41 = vld [vmem:[%s4640_s1 + $0x360] sm:$0xff]  ;;  %v3156_v47 = vcombine.high %v364_v42, %v368_v43  ;;  %v372_v51 = vld [vmem:[%s4640_s1 + $0x388] sm:$0xff]  ;;  %v3155_v54 = vcombine.low %v364_v42, %v368_v43 }
  0x23   : > { %2081 = vmatpush1.bf16.msra.mxu0 %v3097_v60  ;;  %2240 = vmatpush1.bf16.msra.mxu1 %v3099_v61  ;;  %v3154_v46 = vcombine.high %v363_v40, %v367_v41  ;;  %v371_v48 = vld [vmem:[%s4640_s1 + $0x380] sm:$0xff]  ;;  %v376_v52 = vld [vmem:[%s4640_s1 + $0x3a8] sm:$0xff]  ;;  %v3153_v53 = vcombine.low %v363_v40, %v367_v41 }
  0x24   : > { %2082 = vmatprep.subr.bf16.mxu0 %v3106_v62  ;;  %2241 = vmatprep.subr.bf16.mxu1 %v3108_v63  ;;  %v375_v49 = vld [vmem:[%s4640_s1 + $0x3a0] sm:$0xff]  ;;  %v3164_v56 = vcombine.high %v372_v51, %v376_v52  ;;  %v380_v60 = vld [vmem:[%s4640_s1 + $0x3c8] sm:$0xff]  ;;  %v3163_v63 = vcombine.low %v372_v51, %v376_v52 }
  0x25   : > { %v3162_v55 = vcombine.high %v371_v48, %v375_v49  ;;  %v379_v58 = vld [vmem:[%s4640_s1 + $0x3c0] sm:$0xff]  ;;  %v384_v61 = vld [vmem:[%s4640_s1 + $0x3e8] sm:$0xff]  ;;  %v3161_v62 = vcombine.low %v371_v48, %v375_v49 }
  0x26   : > { %v383_v59 = vld [vmem:[%s4640_s1 + $0x3e0] sm:$0xff]  ;;  %v3172_v1 = vcombine.high %v380_v60, %v384_v61  ;;  %v3850_v32 = vld [vmem:[%s3674_s29 + $0x28] ss:$20 sps:$4 sm:$0xff]  }
  0x27   : > { %2083 = vmatpush1.bf16.msra.mxu0 %v3105_v4  ;;  %2242 = vmatpush1.bf16.msra.mxu1 %v3107_v5  ;;  %v3170_v0 = vcombine.high %v379_v58, %v383_v59  ;;  %v387_v2 = vld [vmem:[%s4640_s1 + $0x400] sm:$0xff]  ;;  %v388_v4 = vld [vmem:[%s4640_s1 + $0x408] sm:$0xff] }
  0x28   : > { %2084 = vmatprep.subr.bf16.mxu0 %v3114_v6  ;;  %2243 = vmatprep.subr.bf16.mxu1 %v3116_v7  ;;  %v391_v3 = vld [vmem:[%s4640_s1 + $0x420] sm:$0xff]  ;;  %v392_v5 = vld [vmem:[%s4640_s1 + $0x428] sm:$0xff]  ;;  %v3169_v6 = vcombine.low %v379_v58, %v383_v59  ;;  %v3171_v7 = vcombine.low %v380_v60, %v384_v61 }
  0x29   : > { %v3178_v8 = vcombine.high %v387_v2, %v391_v3  ;;  %v3180_v9 = vcombine.high %v388_v4, %v392_v5  ;;  %v395_v10 = vld [vmem:[%s4640_s1 + $0x440] sm:$0xff]  ;;  %v3179_v16 = vcombine.low %v388_v4, %v392_v5  ;;  %v420_v40 = vld [vmem:[%s4640_s1 + $0x508] sm:$0xff] }
  0x2a   : > { %v399_v11 = vld [vmem:[%s4640_s1 + $0x460] sm:$0xff]  ;;  %v424_v41 = vld [vmem:[%s4640_s1 + $0x528] sm:$0xff] }
  0x2b   : > { %2085 = vmatpush1.bf16.msra.mxu0 %v3113_v12  ;;  %2244 = vmatpush1.bf16.msra.mxu1 %v3115_v13  ;;  %v3810_v12 = vld [vmem:[%s3674_s29] ss:$20 sps:$4 sm:$0xff]   ;;  %v396_v13 = vld [vmem:[%s4640_s1 + $0x448] sm:$0xff]  ;;  %v3186_v17 = vcombine.high %v395_v10, %v399_v11  ;;  %v3185_v24 = vcombine.low %v395_v10, %v399_v11  ;;  %v3211_v52 = vcombine.low %v420_v40, %v424_v41 }
  0x2c   : > { %2086 = vmatprep.subr.bf16.mxu0 %v3122_v14  ;;  %2245 = vmatprep.subr.bf16.mxu1 %v3124_v15  ;;  %v400_v14 = vld [vmem:[%s4640_s1 + $0x468] sm:$0xff]  ;;  %v3177_v15 = vcombine.low %v387_v2, %v391_v3  ;;  %v403_v19 = vld [vmem:[%s4640_s1 + $0x480] sm:$0xff] }
  0x2d   : > { %v3188_v18 = vcombine.high %v396_v13, %v400_v14  ;;  %v3187_v25 = vcombine.low %v396_v13, %v400_v14  ;;  %v428_v48 = vld [vmem:[%s4640_s1 + $0x548] sm:$0xff] }
  0x2e   : > { %v432_v49 = vld [vmem:[%s4640_s1 + $0x568] sm:$0xff] }
  0x2f   : > { %2087 = vmatpush1.bf16.msra.mxu0 %v3121_v20  ;;  %2246 = vmatpush1.bf16.msra.mxu1 %v3123_v21  ;;  %v407_v20 = vld [vmem:[%s4640_s1 + $0x4a0] sm:$0xff]  ;;  %v436_v58 = vld [vmem:[%s4640_s1 + $0x588] sm:$0xff]  ;;  %v3219_v61 = vcombine.low %v428_v48, %v432_v49 }
  0x30   : > { %2088 = vmatprep.subr.bf16.mxu0 %v3130_v22  ;;  %2247 = vmatprep.subr.bf16.mxu1 %v3132_v23  ;;  %v3825_v21 = vld [vmem:[%s3674_s29 + $0x2c] ss:$20 sps:$4 sm:$0xff]   ;;  %v3194_v26 = vcombine.high %v403_v19, %v407_v20  ;;  %v3193_v33 = vcombine.low %v403_v19, %v407_v20 }
  0x31   : > { %v404_v22 = vld [vmem:[%s4640_s1 + $0x488] sm:$0xff] }
  0x32   : > { %v408_v23 = vld [vmem:[%s4640_s1 + $0x4a8] sm:$0xff] }
  0x33   : > { %2089 = vmatpush1.bf16.msra.mxu0 %v3129_v28  ;;  %2248 = vmatpush1.bf16.msra.mxu1 %v3131_v29  ;;  %v3196_v27 = vcombine.high %v404_v22, %v408_v23  ;;  %v411_v28 = vld [vmem:[%s4640_s1 + $0x4c0] sm:$0xff]  ;;  %v3195_v34 = vcombine.low %v404_v22, %v408_v23  ;;  %v440_v59 = vld [vmem:[%s4640_s1 + $0x5a8] sm:$0xff] }
  0x34   : > { %2090 = vmatprep.subr.bf16.mxu0 %v3138_v30  ;;  %2249 = vmatprep.subr.bf16.mxu1 %v3140_v31  ;;  %v415_v29 = vld [vmem:[%s4640_s1 + $0x4e0] sm:$0xff]  ;;  %v412_v30 = vld [vmem:[%s4640_s1 + $0x4c8] sm:$0xff]  ;;  %v3227_v5 = vcombine.low %v436_v58, %v440_v59 }
  0x35   : > { %v416_v31 = vld [vmem:[%s4640_s1 + $0x4e8] sm:$0xff]  ;;  %v3202_v35 = vcombine.high %v411_v28, %v415_v29  ;;  %v3201_v42 = vcombine.low %v411_v28, %v415_v29 }
  0x36   : > { %v3203_v43 = vcombine.low %v412_v30, %v416_v31  ;;  %v444_v2 = vld [vmem:[%s4640_s1 + $0x5c8] sm:$0xff] }
  0x37   : > { %2091 = vmatpush1.bf16.msra.mxu0 %v3137_v36  ;;  %2250 = vmatpush1.bf16.msra.mxu1 %v3139_v37  ;;  %v3204_v36 = vcombine.high %v412_v30, %v416_v31  ;;  %v419_v37 = vld [vmem:[%s4640_s1 + $0x500] sm:$0xff]  ;;  %v448_v3 = vld [vmem:[%s4640_s1 + $0x5e8] sm:$0xff] }
  0x38   : > { %2092 = vmatprep.subr.bf16.mxu0 %v3146_v38  ;;  %2251 = vmatprep.subr.bf16.mxu1 %v3148_v39  ;;  %v423_v38 = vld [vmem:[%s4640_s1 + $0x520] sm:$0xff]  ;;  %v452_v10 = vld [vmem:[%s4640_s1 + $0x608] sm:$0xff]  ;;  %v3235_v14 = vcombine.low %v444_v2, %v448_v3 }
  0x39   : > { %v3859_v39 = vld [vmem:[%s3674_s29 + $0xc] ss:$20 sps:$4 sm:$0xff]   ;;  %v3209_v51 = vcombine.low %v419_v37, %v423_v38 }
  0x3a   : > { %v456_v11 = vld [vmem:[%s4640_s1 + $0x628] sm:$0xff] }
  0x3b   : > { %2093 = vmatpush1.bf16.msra.mxu0 %v3145_v44  ;;  %2252 = vmatpush1.bf16.msra.mxu1 %v3147_v45  ;;  %v3210_v44 = vcombine.high %v419_v37, %v423_v38  ;;  %v3212_v45 = vcombine.high %v420_v40, %v424_v41  ;;  %v460_v19 = vld [vmem:[%s4640_s1 + $0x648] sm:$0xff]  ;;  %v3243_v23 = vcombine.low %v452_v10, %v456_v11  ;;  %v479_v37 = vld [vmem:[%s4640_s1 + $0x6e0] sm:$0xff] }
  0x3c   : > { %2094 = vmatprep.subr.bf16.mxu0 %v3154_v46  ;;  %2253 = vmatprep.subr.bf16.mxu1 %v3156_v47  ;;  %v427_v46 = vld [vmem:[%s4640_s1 + $0x540] sm:$0xff]  ;;  %v464_v20 = vld [vmem:[%s4640_s1 + $0x668] sm:$0xff] }
  0x3d   : > { %v431_v47 = vld [vmem:[%s4640_s1 + $0x560] sm:$0xff]  ;;  %v468_v28 = vld [vmem:[%s4640_s1 + $0x688] sm:$0xff]  ;;  %v3251_v31 = vcombine.low %v460_v19, %v464_v20 }
  0x3e   : > { %v3217_v60 = vcombine.low %v427_v46, %v431_v47  ;;  %v472_v29 = vld [vmem:[%s4640_s1 + $0x6a8] sm:$0xff] }
  0x3f   : > { %2095 = vmatpush1.bf16.msra.mxu0 %v3153_v53  ;;  %2254 = vmatpush1.bf16.msra.mxu1 %v3155_v54  ;;  %v3218_v53 = vcombine.high %v427_v46, %v431_v47  ;;  %v3220_v54 = vcombine.high %v428_v48, %v432_v49  ;;  %v476_v38 = vld [vmem:[%s4640_s1 + $0x6c8] sm:$0xff]  ;;  %v483_v46 = vld [vmem:[%s4640_s1 + $0x700] sm:$0xff] }
  0x40   : > { %2096 = vmatprep.subr.bf16.mxu0 %v3162_v55  ;;  %2255 = vmatprep.subr.bf16.mxu1 %v3164_v56  ;;  %v435_v55 = vld [vmem:[%s4640_s1 + $0x580] sm:$0xff]  ;;  %v480_v40 = vld [vmem:[%s4640_s1 + $0x6e8] sm:$0xff] }
  0x41   : > { %v439_v56 = vld [vmem:[%s4640_s1 + $0x5a0] sm:$0xff]  ;;  %v484_v48 = vld [vmem:[%s4640_s1 + $0x708] sm:$0xff] }
  0x42   : > { %v3225_v4 = vcombine.low %v435_v55, %v439_v56  ;;  %v487_v47 = vld [vmem:[%s4640_s1 + $0x720] sm:$0xff]  ;;  %v488_v49 = vld [vmem:[%s4640_s1 + $0x728] sm:$0xff] }
  0x43   : > { %2097 = vmatpush1.bf16.msra.mxu0 %v3161_v62  ;;  %2256 = vmatpush1.bf16.msra.mxu1 %v3163_v63  ;;  %v3226_v62 = vcombine.high %v435_v55, %v439_v56  ;;  %v3228_v63 = vcombine.high %v436_v58, %v440_v59  ;;  %v3276_v55 = vcombine.high %v484_v48, %v488_v49  ;;  %v491_v56 = vld [vmem:[%s4640_s1 + $0x740] sm:$0xff]  ;;  %v492_v59 = vld [vmem:[%s4640_s1 + $0x748] sm:$0xff] }
  0x44   : > { %2098 = vmatprep.subr.bf16.mxu0 %v3170_v0  ;;  %2257 = vmatprep.subr.bf16.mxu1 %v3172_v1  ;;  %v443_v0 = vld [vmem:[%s4640_s1 + $0x5c0] sm:$0xff] }
  0x45   : > { %v447_v1 = vld [vmem:[%s4640_s1 + $0x5e0] sm:$0xff] }
  0x46   : > { %v3233_v13 = vcombine.low %v443_v0, %v447_v1  ;;  %v495_v58 = vld [vmem:[%s4640_s1 + $0x760] sm:$0xff] }
  0x47   : > { %2099 = vmatpush1.bf16.msra.mxu0 %v3169_v6  ;;  %2258 = vmatpush1.bf16.msra.mxu1 %v3171_v7  ;;  %v3234_v6 = vcombine.high %v443_v0, %v447_v1  ;;  %v3236_v7 = vcombine.high %v444_v2, %v448_v3  ;;  %v550_v0 = vld [vmem:[%s3947_s16 + $0x18] sm:$0xff]  ;;  %v499_v2 = vld [vmem:[%s4640_s1 + $0x780] sm:$0xff] }
  0x48   : > { %2121 = vmatprep.subr.bf16.mxu0 %v3178_v8  ;;  %2280 = vmatprep.subr.bf16.mxu1 %v3180_v9  ;;  %v451_v8 = vld [vmem:[%s4640_s1 + $0x600] sm:$0xff] }
  0x49   : > { %v455_v9 = vld [vmem:[%s4640_s1 + $0x620] sm:$0xff] }
  0x4a   : > { %2101 = vmatmul.mubr.bf16.vlgmr.msra.gmra.mrb[0].mxu0 %v3810_v12  ;;  %2260 = vmatmul.mubr.bf16.vlgmr.msra.gmra.mrb[0].mxu1 %v3810_v12  ;;  %v3241_v22 = vcombine.low %v451_v8, %v455_v9  ;;  %v503_v3 = vld [vmem:[%s4640_s1 + $0x7a0] sm:$0xff] }
  0x4b   : > { %2122 = vmatpush1.bf16.msra.mxu0 %v3177_v15  ;;  %2281 = vmatpush1.bf16.msra.mxu1 %v3179_v16  ;;  %v3242_v15 = vcombine.high %v451_v8, %v455_v9  ;;  %v3244_v16 = vcombine.high %v452_v10, %v456_v11  ;;  %v3290_v8 = vcombine.high %v499_v2, %v503_v3  ;;  %v507_v10 = vld [vmem:[%s4640_s1 + $0x7c0] sm:$0xff] }
  0x4c   : > { %2123 = vmatprep.subr.bf16.mxu0 %v3186_v17  ;;  %2282 = vmatprep.subr.bf16.mxu1 %v3188_v18  ;;  %v459_v17 = vld [vmem:[%s4640_s1 + $0x640] sm:$0xff] }
  0x4d   : > { %2110 = vmatprep.mubr.bf16.mxu0 %v3825_v21  ;;  %2269 = vmatprep.mubr.bf16.mxu1 %v3825_v21  ;;  %v463_v18 = vld [vmem:[%s4640_s1 + $0x660] sm:$0xff] }
  0x4e   : > { %v3249_v30 = vcombine.low %v459_v17, %v463_v18  ;;  %v511_v11 = vld [vmem:[%s4640_s1 + $0x7e0] sm:$0xff] }
  0x4f   : > { %2124 = vmatpush1.bf16.msra.mxu0 %v3185_v24  ;;  %2283 = vmatpush1.bf16.msra.mxu1 %v3187_v25  ;;  %v3250_v24 = vcombine.high %v459_v17, %v463_v18  ;;  %v3252_v25 = vcombine.high %v460_v19, %v464_v20  ;;  %v3298_v17 = vcombine.high %v507_v10, %v511_v11  ;;  %v515_v19 = vld [vmem:[%s4640_s1 + $0x800] sm:$0xff] }
  0x50   : > { %2125 = vmatprep.subr.bf16.mxu0 %v3194_v26  ;;  %2284 = vmatprep.subr.bf16.mxu1 %v3196_v27  ;;  %v467_v26 = vld [vmem:[%s4640_s1 + $0x680] sm:$0xff] }
  0x51   : > { %v471_v27 = vld [vmem:[%s4640_s1 + $0x6a0] sm:$0xff] }
  0x52   : > { %2111 = vmatmul.mubr.bf16.gmra.mrb[4].mxu0 %v3850_v32  ;;  %2270 = vmatmul.mubr.bf16.gmra.mrb[4].mxu1 %v3850_v32  ;;  %v3257_v41 = vcombine.low %v467_v26, %v471_v27  ;;  %v519_v20 = vld [vmem:[%s4640_s1 + $0x820] sm:$0xff] }
  0x53   : > { %2126 = vmatpush1.bf16.msra.mxu0 %v3193_v33  ;;  %2285 = vmatpush1.bf16.msra.mxu1 %v3195_v34  ;;  %v3258_v33 = vcombine.high %v467_v26, %v471_v27  ;;  %v547_v34 = vld [vmem:[%s3947_s16] sm:$0xff]  ;;  %v3306_v26 = vcombine.high %v515_v19, %v519_v20 }
  0x54   : > { %2127 = vmatprep.subr.bf16.mxu0 %v3202_v35  ;;  %2286 = vmatprep.subr.bf16.mxu1 %v3204_v36  ;;  %v3260_v35 = vcombine.high %v468_v28, %v472_v29  ;;  %v475_v36 = vld [vmem:[%s4640_s1 + $0x6c0] sm:$0xff] }
  0x55   : > { %2153 = vmatprep.mubr.bf16.mxu0 %v3859_v39  ;;  %2312 = vmatprep.mubr.bf16.mxu1 %v3859_v39 }
  0x56   : > { %553 = vperm.xlu0 %3502, %v547_v34   ;;  %v3305_v34 = vcombine.low %v515_v19, %v519_v20 }
  0x57   : > { %2128 = vmatpush1.bf16.msra.mxu0 %v3201_v42  ;;  %2287 = vmatpush1.bf16.msra.mxu1 %v3203_v43  ;;  %v3259_v42 = vcombine.low %v468_v28, %v472_v29  ;;  %v3266_v43 = vcombine.high %v475_v36, %v479_v37  ;;  %v523_v28 = vld [vmem:[%s4640_s1 + $0x840] sm:$0xff] }
  0x58   : > { %2129 = vmatprep.subr.bf16.mxu0 %v3210_v44  ;;  %2288 = vmatprep.subr.bf16.mxu1 %v3212_v45  ;;  %v548_v44 = vld [vmem:[%s3947_s16 + $0x8] sm:$0xff]  ;;  %v3268_v45 = vcombine.high %v476_v38, %v480_v40  ;;  %v527_v29 = vld [vmem:[%s4640_s1 + $0x860] sm:$0xff] }
  0x5a   : > { %558 = vperm.xlu0 %3502, %v548_v44   ;;  %v3313_v44 = vcombine.low %v523_v28, %v527_v29 }
  0x5b   : > { %2130 = vmatpush1.bf16.msra.mxu0 %v3209_v51  ;;  %2289 = vmatpush1.bf16.msra.mxu1 %v3211_v52  ;;  %v3265_v51 = vcombine.low %v475_v36, %v479_v37  ;;  %v3267_v52 = vcombine.low %v476_v38, %v480_v40  ;;  %v3314_v36 = vcombine.high %v523_v28, %v527_v29  ;;  %v4041_v38 = vld [vmem:[%s3674_s29 + $0x34] ss:$20 sps:$4 sm:$0xff]   ;;  %v531_v40 = vld [vmem:[%s4640_s1 + $0x880] sm:$0xff] }
  0x5c   : > { %2131 = vmatprep.subr.bf16.mxu0 %v3218_v53  ;;  %2290 = vmatprep.subr.bf16.mxu1 %v3220_v54  ;;  %v3274_v53 = vcombine.high %v483_v46, %v487_v47  ;;  %v549_v54 = vld [vmem:[%s3947_s16 + $0x10] sm:$0xff] }
  0x5d   : > { %563 = vperm.xlu1 %3503, %v549_v54  }
  0x5f   : > { %2132 = vmatpush1.bf16.msra.mxu0 %v3217_v60  ;;  %2291 = vmatpush1.bf16.msra.mxu1 %v3219_v61  ;;  %v496_v60 = vld [vmem:[%s4640_s1 + $0x768] sm:$0xff]  ;;  %v3273_v61 = vcombine.low %v483_v46, %v487_v47 }
  0x60   : > { %2133 = vmatprep.subr.bf16.mxu0 %v3226_v62  ;;  %2292 = vmatprep.subr.bf16.mxu1 %v3228_v63  ;;  %v3275_v62 = vcombine.low %v484_v48, %v488_v49  ;;  %v3282_v63 = vcombine.high %v491_v56, %v495_v58  ;;  %v3284_v1 = vcombine.high %v492_v59, %v496_v60  ;;  %v539_v48 = vld [vmem:[%s4640_s1 + $0x8c0] sm:$0xff] }
  0x61   : > { %568 = vperm.xlu1 %3503, %v550_v0   ;;  %v543_v49 = vld [vmem:[%s4640_s1 + $0x8e0] sm:$0xff] }
  0x63   : > { %2134 = vmatpush1.bf16.msra.mxu0 %v3225_v4  ;;  %2293 = vmatpush1.bf16.msra.mxu1 %v3227_v5  ;;  %v500_v4 = vld [vmem:[%s4640_s1 + $0x788] sm:$0xff] }
  0x64   : > { %2135 = vmatprep.subr.bf16.mxu0 %v3234_v6  ;;  %2294 = vmatprep.subr.bf16.mxu1 %v3236_v7  ;;  %v504_v5 = vld [vmem:[%s4640_s1 + $0x7a8] sm:$0xff]  ;;  %v3281_v6 = vcombine.low %v491_v56, %v495_v58  ;;  %v3283_v7 = vcombine.low %v492_v59, %v496_v60  ;;  %v3330_v56 = vcombine.high %v539_v48, %v543_v49  ;;  %v261_v59 = vld [vmem:[%s4640_s1 + $0x10] sm:$0xff] }
  0x65   : > { %v3292_v9 = vcombine.high %v500_v4, %v504_v5  ;;  %v265_v60 = vld [vmem:[%s4640_s1 + $0x30] sm:$0xff] }
  0x67   : > { %2136 = vmatpush1.bf16.msra.mxu0 %v3233_v13  ;;  %2295 = vmatpush1.bf16.msra.mxu1 %v3235_v14  ;;  %v508_v13 = vld [vmem:[%s4640_s1 + $0x7c8] sm:$0xff] }
  0x68   : > { %2137 = vmatprep.subr.bf16.mxu0 %v3242_v15  ;;  %2296 = vmatprep.subr.bf16.mxu1 %v3244_v16  ;;  %v512_v14 = vld [vmem:[%s4640_s1 + $0x7e8] sm:$0xff]  ;;  %v3289_v15 = vcombine.low %v499_v2, %v503_v3  ;;  %v3291_v16 = vcombine.low %v500_v4, %v504_v5  ;;  %v269_v3 = vld [vmem:[%s4640_s1 + $0x50] sm:$0xff] }
  0x69   : > { %v3300_v18 = vcombine.high %v508_v13, %v512_v14  ;;  %v273_v4 = vld [vmem:[%s4640_s1 + $0x70] sm:$0xff] }
  0x6a   : > { %v4097_v5 = vld [vmem:[%s3674_s29 + $0x10] ss:$20 sps:$4 sm:$0xff]  }
  0x6b   : > { %2138 = vmatpush1.bf16.msra.mxu0 %v3241_v22  ;;  %2297 = vmatpush1.bf16.msra.mxu1 %v3243_v23  ;;  %v516_v22 = vld [vmem:[%s4640_s1 + $0x808] sm:$0xff] }
  0x6c   : > { %2139 = vmatprep.subr.bf16.mxu0 %v3250_v24  ;;  %2298 = vmatprep.subr.bf16.mxu1 %v3252_v25  ;;  %v520_v23 = vld [vmem:[%s4640_s1 + $0x828] sm:$0xff]  ;;  %v3297_v24 = vcombine.low %v507_v10, %v511_v11  ;;  %v3299_v25 = vcombine.low %v508_v13, %v512_v14  ;;  %v3062_v10 = vcombine.high %v269_v3, %v273_v4  ;;  %v277_v13 = vld [vmem:[%s4640_s1 + $0x90] sm:$0xff] }
  0x6d   : > { %v3308_v27 = vcombine.high %v516_v22, %v520_v23  ;;  %v281_v14 = vld [vmem:[%s4640_s1 + $0xb0] sm:$0xff] }
  0x6e   : > { %v3070_v19 = vcombine.high %v277_v13, %v281_v14 }
  0x6f   : > { %2140 = vmatpush1.bf16.msra.mxu0 %v3249_v30  ;;  %2299 = vmatpush1.bf16.msra.mxu1 %v3251_v31  ;;  %v4032_v30 = vld [vmem:[%s3674_s29 + $0x8] ss:$20 sps:$4 sm:$0xff]  }
  0x70   : > { %2141 = vmatprep.subr.bf16.mxu0 %v3258_v33  ;;  %2300 = vmatprep.subr.bf16.mxu1 %v3260_v35  ;;  %v524_v31 = vld [vmem:[%s4640_s1 + $0x848] sm:$0xff]  ;;  %v3307_v35 = vcombine.low %v516_v22, %v520_v23  ;;  %v285_v22 = vld [vmem:[%s4640_s1 + $0xd0] sm:$0xff] }
  0x71   : > { %v528_v33 = vld [vmem:[%s4640_s1 + $0x868] sm:$0xff]  ;;  %v289_v23 = vld [vmem:[%s4640_s1 + $0xf0] sm:$0xff] }
  0x72   : > { %v3316_v37 = vcombine.high %v524_v31, %v528_v33  ;;  %v3078_v29 = vcombine.high %v285_v22, %v289_v23 }
  0x73   : > { %2142 = vmatpush1.bf16.msra.mxu0 %v3257_v41  ;;  %2301 = vmatpush1.bf16.msra.mxu1 %v3259_v42  ;;  %v535_v41 = vld [vmem:[%s4640_s1 + $0x8a0] sm:$0xff]  ;;  %v532_v42 = vld [vmem:[%s4640_s1 + $0x888] sm:$0xff] }
  0x74   : > { %2143 = vmatprep.subr.bf16.mxu0 %v3266_v43  ;;  %2302 = vmatprep.subr.bf16.mxu1 %v3268_v45  ;;  %v536_v43 = vld [vmem:[%s4640_s1 + $0x8a8] sm:$0xff]  ;;  %v3315_v45 = vcombine.low %v524_v31, %v528_v33  ;;  %v3322_v46 = vcombine.high %v531_v40, %v535_v41  ;;  %v3321_v54 = vcombine.low %v531_v40, %v535_v41  ;;  %v293_v33 = vld [vmem:[%s4640_s1 + $0x110] sm:$0xff] }
  0x75   : > { %v3324_v47 = vcombine.high %v532_v42, %v536_v43 }
  0x77   : > { %2144 = vmatpush1.bf16.msra.mxu0 %v3265_v51  ;;  %2303 = vmatpush1.bf16.msra.mxu1 %v3267_v52  ;;  %v4066_v51 = vld [vmem:[%s3674_s29 + $0x30] ss:$20 sps:$4 sm:$0xff]   ;;  %v540_v52 = vld [vmem:[%s4640_s1 + $0x8c8] sm:$0xff] }
  0x78   : > { %2145 = vmatprep.subr.bf16.mxu0 %v3274_v53  ;;  %2304 = vmatprep.subr.bf16.mxu1 %v3276_v55  ;;  %v544_v53 = vld [vmem:[%s4640_s1 + $0x8e8] sm:$0xff]  ;;  %v3323_v55 = vcombine.low %v532_v42, %v536_v43  ;;  %v301_v43 = vld [vmem:[%s4640_s1 + $0x150] sm:$0xff] }
  0x79   : > { %v3332_v58 = vcombine.high %v540_v52, %v544_v53  ;;  %v3331_v0 = vcombine.low %v540_v52, %v544_v53  ;;  %v309_v53 = vld [vmem:[%s4640_s1 + $0x190] sm:$0xff] }
  0x7b   : > { %2146 = vmatpush1.bf16.msra.mxu0 %v3273_v61  ;;  %2305 = vmatpush1.bf16.msra.mxu1 %v3275_v62  ;;  %v262_v61 = vld [vmem:[%s4640_s1 + $0x18] sm:$0xff] }
  0x7c   : > { %2147 = vmatprep.subr.bf16.mxu0 %v3282_v63  ;;  %2306 = vmatprep.subr.bf16.mxu1 %v3284_v1  ;;  %v266_v62 = vld [vmem:[%s4640_s1 + $0x38] sm:$0xff]  ;;  %v3329_v63 = vcombine.low %v539_v48, %v543_v49  ;;  %v3054_v1 = vcombine.high %v261_v59, %v265_v60 }
  0x7d   : > { %v3056_v2 = vcombine.high %v262_v61, %v266_v62 }
  0x7f   : > { %2148 = vmatpush1.bf16.msra.mxu0 %v3281_v6  ;;  %2307 = vmatpush1.bf16.msra.mxu1 %v3283_v7  ;;  %v270_v6 = vld [vmem:[%s4640_s1 + $0x58] sm:$0xff] }
  0x80   : > { %2149 = vmatprep.subr.bf16.mxu0 %v3290_v8  ;;  %2308 = vmatprep.subr.bf16.mxu1 %v3292_v9  ;;  %v274_v7 = vld [vmem:[%s4640_s1 + $0x78] sm:$0xff]  ;;  %v3053_v8 = vcombine.low %v261_v59, %v265_v60  ;;  %v3055_v9 = vcombine.low %v262_v61, %v266_v62  ;;  %v317_v61 = vld [vmem:[%s4640_s1 + $0x1d0] sm:$0xff] }
  0x81   : > { %v3064_v11 = vcombine.high %v270_v6, %v274_v7  ;;  %v321_v62 = vld [vmem:[%s4640_s1 + $0x1f0] sm:$0xff] }
  0x83   : > { %2150 = vmatpush1.bf16.msra.mxu0 %v3289_v15  ;;  %2309 = vmatpush1.bf16.msra.mxu1 %v3291_v16  ;;  %v278_v15 = vld [vmem:[%s4640_s1 + $0x98] sm:$0xff] }
  0x84   : > { %2151 = vmatprep.subr.bf16.mxu0 %v3298_v17  ;;  %2310 = vmatprep.subr.bf16.mxu1 %v3300_v18  ;;  %v282_v16 = vld [vmem:[%s4640_s1 + $0xb8] sm:$0xff]  ;;  %v3061_v17 = vcombine.low %v269_v3, %v273_v4  ;;  %v3063_v18 = vcombine.low %v270_v6, %v274_v7  ;;  %v3110_v3 = vcombine.high %v317_v61, %v321_v62  ;;  %v325_v6 = vld [vmem:[%s4640_s1 + $0x210] sm:$0xff] }
  0x85   : > { %v3072_v20 = vcombine.high %v278_v15, %v282_v16  ;;  %v3071_v28 = vcombine.low %v278_v15, %v282_v16  ;;  %v329_v7 = vld [vmem:[%s4640_s1 + $0x230] sm:$0xff] }
  0x86   : > { %v333_v15 = vld [vmem:[%s4640_s1 + $0x250] sm:$0xff] }
  0x87   : > { %2152 = vmatpush1.bf16.msra.mxu0 %v3297_v24  ;;  %2311 = vmatpush1.bf16.msra.mxu1 %v3299_v25  ;;  %v4130_v24 = vld [vmem:[%s3674_s29 + $0x38] ss:$20 sps:$4 sm:$0xff]   ;;  %v337_v16 = vld [vmem:[%s4640_s1 + $0x270] sm:$0xff] }
  0x88   : > { %2174 = vmatprep.subr.bf16.mxu0 %v3306_v26  ;;  %2333 = vmatprep.subr.bf16.mxu1 %v3308_v27  ;;  %v286_v25 = vld [vmem:[%s4640_s1 + $0xd8] sm:$0xff]  ;;  %v3069_v27 = vcombine.low %v277_v13, %v281_v14  ;;  %v3118_v13 = vcombine.high %v325_v6, %v329_v7 }
  0x89   : > { %v290_v26 = vld [vmem:[%s4640_s1 + $0xf8] sm:$0xff] }
  0x8a   : > { %2154 = vmatmul.mubr.bf16.vlgmr.msra.gmra.mrb[0].mxu0 %v4032_v30  ;;  %2313 = vmatmul.mubr.bf16.vlgmr.msra.gmra.mrb[0].mxu1 %v4032_v30  ;;  %v3080_v31 = vcombine.high %v286_v25, %v290_v26  ;;  %v3079_v40 = vcombine.low %v286_v25, %v290_v26  ;;  %v341_v25 = vld [vmem:[%s4640_s1 + $0x290] sm:$0xff] }
  0x8b   : > { %2175 = vmatpush1.bf16.msra.mxu0 %v3305_v34  ;;  %2334 = vmatpush1.bf16.msra.mxu1 %v3307_v35  ;;  %v297_v34 = vld [vmem:[%s4640_s1 + $0x130] sm:$0xff]  ;;  %v294_v35 = vld [vmem:[%s4640_s1 + $0x118] sm:$0xff] }
  0x8c   : > { %2176 = vmatprep.subr.bf16.mxu0 %v3314_v36  ;;  %2335 = vmatprep.subr.bf16.mxu1 %v3316_v37  ;;  %v298_v36 = vld [vmem:[%s4640_s1 + $0x138] sm:$0xff]  ;;  %v3077_v37 = vcombine.low %v285_v22, %v289_v23  ;;  %v3086_v41 = vcombine.high %v293_v33, %v297_v34  ;;  %v3126_v22 = vcombine.high %v333_v15, %v337_v16  ;;  %v345_v26 = vld [vmem:[%s4640_s1 + $0x2b0] sm:$0xff] }
  0x8d   : > { %2163 = vmatprep.mubr.bf16.mxu0 %v4041_v38  ;;  %2322 = vmatprep.mubr.bf16.mxu1 %v4041_v38  ;;  %v3088_v42 = vcombine.high %v294_v35, %v298_v36  ;;  %v3087_v48 = vcombine.low %v294_v35, %v298_v36  ;;  %v349_v35 = vld [vmem:[%s4640_s1 + $0x2d0] sm:$0xff] }
  0x8e   : > { %v353_v36 = vld [vmem:[%s4640_s1 + $0x2f0] sm:$0xff] }
  0x8f   : > { %2177 = vmatpush1.bf16.msra.mxu0 %v3313_v44  ;;  %2336 = vmatpush1.bf16.msra.mxu1 %v3315_v45  ;;  %v305_v44 = vld [vmem:[%s4640_s1 + $0x170] sm:$0xff]  ;;  %v302_v45 = vld [vmem:[%s4640_s1 + $0x158] sm:$0xff] }
  0x90   : > { %2178 = vmatprep.subr.bf16.mxu0 %v3322_v46  ;;  %2337 = vmatprep.subr.bf16.mxu1 %v3324_v47  ;;  %v306_v46 = vld [vmem:[%s4640_s1 + $0x178] sm:$0xff]  ;;  %v3085_v47 = vcombine.low %v293_v33, %v297_v34  ;;  %v3094_v49 = vcombine.high %v301_v43, %v305_v44  ;;  %v3134_v33 = vcombine.high %v341_v25, %v345_v26 }
  0x91   : > { %v3096_v52 = vcombine.high %v302_v45, %v306_v46 }
  0x92   : > { %2164 = vmatmul.mubr.bf16.gmra.mrb[4].mxu0 %v4066_v51  ;;  %2323 = vmatmul.mubr.bf16.gmra.mrb[4].mxu1 %v4066_v51 }
  0x93   : > { %2179 = vmatpush1.bf16.msra.mxu0 %v3321_v54  ;;  %2338 = vmatpush1.bf16.msra.mxu1 %v3323_v55  ;;  %v313_v54 = vld [vmem:[%s4640_s1 + $0x1b0] sm:$0xff]  ;;  %v314_v55 = vld [vmem:[%s4640_s1 + $0x1b8] sm:$0xff] }
  0x94   : > { %2180 = vmatprep.subr.bf16.mxu0 %v3330_v56  ;;  %2339 = vmatprep.subr.bf16.mxu1 %v3332_v58  ;;  %v3093_v56 = vcombine.low %v301_v43, %v305_v44  ;;  %v3095_v58 = vcombine.low %v302_v45, %v306_v46  ;;  %v3102_v59 = vcombine.high %v309_v53, %v313_v54  ;;  %v357_v45 = vld [vmem:[%s4640_s1 + $0x310] sm:$0xff] }
  0x95   : > { %2206 = vmatprep.mubr.bf16.mxu0 %v3542_v50  ;;  %2365 = vmatprep.mubr.bf16.mxu1 %v3542_v50  ;;  %v3142_v43 = vcombine.high %v349_v35, %v353_v36  ;;  %v361_v46 = vld [vmem:[%s4640_s1 + $0x330] sm:$0xff] }
  0x97   : > { %2181 = vmatpush1.bf16.msra.mxu0 %v3329_v63  ;;  %2340 = vmatpush1.bf16.msra.mxu1 %v3331_v0  ;;  %v318_v63 = vld [vmem:[%s4640_s1 + $0x1d8] sm:$0xff] }
  0x98   : > { %2386 = vmatprep.subr.bf16.mxu0 %v3054_v1  ;;  %2545 = vmatprep.subr.bf16.mxu1 %v3056_v2  ;;  %v322_v0 = vld [vmem:[%s4640_s1 + $0x1f8] sm:$0xff]  ;;  %v3101_v1 = vcombine.low %v309_v53, %v313_v54  ;;  %v3150_v53 = vcombine.high %v357_v45, %v361_v46 }
  0x99   : > { %v3112_v4 = vcombine.high %v318_v63, %v322_v0 }
  0x9a   : > { %3337 = vmatmul.mubr.msk.bf16.vlgmr.msra.gmra.mrb[0].mxu0 %vm2061_vm0, %v4097_v5  ;;  %3339 = vmatmul.mubr.msk.bf16.vlgmr.msra.gmra.mrb[0].mxu1 %vm2061_vm0, %v4097_v5 }
  0x9b   : > { %2387 = vmatpush1.bf16.msra.mxu0 %v3053_v8  ;;  %2546 = vmatpush1.bf16.msra.mxu1 %v3055_v9  ;;  %v326_v8 = vld [vmem:[%s4640_s1 + $0x218] sm:$0xff] }
  0x9c   : > { %2388 = vmatprep.subr.bf16.mxu0 %v3062_v10  ;;  %2547 = vmatprep.subr.bf16.mxu1 %v3064_v11  ;;  %v330_v9 = vld [vmem:[%s4640_s1 + $0x238] sm:$0xff]  ;;  %v3109_v10 = vcombine.low %v317_v61, %v321_v62  ;;  %v3111_v11 = vcombine.low %v318_v63, %v322_v0  ;;  %v373_v63 = vld [vmem:[%s4640_s1 + $0x390] sm:$0xff] }
  0x9d   : > { %2216 = vmatprep.mubr.bf16.mxu0 %v3542_v50  ;;  %2375 = vmatprep.mubr.bf16.mxu1 %v3542_v50  ;;  %v3120_v14 = vcombine.high %v326_v8, %v330_v9  ;;  %v377_v0 = vld [vmem:[%s4640_s1 + $0x3b0] sm:$0xff] }
  0x9f   : > { %2389 = vmatpush1.bf16.msra.mxu0 %v3061_v17  ;;  %2548 = vmatpush1.bf16.msra.mxu1 %v3063_v18  ;;  %v334_v17 = vld [vmem:[%s4640_s1 + $0x258] sm:$0xff] }
  0xa0   : > { %2390 = vmatprep.subr.bf16.mxu0 %v3070_v19  ;;  %2549 = vmatprep.subr.bf16.mxu1 %v3072_v20  ;;  %v338_v18 = vld [vmem:[%s4640_s1 + $0x278] sm:$0xff]  ;;  %v3117_v19 = vcombine.low %v325_v6, %v329_v7  ;;  %v3119_v20 = vcombine.low %v326_v8, %v330_v9  ;;  %v3166_v6 = vcombine.high %v373_v63, %v377_v0  ;;  %v381_v8 = vld [vmem:[%s4640_s1 + $0x3d0] sm:$0xff] }
  0xa1   : > { %v3128_v23 = vcombine.high %v334_v17, %v338_v18  ;;  %v385_v9 = vld [vmem:[%s4640_s1 + $0x3f0] sm:$0xff] }
  0xa2   : > { %3338 = vmatmul.mubr.msk.bf16.gmra.mrb[4].mxu0 %vm2061_vm0, %v4130_v24  ;;  %3340 = vmatmul.mubr.msk.bf16.gmra.mrb[4].mxu1 %vm2061_vm0, %v4130_v24 }
  0xa3   : > { %2391 = vmatpush1.bf16.msra.mxu0 %v3069_v27  ;;  %2550 = vmatpush1.bf16.msra.mxu1 %v3071_v28  ;;  %v342_v27 = vld [vmem:[%s4640_s1 + $0x298] sm:$0xff] }
  0xa4   : > { %2392 = vmatprep.subr.bf16.mxu0 %v3078_v29  ;;  %2551 = vmatprep.subr.bf16.mxu1 %v3080_v31  ;;  %v346_v28 = vld [vmem:[%s4640_s1 + $0x2b8] sm:$0xff]  ;;  %v3125_v29 = vcombine.low %v333_v15, %v337_v16  ;;  %v3127_v31 = vcombine.low %v334_v17, %v338_v18  ;;  %v3174_v15 = vcombine.high %v381_v8, %v385_v9  ;;  %v389_v17 = vld [vmem:[%s4640_s1 + $0x410] sm:$0xff] }
  0xa5   : > { %2418 = vmatprep.mubr.bf16.mxu0 %v3685_v57  ;;  %2577 = vmatprep.mubr.bf16.mxu1 %v3685_v57  ;;  %v310_v57 = vld [vmem:[%s4640_s1 + $0x198] sm:$0xff]  ;;  %v3136_v34 = vcombine.high %v342_v27, %v346_v28  ;;  %v393_v18 = vld [vmem:[%s4640_s1 + $0x430] sm:$0xff] }
  0xa6   : > { %v3104_v60 = vcombine.high %v310_v57, %v314_v55  ;;  %v3103_v2 = vcombine.low %v310_v57, %v314_v55  ;;  %v365_v57 = vld [vmem:[%s4640_s1 + $0x350] sm:$0xff] }
  0xa7   : > { %2393 = vmatpush1.bf16.msra.mxu0 %v3077_v37  ;;  %2552 = vmatpush1.bf16.msra.mxu1 %v3079_v40  ;;  %v350_v37 = vld [vmem:[%s4640_s1 + $0x2d8] sm:$0xff]  ;;  %v369_v55 = vld [vmem:[%s4640_s1 + $0x370] sm:$0xff] }
  0xa8   : > { %2394 = vmatprep.subr.bf16.mxu0 %v3086_v41  ;;  %2553 = vmatprep.subr.bf16.mxu1 %v3088_v42  ;;  %v354_v40 = vld [vmem:[%s4640_s1 + $0x2f8] sm:$0xff]  ;;  %v3133_v41 = vcombine.low %v341_v25, %v345_v26  ;;  %v3135_v42 = vcombine.low %v342_v27, %v346_v28  ;;  %v3158_v61 = vcombine.high %v365_v57, %v369_v55  ;;  %v397_v27 = vld [vmem:[%s4640_s1 + $0x450] sm:$0xff] }
  0xa9   : > { %v3144_v44 = vcombine.high %v350_v37, %v354_v40  ;;  %v3182_v25 = vcombine.high %v389_v17, %v393_v18  ;;  %v401_v28 = vld [vmem:[%s4640_s1 + $0x470] sm:$0xff] }
  0xab   : > { %2395 = vmatpush1.bf16.msra.mxu0 %v3085_v47  ;;  %2554 = vmatpush1.bf16.msra.mxu1 %v3087_v48  ;;  %v358_v47 = vld [vmem:[%s4640_s1 + $0x318] sm:$0xff] }
  0xac   : > { %2396 = vmatprep.subr.bf16.mxu0 %v3094_v49  ;;  %2555 = vmatprep.subr.bf16.mxu1 %v3096_v52  ;;  %v362_v48 = vld [vmem:[%s4640_s1 + $0x338] sm:$0xff]  ;;  %v3141_v49 = vcombine.low %v349_v35, %v353_v36  ;;  %v3143_v52 = vcombine.low %v350_v37, %v354_v40  ;;  %v3190_v35 = vcombine.high %v397_v27, %v401_v28  ;;  %v405_v37 = vld [vmem:[%s4640_s1 + $0x490] sm:$0xff] }
  0xad   : > { %v3152_v54 = vcombine.high %v358_v47, %v362_v48  ;;  %v409_v40 = vld [vmem:[%s4640_s1 + $0x4b0] sm:$0xff] }
  0xaf   : > { %2397 = vmatpush1.bf16.msra.mxu0 %v3093_v56  ;;  %2556 = vmatpush1.bf16.msra.mxu1 %v3095_v58  ;;  %v366_v56 = vld [vmem:[%s4640_s1 + $0x358] sm:$0xff] }
  0xb0   : > { %2398 = vmatprep.subr.bf16.mxu0 %v3102_v59  ;;  %2557 = vmatprep.subr.bf16.mxu1 %v3104_v60  ;;  %v370_v58 = vld [vmem:[%s4640_s1 + $0x378] sm:$0xff]  ;;  %v3149_v59 = vcombine.low %v357_v45, %v361_v46  ;;  %v3151_v60 = vcombine.low %v358_v47, %v362_v48  ;;  %v3198_v45 = vcombine.high %v405_v37, %v409_v40  ;;  %v413_v47 = vld [vmem:[%s4640_s1 + $0x4d0] sm:$0xff] }
  0xb1   : > { %v3160_v62 = vcombine.high %v366_v56, %v370_v58  ;;  %v417_v48 = vld [vmem:[%s4640_s1 + $0x4f0] sm:$0xff] }
  0xb3   : > { %2399 = vmatpush1.bf16.msra.mxu0 %v3101_v1  ;;  %2558 = vmatpush1.bf16.msra.mxu1 %v3103_v2  ;;  %v374_v1 = vld [vmem:[%s4640_s1 + $0x398] sm:$0xff] }
  0xb4   : > { %2400 = vmatprep.subr.bf16.mxu0 %v3110_v3  ;;  %2559 = vmatprep.subr.bf16.mxu1 %v3112_v4  ;;  %v378_v2 = vld [vmem:[%s4640_s1 + $0x3b8] sm:$0xff]  ;;  %v3157_v3 = vcombine.low %v365_v57, %v369_v55  ;;  %v3159_v4 = vcombine.low %v366_v56, %v370_v58  ;;  %v421_v55 = vld [vmem:[%s4640_s1 + $0x510] sm:$0xff] }
  0xb5   : > { %v3168_v7 = vcombine.high %v374_v1, %v378_v2  ;;  %v425_v56 = vld [vmem:[%s4640_s1 + $0x530] sm:$0xff]  ;;  %v426_v58 = vld [vmem:[%s4640_s1 + $0x538] sm:$0xff] }
  0xb7   : > { %2401 = vmatpush1.bf16.msra.mxu0 %v3109_v10  ;;  %2560 = vmatpush1.bf16.msra.mxu1 %v3111_v11  ;;  %v382_v10 = vld [vmem:[%s4640_s1 + $0x3d8] sm:$0xff] }
  0xb8   : > { %2402 = vmatprep.subr.bf16.mxu0 %v3118_v13  ;;  %2561 = vmatprep.subr.bf16.mxu1 %v3120_v14  ;;  %v386_v11 = vld [vmem:[%s4640_s1 + $0x3f8] sm:$0xff]  ;;  %v3165_v13 = vcombine.low %v373_v63, %v377_v0  ;;  %v3167_v14 = vcombine.low %v374_v1, %v378_v2  ;;  %v429_v63 = vld [vmem:[%s4640_s1 + $0x550] sm:$0xff]  ;;  %v3213_v2 = vcombine.low %v421_v55, %v425_v56 }
  0xb9   : > { %v3176_v16 = vcombine.high %v382_v10, %v386_v11  ;;  %v433_v0 = vld [vmem:[%s4640_s1 + $0x570] sm:$0xff]  ;;  %v434_v1 = vld [vmem:[%s4640_s1 + $0x578] sm:$0xff] }
  0xbb   : > { %2403 = vmatpush1.bf16.msra.mxu0 %v3117_v19  ;;  %2562 = vmatpush1.bf16.msra.mxu1 %v3119_v20  ;;  %v390_v19 = vld [vmem:[%s4640_s1 + $0x418] sm:$0xff] }
  0xbc   : > { %2404 = vmatprep.subr.bf16.mxu0 %v3126_v22  ;;  %2563 = vmatprep.subr.bf16.mxu1 %v3128_v23  ;;  %v394_v20 = vld [vmem:[%s4640_s1 + $0x438] sm:$0xff]  ;;  %v3173_v22 = vcombine.low %v381_v8, %v385_v9  ;;  %v3175_v23 = vcombine.low %v382_v10, %v386_v11  ;;  %v441_v8 = vld [vmem:[%s4640_s1 + $0x5b0] sm:$0xff]  ;;  %v3221_v10 = vcombine.low %v429_v63, %v433_v0 }
  0xbd   : > { %v3184_v26 = vcombine.high %v390_v19, %v394_v20  ;;  %v442_v9 = vld [vmem:[%s4640_s1 + $0x5b8] sm:$0xff] }
  0xbf   : > { %2405 = vmatpush1.bf16.msra.mxu0 %v3125_v29  ;;  %2564 = vmatpush1.bf16.msra.mxu1 %v3127_v31  ;;  %v398_v29 = vld [vmem:[%s4640_s1 + $0x458] sm:$0xff] }
  0xc0   : > { %2406 = vmatprep.subr.bf16.mxu0 %v3134_v33  ;;  %2565 = vmatprep.subr.bf16.mxu1 %v3136_v34  ;;  %v402_v31 = vld [vmem:[%s4640_s1 + $0x478] sm:$0xff]  ;;  %v3181_v33 = vcombine.low %v389_v17, %v393_v18  ;;  %v3183_v34 = vcombine.low %v390_v19, %v394_v20 }
  0xc1   : > { %v3192_v36 = vcombine.high %v398_v29, %v402_v31  ;;  %v446_v17 = vld [vmem:[%s4640_s1 + $0x5d8] sm:$0xff] }
  0xc2   : > { %v450_v18 = vld [vmem:[%s4640_s1 + $0x5f8] sm:$0xff] }
  0xc3   : > { %2407 = vmatpush1.bf16.msra.mxu0 %v3133_v41  ;;  %2566 = vmatpush1.bf16.msra.mxu1 %v3135_v42  ;;  %v406_v41 = vld [vmem:[%s4640_s1 + $0x498] sm:$0xff] }
  0xc4   : > { %2408 = vmatprep.subr.bf16.mxu0 %v3142_v43  ;;  %2567 = vmatprep.subr.bf16.mxu1 %v3144_v44  ;;  %v410_v42 = vld [vmem:[%s4640_s1 + $0x4b8] sm:$0xff]  ;;  %v3189_v43 = vcombine.low %v397_v27, %v401_v28  ;;  %v3191_v44 = vcombine.low %v398_v29, %v402_v31  ;;  %v3239_v31 = vcombine.low %v446_v17, %v450_v18 }
  0xc5   : > { %v3200_v46 = vcombine.high %v406_v41, %v410_v42  ;;  %v454_v27 = vld [vmem:[%s4640_s1 + $0x618] sm:$0xff] }
  0xc6   : > { %v458_v28 = vld [vmem:[%s4640_s1 + $0x638] sm:$0xff] }
  0xc7   : > { %2409 = vmatpush1.bf16.msra.mxu0 %v3141_v49  ;;  %2568 = vmatpush1.bf16.msra.mxu1 %v3143_v52  ;;  %v418_v49 = vld [vmem:[%s4640_s1 + $0x4f8] sm:$0xff]  ;;  %v3197_v52 = vcombine.low %v405_v37, %v409_v40 }
  0xc8   : > { %2410 = vmatprep.subr.bf16.mxu0 %v3150_v53  ;;  %2569 = vmatprep.subr.bf16.mxu1 %v3152_v54  ;;  %v3199_v53 = vcombine.low %v406_v41, %v410_v42  ;;  %v3206_v54 = vcombine.high %v413_v47, %v417_v48  ;;  %v462_v37 = vld [vmem:[%s4640_s1 + $0x658] sm:$0xff]  ;;  %v3247_v42 = vcombine.low %v454_v27, %v458_v28 }
  0xc9   : > { %v466_v40 = vld [vmem:[%s4640_s1 + $0x678] sm:$0xff] }
  0xcb   : > { %2411 = vmatpush1.bf16.msra.mxu0 %v3149_v59  ;;  %2570 = vmatpush1.bf16.msra.mxu1 %v3151_v60  ;;  %v3205_v59 = vcombine.low %v413_v47, %v417_v48  ;;  %v470_v47 = vld [vmem:[%s4640_s1 + $0x698] sm:$0xff] }
  0xcc   : > { %2412 = vmatprep.subr.bf16.mxu0 %v3158_v61  ;;  %2571 = vmatprep.subr.bf16.mxu1 %v3160_v62  ;;  %v3214_v61 = vcombine.high %v421_v55, %v425_v56  ;;  %v474_v48 = vld [vmem:[%s4640_s1 + $0x6b8] sm:$0xff] }
  0xcd   : > { %v478_v55 = vld [vmem:[%s4640_s1 + $0x6d8] sm:$0xff] }
  0xce   : > { %v482_v56 = vld [vmem:[%s4640_s1 + $0x6f8] sm:$0xff] }
  0xcf   : > { %2413 = vmatpush1.bf16.msra.mxu0 %v3157_v3  ;;  %2572 = vmatpush1.bf16.msra.mxu1 %v3159_v4  ;;  %v3222_v4 = vcombine.high %v429_v63, %v433_v0  ;;  %v486_v63 = vld [vmem:[%s4640_s1 + $0x718] sm:$0xff] }
  0xd0   : > { %2414 = vmatprep.subr.bf16.mxu0 %v3166_v6  ;;  %2573 = vmatprep.subr.bf16.mxu1 %v3168_v7  ;;  %v437_v7 = vld [vmem:[%s4640_s1 + $0x590] sm:$0xff]  ;;  %v490_v0 = vld [vmem:[%s4640_s1 + $0x738] sm:$0xff] }
  0xd1   : > { %v3229_v19 = vcombine.low %v437_v7, %v441_v8 }
  0xd3   : > { %2415 = vmatpush1.bf16.msra.mxu0 %v3165_v13  ;;  %2574 = vmatpush1.bf16.msra.mxu1 %v3167_v14  ;;  %v3230_v13 = vcombine.high %v437_v7, %v441_v8  ;;  %v494_v7 = vld [vmem:[%s4640_s1 + $0x758] sm:$0xff] }
  0xd4   : > { %2416 = vmatprep.subr.bf16.mxu0 %v3174_v15  ;;  %2575 = vmatprep.subr.bf16.mxu1 %v3176_v16  ;;  %v445_v15 = vld [vmem:[%s4640_s1 + $0x5d0] sm:$0xff]  ;;  %v498_v8 = vld [vmem:[%s4640_s1 + $0x778] sm:$0xff] }
  0xd5   : > { %v449_v16 = vld [vmem:[%s4640_s1 + $0x5f0] sm:$0xff] }
  0xd6   : > { %v3237_v29 = vcombine.low %v445_v15, %v449_v16 }
  0xd7   : > { %2417 = vmatpush1.bf16.msra.mxu0 %v3173_v22  ;;  %2576 = vmatpush1.bf16.msra.mxu1 %v3175_v23  ;;  %v3238_v22 = vcombine.high %v445_v15, %v449_v16  ;;  %v3240_v23 = vcombine.high %v446_v17, %v450_v18  ;;  %v502_v15 = vld [vmem:[%s4640_s1 + $0x798] sm:$0xff]  ;;  %v3287_v18 = vcombine.low %v494_v7, %v498_v8 }
  0xd8   : > { %2439 = vmatprep.subr.bf16.mxu0 %v3182_v25  ;;  %2598 = vmatprep.subr.bf16.mxu1 %v3184_v26  ;;  %v453_v25 = vld [vmem:[%s4640_s1 + $0x610] sm:$0xff]  ;;  %v506_v16 = vld [vmem:[%s4640_s1 + $0x7b8] sm:$0xff] }
  0xd9   : > { %v457_v26 = vld [vmem:[%s4640_s1 + $0x630] sm:$0xff] }
  0xda   : > { %2419 = vmatmul.mubr.bf16.vlgmr.msra.gmra.mrb[8].mxu0 %v3810_v12  ;;  %2578 = vmatmul.mubr.bf16.vlgmr.msra.gmra.mrb[8].mxu1 %v3810_v12  ;;  %v414_v12 = vld [vmem:[%s4640_s1 + $0x4d8] sm:$0xff]  ;;  %v3245_v41 = vcombine.low %v453_v25, %v457_v26 }
  0xdb   : > { %2440 = vmatpush1.bf16.msra.mxu0 %v3181_v33  ;;  %2599 = vmatpush1.bf16.msra.mxu1 %v3183_v34  ;;  %v3208_v57 = vcombine.high %v414_v12, %v418_v49  ;;  %v3207_v60 = vcombine.low %v414_v12, %v418_v49  ;;  %v3246_v33 = vcombine.high %v453_v25, %v457_v26  ;;  %v510_v25 = vld [vmem:[%s4640_s1 + $0x7d8] sm:$0xff] }
  0xdc   : > { %2441 = vmatprep.subr.bf16.mxu0 %v3190_v35  ;;  %2600 = vmatprep.subr.bf16.mxu1 %v3192_v36  ;;  %v3248_v34 = vcombine.high %v454_v27, %v458_v28  ;;  %v461_v35 = vld [vmem:[%s4640_s1 + $0x650] sm:$0xff]  ;;  %v3255_v49 = vcombine.low %v462_v37, %v466_v40  ;;  %v514_v26 = vld [vmem:[%s4640_s1 + $0x7f8] sm:$0xff]  ;;  %v3295_v28 = vcombine.low %v502_v15, %v506_v16 }
  0xdd   : > { %2428 = vmatprep.mubr.bf16.mxu0 %v3825_v21  ;;  %2587 = vmatprep.mubr.bf16.mxu1 %v3825_v21  ;;  %v422_v21 = vld [vmem:[%s4640_s1 + $0x518] sm:$0xff]  ;;  %v465_v36 = vld [vmem:[%s4640_s1 + $0x670] sm:$0xff] }
  0xde   : > { %v3216_v62 = vcombine.high %v422_v21, %v426_v58  ;;  %v3215_v3 = vcombine.low %v422_v21, %v426_v58  ;;  %v3253_v12 = vcombine.low %v461_v35, %v465_v36  ;;  %v3263_v58 = vcombine.low %v470_v47, %v474_v48 }
  0xdf   : > { %2442 = vmatpush1.bf16.msra.mxu0 %v3189_v43  ;;  %2601 = vmatpush1.bf16.msra.mxu1 %v3191_v44  ;;  %v3254_v43 = vcombine.high %v461_v35, %v465_v36  ;;  %v3256_v44 = vcombine.high %v462_v37, %v466_v40  ;;  %v518_v35 = vld [vmem:[%s4640_s1 + $0x818] sm:$0xff]  ;;  %v3303_v40 = vcombine.low %v510_v25, %v514_v26 }
  0xe0   : > { %2443 = vmatprep.subr.bf16.mxu0 %v3198_v45  ;;  %2602 = vmatprep.subr.bf16.mxu1 %v3200_v46  ;;  %v469_v45 = vld [vmem:[%s4640_s1 + $0x690] sm:$0xff]  ;;  %v522_v36 = vld [vmem:[%s4640_s1 + $0x838] sm:$0xff] }
  0xe1   : > { %v473_v46 = vld [vmem:[%s4640_s1 + $0x6b0] sm:$0xff] }
  0xe2   : > { %2429 = vmatmul.mubr.bf16.gmra.mrb[12].mxu0 %v3850_v32  ;;  %2588 = vmatmul.mubr.bf16.gmra.mrb[12].mxu1 %v3850_v32  ;;  %v430_v32 = vld [vmem:[%s4640_s1 + $0x558] sm:$0xff]  ;;  %v3261_v21 = vcombine.low %v469_v45, %v473_v46 }
  0xe3   : > { %2444 = vmatpush1.bf16.msra.mxu0 %v3197_v52  ;;  %2603 = vmatpush1.bf16.msra.mxu1 %v3199_v53  ;;  %v3224_v6 = vcombine.high %v430_v32, %v434_v1  ;;  %v3223_v11 = vcombine.low %v430_v32, %v434_v1  ;;  %v3262_v52 = vcombine.high %v469_v45, %v473_v46  ;;  %v526_v45 = vld [vmem:[%s4640_s1 + $0x858] sm:$0xff] }
  0xe4   : > { %2445 = vmatprep.subr.bf16.mxu0 %v3206_v54  ;;  %2604 = vmatprep.subr.bf16.mxu1 %v3208_v57  ;;  %v3264_v53 = vcombine.high %v470_v47, %v474_v48  ;;  %v477_v54 = vld [vmem:[%s4640_s1 + $0x6d0] sm:$0xff]  ;;  %v3271_v1 = vcombine.low %v478_v55, %v482_v56  ;;  %v530_v46 = vld [vmem:[%s4640_s1 + $0x878] sm:$0xff]  ;;  %v3311_v48 = vcombine.low %v518_v35, %v522_v36 }
  0xe5   : > { %2471 = vmatprep.mubr.bf16.mxu0 %v3859_v39  ;;  %2630 = vmatprep.mubr.bf16.mxu1 %v3859_v39  ;;  %v438_v39 = vld [vmem:[%s4640_s1 + $0x598] sm:$0xff]  ;;  %v481_v57 = vld [vmem:[%s4640_s1 + $0x6f0] sm:$0xff] }
  0xe6   : > { %v3232_v14 = vcombine.high %v438_v39, %v442_v9  ;;  %v3231_v20 = vcombine.low %v438_v39, %v442_v9  ;;  %v3269_v32 = vcombine.low %v477_v54, %v481_v57  ;;  %v3279_v9 = vcombine.low %v486_v63, %v490_v0 }
  0xe7   : > { %2446 = vmatpush1.bf16.msra.mxu0 %v3205_v59  ;;  %2605 = vmatpush1.bf16.msra.mxu1 %v3207_v60  ;;  %v3270_v59 = vcombine.high %v477_v54, %v481_v57  ;;  %v3272_v60 = vcombine.high %v478_v55, %v482_v56  ;;  %v534_v54 = vld [vmem:[%s4640_s1 + $0x898] sm:$0xff]  ;;  %v3319_v56 = vcombine.low %v526_v45, %v530_v46 }
  0xe8   : > { %2447 = vmatprep.subr.bf16.mxu0 %v3214_v61  ;;  %2606 = vmatprep.subr.bf16.mxu1 %v3216_v62  ;;  %v485_v61 = vld [vmem:[%s4640_s1 + $0x710] sm:$0xff]  ;;  %v538_v57 = vld [vmem:[%s4640_s1 + $0x8b8] sm:$0xff] }
  0xe9   : > { %v489_v62 = vld [vmem:[%s4640_s1 + $0x730] sm:$0xff] }
  0xea   : > { %v3277_v39 = vcombine.low %v485_v61, %v489_v62 }
  0xeb   : > { %2448 = vmatpush1.bf16.msra.mxu0 %v3213_v2  ;;  %2607 = vmatpush1.bf16.msra.mxu1 %v3215_v3  ;;  %v3278_v2 = vcombine.high %v485_v61, %v489_v62  ;;  %v3280_v3 = vcombine.high %v486_v63, %v490_v0  ;;  %v546_v61 = vld [vmem:[%s4640_s1 + $0x8f8] sm:$0xff]  ;;  %v3327_v63 = vcombine.low %v534_v54, %v538_v57 }
  0xec   : > { %2449 = vmatprep.subr.bf16.mxu0 %v3222_v4  ;;  %2608 = vmatprep.subr.bf16.mxu1 %v3224_v6  ;;  %v493_v4 = vld [vmem:[%s4640_s1 + $0x750] sm:$0xff] }
  0xed   : > { %v497_v6 = vld [vmem:[%s4640_s1 + $0x770] sm:$0xff] }
  0xee   : > { %v3285_v17 = vcombine.low %v493_v4, %v497_v6 }
  0xef   : > { %2450 = vmatpush1.bf16.msra.mxu0 %v3221_v10  ;;  %2609 = vmatpush1.bf16.msra.mxu1 %v3223_v11  ;;  %v3286_v10 = vcombine.high %v493_v4, %v497_v6  ;;  %v3288_v11 = vcombine.high %v494_v7, %v498_v8  ;;  %v4558_v4 = vpop.permute.xlu1 %563 }
  0xf0   : > { %2451 = vmatprep.subr.bf16.mxu0 %v3230_v13  ;;  %2610 = vmatprep.subr.bf16.mxu1 %v3232_v14  ;;  %v501_v13 = vld [vmem:[%s4640_s1 + $0x790] sm:$0xff] }
  0xf1   : > { %v505_v14 = vld [vmem:[%s4640_s1 + $0x7b0] sm:$0xff] }
  0xf2   : > { %v3293_v27 = vcombine.low %v501_v13, %v505_v14 }
  0xf3   : > { %2452 = vmatpush1.bf16.msra.mxu0 %v3229_v19  ;;  %2611 = vmatpush1.bf16.msra.mxu1 %v3231_v20  ;;  %v3294_v19 = vcombine.high %v501_v13, %v505_v14  ;;  %v3296_v20 = vcombine.high %v502_v15, %v506_v16 }
  0xf4   : > { %2453 = vmatprep.subr.bf16.mxu0 %v3238_v22  ;;  %2612 = vmatprep.subr.bf16.mxu1 %v3240_v23  ;;  %v509_v22 = vld [vmem:[%s4640_s1 + $0x7d0] sm:$0xff] }
  0xf5   : > { %v513_v23 = vld [vmem:[%s4640_s1 + $0x7f0] sm:$0xff] }
  0xf6   : > { %v3301_v37 = vcombine.low %v509_v22, %v513_v23 }
  0xf7   : > { %2454 = vmatpush1.bf16.msra.mxu0 %v3237_v29  ;;  %2613 = vmatpush1.bf16.msra.mxu1 %v3239_v31  ;;  %v3302_v29 = vcombine.high %v509_v22, %v513_v23  ;;  %v3304_v31 = vcombine.high %v510_v25, %v514_v26 }
  0xf8   : > { %2455 = vmatprep.subr.bf16.mxu0 %v3246_v33  ;;  %2614 = vmatprep.subr.bf16.mxu1 %v3248_v34  ;;  %v517_v33 = vld [vmem:[%s4640_s1 + $0x810] sm:$0xff] }
  0xf9   : > { %v521_v34 = vld [vmem:[%s4640_s1 + $0x830] sm:$0xff] }
  0xfa   : > { %v3309_v47 = vcombine.low %v517_v33, %v521_v34 }
  0xfb   : > { %2456 = vmatpush1.bf16.msra.mxu0 %v3245_v41  ;;  %2615 = vmatpush1.bf16.msra.mxu1 %v3247_v42  ;;  %v3310_v41 = vcombine.high %v517_v33, %v521_v34  ;;  %v3312_v42 = vcombine.high %v518_v35, %v522_v36 }
  0xfc   : > { %2457 = vmatprep.subr.bf16.mxu0 %v3254_v43  ;;  %2616 = vmatprep.subr.bf16.mxu1 %v3256_v44  ;;  %v525_v43 = vld [vmem:[%s4640_s1 + $0x850] sm:$0xff] }
  0xfd   : > { %v529_v44 = vld [vmem:[%s4640_s1 + $0x870] sm:$0xff] }
  0xfe   : > { %v3317_v55 = vcombine.low %v525_v43, %v529_v44 }
  0xff   : > { %2458 = vmatpush1.bf16.msra.mxu0 %v3253_v12  ;;  %2617 = vmatpush1.bf16.msra.mxu1 %v3255_v49  ;;  %v3318_v12 = vcombine.high %v525_v43, %v529_v44  ;;  %v3320_v49 = vcombine.high %v526_v45, %v530_v46 }
 0x100   : > { %2459 = vmatprep.subr.bf16.mxu0 %v3262_v52  ;;  %2618 = vmatprep.subr.bf16.mxu1 %v3264_v53  ;;  %v533_v52 = vld [vmem:[%s4640_s1 + $0x890] sm:$0xff] }
 0x101   : > { %v537_v53 = vld [vmem:[%s4640_s1 + $0x8b0] sm:$0xff] }
 0x102   : > { %v3325_v62 = vcombine.low %v533_v52, %v537_v53 }
 0x103   : > { %2460 = vmatpush1.bf16.msra.mxu0 %v3261_v21  ;;  %2619 = vmatpush1.bf16.msra.mxu1 %v3263_v58  ;;  %v3326_v21 = vcombine.high %v533_v52, %v537_v53  ;;  %v3328_v58 = vcombine.high %v534_v54, %v538_v57 }
 0x104   : > { %2461 = vmatprep.subr.bf16.mxu0 %v3270_v59  ;;  %2620 = vmatprep.subr.bf16.mxu1 %v3272_v60  ;;  %v541_v59 = vld [vmem:[%s4640_s1 + $0x8d0] sm:$0xff] }
 0x105   : > { %v545_v60 = vld [vmem:[%s4640_s1 + $0x8f0] sm:$0xff] }
 0x106   : > { %v3334_v0 = vcombine.high %v541_v59, %v545_v60 }
 0x107   : > { %2462 = vmatpush1.bf16.msra.mxu0 %v3269_v32  ;;  %2621 = vmatpush1.bf16.msra.mxu1 %v3271_v1 }
 0x108   : > { %2463 = vmatprep.subr.bf16.mxu0 %v3278_v2  ;;  %2622 = vmatprep.subr.bf16.mxu1 %v3280_v3 }
 0x10b   : > { %2464 = vmatpush1.bf16.msra.mxu0 %v3277_v39  ;;  %2623 = vmatpush1.bf16.msra.mxu1 %v3279_v9 }
 0x10c   : > { %2465 = vmatprep.subr.bf16.mxu0 %v3286_v10  ;;  %2624 = vmatprep.subr.bf16.mxu1 %v3288_v11 }
 0x10f   : > { %2466 = vmatpush1.bf16.msra.mxu0 %v3285_v17  ;;  %2625 = vmatpush1.bf16.msra.mxu1 %v3287_v18 }
 0x110   : > { %2467 = vmatprep.subr.bf16.mxu0 %v3294_v19  ;;  %2626 = vmatprep.subr.bf16.mxu1 %v3296_v20 }
 0x113   : > { %2468 = vmatpush1.bf16.msra.mxu0 %v3293_v27  ;;  %2627 = vmatpush1.bf16.msra.mxu1 %v3295_v28 }
 0x114   : > { %2469 = vmatprep.subr.bf16.mxu0 %v3302_v29  ;;  %2628 = vmatprep.subr.bf16.mxu1 %v3304_v31 }
 0x117   : > { %2470 = vmatpush1.bf16.msra.mxu0 %v3301_v37  ;;  %2629 = vmatpush1.bf16.msra.mxu1 %v3303_v40  ;;  %v4575_v40 = vpop.permute.xlu1 %568 }
 0x118   : > { %2492 = vmatprep.subr.bf16.mxu0 %v3310_v41  ;;  %2651 = vmatprep.subr.bf16.mxu1 %v3312_v42 }
 0x11a   : > { %2472 = vmatmul.mubr.bf16.vlgmr.msra.gmra.mrb[8].mxu0 %v4032_v30  ;;  %2631 = vmatmul.mubr.bf16.vlgmr.msra.gmra.mrb[8].mxu1 %v4032_v30  ;;  %v542_v30 = vld [vmem:[%s4640_s1 + $0x8d8] sm:$0xff] }
 0x11b   : > { %2493 = vmatpush1.bf16.msra.mxu0 %v3309_v47  ;;  %2652 = vmatpush1.bf16.msra.mxu1 %v3311_v48  ;;  %v3336_v32 = vcombine.high %v542_v30, %v546_v61  ;;  %v3335_v1 = vcombine.low %v542_v30, %v546_v61 }
 0x11c   : > { %2494 = vmatprep.subr.bf16.mxu0 %v3318_v12  ;;  %2653 = vmatprep.subr.bf16.mxu1 %v3320_v49 }
 0x11d   : > { %2481 = vmatprep.mubr.bf16.mxu0 %v4041_v38  ;;  %2640 = vmatprep.mubr.bf16.mxu1 %v4041_v38  ;;  %v3333_v38 = vcombine.low %v541_v59, %v545_v60 }
 0x11f   : > { %2495 = vmatpush1.bf16.msra.mxu0 %v3317_v55  ;;  %2654 = vmatpush1.bf16.msra.mxu1 %v3319_v56 }
 0x120   : > { %2496 = vmatprep.subr.bf16.mxu0 %v3326_v21  ;;  %2655 = vmatprep.subr.bf16.mxu1 %v3328_v58 }
 0x122   : > { %2482 = vmatmul.mubr.bf16.gmra.mrb[12].mxu0 %v4066_v51  ;;  %2641 = vmatmul.mubr.bf16.gmra.mrb[12].mxu1 %v4066_v51  ;;  %v4554_v51 = vpop.permute.xlu0 %553 }
 0x123   : > { %2497 = vmatpush1.bf16.msra.mxu0 %v3325_v62  ;;  %2656 = vmatpush1.bf16.msra.mxu1 %v3327_v63 }
 0x124   : > { %2498 = vmatprep.subr.bf16.mxu0 %v3334_v0  ;;  %2657 = vmatprep.subr.bf16.mxu1 %v3336_v32 }
 0x125   : > { %2524 = vmatprep.mubr.bf16.mxu0 %v3542_v50  ;;  %2683 = vmatprep.mubr.bf16.mxu1 %v3542_v50 }
 0x126   : > { %v4556_v2 = vpop.permute.xlu0 %558 }
 0x127   : > { %2499 = vmatpush1.bf16.msra.mxu0 %v3333_v38  ;;  %2658 = vmatpush1.bf16.msra.mxu1 %v3335_v1 }
 0x12a   : > { %3341 = vmatmul.mubr.msk.bf16.vlgmr.msra.gmra.mrb[8].mxu0 %vm2061_vm0, %v4097_v5  ;;  %3343 = vmatmul.mubr.msk.bf16.vlgmr.msra.gmra.mrb[8].mxu1 %vm2061_vm0, %v4097_v5 }
 0x12b   : > { %2534 = vmatprep.mubr.bf16.mxu0 %v3542_v50  ;;  %2693 = vmatprep.mubr.bf16.mxu1 %v3542_v50 }
 0x132   : > { %3342 = vmatmul.mubr.msk.bf16.gmra.mrb[12].mxu0 %vm2061_vm0, %v4130_v24  ;;  %3344 = vmatmul.mubr.msk.bf16.gmra.mrb[12].mxu1 %vm2061_vm0, %v4130_v24 }
 0x16d   : > { %v2208_v3 = vpop.f32.mrb[0].mxu0  ;;  %v2367_v6 = vpop.f32.mrb[0].mxu1 }
 0x16e   : > { %v3380_v5 = vadd.f32 %v2208_v3, %v4554_v51  ;;  %v2210_v7 = vpop.f32.mrb[1].mxu0  ;;  %v3388_v8 = vadd.f32 %v2367_v6, %v4554_v51  ;;  %v2369_v39 = vpop.f32.mrb[1].mxu1 }
 0x16f   : > { %v3381_v50 = vadd.f32 %v2210_v7, %v4554_v51  ;;  %v2212_v9 = vpop.f32.mrb[2].mxu0  ;;  %v3389_v10 = vadd.f32 %v2369_v39, %v4554_v51  ;;  %v2371_v13 = vpop.f32.mrb[2].mxu1 }
 0x170   : > { %vm2704_vm1 = vcmp.ge.f32.partialorder %v3380_v5, 0.0  ;;  %v2736_v24 = vmul.f32 0.1, %v3380_v5  ;;  %v3382_v11 = vadd.f32 %v2212_v9, %v4556_v2  ;;  %v2214_v14 = vpop.f32.mrb[3].mxu0  ;;  %vm2706_vm2 = vcmp.ge.f32.partialorder %v3388_v8, 0.0  ;;  %v2373_v19 = vpop.f32.mrb[3].mxu1 }
 0x171   : > { %v2738_v15 = vmul.f32 0.1, %v3388_v8  ;;  %vm2705_vm3 = vcmp.ge.f32.partialorder %v3381_v50, 0.0  ;;  %v2737_v16 = vmul.f32 0.1, %v3381_v50  ;;  %vm2707_vm4 = vcmp.ge.f32.partialorder %v3389_v10, 0.0 }
 0x172   : > { %v2768_v17 = vsel %vm2704_vm1, %v3380_v5, %v2736_v24  ;;  %v2739_v18 = vmul.f32 0.1, %v3389_v10  ;;  %vm2712_vm5 = vcmp.ge.f32.partialorder %v3382_v11, 0.0  ;;  %v2744_v23 = vmul.f32 0.1, %v3382_v11 }
 0x173   : > { %v2770_v20 = vsel %vm2706_vm2, %v3388_v8, %v2738_v15  ;;  %v2769_v22 = vsel %vm2705_vm3, %v3381_v50, %v2737_v16  ;;  %v3390_v25 = vadd.f32 %v2371_v13, %v4556_v2  ;;  %v3383_v28 = vadd.f32 %v2214_v14, %v4556_v2 }
 0x174   : > { %v3364_v26 = vpack.c.bf16 %v2769_v22, %v2768_v17  ;;  %v2771_v27 = vsel %vm2707_vm4, %v3389_v10, %v2739_v18  ;;  %v3391_v29 = vadd.f32 %v2373_v19, %v4556_v2  ;;  %v2776_v33 = vsel %vm2712_vm5, %v3382_v11, %v2744_v23 }
 0x175   : > { %v3365_v31 = vpack.c.bf16 %v2771_v27, %v2770_v20  ;;  %vm2714_vm6 = vcmp.ge.f32.partialorder %v3390_v25, 0.0  ;;  %v2746_v34 = vmul.f32 0.1, %v3390_v25  ;;  %v2218_v35 = vpop.f32.mrb[4].mxu0  ;;  %vm2713_vm7 = vcmp.ge.f32.partialorder %v3383_v28, 0.0  ;;  %v2377_v43 = vpop.f32.mrb[4].mxu1 }
 0x176   : > { %2896 = vst [vmem:[%s4569_s17] sm:$0xff] %v3364_v26  ;;  %v2745_v36 = vmul.f32 0.1, %v3383_v28  ;;  %vm2715_vm8 = vcmp.ge.f32.partialorder %v3391_v29, 0.0  ;;  %v2747_v37 = vmul.f32 0.1, %v3391_v29  ;;  %v3384_v42 = vadd.f32 %v2218_v35, %v4558_v4  ;;  %v2220_v44 = vpop.f32.mrb[5].mxu0 }
 0x177   : > { %2897 = vst [vmem:[%s4569_s17 + $0x8] sm:$0xff] %v3365_v31  ;;  %v2778_v41 = vsel %vm2714_vm6, %v3390_v25, %v2746_v34  ;;  %v3392_v47 = vadd.f32 %v2377_v43, %v4558_v4  ;;  %v3385_v48 = vadd.f32 %v2220_v44, %v4558_v4  ;;  %v2379_v12 = vpop.f32.mrb[5].mxu1  ;;  %v2222_v49 = vpop.f32.mrb[6].mxu0  ;;  %vm2899_vm1 = vcmask 1043456  }
 0x178   : > { %v2777_v45 = vsel %vm2713_vm7, %v3383_v28, %v2745_v36  ;;  %v2779_v46 = vsel %vm2715_vm8, %v3391_v29, %v2747_v37  ;;  %vm2720_vm9 = vcmp.ge.f32.partialorder %v3384_v42, 0.0  ;;  %v2752_v54 = vmul.f32 0.1, %v3384_v42  ;;  %v2381_v57 = vpop.f32.mrb[6].mxu1  ;;  %v2224_v55 = vpop.f32.mrb[7].mxu0 }
 0x179   : > { %v3368_v52 = vpack.c.bf16 %v2777_v45, %v2776_v33  ;;  %v3369_v53 = vpack.c.bf16 %v2779_v46, %v2778_v41  ;;  %vm2722_vm10 = vcmp.ge.f32.partialorder %v3392_v47, 0.0  ;;  %v2754_v56 = vmul.f32 0.1, %v3392_v47  ;;  %v2383_v61 = vpop.f32.mrb[7].mxu1 }
 0x17a   : > { %vm2721_vm11 = vcmp.ge.f32.partialorder %v3385_v48, 0.0  ;;  %v2753_v21 = vmul.f32 0.1, %v3385_v48  ;;  %v2784_v58 = vsel %vm2720_vm9, %v3384_v42, %v2752_v54  ;;  %v3393_v59 = vadd.f32 %v2379_v12, %v4558_v4 }
 0x17b   : > { %2903 = vst [vmem:[%s4569_s17 + $0x20] sm:$0xff] %v3368_v52  ;;  %2904 = vst [vmem:[%s4569_s17 + $0x28] sm:$0xff] %v3369_v53  ;;  %v3386_v60 = vadd.f32 %v2222_v49, %v4575_v40  ;;  %v3394_v30 = vadd.f32 %v2381_v57, %v4575_v40  ;;  %v2786_v62 = vsel %vm2722_vm10, %v3392_v47, %v2754_v56  ;;  %vm2900_vm2 = vcmask 916484  }
 0x17c   : > { %v2785_v63 = vsel %vm2721_vm11, %v3385_v48, %v2753_v21  ;;  %v3387_v0 = vadd.f32 %v2224_v55, %v4575_v40  ;;  %v3395_v32 = vadd.f32 %v2383_v61, %v4575_v40  ;;  %vm2723_vm12 = vcmp.ge.f32.partialorder %v3393_v59, 0.0  ;;  %vm4600_vm8 = vmor %vm2900_vm2, %vm2899_vm1 }
 0x17d   : > { %v3372_v38 = vpack.c.bf16 %v2785_v63, %v2784_v58  ;;  %v2755_v1 = vmul.f32 0.1, %v3393_v59  ;;  %vm2728_vm13 = vcmp.ge.f32.partialorder %v3386_v60, 0.0  ;;  %v2760_v3 = vmul.f32 0.1, %v3386_v60 }
 0x17e   : > { %vm2730_vm14 = vcmp.ge.f32.partialorder %v3394_v30, 0.0  ;;  %v2762_v5 = vmul.f32 0.1, %v3394_v30  ;;  %vm2729_vm15 = vcmp.ge.f32.partialorder %v3387_v0, 0.0  ;;  %v2761_v7 = vmul.f32 0.1, %v3387_v0 }
 0x17f   : > { %2907 = vst [vmem:[%s4569_s17 + $0x40] sm:$0xff] %v3372_v38  ;;  %v2787_v6 = vsel %vm2723_vm12, %v3393_v59, %v2755_v1  ;;  %vm2731_vm0 = vcmp.ge.f32.partialorder %v3395_v32, 0.0  ;;  %v2763_v8 = vmul.f32 0.1, %v3395_v32  ;;  %v2792_v39 = vsel %vm2728_vm13, %v3386_v60, %v2760_v3 }
 0x180   : > { %v3373_v50 = vpack.c.bf16 %v2787_v6, %v2786_v62  ;;  %v2794_v9 = vsel %vm2730_vm14, %v3394_v30, %v2762_v5  ;;  %v2793_v24 = vsel %vm2729_vm15, %v3387_v0, %v2761_v7 }
 0x181   : > { %v2795_v10 = vsel %vm2731_vm0, %v3395_v32, %v2763_v8  ;;  %v3376_v11 = vpack.c.bf16 %v2793_v24, %v2792_v39 }
 0x182   : > { %2908 = vst [vmem:[%s4569_s17 + $0x48] sm:$0xff] %v3373_v50  ;;  %v3377_v13 = vpack.c.bf16 %v2795_v10, %v2794_v9 }
 0x183   : > { %2911 = vst [vmem:[%s4569_s17 + $0x60] sm:$0xff] %v3376_v11 }
 0x184   : > { %2912 = vst [vmem:[%s4569_s17 + $0x68] sm:$0xff] %v3377_v13 }
 0x1fd   : > { %v2526_v14 = vpop.f32.mrb[8].mxu0  ;;  %v2685_v16 = vpop.f32.mrb[8].mxu1 }
 0x1fe   : > { %v3396_v15 = vadd.f32 %v2526_v14, %v4554_v51  ;;  %v2528_v17 = vpop.f32.mrb[9].mxu0  ;;  %v3404_v18 = vadd.f32 %v2685_v16, %v4554_v51  ;;  %v2687_v20 = vpop.f32.mrb[9].mxu1 }
 0x1ff   : > { %v3397_v19 = vadd.f32 %v2528_v17, %v4554_v51  ;;  %v2530_v22 = vpop.f32.mrb[10].mxu0  ;;  %v3405_v25 = vadd.f32 %v2687_v20, %v4554_v51  ;;  %v2689_v27 = vpop.f32.mrb[10].mxu1 }
 0x200   : > { %vm2708_vm3 = vcmp.ge.f32.partialorder %v3396_v15, 0.0  ;;  %v2740_v23 = vmul.f32 0.1, %v3396_v15  ;;  %v3398_v26 = vadd.f32 %v2530_v22, %v4556_v2  ;;  %v2532_v28 = vpop.f32.mrb[11].mxu0  ;;  %vm2710_vm4 = vcmp.ge.f32.partialorder %v3404_v18, 0.0  ;;  %v2691_v35 = vpop.f32.mrb[11].mxu1 }
 0x201   : > { %v2742_v29 = vmul.f32 0.1, %v3404_v18  ;;  %vm2709_vm5 = vcmp.ge.f32.partialorder %v3397_v19, 0.0  ;;  %v2741_v31 = vmul.f32 0.1, %v3397_v19  ;;  %vm2711_vm6 = vcmp.ge.f32.partialorder %v3405_v25, 0.0 }
 0x202   : > { %v2772_v33 = vsel %vm2708_vm3, %v3396_v15, %v2740_v23  ;;  %v2743_v34 = vmul.f32 0.1, %v3405_v25  ;;  %vm2716_vm7 = vcmp.ge.f32.partialorder %v3398_v26, 0.0  ;;  %v2748_v41 = vmul.f32 0.1, %v3398_v26 }
 0x203   : > { %v2774_v36 = vsel %vm2710_vm4, %v3404_v18, %v2742_v29  ;;  %v2773_v37 = vsel %vm2709_vm5, %v3397_v19, %v2741_v31  ;;  %v3406_v42 = vadd.f32 %v2689_v27, %v4556_v2  ;;  %v3399_v45 = vadd.f32 %v2532_v28, %v4556_v2 }
 0x204   : > { %v3366_v51 = vpack.c.bf16 %v2773_v37, %v2772_v33  ;;  %v2775_v43 = vsel %vm2711_vm6, %v3405_v25, %v2743_v34  ;;  %v3407_v46 = vadd.f32 %v2691_v35, %v4556_v2  ;;  %v2780_v48 = vsel %vm2716_vm7, %v3398_v26, %v2748_v41 }
 0x205   : > { %v3367_v47 = vpack.c.bf16 %v2775_v43, %v2774_v36  ;;  %vm2718_vm9 = vcmp.ge.f32.partialorder %v3406_v42, 0.0  ;;  %v2750_v12 = vmul.f32 0.1, %v3406_v42  ;;  %v2536_v49 = vpop.f32.mrb[12].mxu0  ;;  %vm2717_vm10 = vcmp.ge.f32.partialorder %v3399_v45, 0.0  ;;  %v2695_v55 = vpop.f32.mrb[12].mxu1 }
 0x206   : > { %2898 = vst [vmem:[%s4569_s17 + $0x10] sm:$0xff] %v3366_v51  ;;  %v2749_v52 = vmul.f32 0.1, %v3399_v45  ;;  %vm2719_vm11 = vcmp.ge.f32.partialorder %v3407_v46, 0.0  ;;  %v2751_v53 = vmul.f32 0.1, %v3407_v46  ;;  %v3400_v57 = vadd.f32 %v2536_v49, %v4558_v4 }
 0x207   : > { %2902 = vst.msk [vmem:[%s4569_s17 + $0x18] sm:$0xff] %vm4600_vm8, %v3367_v47  ;;  %v2782_v54 = vsel %vm2718_vm9, %v3406_v42, %v2750_v12  ;;  %v2538_v56 = vpop.f32.mrb[13].mxu0  ;;  %v3408_v58 = vadd.f32 %v2695_v55, %v4558_v4  ;;  %v2697_v60 = vpop.f32.mrb[13].mxu1 }
 0x208   : > { %v2781_v21 = vsel %vm2717_vm10, %v3399_v45, %v2749_v52  ;;  %v2783_v2 = vsel %vm2719_vm11, %v3407_v46, %v2751_v53  ;;  %v3401_v59 = vadd.f32 %v2538_v56, %v4558_v4  ;;  %v2540_v30 = vpop.f32.mrb[14].mxu0  ;;  %vm2724_vm12 = vcmp.ge.f32.partialorder %v3400_v57, 0.0  ;;  %v2699_v0 = vpop.f32.mrb[14].mxu1 }
 0x209   : > { %v3370_v61 = vpack.c.bf16 %v2781_v21, %v2780_v48  ;;  %v3371_v62 = vpack.c.bf16 %v2783_v2, %v2782_v54  ;;  %v2756_v63 = vmul.f32 0.1, %v3400_v57  ;;  %v2542_v32 = vpop.f32.mrb[15].mxu0  ;;  %vm2726_vm13 = vcmp.ge.f32.partialorder %v3408_v58, 0.0  ;;  %v2701_v8 = vpop.f32.mrb[15].mxu1 }
 0x20a   : > { %v2758_v38 = vmul.f32 0.1, %v3408_v58  ;;  %vm2725_vm14 = vcmp.ge.f32.partialorder %v3401_v59, 0.0  ;;  %v2757_v1 = vmul.f32 0.1, %v3401_v59  ;;  %v3409_v5 = vadd.f32 %v2697_v60, %v4558_v4 }
 0x20b   : > { %2905 = vst [vmem:[%s4569_s17 + $0x30] sm:$0xff] %v3370_v61  ;;  %2906 = vst.msk [vmem:[%s4569_s17 + $0x38] sm:$0xff] %vm4600_vm8, %v3371_v62  ;;  %v2788_v3 = vsel %vm2724_vm12, %v3400_v57, %v2756_v63  ;;  %v3402_v6 = vadd.f32 %v2540_v30, %v4575_v40  ;;  %v3410_v7 = vadd.f32 %v2699_v0, %v4575_v40 }
 0x20c   : > { %v2790_v50 = vsel %vm2726_vm13, %v3408_v58, %v2758_v38  ;;  %v2789_v39 = vsel %vm2725_vm14, %v3401_v59, %v2757_v1  ;;  %v3403_v9 = vadd.f32 %v2542_v32, %v4575_v40  ;;  %v3411_v24 = vadd.f32 %v2701_v8, %v4575_v40 }
 0x20d   : > { %v3374_v10 = vpack.c.bf16 %v2789_v39, %v2788_v3  ;;  %vm2727_vm15 = vcmp.ge.f32.partialorder %v3409_v5, 0.0  ;;  %v2759_v11 = vmul.f32 0.1, %v3409_v5  ;;  %vm2732_vm0 = vcmp.ge.f32.partialorder %v3402_v6, 0.0 }
 0x20e   : > { %v2764_v13 = vmul.f32 0.1, %v3402_v6  ;;  %vm2734_vm1 = vcmp.ge.f32.partialorder %v3410_v7, 0.0  ;;  %v2766_v4 = vmul.f32 0.1, %v3410_v7  ;;  %vm2733_vm2 = vcmp.ge.f32.partialorder %v3403_v9, 0.0 }
 0x20f   : > { %2909 = vst [vmem:[%s4569_s17 + $0x50] sm:$0xff] %v3374_v10  ;;  %v2791_v14 = vsel %vm2727_vm15, %v3409_v5, %v2759_v11  ;;  %v2765_v15 = vmul.f32 0.1, %v3403_v9  ;;  %vm2735_vm3 = vcmp.ge.f32.partialorder %v3411_v24, 0.0  ;;  %v2767_v16 = vmul.f32 0.1, %v3411_v24 }
 0x210   : > { %v3375_v17 = vpack.c.bf16 %v2791_v14, %v2790_v50  ;;  %v2796_v18 = vsel %vm2732_vm0, %v3402_v6, %v2764_v13  ;;  %v2798_v19 = vsel %vm2734_vm1, %v3410_v7, %v2766_v4 }
 0x211   : > { %v2797_v40 = vsel %vm2733_vm2, %v3403_v9, %v2765_v15  ;;  %v2799_v20 = vsel %vm2735_vm3, %v3411_v24, %v2767_v16 }
 0x212   : > { %2910 = vst.msk [vmem:[%s4569_s17 + $0x58] sm:$0xff] %vm4600_vm8, %v3375_v17  ;;  %v3378_v22 = vpack.c.bf16 %v2797_v40, %v2796_v18  ;;  %v3379_v23 = vpack.c.bf16 %v2799_v20, %v2798_v19 }
 0x214   : > { %2913 = vst [vmem:[%s4569_s17 + $0x70] sm:$0xff] %v3378_v22  ;;  %2914 = vst.msk [vmem:[%s4569_s17 + $0x78] sm:$0xff] %vm4600_vm8, %v3379_v23 }
 0x215 PF: > { %s13_s14 = sadd.s32 1, %s3540_s14   ;;  %s4645_s12 = smov %s3536_s13 }
 0x216   : > { %p10_p5 = scmp.ge.s32.totalorder %s13_s14, 4   ;;  %s4646_s13 = smov %s4648_s15 }
 0x218   :  { %12 = sbr.rel (!%p10_p5) target bundleno = 2 (0x2), region = 68 }

// kernel: tile.18
= control target key start
LH: loop header
LB: loop body
LE: loop exit
PB: predicated region body
PF: predicated region fallthrough
CT: control target
= control target key end

     0   :  { %s22_s0 = inlined_call_operand.vmem [shape: f32[36], index: 0, kind: input, shape index: {}]   ;;  %s23_s1 = inlined_call_operand.vmem [shape: f32[4,36], index: 1, kind: output, shape index: {}]  }
   0x1   :  { %v4_v0 = vld [vmem:[%s22_s0] ss:$0 sm:$0xff] }
   0x2   :  { %5 = vst [vmem:[%s23_s1] sm:$0xf] %v4_v0 }

// kernel: tile.19
= control target key start
LH: loop header
LB: loop body
LE: loop exit
PB: predicated region body
PF: predicated region fallthrough
CT: control target
= control target key end

     0   :  { %vm13_vm0 = vcmask 162816   ;;  %vm7_vm1 = vcmask 293888   ;;  %s50_s8 = smov 36   ;;  %s51_s9 = smov 72   ;;  %vm17_vm2 = vcmask 130048   ;;  %vm20_vm3 = vcmask 1048416   ;;  %s71_s0 = inlined_call_operand.vmem [shape: f32[4,36], index: 0, kind: input, shape index: {}]   ;;  %s72_s1 = inlined_call_operand.vmem [shape: f32[1,144], index: 1, kind: output, shape index: {}]  }
   0x1   :  { %v4_v0 = vld [vmem:[%s71_s0] sm:$0xf]  ;;  %s49_s0 = smov 108   ;;  %vm26_vm4 = vcmask 884288   ;;  %vm32_vm5 = vcmask 589088  }
   0x2   :  { %5 = vst [vmem:[#allocation1] sm:$0xf] %v4_v0 }
   0x9   :  { %v10_v1 = vld [vmem:[#allocation1 + $0x3] sm:$0x1]   ;;  %v29_v4 = vld [vmem:[#allocation1 + $0x1] sm:$0x1]   ;;  %v6_v5 = vld [vmem:[#allocation1] sm:$0x1]  }
   0xa   :  { %v12_v2 = vld [vmem:[#allocation1 + $0x3] sm:$0x1]   ;;  %30 = vrot.lane.b32.xlu1 %v29_v4, %s50_s8  ;;  %8 = vst.msk [vmem:[#allocation0] sm:$0x1] %vm7_vm1, %v6_v5   ;;  %v23_v6 = vld [vmem:[#allocation1 + $0x2] sm:$0x1]  }
   0xb   :  { %v14_v3 = vsel %vm13_vm0, %v12_v2, %v10_v1 }
   0xc   :  { %15 = vrot.lane.b32.xlu0 %v14_v3, %s49_s0 }
  0x10   :  { %24 = vrot.lane.b32.xlu0 %v23_v6, %s51_s9 }
  0x7c   :  { %v31_v8 = vpop.permute.xlu1 %30  }
  0x7e   :  { %v16_v7 = vpop.permute.xlu0 %15  }
  0x7f   :  { %19 = vst.msk [vmem:[#allocation0 + $0x8] sm:$0x1] %vm17_vm2, %v16_v7  }
  0x80   :  { %21 = vst.msk [vmem:[#allocation0] sm:$0x1] %vm20_vm3, %v16_v7  }
  0x82   :  { %v25_v9 = vpop.permute.xlu0 %24  }
  0x83   :  { %27 = vst.msk [vmem:[#allocation0] sm:$0x1] %vm26_vm4, %v25_v9  }
  0x84   :  { %33 = vst.msk [vmem:[#allocation0] sm:$0x1] %vm32_vm5, %v31_v8  }
  0x86   :  { %v41_v10 = vld [vmem:[#allocation0 + $0x8] sm:$0x1] }
  0x87   :  { %45 = vst [vmem:[%s72_s1 + $0x1] sm:$0x1] %v41_v10 }
  0x8b   :  { %v37_v11 = vld [vmem:[#allocation0] sm:$0x1] }
  0x8c   :  { %39 = vst [vmem:[%s72_s1] sm:$0x1] %v37_v11 }

// kernel: tile.13
= control target key start
LH: loop header
LB: loop body
LE: loop exit
PB: predicated region body
PF: predicated region fallthrough
CT: control target
= control target key end

     0   :  { %s22_s0 = inlined_call_operand.vmem [shape: f32[6], index: 0, kind: input, shape index: {}]   ;;  %s23_s1 = inlined_call_operand.vmem [shape: f32[4,6], index: 1, kind: output, shape index: {}]  }
   0x1   :  { %v4_v0 = vld [vmem:[%s22_s0] ss:$0 sm:$0xff] }
   0x2   :  { %5 = vst [vmem:[%s23_s1] sm:$0xf] %v4_v0 }

// kernel: tile.14
= control target key start
LH: loop header
LB: loop body
LE: loop exit
PB: predicated region body
PF: predicated region fallthrough
CT: control target
= control target key end

     0   :  { %vm7_vm0 = vcmask 48128   ;;  %s37_s8 = smov 6   ;;  %s38_s9 = smov 12   ;;  %vm13_vm1 = vcmask 195728   ;;  %vm19_vm2 = vcmask 146528   ;;  %vm25_vm3 = vcmask 97328   ;;  %s55_s0 = inlined_call_operand.vmem [shape: f32[4,6], index: 0, kind: input, shape index: {}]   ;;  %s56_s1 = inlined_call_operand.vmem [shape: f32[1,24], index: 1, kind: output, shape index: {}]  }
   0x1   :  { %v4_v0 = vld [vmem:[%s55_s0] sm:$0xf]  ;;  %s36_s0 = smov 18  }
   0x2   :  { %5 = vst [vmem:[#allocation1] sm:$0xf] %v4_v0 }
   0x9   :  { %v10_v1 = vld [vmem:[#allocation1 + $0x3] sm:$0x1]   ;;  %v22_v2 = vld [vmem:[#allocation1 + $0x1] sm:$0x1]   ;;  %v6_v3 = vld [vmem:[#allocation1] sm:$0x1]  }
   0xa   :  { %11 = vrot.lane.b32.xlu0 %v10_v1, %s36_s0  ;;  %23 = vrot.lane.b32.xlu1 %v22_v2, %s37_s8  ;;  %v16_v4 = vld [vmem:[#allocation1 + $0x2] sm:$0x1]   ;;  %8 = vst.msk [vmem:[#allocation0] sm:$0x1] %vm7_vm0, %v6_v3  }
   0xe   :  { %17 = vrot.lane.b32.xlu0 %v16_v4, %s38_s9 }
  0x7c   :  { %v12_v5 = vpop.permute.xlu0 %11   ;;  %v24_v6 = vpop.permute.xlu1 %23  }
  0x7d   :  { %14 = vst.msk [vmem:[#allocation0] sm:$0x1] %vm13_vm1, %v12_v5  }
  0x80   :  { %v18_v7 = vpop.permute.xlu0 %17  }
  0x81   :  { %20 = vst.msk [vmem:[#allocation0] sm:$0x1] %vm19_vm2, %v18_v7  }
  0x82   :  { %26 = vst.msk [vmem:[#allocation0] sm:$0x1] %vm25_vm3, %v24_v6  }
  0x89   :  { %v30_v8 = vld [vmem:[#allocation0] sm:$0x1] }
  0x8a   :  { %32 = vst [vmem:[%s56_s1] sm:$0x1] %v30_v8 }

// kernel: model_forward.7
= control target key start
LH: loop header
LB: loop body
LE: loop exit
PB: predicated region body
PF: predicated region fallthrough
CT: control target
= control target key end

     0   :  { %s3258_s0 = inlined_call_operand.vmem [shape: f32[2,5,36,64], index: 0, kind: input, shape index: {}]   ;;  %s3259_s1 = inlined_call_operand.vmem [shape: f32[2,5,64,36], index: 1, kind: input, shape index: {}]   ;;  %s3260_s2 = inlined_call_operand.vmem [shape: bf16[2,64,144], index: 2, kind: input, shape index: {}]   ;;  %s3261_s3 = inlined_call_operand.vmem [shape: bf16[2,144,64], index: 3, kind: input, shape index: {}]   ;;  %s3262_s4 = inlined_call_operand.vmem [shape: f32[2,4,64], index: 4, kind: input, shape index: {}]   ;;  %s3263_s5 = inlined_call_operand.vmem [shape: f32[36,6], index: 5, kind: input, shape index: {}]   ;;  %s3264_s6 = inlined_call_operand.vmem [shape: f32[1,6], index: 6, kind: input, shape index: {}]   ;;  %s3265_s7 = inlined_call_operand.vmem [shape: f32[6,36], index: 7, kind: input, shape index: {}]   ;;  %s3266_s8 = inlined_call_operand.vmem [shape: f32[1,36], index: 8, kind: input, shape index: {}]   ;;  %s3267_s9 = inlined_call_operand.vmem [shape: f32[144,24], index: 9, kind: input, shape index: {}]   ;;  %s3268_s10 = inlined_call_operand.vmem [shape: f32[1,24], index: 10, kind: input, shape index: {}]   ;;  %s3269_s11 = inlined_call_operand.vmem [shape: f32[24,144], index: 11, kind: input, shape index: {}]   ;;  %s3270_s12 = inlined_call_operand.vmem [shape: f32[1,144], index: 12, kind: input, shape index: {}]   ;;  %s3271_s13 = inlined_call_operand.vmem [shape: f32[4,144], index: 13, kind: input, shape index: {}]   ;;  %s3272_s14 = inlined_call_operand.hbm [shape: f32[2,5,4,64], index: 14, kind: output, shape index: {0}]   ;;  %s3273_s15 = inlined_call_operand.vmem [shape: f32[2,5,1,144], index: 15, kind: output, shape index: {1}]   ;;  %s3274_s16 = inlined_call_operand.vmem [shape: f32[2,5,1,144], index: 16, kind: output, shape index: {2}]  }
   0x1   :  { %3287 = sst [smem:[#allocation15_spill]] %s3258_s0 }
   0x2   :  { %3288 = sst [smem:[#allocation16_spill]] %s3259_s1 }
   0x3   :  { %3289 = sst [smem:[#allocation17_spill]] %s3260_s2 }
   0x4   :  { %3290 = sst [smem:[#allocation18_spill]] %s3261_s3 }
   0x5   :  { %3291 = sst [smem:[#allocation19_spill]] %s3262_s4 }
   0x6   :  { %3292 = sst [smem:[#allocation20_spill]] %s3272_s14 }
   0x7   :  { %3293 = sst [smem:[#allocation21_spill]] %s3274_s16 }
   0x8   :  { %22 = vsyncpa [#allocation3], 0 }
   0x9   :  { %24 = vsyncpa [#allocation3 + $0x1], 0  ;;  %s2731_s21 = smov 0   ;;  %s2733_s22 = smov 0  }
   0xa   :  { %s2735_s23 = smov 0   ;;  %s2737_s24 = smov 0  }
   0xb   :  { %s2739_s25 = smov 0   ;;  %s2741_s26 = smov 0  }
   0xc   :  { %s2743_s27 = smov 0   ;;  %s2745_s28 = smov 0  }
   0xd LB: > { %3294 = sst [smem:[#allocation5_spill]] %s2609_s21  ;;  %s2168_s29 = sadd.s32 4294967295, %s2637_s28   ;;  %s2637_s28 = sphi %s2745_s28, %s30_s28   ;;  %s2633_s27 = sphi %s2743_s27, %s3325_s27   ;;  %s2629_s26 = sphi %s2741_s26, %s3324_s26   ;;  %s2625_s25 = sphi %s2739_s25, %s3323_s25   ;;  %s2621_s24 = sphi %s2737_s24, %s3322_s24   ;;  %s2617_s23 = sphi %s2735_s23, %s3328_s23   ;;  %s2613_s22 = sphi %s2733_s22, %s3327_s22   ;;  %s2609_s21 = sphi %s2731_s21, %s3326_s21  }
   0xe   : > { %3295 = sst [smem:[#allocation6_spill]] %s2617_s23  ;;  %s2169_s30 = sadd.s32 4294967294, %s2637_s28  }
   0xf   : > { %3296 = sst [smem:[#allocation7_spill]] %s2629_s26  ;;  %s39_s0 = sadd.s32 1, %s2629_s26 }
  0x10   : > { %3297 = sst [smem:[#allocation8_spill]] %s2633_s27  ;;  %p40_p0 = scmp.ge.s32.totalorder %s39_s0, 5 }
  0x11   : > { %3298 = sst [smem:[#allocation9_spill]] %s2637_s28  ;;  %s42_s17 = sadd.s32 1, %s2633_s27 }
  0x12   : > { %p384_p1 = scmp.ne.s32.totalorder %s2617_s23, %s2613_s22  ;;  %p385_p2 = scmp.eq.s32.totalorder %s2168_s29, 9 }
  0x13   : > { %s3330_s0 = smov (%p40_p0, %s39_s0), 0  ;;  %s3332_s17 = smov (!%p40_p0, %s42_s17), %s2633_s27 }
  0x14   : > { %3299 = sst [smem:[#allocation10_spill]] %s3330_s0  ;;  %s370_s18 = ssub.s32 %s2629_s26, %s3330_s0 }
  0x15   : > { %p2782_p3 = por %p385_p2, %p384_p1  ;;  %p44_p4 = scmp.ge.s32.totalorder %s3332_s17, 2 }
  0x16   : > { %p390_p5 = scmp.ne.s32.totalorder %s2613_s22, %s2609_s21  ;;  %p391_p6 = scmp.eq.s32.totalorder %s2169_s30, 9 }
  0x17   : > { %s3300_s19 = scalar_select %p2782_p3, 1, 0 }
  0x18   : > { %p2172_p7 = scmp.ge.s32.totalorder %s2637_s28, 1  ;;  %s3334_s17 = smov (%p44_p4, %s3332_s17), 0 }
  0x19   : > { %3301 = sst [smem:[#allocation11_spill]] %s3300_s19  ;;  %p2791_p8 = por %p391_p6, %p390_p5 }
  0x1a   : > { %3302 = sst [smem:[#allocation12_spill]] %s3334_s17  ;;  %p539_p9 = scmp.lt.s32.totalorder %s2637_s28, 11 }
  0x1b   : > { %s3303_s20 = scalar_select %p2791_p8, 1, 0 }
  0x1c   : > { %s369_s29 = ssub.s32 %s2633_s27, %s3334_s17  ;;  %s374_s16 = sadd.s32 1, %s2617_s23 }
  0x1d   : > { %3304 = sst [smem:[#allocation13_spill]] %s3303_s20  ;;  %s371_s14 = sor.u32 %s370_s18, %s369_s29 }
  0x1e   : > { %p540_p10 = pnand %p2172_p7, %p539_p9  ;;  %p372_p11 = scmp.eq.s32.totalorder %s371_s14, 0 }
  0x1f   : > { %p632_p12 = scmp.lt.s32.totalorder (!%p540_p10), %s2625_s25, 1  ;;  %p634_p13 = scmp.lt.s32.totalorder (!%p540_p10), %s2621_s24, 4  ;;  %vm727_vm0 = vcmask (!%p540_p10), 523264   ;;  %vm740_vm1 = vcmask (!%p540_p10), 519168   ;;  %v2639_v15 = vmov (!%p540_p10), 0   ;;  %v901_v24 = vld [vmem:[%s3267_s9] sm:$0xff] (!%p540_p10) }
  0x20   : > { %s2800_s0 = scalar_select %p372_p11, %s2617_s23, %s374_s16  }
  0x21   : > { %543 = sbr.rel (%p540_p10) target bundleno = 3235 (0xca3), region = 76  ;;  %s3306_s23 = sld [smem:[#allocation15_spill]] (!%p540_p10)  ;;  %892 = vmatprep.mubr.bf16.mxu0 (!%p540_p10), %v2639_v15  ;;  %v902_v25 = vld [vmem:[%s3267_s9 + $0x8] sm:$0xff] (!%p540_p10)  ;;  %v903_v26 = vld [vmem:[%s3267_s9 + $0x10] sm:$0xff] (!%p540_p10)  ;;  %v2640_v27 = vmov (!%p540_p10), 0.0|0.0   ;;  %v904_v29 = vld [vmem:[%s3267_s9 + $0x18] sm:$0xff] (!%p540_p10) }
  0x22   : > { %3305 = sst [smem:[#allocation14_spill]] %s2800_s0  ;;  %s3307_s3 = sld [smem:[#allocation18_spill]] (!%p540_p10)  ;;  %2343 = vmatprep.subr.bf16.mxu1 (!%p540_p10), %v2640_v27  ;;  %v2344_v28 = vpack.c.bf16 (!%p540_p10), %v902_v25, %v901_v24  ;;  %v2347_v30 = vpack.c.bf16 (!%p540_p10), %v904_v29, %v903_v26  ;;  %v905_v31 = vld [vmem:[%s3267_s9 + $0x20] sm:$0xff] (!%p540_p10)  ;;  %v906_v32 = vld [vmem:[%s3267_s9 + $0x28] sm:$0xff] (!%p540_p10)  ;;  %v907_v34 = vld [vmem:[%s3267_s9 + $0x30] sm:$0xff] (!%p540_p10)  ;;  %vm920_vm2 = vcmask (!%p540_p10), 130048  }
  0x23   : > { %s3308_s2 = sld [smem:[#allocation17_spill]] (!%p540_p10)  ;;  %v2350_v33 = vpack.c.bf16 (!%p540_p10), %v906_v32, %v905_v31  ;;  %v908_v35 = vld [vmem:[%s3267_s9 + $0x38] sm:$0xff] (!%p540_p10)  ;;  %v909_v37 = vld [vmem:[%s3267_s9 + $0x40] sm:$0xff] (!%p540_p10)  ;;  %v910_v38 = vld [vmem:[%s3267_s9 + $0x48] sm:$0xff] (!%p540_p10)  ;;  %vm1013_vm3 = vcmask (!%p540_p10), 195584   ;;  %s3309_s1 = sld [smem:[#allocation16_spill]] (!%p540_p10) }
  0x24   : > { %2345 = vmatpush1.bf16.msra.mxu1 (!%p540_p10), %v2344_v28  ;;  %v2353_v36 = vpack.c.bf16 (!%p540_p10), %v908_v35, %v907_v34  ;;  %v2356_v39 = vpack.c.bf16 (!%p540_p10), %v910_v38, %v909_v37  ;;  %v911_v40 = vld [vmem:[%s3267_s9 + $0x50] sm:$0xff] (!%p540_p10)  ;;  %v912_v41 = vld [vmem:[%s3267_s9 + $0x58] sm:$0xff] (!%p540_p10)  ;;  %v913_v43 = vld [vmem:[%s3267_s9 + $0x60] sm:$0xff] (!%p540_p10)  ;;  %vm767_vm4 = vcmask (!%p540_p10), 293888   ;;  %vm2642_vm5 = vmmov (!%p540_p10), 0   ;;  %s3310_s4 = sld [smem:[#allocation19_spill]] (!%p540_p10) }
  0x25   : > { %2346 = vmatprep.subr.bf16.mxu1 (!%p540_p10), %v2640_v27  ;;  %v2359_v42 = vpack.c.bf16 (!%p540_p10), %v912_v41, %v911_v40  ;;  %v914_v44 = vld [vmem:[%s3267_s9 + $0x68] sm:$0xff] (!%p540_p10)  ;;  %v915_v46 = vld [vmem:[%s3267_s9 + $0x70] sm:$0xff] (!%p540_p10)  ;;  %v916_v47 = vld [vmem:[%s3267_s9 + $0x78] sm:$0xff] (!%p540_p10)  ;;  %vm1277_vm6 = vcmask (!%p540_p10), 289792   ;;  %vm1293_vm7 = vcmask (!%p540_p10), 1043456   ;;  %vm1640_vm8 = vcmask (!%p540_p10), 1045504  }
  0x26   : > { %v2362_v45 = vpack.c.bf16 (!%p540_p10), %v914_v44, %v913_v43  ;;  %v2365_v48 = vpack.c.bf16 (!%p540_p10), %v916_v47, %v915_v46  ;;  %v918_v40 = vld [vmem:[%s3267_s9 + $0x88] sm:$0xff] (!%p540_p10)  ;;  %v998_v43 = vld [vmem:[%s3269_s11 + $0x18] sm:$0xff] (!%p540_p10)  ;;  %vm1433_vm9 = vcmask (!%p540_p10), 125952   ;;  %vm1636_vm10 = vcmask (!%p540_p10), 48128  }
  0x28   : > { %s2805_s30 = scalar_select %p632_p12, %s2625_s25, 1  ;;  %2348 = vmatpush1.bf16.msra.mxu1 %v2347_v30 }
  0x29   : > { %s2808_s26 = scalar_select %p634_p13, %s2621_s24, 4  ;;  %2349 = vmatprep.subr.bf16.mxu1 %v2640_v27 }
  0x2a   : > { %s2417_s17 = smul.u32 25, %s2805_s30  ;;  %s2222_s21 = sshll.u32 %s2805_s30, 6 }
  0x2b   : > { %s2416_s18 = smul.u32 5, %s2808_s26  ;;  %s654_s28 = scalar_lea.vmem %s3308_s2, %s2222_s21 }
  0x2c   : > { %s2419_s14 = smul.u32 72, %s2805_s30  ;;  %v2851_v16 = vld [vmem:[%s654_s28 + $0x4] ss:$8 sps:$4 sm:$0xff]   ;;  %v2853_v17 = vld [vmem:[%s654_s28] ss:$8 sps:$4 sm:$0xff]   ;;  %2351 = vmatpush1.bf16.msra.mxu1 %v2350_v33  ;;  %s2175_s21 = sshll.u32 %s2808_s26, 3 }
  0x2d   : > { %s638_s29 = sadd.s32 %s2417_s17, %s2416_s18  ;;  %860 = vmatprep.subr.bf16.mxu0 %v2851_v16  ;;  %v2856_v18 = vld [vmem:[%s654_s28 + $0x14] ss:$8 sps:$4 sm:$0xff]   ;;  %v2859_v19 = vld [vmem:[%s654_s28 + $0x10] ss:$8 sps:$4 sm:$0xff]   ;;  %v2862_v20 = vld [vmem:[%s654_s28 + $0x24] ss:$8 sps:$4 sm:$0xff]   ;;  %2352 = vmatprep.subr.bf16.mxu1 %v2640_v27 }
  0x2e   : > { %s2174_s16 = sshll.u32 %s638_s29, 3  ;;  %s2819_s19 = scalar_lea.vmem %s3307_s3, %s2419_s14  ;;  %861 = vmatpush1.bf16.msra.mxu0 %v2853_v17  ;;  %v2865_v21 = vld [vmem:[%s654_s28 + $0x20] ss:$8 sps:$4 sm:$0xff]   ;;  %v2868_v22 = vld [vmem:[%s654_s28 + $0x34] ss:$8 sps:$4 sm:$0xff]  }
  0x2f   : > { %s640_s20 = scalar_lea.vmem %s3306_s23, %s2174_s16  ;;  %862 = vmatprep.subr.bf16.mxu0 %v2856_v18  ;;  %v2871_v23 = vld [vmem:[%s654_s28 + $0x30] ss:$8 sps:$4 sm:$0xff]   ;;  %s2418_s16 = smul.u32 40, %s2805_s30 }
  0x30   : > { %v2821_v0 = vld [vmem:[%s640_s20 + $0x10] sm:$0xff]  ;;  %v2823_v1 = vld [vmem:[%s640_s20] sm:$0xff]  ;;  %v2825_v2 = vld [vmem:[%s640_s20 + $0x18] sm:$0xff]  ;;  %2354 = vmatpush1.bf16.msra.mxu1 %v2353_v36  ;;  %s2180_s14 = sshll.u32 %s2805_s30, 2  ;;  %s2421_s18 = smul.u32 5, %s2625_s25 }
  0x31   : > { %v724_v3 = vmul.f32 %v2821_v0, %v2821_v0  ;;  %v722_v4 = vmul.f32 %v2823_v1, %v2823_v1  ;;  %v725_v5 = vmul.f32 %v2825_v2, %v2825_v2  ;;  %v2833_v6 = vld [vmem:[%s640_s20 + $0x8] sm:$0xff]  ;;  %v2835_v7 = vld [vmem:[%s640_s20 + $0x20] sm:$0xf]  ;;  %2355 = vmatprep.subr.bf16.mxu1 %v2640_v27  ;;  %s647_s23 = sadd.s32 %s2418_s16, %s2175_s21  ;;  %s2181_s16 = sshll.u32 %s2808_s26, 1 }
  0x32   : > { %v723_v8 = vmul.f32 %v2833_v6, %v2833_v6  ;;  %v726_v13 = vmul.f32 %v2835_v7, %v2835_v7  ;;  %863 = vmatpush1.bf16.msra.mxu0 %v2859_v19  ;;  %s2176_s27 = sshll.u32 %s647_s23, 3  ;;  %s663_s23 = scalar_lea.vmem %s3310_s4, %s2180_s14 }
  0x33   : > { %v734_v9 = vsel %vm727_vm0, %v724_v3, 0.0  ;;  %v728_v10 = vsel %vm727_vm0, %v722_v4, 0.0  ;;  %v737_v11 = vsel %vm727_vm0, %v725_v5, 0.0  ;;  %864 = vmatprep.subr.bf16.mxu0 %v2862_v20  ;;  %s649_s17 = scalar_lea.vmem %s3309_s1, %s2176_s27  ;;  %s609_s27 = sand.u32 1, %s2613_s22  }
  0x34   : > { %735 = vadd.xlane.f32.xlu1 %v734_v9  ;;  %729 = vadd.xlane.f32.xlu0 %v728_v10  ;;  %v731_v12 = vsel %vm727_vm0, %v723_v8, 0.0  ;;  %v741_v14 = vsel %vm740_vm1, %v726_v13, 0.0  ;;  %s3099_s28 = sshll.u32 %s609_s27, 2  ;;  %s2420_s14 = smul.u32 10, %s2805_s30 }
  0x35   : > { %2357 = vmatpush1.bf16.msra.mxu1 %v2356_v39  ;;  %v917_v39 = vld [vmem:[%s3267_s9 + $0x80] sm:$0xff]  ;;  %s611_s0 = scalar_lea.vmem [#allocation2], %s3099_s28  ;;  %s1948_s29 = sadd.s32 %s2621_s24, %s2421_s18 }
  0x36   : > { %865 = vmatpush1.bf16.msra.mxu0 %v2865_v21  ;;  %2358 = vmatprep.subr.bf16.mxu1 %v2640_v27  ;;  %v2368_v41 = vpack.c.bf16 %v918_v40, %v917_v39  ;;  %v692_v40 = vld [vmem:[%s649_s17 + $0x30] sm:$0xff]  ;;  %s3160_s21 = sadd.s32 %s2420_s14, %s2181_s16  ;;  %s2219_s14 = sshll.u32 %s1948_s29, 6 }
  0x37   : > { %866 = vmatprep.subr.bf16.mxu0 %v2868_v22  ;;  %s1952_s16 = sshll.u32 %s611_s0, 4  ;;  %s1921_s1 = scalar_lea.sflag [#allocation3], %s609_s27  ;;  %s1953_s16 = int_to_ptr.vmem [resolvable:$true] %s1952_s16 }
  0x38   : > { %738 = vadd.xlane.f32.xlu1 %v737_v11  ;;  %732 = vadd.xlane.f32.xlu0 %v731_v12  ;;  %s2543_s2 = scalar_lea.vmem %s1953_s16, 64  ;;  %s2645_s3 = smov [#allocation2]  }
  0x39   : > { %2360 = vmatpush1.bf16.msra.mxu1 %v2359_v42  ;;  %v996_v42 = vld [vmem:[%s3269_s11 + $0x8] sm:$0xff]  ;;  %p2544_p0 = scmp.ne.s32.totalorder %s1953_s16, %s2543_s2  ;;  %s2547_s4 = sshll.u32 %s2645_s3, 4  ;;  %s2548_s4 = int_to_ptr.vmem [resolvable:$false] %s2547_s4 }
  0x3a   : > { %867 = vmatpush1.bf16.msra.mxu0 %v2871_v23  ;;  %2361 = vmatprep.subr.bf16.mxu1 %v2640_v27  ;;  %v2370_v44 = vpack.c.bf16 %v998_v43, %v996_v42  ;;  %s2549_s24 = scalar_lea.vmem %s2548_s4, 128  ;;  %p2550_p4 = scmp.lt.s32.totalorder %s1953_s16, %s2548_s4 }
  0x3b   : > { %1163 = vmatprep.subr.bf16.mxu0 %v2639_v15  ;;  %p2545_p1 = pnand %p2544_p0, %p2782_p3  ;;  %p2551_p5 = scmp.lt.s32.totalorder %s2549_s24, %s2543_s2 }
  0x3c   : > { %742 = vadd.xlane.f32.xlu0 %v741_v14 }
  0x3d   : > { %2363 = vmatpush1.bf16.msra.mxu1 %v2362_v45  ;;  %p2546_p2 = pneg %p2545_p1  ;;  %p2552_p6 = por %p2551_p5, %p2550_p4 }
  0x3e   : > { %2364 = vmatprep.subr.bf16.mxu1 %v2640_v27 }
  0x3f   : > { %p2553_p7 = pnand %p2552_p6, %p2546_p2 }
  0x41   : > { %2366 = vmatpush1.bf16.msra.mxu1 %v2365_v48 }
  0x42   : > { %2367 = vmatprep.subr.bf16.mxu1 %v2640_v27 }
  0x45   : > { %2369 = vmatpush1.bf16.msra.mxu1 %v2368_v41 }
  0x46   : > { %2371 = vmatprep.subr.bf16.mxu1 %v2370_v44 }
  0xc1   : > { %v736_v49 = vpop.xlane.xlu1 %735  ;;  %v730_v50 = vpop.xlane.xlu0 %729 }
  0xc2   : > { %v746_v51 = vmax.f32 %v736_v49, 1e-24  ;;  %v744_v52 = vmax.f32 %v730_v50, 1e-24  ;;  %v995_v49 = vld [vmem:[%s3269_s11] sm:$0xff]  ;;  %v997_v50 = vld [vmem:[%s3269_s11 + $0x10] sm:$0xff] }
  0xc4   : > { %2521 = vrsqrt.f32 %v746_v51  ;;  %v2372_v51 = vpack.c.bf16 %v997_v50, %v995_v49 }
  0xc5   : > { %2523 = vrsqrt.f32 %v744_v52  ;;  %v739_v53 = vpop.xlane.xlu1 %738  ;;  %v733_v54 = vpop.xlane.xlu0 %732  ;;  %v1000_v52 = vld [vmem:[%s3269_s11 + $0x28] sm:$0xff] }
  0xc6   : > { %v747_v55 = vmax.f32 %v739_v53, 1e-24  ;;  %v745_v56 = vmax.f32 %v733_v54, 1e-24  ;;  %v999_v53 = vld [vmem:[%s3269_s11 + $0x20] sm:$0xff]  ;;  %v2641_v54 = vmov 0.0  }
  0xc8   : > { %2525 = vrsqrt.f32 %v747_v55  ;;  %v2511_v55 = vld [vmem:[%s2819_s19] sm:$0xff]  }
  0xc9   : > { %2527 = vrsqrt.f32 %v745_v56  ;;  %v743_v57 = vpop.xlane.xlu0 %742  ;;  %v2512_v56 = vld [vmem:[%s2819_s19 + $0x8] sm:$0xff]  }
  0xca   : > { %v748_v58 = vmax.f32 %v743_v57, 1e-24  ;;  %v2513_v57 = vld [vmem:[%s2819_s19 + $0x10] sm:$0xff]  }
  0xcc   : > { %2529 = vrsqrt.f32 %v748_v58  ;;  %v2514_v58 = vld [vmem:[%s2819_s19 + $0x18] sm:$0xff]  }
  0xce   : > { %v2522_v59 = vpop.eup %2521 }
  0xcf   : > { %v2524_v60 = vpop.eup %2523  ;;  %v2934_v61 = vmul.f32 %v2522_v59, %v2821_v0  ;;  %v2515_v59 = vld [vmem:[%s2819_s19 + $0x20] sm:$0xff]  }
  0xd0   : > { %v2937_v63 = vmul.f32 %v2524_v60, %v2823_v1  ;;  %v919_v60 = vld [vmem:[%s3268_s10] sm:$0x1] }
  0xd1   : > { %v802_v24 = vsel %vm727_vm0, %v2934_v61, 0.0 }
  0xd2   : > { %v2526_v62 = vpop.eup %2525  ;;  %v799_v10 = vsel %vm727_vm0, %v2937_v63, 0.0 }
  0xd3   : > { %v2528_v3 = vpop.eup %2527  ;;  %v2940_v4 = vmul.f32 %v2526_v62, %v2825_v2 }
  0xd4   : > { %v2943_v5 = vmul.f32 %v2528_v3, %v2833_v6 }
  0xd5   : > { %v2414_v8 = vpack.c.bf16 %v2940_v4, %v2934_v61  ;;  %v804_v25 = vsel %vm727_vm0, %v2940_v4, 0.0  ;;  %v2212_v61 = vld [vmem:[%s3266_s8] ss:$0 sm:$0xff] }
  0xd6   : > { %v2530_v9 = vpop.eup %2529  ;;  %v800_v11 = vsel %vm727_vm0, %v2943_v5, 0.0  ;;  %v2411_v12 = vpack.c.bf16 %v2943_v5, %v2937_v63 }
  0xd7   : > { %v801_v13 = vadd.f32 %v800_v11, %v799_v10  ;;  %v2954_v14 = vmul.f32 %v2530_v9, %v2835_v7  ;;  %v2516_v11 = vld [vmem:[%s2819_s19 + $0x28] sm:$0xff]  }
  0xd9   : > { %v803_v26 = vadd.f32 %v802_v24, %v801_v13  ;;  %v806_v28 = vsel %vm740_vm1, %v2954_v14, 0.0  ;;  %v2517_v13 = vld [vmem:[%s2819_s19 + $0x30] sm:$0xff]   ;;  %v2518_v24 = vld [vmem:[%s2819_s19 + $0x38] sm:$0xff]  }
  0xdb   : > { %v805_v29 = vadd.f32 %v804_v25, %v803_v26  ;;  %v2519_v25 = vld [vmem:[%s2819_s19 + $0x40] sm:$0xff]  }
  0xdc   : > { %v686_v26 = vld [vmem:[%s649_s17] sm:$0xff] }
  0xdd   : > { %v807_v30 = vadd.f32 %v806_v28, %v805_v29  ;;  %v687_v28 = vld [vmem:[%s649_s17 + $0x8] sm:$0xff]  ;;  %v688_v29 = vld [vmem:[%s649_s17 + $0x10] sm:$0xff] }
  0xdf   : > { %v808_v31 = vrot.slane %v807_v30, 4 }
  0xe1   : > { %v809_v32 = vadd.f32 %v808_v31, %v807_v30  ;;  %v689_v30 = vld [vmem:[%s649_s17 + $0x18] sm:$0xff]  ;;  %v690_v31 = vld [vmem:[%s649_s17 + $0x20] sm:$0xff] }
  0xe3   : > { %v810_v33 = vrot.slane %v809_v32, 2 }
  0xe5   : > { %v811_v34 = vadd.f32 %v810_v33, %v809_v32  ;;  %v759_v32 = vmul.f32 %v686_v26, %v686_v26  ;;  %v760_v33 = vmul.f32 %v687_v28, %v687_v28 }
  0xe7   : > { %v812_v35 = vrot.slane %v811_v34, 1  ;;  %v769_v39 = vsel %vm767_vm4, %v760_v33, 0.0 }
  0xe9   : > { %v813_v36 = vadd.f32 %v812_v35, %v811_v34  ;;  %v761_v34 = vmul.f32 %v688_v29, %v688_v29  ;;  %v691_v35 = vld [vmem:[%s649_s17 + $0x28] sm:$0xff] }
  0xea   : > { %v764_v43 = vmul.f32 %v691_v35, %v691_v35 }
  0xeb   : > { %v815_v37 = vmul.f32 0.027777778, %v813_v36  ;;  %v762_v36 = vmul.f32 %v689_v30, %v689_v30  ;;  %v771_v42 = vsel %vm767_vm4, %v761_v34, 0.0 }
  0xed   : > { %v816_v38 = vpack.c.bf16 %v815_v37, %v815_v37  ;;  %v763_v37 = vmul.f32 %v690_v31, %v690_v31  ;;  %v773_v44 = vsel %vm767_vm4, %v762_v36, 0.0 }
  0xef   : > { %2191 = vmatmul.mubr.msk.bf16.vlgmr.msra.gmra.mrb[0].mxu0 %vm727_vm0, %v816_v38  ;;  %v768_v38 = vsel %vm767_vm4, %v759_v32, 0.0 }
  0xf0   : > { %1164 = vmatpush1.bf16.msra.mxu0 %v2511_v55  ;;  %v770_v41 = vadd.f32 %v769_v39, %v768_v38 }
  0xf1   : > { %1165 = vmatprep.subr.bf16.mxu0 %v2639_v15 }
  0xf4   : > { %1166 = vmatpush1.bf16.msra.mxu0 %v2512_v56 }
  0xf5   : > { %1167 = vmatprep.subr.bf16.mxu0 %v2639_v15 }
  0xf8   : > { %1168 = vmatpush1.bf16.msra.mxu0 %v2513_v57 }
  0xf9   : > { %1169 = vmatprep.subr.bf16.mxu0 %v2639_v15 }
  0xfc   : > { %1170 = vmatpush1.bf16.msra.mxu0 %v2514_v58 }
  0xfd   : > { %1171 = vmatprep.subr.bf16.mxu0 %v2639_v15 }
 0x100   : > { %1172 = vmatpush1.bf16.msra.mxu0 %v2515_v59 }
 0x101   : > { %1173 = vmatprep.subr.bf16.mxu0 %v2639_v15 }
 0x104   : > { %1174 = vmatpush1.bf16.msra.mxu0 %v2516_v11 }
 0x105   : > { %1175 = vmatprep.subr.bf16.mxu0 %v2639_v15 }
 0x108   : > { %1176 = vmatpush1.bf16.msra.mxu0 %v2517_v13 }
 0x109   : > { %1177 = vmatprep.subr.bf16.mxu0 %v2639_v15 }
 0x10c   : > { %1178 = vmatpush1.bf16.msra.mxu0 %v2518_v24 }
 0x10d   : > { %1179 = vmatprep.subr.bf16.mxu0 %v2639_v15 }
 0x110   : > { %1180 = vmatpush1.bf16.msra.mxu0 %v2519_v25 }
 0x111   : > { %1380 = vmatprep.subr.bf16.mxu0 %v2851_v16 }
 0x1c2   : > { %v894_v45 = vpop.f32.mrb[0].mxu0 }
 0x1c3   : > { %v896_v46 = vpop.f32.mrb[1].mxu0 }
 0x1c4   : > { %v898_v47 = vpop.f32.mrb[2].mxu0  ;;  %2192 = vmatprep.mubr.msk.f32.mxu1 %vm920_vm2, %v896_v46  ;;  %v772_v46 = vadd.f32 %v771_v42, %v770_v41 }
 0x1c5   : > { %v899_v48 = vpop.f32.mrb[3].mxu0  ;;  %989 = vmatmul.mubr.f32.vlgmr.msra.gmra.mrb[0].mxu1 %v894_v45  ;;  %v693_v45 = vld [vmem:[%s649_s17 + $0x38] sm:$0xff]  ;;  %v765_v47 = vmul.f32 %v692_v40, %v692_v40 }
 0x1c6   : > { %2373 = vmatpush1.bf16.msra.mxu1 %v2372_v51  ;;  %1081 = vmatprep.mubr.f32.mxu1 %v2641_v54  ;;  %v775_v48 = vsel %vm767_vm4, %v763_v37, 0.0  ;;  %v774_v49 = vadd.f32 %v773_v44, %v772_v46  ;;  %v766_v50 = vmul.f32 %v693_v45, %v693_v45  ;;  %v777_v51 = vsel %vm767_vm4, %v764_v43, 0.0 }
 0x1c7   : > { %1021 = vmatprep.subr.mxu1 %v1000_v52 }
 0x1c8   : > { %v776_v52 = vadd.f32 %v775_v48, %v774_v49  ;;  %v781_v56 = vsel %vm767_vm4, %v766_v50, 0.0  ;;  %v3051_v50 = vld [vmem:[%s3271_s13] sm:$0xff] }
 0x1c9   : > { %vm1837_vm12 = vcmp.gt.f32.partialorder %v3051_v50, 0.0 }
 0x1ca   : > { %1022 = vmatpush1.msra.mxu1 %v999_v53  ;;  %v779_v53 = vsel %vm767_vm4, %v765_v47, 0.0  ;;  %v778_v55 = vadd.f32 %v777_v51, %v776_v52 }
 0x1cb   : > { %2374 = vmatprep.subr.bf16.mxu1 %v2640_v27 }
 0x1cc   : > { %v780_v57 = vadd.f32 %v779_v53, %v778_v55 }
 0x1ce   : > { %v782_v58 = vadd.f32 %v781_v56, %v780_v57  ;;  %v2387_v57 = vpack.c.bf16 %v2833_v6, %v2823_v1 }
 0x1d0   : > { %v783_v59 = vrot.slane %v782_v58, 4 }
 0x298   : > { %v990_v62 = vpop.f32.mrb[0].mxu1 }
 0x299   : > { %v991_v3 = vadd.f32 %v990_v62, %v919_v60  ;;  %v992_v9 = vpop.f32.mrb[1].mxu1  ;;  %v784_v60 = vadd.f32 %v783_v59, %v782_v58 }
 0x29b   : > { %v994_v10 = vmax.f32 %v991_v3, 0.0  ;;  %v785_v62 = vrot.slane %v784_v60, 2 }
 0x29d   : > { %2193 = vmatmul.mubr.msk.f32.vlgmr.msra.gmra.mrb[2].mxu1 %vm1013_vm3, %v994_v10  ;;  %v786_v3 = vadd.f32 %v785_v62, %v784_v60  ;;  %v2390_v60 = vpack.c.bf16 %v2825_v2, %v2821_v0 }
 0x29e   : > { %2277 = vmatprep.mubr.msk.f32.mxu1 %vm2642_vm5, %v2641_v54 }
 0x29f   : > { %v787_v9 = vrot.slane %v786_v3, 1 }
 0x2a1   : > { %v788_v10 = vadd.f32 %v787_v9, %v786_v3 }
 0x2a3   : > { %v789_v11 = vmax.f32 %v788_v10, 1e-24 }
 0x2a5   : > { %2531 = vrsqrt.f32 %v789_v11 }
 0x2af   : > { %v2532_v13 = vpop.eup %2531 }
 0x2b0   : > { %v791_v24 = vmul.f32 %v2532_v13, %v686_v26  ;;  %v792_v25 = vmul.f32 %v2532_v13, %v687_v28  ;;  %v793_v32 = vmul.f32 %v2532_v13, %v688_v29  ;;  %v794_v33 = vmul.f32 %v2532_v13, %v689_v30 }
 0x2b1   : > { %v795_v37 = vmul.f32 %v2532_v13, %v690_v31  ;;  %v796_v38 = vmul.f32 %v2532_v13, %v691_v35  ;;  %v797_v41 = vmul.f32 %v2532_v13, %v692_v40  ;;  %v798_v42 = vmul.f32 %v2532_v13, %v693_v45  ;;  %v1001_v31 = vld [vmem:[%s3270_s12] sm:$0x3] }
 0x2b2   : > { %v3024_v34 = vpack.c.bf16 %v792_v25, %v791_v24  ;;  %v3027_v36 = vpack.c.bf16 %v794_v33, %v793_v32  ;;  %v1003_v28 = vlaneseq }
 0x2b3   : > { %v3031_v39 = vpack.c.bf16 %v796_v38, %v795_v37  ;;  %v3035_v26 = vpack.c.bf16 %v798_v42, %v797_v41 }
 0x2b4   : > { %2376 = vmatpush3.bf16.msra.mxu1 %v3024_v34  ;;  %v3041_v29 = vshrl.u32 %v1003_v28, 7  ;;  %vm3168_vm11 = vcmp.lt.s32.totalorder %v1003_v28, 144 }
 0x2b5   : > { %2377 = vmatprep.subr.bf16.mxu1 %v2640_v27 }
 0x2b6   : > { %v1005_v30 = vsub.s32 0, %v3041_v29  ;;  %v1009_v35 = vsub.s32 1, %v3041_v29 }
 0x2b8   : > { %2379 = vmatpush3.bf16.msra.mxu1 %v3027_v36  ;;  %v1006_v40 = vrot.slane %v1001_v31, %v1005_v30  ;;  %v1010_v43 = vrot.slane %v1001_v31, %v1009_v35  ;;  %v1539_v35 = vld [vmem:[%s3263_s5] sm:$0xff] }
 0x2b9   : > { %2380 = vmatprep.subr.bf16.mxu1 %v2640_v27 }
 0x2bc   : > { %2382 = vmatpush3.bf16.msra.mxu1 %v3031_v39 }
 0x2bd   : > { %2383 = vmatprep.subr.bf16.mxu1 %v2640_v27 }
 0x2c0   : > { %2385 = vmatpush3.bf16.msra.mxu1 %v3035_v26 }
 0x2c1   : > { %2386 = vmatprep.subr.bf16.mxu1 %v2640_v27 }
 0x370   : > { %v1083_v44 = vpop.f32.mrb[2].mxu1 }
 0x371   : > { %v1084_v45 = vadd.f32 %v1083_v44, %v1006_v40  ;;  %v1085_v46 = vpop.f32.mrb[3].mxu1  ;;  %v1540_v40 = vld [vmem:[%s3263_s5 + $0x8] sm:$0xff] }
 0x372   : > { %v1086_v47 = vadd.f32 %v1085_v46, %v1010_v43 }
 0x373   : > { %v1091_v48 = vrot.slane %v1084_v45, %v1005_v30  ;;  %v2405_v45 = vpack.c.bf16 %v1540_v40, %v1539_v35 }
 0x374   : > { %v1095_v49 = vrot.slane %v1086_v47, %v1005_v30  ;;  %v1541_v47 = vld [vmem:[%s3263_s5 + $0x10] sm:$0xff] }
 0x376   : > { %v1098_v51 = vcombine.low %v1091_v48, %v1095_v49  ;;  %v1542_v48 = vld [vmem:[%s3263_s5 + $0x18] sm:$0xff] }
 0x377   : > { %v2408_v49 = vpack.c.bf16 %v1542_v48, %v1541_v47 }
 0x378   : > { %v1100_v52 = vmul.f32 %v1098_v51, %v3051_v50  ;;  %v1543_v51 = vld [vmem:[%s3263_s5 + $0x20] sm:$0xf] }
 0x37a   : > { %v1102_v53 = vcombine.high %v1100_v52, %v1100_v52  ;;  %v1104_v56 = vpack.c.bf16 %v1100_v52, %v1100_v52 }
 0x37c   : > { %v1105_v55 = vpack.c.bf16 %v1102_v53, %v1102_v53 }
 0x37e   : > { %2203 = vmatprep.mubr.msk.bf16.mxu0 %vm920_vm2, %v1105_v55 }
 0x37f   : > { %1196 = vmatmul.mubr.bf16.vlgmr.msra.gmra.mrb[4].mxu0 %v1104_v56 }
 0x380   : > { %1381 = vmatpush1.bf16.msra.mxu0 %v2853_v17  ;;  %1412 = vmatprep.mubr.bf16.mxu0 %v2639_v15 }
 0x381   : > { %1382 = vmatprep.subr.bf16.mxu0 %v2856_v18 }
 0x384   : > { %1383 = vmatpush1.bf16.msra.mxu0 %v2859_v19 }
 0x385   : > { %1384 = vmatprep.subr.bf16.mxu0 %v2862_v20 }
 0x388   : > { %1385 = vmatpush1.bf16.msra.mxu0 %v2865_v21 }
 0x389   : > { %1386 = vmatprep.subr.bf16.mxu0 %v2868_v22 }
 0x38c   : > { %1387 = vmatpush1.bf16.msra.mxu0 %v2871_v23 }
 0x38d   : > { %2404 = vmatprep.subr.bf16.mxu0 %v2640_v27 }
 0x452   : > { %v1197_v58 = vpop.f32.mrb[4].mxu0 }
 0x453   : > { %v1199_v59 = vpop.f32.mrb[5].mxu0  ;;  %2278 = vmatmul.mubr.msk.f32.vlgmr.msra.gmra.mrb[4].mxu1 %vm727_vm0, %v1197_v58 }
 0x454   : > { %v1200_v62 = vpop.f32.mrb[6].mxu0  ;;  %2388 = vmatpush3.bf16.msra.mxu1 %v2387_v57  ;;  %2290 = vmatprep.mubr.msk.f32.mxu1 %vm2642_vm5, %v2641_v54  ;;  %v2209_v59 = vld [vmem:[%s3264_s6] ss:$0 sm:$0xff] }
 0x455   : > { %v1201_v3 = vpop.f32.mrb[7].mxu0  ;;  %2389 = vmatprep.subr.bf16.mxu1 %v2640_v27  ;;  %v2643_v62 = vmov 1966171168  }
 0x456   : > { %v1447_v3 = vunpack.c.l.s4 %v2643_v62 }
 0x458   : > { %2391 = vmatpush3.bf16.msra.mxu1 %v2390_v60 }
 0x459   : > { %2288 = vmatprep.subr.mxu1 %v2641_v54 }
 0x45c   : > { %2289 = vmatpush3.msk.msra.mxu1 %vm1293_vm7, %v2835_v7  ;;  %v720_v7 = vld [vmem:[%s663_s23] sm:$0xf]  ;;  %s671_s23 = scalar_lea.vmem %s3273_s15, %s3160_s21 }
 0x45d   : > { %2392 = vmatprep.subr.bf16.mxu1 %v2640_v27 }
 0x526   : > { %v1272_v9 = vpop.f32.mrb[4].mxu1 }
 0x527   : > { %v1276_v1 = vmul.f32 1.1111112, %v1272_v9  ;;  %v2279_v6 = vpop.f32.mrb[5].mxu1 }
 0x529   : > { %v1278_v10 = vsel %vm1277_vm6, %v1276_v1, -inf }
 0x52a   : > { %1279 = vmax.xlane.f32.xlu1 %v1278_v10 }
 0x5b7   : > { %v1280_v11 = vpop.xlane.xlu1 %1279 }
 0x5b8   : > { %v1281_v13 = vsub.f32 %v1276_v1, %v1280_v11 }
 0x5ba   : > { %v1282_v0 = vmul.f32 1.442695, %v1281_v13 }
 0x5bc   : > { %2533 = vpow2.f32 %v1282_v0 }
 0x5c6   : > { %v2534_v2 = vpop.eup %2533 }
 0x5c7   : > { %v1284_v24 = vsel %vm1277_vm6, %v2534_v2, 0.0 }
 0x5c8   : > { %1285 = vadd.xlane.f32.xlu0 %v1284_v24 }
 0x655   : > { %v1286_v25 = vpop.xlane.xlu0 %1285 }
 0x656   : > { %2535 = vrcp.f32 %v1286_v25 }
 0x660   : > { %v2536_v32 = vpop.eup %2535 }
 0x661   : > { %v1288_v33 = vmul.f32 %v2536_v32, %v2534_v2  ;;  %v1448_v2 = vunpack.c.0.s8 %v1447_v3 }
 0x663   : > { %v1289_v37 = vadd.f32 1.0, %v1288_v33 }
 0x665   : > { %2291 = vmatmul.mubr.msk.f32.vlgmr.msra.gmra.mrb[6].mxu1 %vm767_vm4, %v1289_v37 }
 0x666   : > { %2394 = vmatpush3.bf16.msra.mxu1 %v3024_v34  ;;  %2309 = vmatprep.mubr.msk.f32.mxu1 %vm2642_vm5, %v2641_v54 }
 0x667   : > { %2395 = vmatprep.subr.bf16.mxu1 %v2640_v27 }
 0x66a   : > { %2397 = vmatpush3.bf16.msra.mxu1 %v3027_v36 }
 0x66b   : > { %2398 = vmatprep.subr.bf16.mxu1 %v2640_v27 }
 0x66e   : > { %2400 = vmatpush3.bf16.msra.mxu1 %v3031_v39 }
 0x66f   : > { %2401 = vmatprep.subr.bf16.mxu1 %v2640_v27 }
 0x672   : > { %2403 = vmatpush3.bf16.msra.mxu1 %v3035_v26 }
 0x673   : > { %2325 = vmatprep.subr.mxu1 %v2641_v54 }
 0x675   : > { %2310 = vmatmul.mubr.msk.f32.vlgmr.msra.gmra.mrb[8].mxu1 %vm727_vm0, %v720_v7  ;;  %v3157_v7 = vsub.s32 %v1448_v2, %v3041_v29 }
 0x676   : > { %2327 = vmatprep.mubr.msk.f32.mxu1 %vm2642_vm5, %v2641_v54 }
 0x738   : > { %v1363_v34 = vpop.f32.mrb[6].mxu1 }
 0x739   : > { %v1367_v36 = vmul.f32 0.027777778, %v1363_v34  ;;  %v2292_v38 = vpop.f32.mrb[7].mxu1 }
 0x73b   : > { %v1369_v39 = vmul.f32 %v1367_v36, %v1367_v36  ;;  %1368 = vst.msk [vmem:[%s611_s0] sm:$0xf] %vm740_vm1, %v1367_v36 }
 0x73d   : > { %v1370_v41 = vsel %vm740_vm1, %v1369_v39, 0.0 }
 0x73e   : > { %1371 = vadd.xlane.f32.xlu1 %v1370_v41 }
 0x748   : > { %v1535_v42 = vpop.f32.mrb[8].mxu1 }
 0x749   : > { %v2311_v26 = vpop.f32.mrb[9].mxu1 }
 0x7cb   : > { %v1372_v30 = vpop.xlane.xlu1 %1371 }
 0x7cc   : > { %v1373_v31 = vmax.f32 %v1372_v30, 1e-24 }
 0x7ce   : > { %2537 = vrsqrt.f32 %v1373_v31 }
 0x7d8   : > { %v2538_v43 = vpop.eup %2537 }
 0x7d9   : > { %v1375_v44 = vmul.f32 %v2538_v43, %v1367_v36 }
 0x7db   : > { %v1376_v46 = vpack.c.bf16 %v1375_v44, %v1375_v44 }
 0x7dd   : > { %2207 = vmatmul.mubr.msk.bf16.vlgmr.msra.gmra.mrb[8].mxu0 %vm727_vm0, %v1376_v46 }
 0x7de   : > { %2406 = vmatpush3.bf16.msra.mxu0 %v2405_v45  ;;  %2322 = vmatprep.mubr.msk.f32.mxu0 %vm2642_vm5, %v2641_v54  ;;  %v2644_v45 = vmov 839922192  }
 0x7df   : > { %2407 = vmatprep.subr.bf16.mxu0 %v2640_v27  ;;  %v1853_v46 = vunpack.c.l.s4 %v2644_v45 }
 0x7e1   : > { %v1854_v47 = vunpack.c.0.s8 %v1853_v46 }
 0x7e2   : > { %2409 = vmatpush3.bf16.msra.mxu0 %v2408_v49 }
 0x7e3   : > { %2320 = vmatprep.subr.mxu0 %v2641_v54  ;;  %v1857_v48 = vsub.s32 %v1854_v47, %v3041_v29 }
 0x7e6   : > { %2321 = vmatpush3.msk.msra.mxu0 %vm1293_vm7, %v1543_v51 }
 0x7e7   : > { %2323 = vmatmul.mubr.msk.f32.vlgmr.msra.gmra.mrb[12].mxu0 %vm767_vm4, %v1535_v42  ;;  %1794 = vmatprep.subr.bf16.mxu0 %v2851_v16  ;;  %v1628_v16 = vld [vmem:[%s3265_s7] sm:$0x3f] }
 0x7e8   : > { %1795 = vmatpush1.bf16.msra.mxu0 %v2853_v17  ;;  %1826 = vmatprep.mubr.bf16.mxu0 %v2639_v15  ;;  %v1422_v15 = vcombine.high %v3051_v50, %v3051_v50 }
 0x7e9   : > { %1796 = vmatprep.subr.bf16.mxu0 %v2856_v18  ;;  %2326 = vmatpush3.msk.msra.mxu1 %vm1640_vm8, %v1628_v16 }
 0x7ea   : > { %2410 = vmatprep.subr.bf16.mxu1 %v2640_v27 }
 0x7ec   : > { %1797 = vmatpush1.bf16.msra.mxu0 %v2859_v19 }
 0x7ed   : > { %1798 = vmatprep.subr.bf16.mxu0 %v2862_v20 }
 0x7f0   : > { %1799 = vmatpush1.bf16.msra.mxu0 %v2865_v21 }
 0x7f1   : > { %1800 = vmatprep.subr.bf16.mxu0 %v2868_v22 }
 0x7f4   : > { %1801 = vmatpush1.bf16.msra.mxu0 %v2871_v23 }
 0x8b0   : > { %v1414_v17 = vpop.f32.mrb[8].mxu0 }
 0x8b1   : > { %v1424_v18 = vmul.f32 %v1414_v17, %v3051_v50  ;;  %v1416_v19 = vpop.f32.mrb[9].mxu0 }
 0x8b2   : > { %v1425_v20 = vmul.f32 %v1422_v15, %v1416_v19  ;;  %v1418_v21 = vpop.f32.mrb[10].mxu0 }
 0x8b3   : > { %v1426_v22 = vsel %vm1293_vm7, %v1424_v18, 0.0  ;;  %v1419_v23 = vpop.f32.mrb[11].mxu0 }
 0x8b4   : > { %v1427_v52 = vrot.slane %v1426_v22, 4  ;;  %v1434_v53 = vsel %vm1433_vm9, %v1425_v20, 0.0 }
 0x8b5   : > { %v1435_v55 = vrot.slane %v1434_v53, 4 }
 0x8b6   : > { %v1428_v56 = vadd.f32 %v1427_v52, %v1426_v22 }
 0x8b7   : > { %v1436_v57 = vadd.f32 %v1435_v55, %v1434_v53 }
 0x8b8   : > { %v1429_v58 = vrot.slane %v1428_v56, 2 }
 0x8b9   : > { %v1437_v60 = vrot.slane %v1436_v57, 2 }
 0x8ba   : > { %v1430_v9 = vadd.f32 %v1429_v58, %v1428_v56  ;;  %v1623_v1 = vpop.f32.mrb[12].mxu0 }
 0x8bb   : > { %v1438_v6 = vadd.f32 %v1437_v60, %v1436_v57  ;;  %v1624_v10 = vadd.f32 %v2209_v59, %v1623_v1  ;;  %v2324_v11 = vpop.f32.mrb[13].mxu0 }
 0x8bc   : > { %v1431_v13 = vrot.slane %v1430_v9, 1 }
 0x8bd   : > { %v1439_v0 = vrot.slane %v1438_v6, 1  ;;  %v1627_v24 = vmax.f32 %v1624_v10, 0.0 }
 0x8be   : > { %v1432_v25 = vadd.f32 %v1431_v13, %v1430_v9 }
 0x8bf   : > { %v1440_v32 = vadd.f32 %v1439_v0, %v1438_v6  ;;  %2328 = vmatmul.mubr.msk.f32.vlgmr.msra.gmra.mrb[10].mxu1 %vm1636_vm10, %v1627_v24 }
 0x8c0   : > { %v1441_v33 = vmul.f32 7.0, %v1432_v25  ;;  %2412 = vmatpush3.bf16.msra.mxu1 %v2411_v12  ;;  %2340 = vmatprep.mubr.msk.f32.mxu1 %vm2642_vm5, %v2641_v54 }
 0x8c1   : > { %v1442_v37 = vmul.f32 7.0, %v1440_v32  ;;  %2413 = vmatprep.subr.bf16.mxu1 %v2640_v27 }
 0x8c3   : > { %v1445_v34 = vcombine.low %v1441_v33, %v1442_v37 }
 0x8c4   : > { %2415 = vmatpush3.bf16.msra.mxu1 %v2414_v8 }
 0x8c5   : > { %v1452_v63 = vrot.slane %v1445_v34, %v3157_v7  ;;  %2338 = vmatprep.subr.mxu1 %v2641_v54 }
 0x8c7   : > { %v1459_v27 = vrot.slane %v1452_v63, %v3157_v7 }
 0x8c8   : > { %2339 = vmatpush3.msk.msra.mxu1 %vm1293_vm7, %v2954_v14 }
 0x8c9   : > { %1465 = vst.msk [vmem:[%s671_s23] sm:$0x3] %vm3168_vm11, %v1459_v27  ;;  %s3314_s23 = sld [smem:[#allocation20_spill]] }
 0x8cf   : > { %s3315_s17 = smov %s3314_s23  ;;  %s3199_s19 = scalar_lea.hbm %s3314_s23, %s2219_s14 }
 0x992   : > { %v1710_v4 = vpop.f32.mrb[10].mxu1 }
 0x993   : > { %v1711_v8 = vadd.f32 %v2212_v61, %v1710_v4  ;;  %v2329_v12 = vpop.f32.mrb[11].mxu1 }
 0x995   : > { %2341 = vmatmul.mubr.msk.f32.vlgmr.msra.gmra.mrb[12].mxu1 %vm767_vm4, %v1711_v8 }
 0xa68   : > { %v1786_v54 = vpop.f32.mrb[12].mxu1 }
 0xa69   : > { %v1790_v28 = vpack.c.bf16 %v1786_v54, %v1786_v54  ;;  %v2342_v36 = vpop.f32.mrb[13].mxu1 }
 0xa6b   : > { %2217 = vmatmul.mubr.msk.bf16.vlgmr.msra.gmra.mrb[16].mxu0 %vm727_vm0, %v1790_v28 }
 0xb3e   : > { %v1828_v38 = vpop.f32.mrb[16].mxu0 }
 0xb3f   : > { %v1835_v39 = vmul.f32 1.1111112, %v1828_v38  ;;  %v1830_v14 = vpop.f32.mrb[17].mxu0 }
 0xb40   : > { %v1836_v41 = vmul.f32 1.1111112, %v1830_v14  ;;  %v1832_v42 = vpop.f32.mrb[18].mxu0 }
 0xb41   : > { %v1833_v26 = vpop.f32.mrb[19].mxu0 }
 0xb42   : > { %v1840_v30 = vcombine.low %v1835_v39, %v1836_v41 }
 0xb44   : > { %v1842_v31 = vsel %vm1837_vm12, %v1840_v30, -1e+30 }
 0xb45   : > { %v1844_v35 = vcombine.high %v1842_v31, %v1842_v31  ;;  %v1846_v40 = vsel %vm1293_vm7, %v1842_v31, -inf }
 0xb47   : > { %v1847_v43 = vsel %vm1433_vm9, %v1844_v35, -inf }
 0xb48   : > { %v1848_v44 = vmax.f32 %v1846_v40, %v1847_v43 }
 0xb4a   : > { %1849 = vmax.xlane.f32.xlu0 %v1848_v44 }
 0xbd7   : > { %v1850_v49 = vpop.xlane.xlu0 %1849 }
 0xbd8   : > { %v1858_v50 = vrot.slane %v1850_v49, %v1857_v48 }
 0xbda   : > { %v1860_v51 = vsub.f32 %v1842_v31, %v1858_v50 }
 0xbdc   : > { %v1861_v16 = vmul.f32 1.442695, %v1860_v51 }
 0xbde   : > { %2539 = vpow2.f32 %v1861_v16 }
 0xbe8   : > { %v2540_v15 = vpop.eup %2539 }
 0xbe9   : > { %v1864_v17 = vcombine.high %v2540_v15, %v2540_v15  ;;  %v1866_v18 = vsel %vm1293_vm7, %v2540_v15, 0.0 }
 0xbeb   : > { %v1867_v19 = vsel %vm1433_vm9, %v1864_v17, 0.0 }
 0xbec   : > { %v1868_v20 = vadd.f32 %v1867_v19, %v1866_v18 }
 0xbee   : > { %1869 = vadd.xlane.f32.xlu1 %v1868_v20 }
 0xbef   : > { %2556 = shalt.err (!%p2553_p7)
}
 0xbf0   : > { %s2557_s25 = scalar_lea.hbm %s3199_s19, 64  ;;  %s2561_s3 = scalar_lea.hbm %s3315_s17, 640 }
 0xbf1   : > { %p2558_p9 = scmp.ne.s32.totalorder %s3199_s19, %s2557_s25  ;;  %p2562_p12 = scmp.lt.u32.totalorder %s3199_s19, %s3315_s17 }
 0xbf2   : > { %p2563_p13 = scmp.lt.u32.totalorder %s2561_s3, %s2557_s25  ;;  %p2565_p1 = scmp.lt.u32.totalorder %s2557_s25, %s3199_s19 }
 0xbf3   : > { %p2559_p10 = pnand %p2558_p9, %p2782_p3 }
 0xbf4   : > { %p2564_p0 = por %p2563_p13, %p2562_p12 }
 0xbf5   : > { %p2560_p11 = pneg %p2559_p10 }
 0xbf6   : > { %p2566_p2 = por %p2565_p1, %p2564_p0 }
 0xbf8   : > { %p2567_p4 = pnand %p2566_p2, %p2560_p11 }
 0xbfa   : > { %2570 = shalt.err (!%p2567_p4)
}
 0xbfb   : > { %2422 = dma.vmem_to_hbm [thread:$0]  (%p2782_p3), %s1953_s16, 64, %s3199_s19, %s1921_s1  }
 0xbfc   : > { %s3316_s20 = sld [smem:[#allocation21_spill]] }
 0xc02   : > { %s679_s18 = scalar_lea.vmem %s3316_s20, %s3160_s21 }
 0xc7b   : > { %v1870_v29 = vpop.xlane.xlu1 %1869 }
 0xc7c   : > { %2541 = vrcp.f32 %v1870_v29 }
 0xc86   : > { %v2542_v21 = vpop.eup %2541 }
 0xc87   : > { %v1879_v22 = vrot.slane %v2542_v21, %v1857_v48 }
 0xc89   : > { %v1881_v23 = vmul.f32 %v2540_v15, %v1879_v22 }
 0xc8b   : > { %v1883_v52 = vcombine.high %v1881_v23, %v1881_v23  ;;  %v1885_v53 = vsel %vm1293_vm7, %v1881_v23, 0.0 }
 0xc8c   : > { %v1886_v55 = vrot.slane %v1885_v53, 4 }
 0xc8d   : > { %v1892_v56 = vsel %vm1433_vm9, %v1883_v52, 0.0 }
 0xc8e   : > { %v1887_v57 = vadd.f32 %v1886_v55, %v1885_v53  ;;  %v1893_v58 = vrot.slane %v1892_v56, 4 }
 0xc90   : > { %v1888_v59 = vrot.slane %v1887_v57, 2  ;;  %v1894_v60 = vadd.f32 %v1893_v58, %v1892_v56 }
 0xc92   : > { %v1889_v62 = vadd.f32 %v1888_v59, %v1887_v57  ;;  %v1895_v3 = vrot.slane %v1894_v60, 2 }
 0xc94   : > { %v1890_v9 = vrot.slane %v1889_v62, 1  ;;  %v1896_v1 = vadd.f32 %v1895_v3, %v1894_v60 }
 0xc96   : > { %v1891_v6 = vadd.f32 %v1890_v9, %v1889_v62  ;;  %v1897_v10 = vrot.slane %v1896_v1, 1 }
 0xc98   : > { %v1898_v11 = vadd.f32 %v1897_v10, %v1896_v1  ;;  %v1899_v13 = vadd.f32 1.0, %v1891_v6 }
 0xc9a   : > { %v1900_v0 = vadd.f32 1.0, %v1898_v11 }
 0xc9c   : > { %v1903_v2 = vcombine.low %v1899_v13, %v1900_v0 }
 0xc9e   : > { %v1910_v24 = vrot.slane %v1903_v2, %v3157_v7 }
 0xca0   : > { %v1917_v25 = vrot.slane %v1910_v24, %v3157_v7 }
 0xca2   : > { %1919 = vst.msk [vmem:[%s679_s18] sm:$0x3] %vm3168_vm11, %v1917_v25 }
 0xca3 PF: > { %s3317_s29 = sld [smem:[#allocation9_spill]]  ;;  %s3318_s14 = sld [smem:[#allocation5_spill]] }
 0xca9   : > { %p2428_p3 = scmp.ge.s32.totalorder %s3317_s29, 2  ;;  %s1970_s26 = sand.u32 1, %s3318_s14  }
 0xcaa   : > { %s1971_s30 = scalar_lea.sflag [#allocation3], %s1970_s26 }
 0xcab   : > { %p2425_p5 = pnand %p2428_p3, %p2791_p8 }
 0xcad   : > { %2604 = dma.done.wait (!%p2425_p5), %s1971_s30, 64  }
 0xcae   : > { %2606 = vsyncadd (!%p2425_p5), %s1971_s30, 4294967232  ;;  %s30_s28 = sadd.s32 1, %s3317_s29   ;;  %s3320_s23 = sld [smem:[#allocation6_spill]] }
 0xcaf   : > { %p27_p6 = scmp.ge.s32.totalorder %s30_s28, 12   ;;  %s3321_s19 = sld [smem:[#allocation14_spill]] }
 0xcb0   : > { %s3322_s24 = sld [smem:[#allocation7_spill]]  ;;  %s3323_s25 = sld [smem:[#allocation8_spill]] }
 0xcb1   : > { %s3324_s26 = sld [smem:[#allocation10_spill]]  ;;  %s3325_s27 = sld [smem:[#allocation12_spill]] }
 0xcb2   : > { %s3326_s21 = smov %s2613_s22  ;;  %29 = sbr.rel (!%p27_p6) target bundleno = 13 (0xd), region = 147 }
 0xcb4   : > { %s3327_s22 = smov %s3320_s23 }
 0xcb5   : > { %s3328_s23 = smov %s3321_s19 }
 0xcb9   :  { %1998 = vsyncpa [#allocation3], 1 }
 0xcba   :  { %2000 = vsyncpa [#allocation3 + $0x1], 1 }

</bundles_post_ra>
